<compile_context>
chip_gen: v6e
topology: v6e:2x2x1
jax: 0.10.0
libtpu: 0.0.40
codegen_flags: <defaults>
</compile_context>

<pallas_src>
import math

import jax
import jax.numpy as jnp
from jax import lax
from jax.experimental import pallas as pl
from jax.experimental.pallas import tpu as pltpu

# ---- static configuration (mirrors args) -----------------------------------
B = 2                  # batch size
N_OBJ = 8              # objects per sample
N_HINT = 6             # hints per sample
PAD = 8                # hints padded to 8 rows -> 16 rows per batch
ROWS = B * (N_OBJ + PAD)   # 32 stacked activation rows
EMBED_DIM = 32
NUM_LAYERS = 2
SINKHORN_ITERS = 10
MATCH_THRESHOLD = 0.2
NUM_HEADS = 4
HEAD_DIM = EMBED_DIM // NUM_HEADS
F_OBJ = 16
F_HINT = 16
GNN_LAYER_NAMES = ['self', 'cross'] * NUM_LAYERS
NEG_INF = -1e30


# =========================== the single fused kernel ==========================

def _superglue_fused_kernel(
    obj_ref, hint_ref,                                # raw features (stacked rows)
    obj_w_ref, obj_b_ref, lang_w_ref, lang_b_ref,     # embedding heads
    wq_ref, wk_ref, wv_ref, bq_ref, bk_ref, bv_ref,   # GNN attention projections (stacked over layers)
    wm_ref, bm_ref,                                   # GNN attention merge
    w1_ref, b1_ref, w2_ref, b2_ref,                   # GNN MLP
    fin_w_ref, fin_b_ref,                             # final_proj
    ow1_ref, ob1_ref, ow2_ref, ob2_ref,               # mlp_offsets
    alpha_ref,                                        # bin_score scalar (SMEM)
    z_ref, off_ref, m0_ref, m1_ref, ms0_ref, ms1_ref):  # outputs
    f32 = jnp.float32
    D, dh = EMBED_DIM, HEAD_DIM
    m, n = N_OBJ, N_HINT
    S = ROWS                         # 32 stacked rows (16 per batch: 8 obj + 8 padded hints)
    SK = NUM_HEADS * S               # 128 score columns (head-major key blocks)

    def mm(a, b):                    # a @ b
        return lax.dot_general(a, b, (((1,), (0,)), ((), ())),
                               preferred_element_type=f32)

    def mm_nt(a, b):                 # a @ b.T
        return lax.dot_general(a, b, (((1,), (1,)), ((), ())),
                               preferred_element_type=f32)

    def l2norm(x):                   # F.normalize(dim=-1, eps=1e-12)
        nrm2 = jnp.sum(x * x, axis=1, keepdims=True)
        return x * lax.rsqrt(jnp.maximum(nrm2, 1e-24))

    alpha = alpha_ref[0, 0]

    # ---------------- hoisted compile-time masks (iota math, built once) ----------------
    ri = lax.broadcasted_iota(jnp.int32, (S, SK), 0)          # query row
    ci = lax.broadcasted_iota(jnp.int32, (S, SK), 1)          # score column
    kr = jnp.bitwise_and(ci, S - 1)                           # key row (per 32-row head block)
    same_b = (ri >> 4) == (kr >> 4)                           # 16 rows per batch
    lq = jnp.bitwise_and(ri, 15)
    lk = jnp.bitwise_and(kr, 15)
    q_str = jnp.where(lq < m, 0, 1)                           # 0 = object stream, 1 = hint stream
    k_str = jnp.where(lk < m, 0, 1)
    k_valid = lk < (m + n)                                    # exclude padded hint rows as keys
    mask_self = same_b & (q_str == k_str) & k_valid
    mask_cross = same_b & (q_str != k_str) & k_valid

    rr = lax.broadcasted_iota(jnp.int32, (SK, D), 0)
    cc = lax.broadcasted_iota(jnp.int32, (SK, D), 1)
    # head/segment selector: (key block c//32) == (channel head ch//8).  Serves both as the
    # block-diagonal K/V mask and as the segmented-softmax denominator matmul operand.
    hc = jnp.where((rr >> 5) == (cc >> 3), 1.0, 0.0).astype(f32)

    # ---------------- embedding heads + F.normalize (batch folded into rows) ----------------
    obj_emb = l2norm(mm(obj_ref[...], obj_w_ref[...]) + obj_b_ref[...])      # (16, D)
    hint_emb = l2norm(mm(hint_ref[...], lang_w_ref[...]) + lang_b_ref[...])  # (16, D) (2 pad rows/batch)
    x = jnp.concatenate([obj_emb[0:8], hint_emb[0:8],
                         obj_emb[8:16], hint_emb[8:16]], axis=0)             # (32, D) stacked

    # ---------------- attentional GNN: all batches / streams / heads per matmul ----------------
    for li, name in enumerate(GNN_LAYER_NAMES):
        q_p = mm(x, wq_ref[li]) + bq_ref[li]      # 1/sqrt(dh) folded into wq/bq host-side
        k_p = mm(x, wk_ref[li]) + bk_ref[li]
        v_p = mm(x, wv_ref[li]) + bv_ref[li]
        k4 = jnp.concatenate([k_p, k_p, k_p, k_p], axis=0) * hc   # (128, D) block-diag keys
        v4 = jnp.concatenate([v_p, v_p, v_p, v_p], axis=0) * hc   # (128, D) block-diag values
        s = mm_nt(q_p, k4)                                        # (32, 128) all heads' scores
        msk = mask_self if name == 'self' else mask_cross
        s = jnp.where(msk, s, NEG_INF)
        # per-row max is constant within each head segment -> softmax is exact per segment
        e = jnp.exp(s - jnp.max(s, axis=1, keepdims=True))
        denom = mm(e, hc)                                         # (32, D) per-head denominators
        msg = mm(e, v4) / jnp.maximum(denom, 1e-30)               # exact division (no approx recip)
        merged = mm(msg, wm_ref[li]) + bm_ref[li]
        w1 = w1_ref[li]                                           # rows [x part ; msg part]
        h = jnp.maximum(mm(x, w1[0:D, :]) + mm(merged, w1[D:2 * D, :]) + b1_ref[li], 0.0)
        x = x + mm(h, w2_ref[li]) + b2_ref[li]

    # ---------------- mlp_offsets on pre-GNN normalized hint encodings ----------------
    oh = jnp.maximum(mm(hint_emb, ow1_ref[...]) + ob1_ref[...], 0.0)
    off_ref[...] = mm(oh, ow2_ref[...]) + ob2_ref[...]            # (16, 2); host drops pad rows

    # ---------------- final projection + per-batch score matrices ----------------
    md = mm(x, fin_w_ref[...]) + fin_b_ref[...]                   # (32, D)
    inv_sqrt_d = 1.0 / math.sqrt(D)
    sc0 = mm_nt(md[0:8], md[8:16]) * inv_sqrt_d                   # (8, 8) (cols 6,7 = pad, dropped)
    sc1 = mm_nt(md[16:24], md[24:32]) * inv_sqrt_d

    # ---------------- dustbin couplings built in registers; batched log-Sinkhorn ----------------
    r2 = lax.broadcasted_iota(jnp.int32, (m + 1, n + 1), 0)
    c2 = lax.broadcasted_iota(jnp.int32, (m + 1, n + 1), 1)
    inner2 = (r2 < m) & (c2 < n)
    zrow = jnp.zeros((1, 8), f32)

    def couple(sc):                                               # (8,8) -> (9,7) with dustbins
        scp = jnp.concatenate([sc, zrow], axis=0)[:, 0:n + 1]
        return jnp.where(inner2, scp, alpha)

    Z0 = jnp.concatenate([couple(sc0)[None], couple(sc1)[None]], axis=0)   # (B, 9, 7)

    norm_c = -math.log(m + n)
    mu_i = lax.broadcasted_iota(jnp.int32, (1, m + 1, 1), 1)
    nu_j = lax.broadcasted_iota(jnp.int32, (1, 1, n + 1), 2)
    log_mu = jnp.where(mu_i == m, math.log(n) + norm_c, norm_c).astype(f32)
    log_nu = jnp.where(nu_j == n, math.log(m) + norm_c, norm_c).astype(f32)

    def lse(t, axis):
        mx = jnp.max(t, axis=axis, keepdims=True)
        return mx + jnp.log(jnp.sum(jnp.exp(t - mx), axis=axis, keepdims=True))

    u = jnp.zeros((B, m + 1, 1), f32)
    v = jnp.zeros((B, 1, n + 1), f32)
    for _ in range(SINKHORN_ITERS):                               # one batched chain (not B chains)
        u = log_mu - lse(Z0 + v, axis=2)
        v = log_nu - lse(Z0 + u, axis=1)
    Z = Z0 + u + v - norm_c
    z_ref[...] = Z                                                # single store

    # ---------------- match extraction (argmax / mutual / threshold) in-kernel ----------------
    inner = Z[:, 0:m, 0:n]                                        # (B, 8, 6)
    iota_i = lax.broadcasted_iota(jnp.int32, (B, m, n), 1).astype(f32)
    iota_j = lax.broadcasted_iota(jnp.int32, (B, m, n), 2).astype(f32)
    max0 = jnp.max(inner, axis=2, keepdims=True)                  # (B, 8, 1)
    max1 = jnp.max(inner, axis=1, keepdims=True)                  # (B, 1, 6)
    idx0 = jnp.min(jnp.where(inner == max0, iota_j, float(n)), axis=2, keepdims=True)
    idx1 = jnp.min(jnp.where(inner == max1, iota_i, float(m)), axis=1, keepdims=True)
    onehot0 = iota_j == idx0                                      # (B, 8, 6)
    onehot1 = iota_i == idx1                                      # (B, 8, 6)
    cell = jnp.where(onehot0 & onehot1, 1.0, 0.0)
    mutual0 = jnp.max(cell, axis=2, keepdims=True) > 0.5          # (B, 8, 1)
    mutual1 = jnp.max(cell, axis=1, keepdims=True) > 0.5          # (B, 1, 6)
    msc0 = jnp.where(mutual0, jnp.exp(max0), 0.0)
    valid0 = mutual0 & (msc0 > MATCH_THRESHOLD)
    msc0_at1 = jnp.sum(jnp.where(onehot1, msc0, 0.0), axis=1, keepdims=True)          # gather via one-hot
    val0_at1 = jnp.max(jnp.where(onehot1 & valid0, 1.0, 0.0), axis=1, keepdims=True) > 0.5
    msc1 = jnp.where(mutual1, msc0_at1, 0.0)
    valid1 = mutual1 & val0_at1
    m0_ref[...] = jnp.where(valid0, idx0, -1.0).astype(jnp.int32)   # (B, 8, 1)
    m1_ref[...] = jnp.where(valid1, idx1, -1.0).astype(jnp.int32)   # (B, 1, 6)
    ms0_ref[...] = msc0
    ms1_ref[...] = msc1


# ============================ host-side wrapper ===============================

def _prep_matcher_params(params):
    """Pack weights: head-major channel permutation, 1/sqrt(dh) folded into the
    query projection, per-layer stacking, 2D biases, (1,1) bin_score."""
    D, H, dh = EMBED_DIM, NUM_HEADS, HEAD_DIM
    # head-major channel j = h*dh + d  <-  torch dim-major channel d*H + h
    perm = jnp.asarray([(j % dh) * H + (j // dh) for j in range(D)], jnp.int32)
    scale = 1.0 / math.sqrt(dh)
    wq, wk, wv, bq, bk, bv, wm, bm, w1, b1, w2, b2 = ([] for _ in range(12))
    for p in params['gnn']:
        wq.append(p['wq'][:, perm] * scale); bq.append(p['bq'][perm][None, :] * scale)
        wk.append(p['wk'][:, perm]);         bk.append(p['bk'][perm][None, :])
        wv.append(p['wv'][:, perm]);         bv.append(p['bv'][perm][None, :])
        wm.append(p['wm'][perm, :]);         bm.append(p['bm'][None, :])
        w1.append(p['mlp_w1']); b1.append(p['mlp_b1'][None, :])
        w2.append(p['mlp_w2']); b2.append(p['mlp_b2'][None, :])
    return dict(
        obj_w=params['obj_w'], obj_b=params['obj_b'][None, :],
        lang_w=params['lang_w'], lang_b=params['lang_b'][None, :],
        wq=jnp.stack(wq), wk=jnp.stack(wk), wv=jnp.stack(wv),
        bq=jnp.stack(bq), bk=jnp.stack(bk), bv=jnp.stack(bv),
        wm=jnp.stack(wm), bm=jnp.stack(bm),
        w1=jnp.stack(w1), b1=jnp.stack(b1), w2=jnp.stack(w2), b2=jnp.stack(b2),
        fin_w=params['final_w'], fin_b=params['final_b'][None, :],
        ow1=params['off_w1'], ob1=params['off_b1'][None, :],
        ow2=params['off_w2'], ob2=params['off_b2'][None, :],
        bin_score=jnp.reshape(params['bin_score'], (1, 1)).astype(jnp.float32),
    )


def _superglue_fused_call(prep, obj_flat, hint_flat):
    vmem = pl.BlockSpec(memory_space=pltpu.MemorySpace.VMEM)
    smem = pl.BlockSpec(memory_space=pltpu.MemorySpace.SMEM)
    out_shape = (
        jax.ShapeDtypeStruct((B, N_OBJ + 1, N_HINT + 1), jnp.float32),  # P (log-OT)
        jax.ShapeDtypeStruct((B * PAD, 2), jnp.float32),                # offsets (padded rows)
        jax.ShapeDtypeStruct((B, N_OBJ, 1), jnp.int32),                 # matches0
        jax.ShapeDtypeStruct((B, 1, N_HINT), jnp.int32),                # matches1
        jax.ShapeDtypeStruct((B, N_OBJ, 1), jnp.float32),               # matching_scores0
        jax.ShapeDtypeStruct((B, 1, N_HINT), jnp.float32),              # matching_scores1
    )
    return pl.pallas_call(
        _superglue_fused_kernel,
        out_shape=out_shape,
        in_specs=[vmem] * 24 + [smem],
        out_specs=(vmem,) * 6,
        cost_estimate=pl.CostEstimate(flops=6_000_000, transcendentals=20_000,
                                      bytes_accessed=250_000),
    )(obj_flat, hint_flat,
      prep['obj_w'], prep['obj_b'], prep['lang_w'], prep['lang_b'],
      prep['wq'], prep['wk'], prep['wv'], prep['bq'], prep['bk'], prep['bv'],
      prep['wm'], prep['bm'],
      prep['w1'], prep['b1'], prep['w2'], prep['b2'],
      prep['fin_w'], prep['fin_b'],
      prep['ow1'], prep['ob1'], prep['ow2'], prep['ob2'],
      prep['bin_score'])


def superglue_match_forward(params, objects_feats, hints_feats, object_points):
    # object_points kept for signature fidelity, unused (encoders replaced, see header TODO).
    del object_points
    prep = _prep_matcher_params(params)
    obj_flat = objects_feats.reshape(B * N_OBJ, F_OBJ)
    hint_pad = jnp.pad(hints_feats, ((0, 0), (0, PAD - N_HINT), (0, 0)))
    hint_flat = hint_pad.reshape(B * PAD, F_HINT)
    Z, off, m0, m1, s0, s1 = _superglue_fused_call(prep, obj_flat, hint_flat)
    offsets = off.reshape(B, PAD, 2)[:, :N_HINT, :]
    return dict(
        P=Z,
        matches0=m0.reshape(B, N_OBJ),
        matches1=m1.reshape(B, N_HINT),
        offsets=offsets,
        matching_scores0=s0.reshape(B, N_OBJ),
        matching_scores1=s1.reshape(B, N_HINT),
    )


# ============================ deterministic params ===========================

def init_params(key):
    keys = iter(jax.random.split(key, 128))

    def w(shape, scale=0.1):
        return scale * jax.random.normal(next(keys), shape, jnp.float32)

    bn_scale = 1.0 / math.sqrt(1.0 + 1e-5)  # eval BatchNorm1d, default running stats
    gnn = []
    for _ in range(len(GNN_LAYER_NAMES)):
        gnn.append(dict(
            wq=w((EMBED_DIM, EMBED_DIM)), bq=w((EMBED_DIM,)),
            wk=w((EMBED_DIM, EMBED_DIM)), bk=w((EMBED_DIM,)),
            wv=w((EMBED_DIM, EMBED_DIM)), bv=w((EMBED_DIM,)),
            wm=w((EMBED_DIM, EMBED_DIM)), bm=w((EMBED_DIM,)),
            mlp_w1=w((2 * EMBED_DIM, 2 * EMBED_DIM)) * bn_scale,
            mlp_b1=w((2 * EMBED_DIM,)) * bn_scale,
            mlp_w2=w((2 * EMBED_DIM, EMBED_DIM)),
            mlp_b2=jnp.zeros((EMBED_DIM,), jnp.float32),  # nn.init.constant_(bias, 0)
        ))
    return dict(
        obj_w=w((F_OBJ, EMBED_DIM)), obj_b=w((EMBED_DIM,)),
        lang_w=w((F_HINT, EMBED_DIM)), lang_b=w((EMBED_DIM,)),
        gnn=gnn,
        final_w=w((EMBED_DIM, EMBED_DIM)), final_b=w((EMBED_DIM,)),
        bin_score=jnp.float32(1.0),
        off_w1=w((EMBED_DIM, EMBED_DIM // 2)), off_b1=w((EMBED_DIM // 2,)),
        off_w2=w((EMBED_DIM // 2, 2)), off_b2=w((2,)),
    )


# =================================== main ====================================

if __name__ == "__main__":
    key = jax.random.PRNGKey(0)
    pkey, okey, hkey, ppkey = jax.random.split(key, 4)
    params = init_params(pkey)

    objects_feats = jax.random.normal(okey, (B, N_OBJ, F_OBJ), jnp.float32)
    hints_feats = jax.random.normal(hkey, (B, N_HINT, F_HINT), jnp.float32)
    object_points = jax.random.normal(ppkey, (B, N_OBJ, 32, 3), jnp.float32)

    fwd = jax.jit(superglue_match_forward)
    out = fwd(params, objects_feats, hints_feats, object_points)
    out = jax.block_until_ready(out)

    assert out['P'].shape == (B, N_OBJ + 1, N_HINT + 1)
    assert out['matches0'].shape == (B, N_OBJ)
    assert out['matches1'].shape == (B, N_HINT)
    assert out['offsets'].shape == (B, N_HINT, 2)
    assert out['matching_scores0'].shape == (B, N_OBJ)
    assert out['matching_scores1'].shape == (B, N_HINT)
    assert bool(jnp.all(jnp.isfinite(out['P'])))
    assert bool(jnp.all(jnp.isfinite(out['offsets'])))
    assert bool(jnp.all(jnp.isfinite(out['matching_scores0'])))
    assert bool(jnp.all(out['matches0'] >= -1)) and bool(jnp.all(out['matches0'] < N_HINT))
    assert bool(jnp.all(out['matches1'] >= -1)) and bool(jnp.all(out['matches1'] < N_OBJ))
    print("KERNEL_OK")
</pallas_src>

<mosaic_0001>
module attributes {stable_mosaic.version = 11 : i64} {
  func.func @_superglue_fused_kernel(%arg0: memref<16x16xf32, #tpu.memory_space<vmem>>, %arg1: memref<16x16xf32, #tpu.memory_space<vmem>>, %arg2: memref<16x32xf32, #tpu.memory_space<vmem>>, %arg3: memref<1x32xf32, #tpu.memory_space<vmem>>, %arg4: memref<16x32xf32, #tpu.memory_space<vmem>>, %arg5: memref<1x32xf32, #tpu.memory_space<vmem>>, %arg6: memref<4x32x32xf32, #tpu.memory_space<vmem>>, %arg7: memref<4x32x32xf32, #tpu.memory_space<vmem>>, %arg8: memref<4x32x32xf32, #tpu.memory_space<vmem>>, %arg9: memref<4x1x32xf32, #tpu.memory_space<vmem>>, %arg10: memref<4x1x32xf32, #tpu.memory_space<vmem>>, %arg11: memref<4x1x32xf32, #tpu.memory_space<vmem>>, %arg12: memref<4x32x32xf32, #tpu.memory_space<vmem>>, %arg13: memref<4x1x32xf32, #tpu.memory_space<vmem>>, %arg14: memref<4x64x64xf32, #tpu.memory_space<vmem>>, %arg15: memref<4x1x64xf32, #tpu.memory_space<vmem>>, %arg16: memref<4x64x32xf32, #tpu.memory_space<vmem>>, %arg17: memref<4x1x32xf32, #tpu.memory_space<vmem>>, %arg18: memref<32x32xf32, #tpu.memory_space<vmem>>, %arg19: memref<1x32xf32, #tpu.memory_space<vmem>>, %arg20: memref<32x16xf32, #tpu.memory_space<vmem>>, %arg21: memref<1x16xf32, #tpu.memory_space<vmem>>, %arg22: memref<16x2xf32, #tpu.memory_space<vmem>>, %arg23: memref<1x2xf32, #tpu.memory_space<vmem>>, %arg24: memref<1x1xf32, #tpu.memory_space<smem>>, %arg25: memref<2x9x7xf32, #tpu.memory_space<vmem>>, %arg26: memref<16x2xf32, #tpu.memory_space<vmem>>, %arg27: memref<2x8x1xi32, #tpu.memory_space<vmem>>, %arg28: memref<2x1x6xi32, #tpu.memory_space<vmem>>, %arg29: memref<2x8x1xf32, #tpu.memory_space<vmem>>, %arg30: memref<2x1x6xf32, #tpu.memory_space<vmem>>) attributes {dimension_semantics = [], scalar_prefetch = 0 : i64, scratch_operands = 0 : i64, tpu.core_type = #tpu.core_type<tc>} {
    %c0 = arith.constant 0 : index
    %c0_0 = arith.constant 0 : index
    %0 = memref.load %arg24[%c0, %c0_0] : memref<1x1xf32, #tpu.memory_space<smem>>
    %1 = tpu.iota {dimensions = array<i32: 0>} : vector<32x128xi32>
    %2 = tpu.iota {dimensions = array<i32: 1>} : vector<32x128xi32>
    %c31_i32 = arith.constant 31 : i32
    %3 = vector.broadcast %c31_i32 : i32 to vector<32x128xi32>
    %4 = arith.andi %2, %3 : vector<32x128xi32>
    %c4_i32 = arith.constant 4 : i32
    %5 = vector.broadcast %c4_i32 : i32 to vector<32x128xi32>
    %6 = arith.shrsi %1, %5 : vector<32x128xi32>
    %c4_i32_1 = arith.constant 4 : i32
    %7 = vector.broadcast %c4_i32_1 : i32 to vector<32x128xi32>
    %8 = arith.shrsi %4, %7 : vector<32x128xi32>
    %9 = arith.cmpi eq, %6, %8 : vector<32x128xi32>
    %c15_i32 = arith.constant 15 : i32
    %10 = vector.broadcast %c15_i32 : i32 to vector<32x128xi32>
    %11 = arith.andi %1, %10 : vector<32x128xi32>
    %c15_i32_2 = arith.constant 15 : i32
    %12 = vector.broadcast %c15_i32_2 : i32 to vector<32x128xi32>
    %13 = arith.andi %4, %12 : vector<32x128xi32>
    %c8_i32 = arith.constant 8 : i32
    %14 = vector.broadcast %c8_i32 : i32 to vector<32x128xi32>
    %15 = arith.cmpi slt, %11, %14 : vector<32x128xi32>
    %c0_i32 = arith.constant 0 : i32
    %c1_i32 = arith.constant 1 : i32
    %16 = vector.broadcast %c0_i32 : i32 to vector<32x128xi32>
    %17 = vector.broadcast %c1_i32 : i32 to vector<32x128xi32>
    %18 = arith.select %15, %16, %17 : vector<32x128xi1>, vector<32x128xi32>
    %c8_i32_3 = arith.constant 8 : i32
    %19 = vector.broadcast %c8_i32_3 : i32 to vector<32x128xi32>
    %20 = arith.cmpi slt, %13, %19 : vector<32x128xi32>
    %c0_i32_4 = arith.constant 0 : i32
    %c1_i32_5 = arith.constant 1 : i32
    %21 = vector.broadcast %c0_i32_4 : i32 to vector<32x128xi32>
    %22 = vector.broadcast %c1_i32_5 : i32 to vector<32x128xi32>
    %23 = arith.select %20, %21, %22 : vector<32x128xi1>, vector<32x128xi32>
    %c14_i32 = arith.constant 14 : i32
    %24 = vector.broadcast %c14_i32 : i32 to vector<32x128xi32>
    %25 = arith.cmpi slt, %13, %24 : vector<32x128xi32>
    %26 = arith.cmpi eq, %18, %23 : vector<32x128xi32>
    %27 = arith.andi %9, %26 : vector<32x128xi1>
    %28 = arith.andi %27, %25 : vector<32x128xi1>
    %29 = arith.cmpi ne, %18, %23 : vector<32x128xi32>
    %30 = arith.andi %9, %29 : vector<32x128xi1>
    %31 = arith.andi %30, %25 : vector<32x128xi1>
    %32 = tpu.iota {dimensions = array<i32: 0>} : vector<128x32xi32>
    %33 = tpu.iota {dimensions = array<i32: 1>} : vector<128x32xi32>
    %c5_i32 = arith.constant 5 : i32
    %34 = vector.broadcast %c5_i32 : i32 to vector<128x32xi32>
    %35 = arith.shrsi %32, %34 : vector<128x32xi32>
    %c3_i32 = arith.constant 3 : i32
    %36 = vector.broadcast %c3_i32 : i32 to vector<128x32xi32>
    %37 = arith.shrsi %33, %36 : vector<128x32xi32>
    %38 = arith.cmpi eq, %35, %37 : vector<128x32xi32>
    %cst = arith.constant 1.000000e+00 : f32
    %cst_6 = arith.constant 0.000000e+00 : f32
    %39 = vector.broadcast %cst : f32 to vector<128x32xf32>
    %40 = vector.broadcast %cst_6 : f32 to vector<128x32xf32>
    %41 = arith.select %38, %39, %40 : vector<128x32xi1>, vector<128x32xf32>
    %c0_7 = arith.constant 0 : index
    %c0_8 = arith.constant 0 : index
    %42 = vector.load %arg0[%c0_7, %c0_8] : memref<16x16xf32, #tpu.memory_space<vmem>>, vector<16x16xf32>
    %c0_9 = arith.constant 0 : index
    %c0_10 = arith.constant 0 : index
    %43 = vector.load %arg2[%c0_9, %c0_10] : memref<16x32xf32, #tpu.memory_space<vmem>>, vector<16x32xf32>
    %cst_11 = arith.constant dense<0.000000e+00> : vector<16x32xf32>
    %44 = tpu.matmul %42, %43, %cst_11 {dimension_numbers = #tpu.dot_dimension_numbers<[1], [0], [0], [1], [0, 0, 1, 1], [], []>} : vector<16x16xf32>, vector<16x32xf32>, vector<16x32xf32> -> vector<16x32xf32>
    %c0_12 = arith.constant 0 : index
    %c0_13 = arith.constant 0 : index
    %45 = vector.load %arg3[%c0_12, %c0_13] : memref<1x32xf32, #tpu.memory_space<vmem>>, vector<1x32xf32>
    %46 = vector.broadcast %45 : vector<1x32xf32> to vector<16x32xf32>
    %47 = arith.addf %44, %46 : vector<16x32xf32>
    %48 = arith.mulf %47, %47 : vector<16x32xf32>
    %cst_14 = arith.constant dense<0.000000e+00> : vector<16xf32>
    %49 = vector.multi_reduction <add>, %48, %cst_14 [1] : vector<16x32xf32> to vector<16xf32>
    %50 = vector.shape_cast %49 : vector<16xf32> to vector<16x1xf32>
    %cst_15 = arith.constant 1.000000e-24 : f32
    %51 = vector.broadcast %cst_15 : f32 to vector<16x1xf32>
    %52 = arith.maximumf %50, %51 : vector<16x1xf32>
    %53 = math.rsqrt %52 : vector<16x1xf32>
    %54 = vector.broadcast %53 : vector<16x1xf32> to vector<16x32xf32>
    %55 = arith.mulf %47, %54 : vector<16x32xf32>
    %c0_16 = arith.constant 0 : index
    %c0_17 = arith.constant 0 : index
    %56 = vector.load %arg1[%c0_16, %c0_17] : memref<16x16xf32, #tpu.memory_space<vmem>>, vector<16x16xf32>
    %c0_18 = arith.constant 0 : index
    %c0_19 = arith.constant 0 : index
    %57 = vector.load %arg4[%c0_18, %c0_19] : memref<16x32xf32, #tpu.memory_space<vmem>>, vector<16x32xf32>
    %cst_20 = arith.constant dense<0.000000e+00> : vector<16x32xf32>
    %58 = tpu.matmul %56, %57, %cst_20 {dimension_numbers = #tpu.dot_dimension_numbers<[1], [0], [0], [1], [0, 0, 1, 1], [], []>} : vector<16x16xf32>, vector<16x32xf32>, vector<16x32xf32> -> vector<16x32xf32>
    %c0_21 = arith.constant 0 : index
    %c0_22 = arith.constant 0 : index
    %59 = vector.load %arg5[%c0_21, %c0_22] : memref<1x32xf32, #tpu.memory_space<vmem>>, vector<1x32xf32>
    %60 = vector.broadcast %59 : vector<1x32xf32> to vector<16x32xf32>
    %61 = arith.addf %58, %60 : vector<16x32xf32>
    %62 = arith.mulf %61, %61 : vector<16x32xf32>
    %cst_23 = arith.constant dense<0.000000e+00> : vector<16xf32>
    %63 = vector.multi_reduction <add>, %62, %cst_23 [1] : vector<16x32xf32> to vector<16xf32>
    %64 = vector.shape_cast %63 : vector<16xf32> to vector<16x1xf32>
    %cst_24 = arith.constant 1.000000e-24 : f32
    %65 = vector.broadcast %cst_24 : f32 to vector<16x1xf32>
    %66 = arith.maximumf %64, %65 : vector<16x1xf32>
    %67 = math.rsqrt %66 : vector<16x1xf32>
    %68 = vector.broadcast %67 : vector<16x1xf32> to vector<16x32xf32>
    %69 = arith.mulf %61, %68 : vector<16x32xf32>
    %70 = vector.extract_strided_slice %55 {offsets = [0, 0], sizes = [8, 32], strides = [1, 1]} : vector<16x32xf32> to vector<8x32xf32>
    %71 = vector.extract_strided_slice %69 {offsets = [0, 0], sizes = [8, 32], strides = [1, 1]} : vector<16x32xf32> to vector<8x32xf32>
    %72 = vector.extract_strided_slice %55 {offsets = [8, 0], sizes = [8, 32], strides = [1, 1]} : vector<16x32xf32> to vector<8x32xf32>
    %73 = vector.extract_strided_slice %69 {offsets = [8, 0], sizes = [8, 32], strides = [1, 1]} : vector<16x32xf32> to vector<8x32xf32>
    %74 = tpu.concatenate %70, %71, %72, %73 in 0 : vector<8x32xf32>, vector<8x32xf32>, vector<8x32xf32>, vector<8x32xf32> -> vector<32x32xf32>
    %c0_25 = arith.constant 0 : index
    %c0_26 = arith.constant 0 : index
    %c0_27 = arith.constant 0 : index
    %75 = vector.load %arg6[%c0_25, %c0_26, %c0_27] : memref<4x32x32xf32, #tpu.memory_space<vmem>>, vector<1x32x32xf32>
    %76 = vector.shape_cast %75 : vector<1x32x32xf32> to vector<32x32xf32>
    %cst_28 = arith.constant dense<0.000000e+00> : vector<32x32xf32>
    %77 = tpu.matmul %74, %76, %cst_28 {dimension_numbers = #tpu.dot_dimension_numbers<[1], [0], [0], [1], [0, 0, 1, 1], [], []>} : vector<32x32xf32>, vector<32x32xf32>, vector<32x32xf32> -> vector<32x32xf32>
    %c0_29 = arith.constant 0 : index
    %c0_30 = arith.constant 0 : index
    %c0_31 = arith.constant 0 : index
    %78 = vector.load %arg9[%c0_29, %c0_30, %c0_31] : memref<4x1x32xf32, #tpu.memory_space<vmem>>, vector<1x1x32xf32>
    %79 = vector.shape_cast %78 : vector<1x1x32xf32> to vector<1x32xf32>
    %80 = vector.broadcast %79 : vector<1x32xf32> to vector<32x32xf32>
    %81 = arith.addf %77, %80 : vector<32x32xf32>
    %c0_32 = arith.constant 0 : index
    %c0_33 = arith.constant 0 : index
    %c0_34 = arith.constant 0 : index
    %82 = vector.load %arg7[%c0_32, %c0_33, %c0_34] : memref<4x32x32xf32, #tpu.memory_space<vmem>>, vector<1x32x32xf32>
    %83 = vector.shape_cast %82 : vector<1x32x32xf32> to vector<32x32xf32>
    %cst_35 = arith.constant dense<0.000000e+00> : vector<32x32xf32>
    %84 = tpu.matmul %74, %83, %cst_35 {dimension_numbers = #tpu.dot_dimension_numbers<[1], [0], [0], [1], [0, 0, 1, 1], [], []>} : vector<32x32xf32>, vector<32x32xf32>, vector<32x32xf32> -> vector<32x32xf32>
    %c0_36 = arith.constant 0 : index
    %c0_37 = arith.constant 0 : index
    %c0_38 = arith.constant 0 : index
    %85 = vector.load %arg10[%c0_36, %c0_37, %c0_38] : memref<4x1x32xf32, #tpu.memory_space<vmem>>, vector<1x1x32xf32>
    %86 = vector.shape_cast %85 : vector<1x1x32xf32> to vector<1x32xf32>
    %87 = vector.broadcast %86 : vector<1x32xf32> to vector<32x32xf32>
    %88 = arith.addf %84, %87 : vector<32x32xf32>
    %c0_39 = arith.constant 0 : index
    %c0_40 = arith.constant 0 : index
    %c0_41 = arith.constant 0 : index
    %89 = vector.load %arg8[%c0_39, %c0_40, %c0_41] : memref<4x32x32xf32, #tpu.memory_space<vmem>>, vector<1x32x32xf32>
    %90 = vector.shape_cast %89 : vector<1x32x32xf32> to vector<32x32xf32>
    %cst_42 = arith.constant dense<0.000000e+00> : vector<32x32xf32>
    %91 = tpu.matmul %74, %90, %cst_42 {dimension_numbers = #tpu.dot_dimension_numbers<[1], [0], [0], [1], [0, 0, 1, 1], [], []>} : vector<32x32xf32>, vector<32x32xf32>, vector<32x32xf32> -> vector<32x32xf32>
    %c0_43 = arith.constant 0 : index
    %c0_44 = arith.constant 0 : index
    %c0_45 = arith.constant 0 : index
    %92 = vector.load %arg11[%c0_43, %c0_44, %c0_45] : memref<4x1x32xf32, #tpu.memory_space<vmem>>, vector<1x1x32xf32>
    %93 = vector.shape_cast %92 : vector<1x1x32xf32> to vector<1x32xf32>
    %94 = vector.broadcast %93 : vector<1x32xf32> to vector<32x32xf32>
    %95 = arith.addf %91, %94 : vector<32x32xf32>
    %96 = tpu.concatenate %88, %88, %88, %88 in 0 : vector<32x32xf32>, vector<32x32xf32>, vector<32x32xf32>, vector<32x32xf32> -> vector<128x32xf32>
    %97 = arith.mulf %96, %41 : vector<128x32xf32>
    %98 = tpu.concatenate %95, %95, %95, %95 in 0 : vector<32x32xf32>, vector<32x32xf32>, vector<32x32xf32>, vector<32x32xf32> -> vector<128x32xf32>
    %99 = arith.mulf %98, %41 : vector<128x32xf32>
    %cst_46 = arith.constant dense<0.000000e+00> : vector<32x128xf32>
    %100 = tpu.matmul %81, %97, %cst_46 {dimension_numbers = #tpu.dot_dimension_numbers<[1], [1], [0], [0], [0, 0, 1, 0], [], []>} : vector<32x32xf32>, vector<128x32xf32>, vector<32x128xf32> -> vector<32x128xf32>
    %cst_47 = arith.constant -1.000000e+30 : f32
    %101 = vector.broadcast %cst_47 : f32 to vector<32x128xf32>
    %102 = arith.select %28, %100, %101 : vector<32x128xi1>, vector<32x128xf32>
    %cst_48 = arith.constant dense<0xFF800000> : vector<32xf32>
    %103 = vector.multi_reduction <maximumf>, %102, %cst_48 [1] : vector<32x128xf32> to vector<32xf32>
    %104 = vector.shape_cast %103 : vector<32xf32> to vector<32x1xf32>
    %105 = vector.broadcast %104 : vector<32x1xf32> to vector<32x128xf32>
    %106 = arith.subf %102, %105 : vector<32x128xf32>
    %107 = math.exp %106 : vector<32x128xf32>
    %cst_49 = arith.constant dense<0.000000e+00> : vector<32x32xf32>
    %108 = tpu.matmul %107, %41, %cst_49 {dimension_numbers = #tpu.dot_dimension_numbers<[1], [0], [0], [1], [0, 0, 1, 1], [], []>} : vector<32x128xf32>, vector<128x32xf32>, vector<32x32xf32> -> vector<32x32xf32>
    %cst_50 = arith.constant dense<0.000000e+00> : vector<32x32xf32>
    %109 = tpu.matmul %107, %99, %cst_50 {dimension_numbers = #tpu.dot_dimension_numbers<[1], [0], [0], [1], [0, 0, 1, 1], [], []>} : vector<32x128xf32>, vector<128x32xf32>, vector<32x32xf32> -> vector<32x32xf32>
    %cst_51 = arith.constant 1.000000e-30 : f32
    %110 = vector.broadcast %cst_51 : f32 to vector<32x32xf32>
    %111 = arith.maximumf %108, %110 : vector<32x32xf32>
    %112 = arith.divf %109, %111 : vector<32x32xf32>
    %c0_52 = arith.constant 0 : index
    %c0_53 = arith.constant 0 : index
    %c0_54 = arith.constant 0 : index
    %113 = vector.load %arg12[%c0_52, %c0_53, %c0_54] : memref<4x32x32xf32, #tpu.memory_space<vmem>>, vector<1x32x32xf32>
    %114 = vector.shape_cast %113 : vector<1x32x32xf32> to vector<32x32xf32>
    %cst_55 = arith.constant dense<0.000000e+00> : vector<32x32xf32>
    %115 = tpu.matmul %112, %114, %cst_55 {dimension_numbers = #tpu.dot_dimension_numbers<[1], [0], [0], [1], [0, 0, 1, 1], [], []>} : vector<32x32xf32>, vector<32x32xf32>, vector<32x32xf32> -> vector<32x32xf32>
    %c0_56 = arith.constant 0 : index
    %c0_57 = arith.constant 0 : index
    %c0_58 = arith.constant 0 : index
    %116 = vector.load %arg13[%c0_56, %c0_57, %c0_58] : memref<4x1x32xf32, #tpu.memory_space<vmem>>, vector<1x1x32xf32>
    %117 = vector.shape_cast %116 : vector<1x1x32xf32> to vector<1x32xf32>
    %118 = vector.broadcast %117 : vector<1x32xf32> to vector<32x32xf32>
    %119 = arith.addf %115, %118 : vector<32x32xf32>
    %c0_59 = arith.constant 0 : index
    %c0_60 = arith.constant 0 : index
    %c0_61 = arith.constant 0 : index
    %120 = vector.load %arg14[%c0_59, %c0_60, %c0_61] : memref<4x64x64xf32, #tpu.memory_space<vmem>>, vector<1x64x64xf32>
    %121 = vector.shape_cast %120 : vector<1x64x64xf32> to vector<64x64xf32>
    %122 = vector.extract_strided_slice %121 {offsets = [0, 0], sizes = [32, 64], strides = [1, 1]} : vector<64x64xf32> to vector<32x64xf32>
    %cst_62 = arith.constant dense<0.000000e+00> : vector<32x64xf32>
    %123 = tpu.matmul %74, %122, %cst_62 {dimension_numbers = #tpu.dot_dimension_numbers<[1], [0], [0], [1], [0, 0, 1, 1], [], []>} : vector<32x32xf32>, vector<32x64xf32>, vector<32x64xf32> -> vector<32x64xf32>
    %124 = vector.extract_strided_slice %121 {offsets = [32, 0], sizes = [32, 64], strides = [1, 1]} : vector<64x64xf32> to vector<32x64xf32>
    %cst_63 = arith.constant dense<0.000000e+00> : vector<32x64xf32>
    %125 = tpu.matmul %119, %124, %cst_63 {dimension_numbers = #tpu.dot_dimension_numbers<[1], [0], [0], [1], [0, 0, 1, 1], [], []>} : vector<32x32xf32>, vector<32x64xf32>, vector<32x64xf32> -> vector<32x64xf32>
    %126 = arith.addf %123, %125 : vector<32x64xf32>
    %c0_64 = arith.constant 0 : index
    %c0_65 = arith.constant 0 : index
    %c0_66 = arith.constant 0 : index
    %127 = vector.load %arg15[%c0_64, %c0_65, %c0_66] : memref<4x1x64xf32, #tpu.memory_space<vmem>>, vector<1x1x64xf32>
    %128 = vector.shape_cast %127 : vector<1x1x64xf32> to vector<1x64xf32>
    %129 = vector.broadcast %128 : vector<1x64xf32> to vector<32x64xf32>
    %130 = arith.addf %126, %129 : vector<32x64xf32>
    %cst_67 = arith.constant 0.000000e+00 : f32
    %131 = vector.broadcast %cst_67 : f32 to vector<32x64xf32>
    %132 = arith.maximumf %130, %131 : vector<32x64xf32>
    %c0_68 = arith.constant 0 : index
    %c0_69 = arith.constant 0 : index
    %c0_70 = arith.constant 0 : index
    %133 = vector.load %arg16[%c0_68, %c0_69, %c0_70] : memref<4x64x32xf32, #tpu.memory_space<vmem>>, vector<1x64x32xf32>
    %134 = vector.shape_cast %133 : vector<1x64x32xf32> to vector<64x32xf32>
    %cst_71 = arith.constant dense<0.000000e+00> : vector<32x32xf32>
    %135 = tpu.matmul %132, %134, %cst_71 {dimension_numbers = #tpu.dot_dimension_numbers<[1], [0], [0], [1], [0, 0, 1, 1], [], []>} : vector<32x64xf32>, vector<64x32xf32>, vector<32x32xf32> -> vector<32x32xf32>
    %136 = arith.addf %74, %135 : vector<32x32xf32>
    %c0_72 = arith.constant 0 : index
    %c0_73 = arith.constant 0 : index
    %c0_74 = arith.constant 0 : index
    %137 = vector.load %arg17[%c0_72, %c0_73, %c0_74] : memref<4x1x32xf32, #tpu.memory_space<vmem>>, vector<1x1x32xf32>
    %138 = vector.shape_cast %137 : vector<1x1x32xf32> to vector<1x32xf32>
    %139 = vector.broadcast %138 : vector<1x32xf32> to vector<32x32xf32>
    %140 = arith.addf %136, %139 : vector<32x32xf32>
    %c1 = arith.constant 1 : index
    %c0_75 = arith.constant 0 : index
    %c0_76 = arith.constant 0 : index
    %141 = vector.load %arg6[%c1, %c0_75, %c0_76] : memref<4x32x32xf32, #tpu.memory_space<vmem>>, vector<1x32x32xf32>
    %142 = vector.shape_cast %141 : vector<1x32x32xf32> to vector<32x32xf32>
    %cst_77 = arith.constant dense<0.000000e+00> : vector<32x32xf32>
    %143 = tpu.matmul %140, %142, %cst_77 {dimension_numbers = #tpu.dot_dimension_numbers<[1], [0], [0], [1], [0, 0, 1, 1], [], []>} : vector<32x32xf32>, vector<32x32xf32>, vector<32x32xf32> -> vector<32x32xf32>
    %c1_78 = arith.constant 1 : index
    %c0_79 = arith.constant 0 : index
    %c0_80 = arith.constant 0 : index
    %144 = vector.load %arg9[%c1_78, %c0_79, %c0_80] : memref<4x1x32xf32, #tpu.memory_space<vmem>>, vector<1x1x32xf32>
    %145 = vector.shape_cast %144 : vector<1x1x32xf32> to vector<1x32xf32>
    %146 = vector.broadcast %145 : vector<1x32xf32> to vector<32x32xf32>
    %147 = arith.addf %143, %146 : vector<32x32xf32>
    %c1_81 = arith.constant 1 : index
    %c0_82 = arith.constant 0 : index
    %c0_83 = arith.constant 0 : index
    %148 = vector.load %arg7[%c1_81, %c0_82, %c0_83] : memref<4x32x32xf32, #tpu.memory_space<vmem>>, vector<1x32x32xf32>
    %149 = vector.shape_cast %148 : vector<1x32x32xf32> to vector<32x32xf32>
    %cst_84 = arith.constant dense<0.000000e+00> : vector<32x32xf32>
    %150 = tpu.matmul %140, %149, %cst_84 {dimension_numbers = #tpu.dot_dimension_numbers<[1], [0], [0], [1], [0, 0, 1, 1], [], []>} : vector<32x32xf32>, vector<32x32xf32>, vector<32x32xf32> -> vector<32x32xf32>
    %c1_85 = arith.constant 1 : index
    %c0_86 = arith.constant 0 : index
    %c0_87 = arith.constant 0 : index
    %151 = vector.load %arg10[%c1_85, %c0_86, %c0_87] : memref<4x1x32xf32, #tpu.memory_space<vmem>>, vector<1x1x32xf32>
    %152 = vector.shape_cast %151 : vector<1x1x32xf32> to vector<1x32xf32>
    %153 = vector.broadcast %152 : vector<1x32xf32> to vector<32x32xf32>
    %154 = arith.addf %150, %153 : vector<32x32xf32>
    %c1_88 = arith.constant 1 : index
    %c0_89 = arith.constant 0 : index
    %c0_90 = arith.constant 0 : index
    %155 = vector.load %arg8[%c1_88, %c0_89, %c0_90] : memref<4x32x32xf32, #tpu.memory_space<vmem>>, vector<1x32x32xf32>
    %156 = vector.shape_cast %155 : vector<1x32x32xf32> to vector<32x32xf32>
    %cst_91 = arith.constant dense<0.000000e+00> : vector<32x32xf32>
    %157 = tpu.matmul %140, %156, %cst_91 {dimension_numbers = #tpu.dot_dimension_numbers<[1], [0], [0], [1], [0, 0, 1, 1], [], []>} : vector<32x32xf32>, vector<32x32xf32>, vector<32x32xf32> -> vector<32x32xf32>
    %c1_92 = arith.constant 1 : index
    %c0_93 = arith.constant 0 : index
    %c0_94 = arith.constant 0 : index
    %158 = vector.load %arg11[%c1_92, %c0_93, %c0_94] : memref<4x1x32xf32, #tpu.memory_space<vmem>>, vector<1x1x32xf32>
    %159 = vector.shape_cast %158 : vector<1x1x32xf32> to vector<1x32xf32>
    %160 = vector.broadcast %159 : vector<1x32xf32> to vector<32x32xf32>
    %161 = arith.addf %157, %160 : vector<32x32xf32>
    %162 = tpu.concatenate %154, %154, %154, %154 in 0 : vector<32x32xf32>, vector<32x32xf32>, vector<32x32xf32>, vector<32x32xf32> -> vector<128x32xf32>
    %163 = arith.mulf %162, %41 : vector<128x32xf32>
    %164 = tpu.concatenate %161, %161, %161, %161 in 0 : vector<32x32xf32>, vector<32x32xf32>, vector<32x32xf32>, vector<32x32xf32> -> vector<128x32xf32>
    %165 = arith.mulf %164, %41 : vector<128x32xf32>
    %cst_95 = arith.constant dense<0.000000e+00> : vector<32x128xf32>
    %166 = tpu.matmul %147, %163, %cst_95 {dimension_numbers = #tpu.dot_dimension_numbers<[1], [1], [0], [0], [0, 0, 1, 0], [], []>} : vector<32x32xf32>, vector<128x32xf32>, vector<32x128xf32> -> vector<32x128xf32>
    %cst_96 = arith.constant -1.000000e+30 : f32
    %167 = vector.broadcast %cst_96 : f32 to vector<32x128xf32>
    %168 = arith.select %31, %166, %167 : vector<32x128xi1>, vector<32x128xf32>
    %cst_97 = arith.constant dense<0xFF800000> : vector<32xf32>
    %169 = vector.multi_reduction <maximumf>, %168, %cst_97 [1] : vector<32x128xf32> to vector<32xf32>
    %170 = vector.shape_cast %169 : vector<32xf32> to vector<32x1xf32>
    %171 = vector.broadcast %170 : vector<32x1xf32> to vector<32x128xf32>
    %172 = arith.subf %168, %171 : vector<32x128xf32>
    %173 = math.exp %172 : vector<32x128xf32>
    %cst_98 = arith.constant dense<0.000000e+00> : vector<32x32xf32>
    %174 = tpu.matmul %173, %41, %cst_98 {dimension_numbers = #tpu.dot_dimension_numbers<[1], [0], [0], [1], [0, 0, 1, 1], [], []>} : vector<32x128xf32>, vector<128x32xf32>, vector<32x32xf32> -> vector<32x32xf32>
    %cst_99 = arith.constant dense<0.000000e+00> : vector<32x32xf32>
    %175 = tpu.matmul %173, %165, %cst_99 {dimension_numbers = #tpu.dot_dimension_numbers<[1], [0], [0], [1], [0, 0, 1, 1], [], []>} : vector<32x128xf32>, vector<128x32xf32>, vector<32x32xf32> -> vector<32x32xf32>
    %cst_100 = arith.constant 1.000000e-30 : f32
    %176 = vector.broadcast %cst_100 : f32 to vector<32x32xf32>
    %177 = arith.maximumf %174, %176 : vector<32x32xf32>
    %178 = arith.divf %175, %177 : vector<32x32xf32>
    %c1_101 = arith.constant 1 : index
    %c0_102 = arith.constant 0 : index
    %c0_103 = arith.constant 0 : index
    %179 = vector.load %arg12[%c1_101, %c0_102, %c0_103] : memref<4x32x32xf32, #tpu.memory_space<vmem>>, vector<1x32x32xf32>
    %180 = vector.shape_cast %179 : vector<1x32x32xf32> to vector<32x32xf32>
    %cst_104 = arith.constant dense<0.000000e+00> : vector<32x32xf32>
    %181 = tpu.matmul %178, %180, %cst_104 {dimension_numbers = #tpu.dot_dimension_numbers<[1], [0], [0], [1], [0, 0, 1, 1], [], []>} : vector<32x32xf32>, vector<32x32xf32>, vector<32x32xf32> -> vector<32x32xf32>
    %c1_105 = arith.constant 1 : index
    %c0_106 = arith.constant 0 : index
    %c0_107 = arith.constant 0 : index
    %182 = vector.load %arg13[%c1_105, %c0_106, %c0_107] : memref<4x1x32xf32, #tpu.memory_space<vmem>>, vector<1x1x32xf32>
    %183 = vector.shape_cast %182 : vector<1x1x32xf32> to vector<1x32xf32>
    %184 = vector.broadcast %183 : vector<1x32xf32> to vector<32x32xf32>
    %185 = arith.addf %181, %184 : vector<32x32xf32>
    %c1_108 = arith.constant 1 : index
    %c0_109 = arith.constant 0 : index
    %c0_110 = arith.constant 0 : index
    %186 = vector.load %arg14[%c1_108, %c0_109, %c0_110] : memref<4x64x64xf32, #tpu.memory_space<vmem>>, vector<1x64x64xf32>
    %187 = vector.shape_cast %186 : vector<1x64x64xf32> to vector<64x64xf32>
    %188 = vector.extract_strided_slice %187 {offsets = [0, 0], sizes = [32, 64], strides = [1, 1]} : vector<64x64xf32> to vector<32x64xf32>
    %cst_111 = arith.constant dense<0.000000e+00> : vector<32x64xf32>
    %189 = tpu.matmul %140, %188, %cst_111 {dimension_numbers = #tpu.dot_dimension_numbers<[1], [0], [0], [1], [0, 0, 1, 1], [], []>} : vector<32x32xf32>, vector<32x64xf32>, vector<32x64xf32> -> vector<32x64xf32>
    %190 = vector.extract_strided_slice %187 {offsets = [32, 0], sizes = [32, 64], strides = [1, 1]} : vector<64x64xf32> to vector<32x64xf32>
    %cst_112 = arith.constant dense<0.000000e+00> : vector<32x64xf32>
    %191 = tpu.matmul %185, %190, %cst_112 {dimension_numbers = #tpu.dot_dimension_numbers<[1], [0], [0], [1], [0, 0, 1, 1], [], []>} : vector<32x32xf32>, vector<32x64xf32>, vector<32x64xf32> -> vector<32x64xf32>
    %192 = arith.addf %189, %191 : vector<32x64xf32>
    %c1_113 = arith.constant 1 : index
    %c0_114 = arith.constant 0 : index
    %c0_115 = arith.constant 0 : index
    %193 = vector.load %arg15[%c1_113, %c0_114, %c0_115] : memref<4x1x64xf32, #tpu.memory_space<vmem>>, vector<1x1x64xf32>
    %194 = vector.shape_cast %193 : vector<1x1x64xf32> to vector<1x64xf32>
    %195 = vector.broadcast %194 : vector<1x64xf32> to vector<32x64xf32>
    %196 = arith.addf %192, %195 : vector<32x64xf32>
    %cst_116 = arith.constant 0.000000e+00 : f32
    %197 = vector.broadcast %cst_116 : f32 to vector<32x64xf32>
    %198 = arith.maximumf %196, %197 : vector<32x64xf32>
    %c1_117 = arith.constant 1 : index
    %c0_118 = arith.constant 0 : index
    %c0_119 = arith.constant 0 : index
    %199 = vector.load %arg16[%c1_117, %c0_118, %c0_119] : memref<4x64x32xf32, #tpu.memory_space<vmem>>, vector<1x64x32xf32>
    %200 = vector.shape_cast %199 : vector<1x64x32xf32> to vector<64x32xf32>
    %cst_120 = arith.constant dense<0.000000e+00> : vector<32x32xf32>
    %201 = tpu.matmul %198, %200, %cst_120 {dimension_numbers = #tpu.dot_dimension_numbers<[1], [0], [0], [1], [0, 0, 1, 1], [], []>} : vector<32x64xf32>, vector<64x32xf32>, vector<32x32xf32> -> vector<32x32xf32>
    %202 = arith.addf %140, %201 : vector<32x32xf32>
    %c1_121 = arith.constant 1 : index
    %c0_122 = arith.constant 0 : index
    %c0_123 = arith.constant 0 : index
    %203 = vector.load %arg17[%c1_121, %c0_122, %c0_123] : memref<4x1x32xf32, #tpu.memory_space<vmem>>, vector<1x1x32xf32>
    %204 = vector.shape_cast %203 : vector<1x1x32xf32> to vector<1x32xf32>
    %205 = vector.broadcast %204 : vector<1x32xf32> to vector<32x32xf32>
    %206 = arith.addf %202, %205 : vector<32x32xf32>
    %c2 = arith.constant 2 : index
    %c0_124 = arith.constant 0 : index
    %c0_125 = arith.constant 0 : index
    %207 = vector.load %arg6[%c2, %c0_124, %c0_125] : memref<4x32x32xf32, #tpu.memory_space<vmem>>, vector<1x32x32xf32>
    %208 = vector.shape_cast %207 : vector<1x32x32xf32> to vector<32x32xf32>
    %cst_126 = arith.constant dense<0.000000e+00> : vector<32x32xf32>
    %209 = tpu.matmul %206, %208, %cst_126 {dimension_numbers = #tpu.dot_dimension_numbers<[1], [0], [0], [1], [0, 0, 1, 1], [], []>} : vector<32x32xf32>, vector<32x32xf32>, vector<32x32xf32> -> vector<32x32xf32>
    %c2_127 = arith.constant 2 : index
    %c0_128 = arith.constant 0 : index
    %c0_129 = arith.constant 0 : index
    %210 = vector.load %arg9[%c2_127, %c0_128, %c0_129] : memref<4x1x32xf32, #tpu.memory_space<vmem>>, vector<1x1x32xf32>
    %211 = vector.shape_cast %210 : vector<1x1x32xf32> to vector<1x32xf32>
    %212 = vector.broadcast %211 : vector<1x32xf32> to vector<32x32xf32>
    %213 = arith.addf %209, %212 : vector<32x32xf32>
    %c2_130 = arith.constant 2 : index
    %c0_131 = arith.constant 0 : index
    %c0_132 = arith.constant 0 : index
    %214 = vector.load %arg7[%c2_130, %c0_131, %c0_132] : memref<4x32x32xf32, #tpu.memory_space<vmem>>, vector<1x32x32xf32>
    %215 = vector.shape_cast %214 : vector<1x32x32xf32> to vector<32x32xf32>
    %cst_133 = arith.constant dense<0.000000e+00> : vector<32x32xf32>
    %216 = tpu.matmul %206, %215, %cst_133 {dimension_numbers = #tpu.dot_dimension_numbers<[1], [0], [0], [1], [0, 0, 1, 1], [], []>} : vector<32x32xf32>, vector<32x32xf32>, vector<32x32xf32> -> vector<32x32xf32>
    %c2_134 = arith.constant 2 : index
    %c0_135 = arith.constant 0 : index
    %c0_136 = arith.constant 0 : index
    %217 = vector.load %arg10[%c2_134, %c0_135, %c0_136] : memref<4x1x32xf32, #tpu.memory_space<vmem>>, vector<1x1x32xf32>
    %218 = vector.shape_cast %217 : vector<1x1x32xf32> to vector<1x32xf32>
    %219 = vector.broadcast %218 : vector<1x32xf32> to vector<32x32xf32>
    %220 = arith.addf %216, %219 : vector<32x32xf32>
    %c2_137 = arith.constant 2 : index
    %c0_138 = arith.constant 0 : index
    %c0_139 = arith.constant 0 : index
    %221 = vector.load %arg8[%c2_137, %c0_138, %c0_139] : memref<4x32x32xf32, #tpu.memory_space<vmem>>, vector<1x32x32xf32>
    %222 = vector.shape_cast %221 : vector<1x32x32xf32> to vector<32x32xf32>
    %cst_140 = arith.constant dense<0.000000e+00> : vector<32x32xf32>
    %223 = tpu.matmul %206, %222, %cst_140 {dimension_numbers = #tpu.dot_dimension_numbers<[1], [0], [0], [1], [0, 0, 1, 1], [], []>} : vector<32x32xf32>, vector<32x32xf32>, vector<32x32xf32> -> vector<32x32xf32>
    %c2_141 = arith.constant 2 : index
    %c0_142 = arith.constant 0 : index
    %c0_143 = arith.constant 0 : index
    %224 = vector.load %arg11[%c2_141, %c0_142, %c0_143] : memref<4x1x32xf32, #tpu.memory_space<vmem>>, vector<1x1x32xf32>
    %225 = vector.shape_cast %224 : vector<1x1x32xf32> to vector<1x32xf32>
    %226 = vector.broadcast %225 : vector<1x32xf32> to vector<32x32xf32>
    %227 = arith.addf %223, %226 : vector<32x32xf32>
    %228 = tpu.concatenate %220, %220, %220, %220 in 0 : vector<32x32xf32>, vector<32x32xf32>, vector<32x32xf32>, vector<32x32xf32> -> vector<128x32xf32>
    %229 = arith.mulf %228, %41 : vector<128x32xf32>
    %230 = tpu.concatenate %227, %227, %227, %227 in 0 : vector<32x32xf32>, vector<32x32xf32>, vector<32x32xf32>, vector<32x32xf32> -> vector<128x32xf32>
    %231 = arith.mulf %230, %41 : vector<128x32xf32>
    %cst_144 = arith.constant dense<0.000000e+00> : vector<32x128xf32>
    %232 = tpu.matmul %213, %229, %cst_144 {dimension_numbers = #tpu.dot_dimension_numbers<[1], [1], [0], [0], [0, 0, 1, 0], [], []>} : vector<32x32xf32>, vector<128x32xf32>, vector<32x128xf32> -> vector<32x128xf32>
    %cst_145 = arith.constant -1.000000e+30 : f32
    %233 = vector.broadcast %cst_145 : f32 to vector<32x128xf32>
    %234 = arith.select %28, %232, %233 : vector<32x128xi1>, vector<32x128xf32>
    %cst_146 = arith.constant dense<0xFF800000> : vector<32xf32>
    %235 = vector.multi_reduction <maximumf>, %234, %cst_146 [1] : vector<32x128xf32> to vector<32xf32>
    %236 = vector.shape_cast %235 : vector<32xf32> to vector<32x1xf32>
    %237 = vector.broadcast %236 : vector<32x1xf32> to vector<32x128xf32>
    %238 = arith.subf %234, %237 : vector<32x128xf32>
    %239 = math.exp %238 : vector<32x128xf32>
    %cst_147 = arith.constant dense<0.000000e+00> : vector<32x32xf32>
    %240 = tpu.matmul %239, %41, %cst_147 {dimension_numbers = #tpu.dot_dimension_numbers<[1], [0], [0], [1], [0, 0, 1, 1], [], []>} : vector<32x128xf32>, vector<128x32xf32>, vector<32x32xf32> -> vector<32x32xf32>
    %cst_148 = arith.constant dense<0.000000e+00> : vector<32x32xf32>
    %241 = tpu.matmul %239, %231, %cst_148 {dimension_numbers = #tpu.dot_dimension_numbers<[1], [0], [0], [1], [0, 0, 1, 1], [], []>} : vector<32x128xf32>, vector<128x32xf32>, vector<32x32xf32> -> vector<32x32xf32>
    %cst_149 = arith.constant 1.000000e-30 : f32
    %242 = vector.broadcast %cst_149 : f32 to vector<32x32xf32>
    %243 = arith.maximumf %240, %242 : vector<32x32xf32>
    %244 = arith.divf %241, %243 : vector<32x32xf32>
    %c2_150 = arith.constant 2 : index
    %c0_151 = arith.constant 0 : index
    %c0_152 = arith.constant 0 : index
    %245 = vector.load %arg12[%c2_150, %c0_151, %c0_152] : memref<4x32x32xf32, #tpu.memory_space<vmem>>, vector<1x32x32xf32>
    %246 = vector.shape_cast %245 : vector<1x32x32xf32> to vector<32x32xf32>
    %cst_153 = arith.constant dense<0.000000e+00> : vector<32x32xf32>
    %247 = tpu.matmul %244, %246, %cst_153 {dimension_numbers = #tpu.dot_dimension_numbers<[1], [0], [0], [1], [0, 0, 1, 1], [], []>} : vector<32x32xf32>, vector<32x32xf32>, vector<32x32xf32> -> vector<32x32xf32>
    %c2_154 = arith.constant 2 : index
    %c0_155 = arith.constant 0 : index
    %c0_156 = arith.constant 0 : index
    %248 = vector.load %arg13[%c2_154, %c0_155, %c0_156] : memref<4x1x32xf32, #tpu.memory_space<vmem>>, vector<1x1x32xf32>
    %249 = vector.shape_cast %248 : vector<1x1x32xf32> to vector<1x32xf32>
    %250 = vector.broadcast %249 : vector<1x32xf32> to vector<32x32xf32>
    %251 = arith.addf %247, %250 : vector<32x32xf32>
    %c2_157 = arith.constant 2 : index
    %c0_158 = arith.constant 0 : index
    %c0_159 = arith.constant 0 : index
    %252 = vector.load %arg14[%c2_157, %c0_158, %c0_159] : memref<4x64x64xf32, #tpu.memory_space<vmem>>, vector<1x64x64xf32>
    %253 = vector.shape_cast %252 : vector<1x64x64xf32> to vector<64x64xf32>
    %254 = vector.extract_strided_slice %253 {offsets = [0, 0], sizes = [32, 64], strides = [1, 1]} : vector<64x64xf32> to vector<32x64xf32>
    %cst_160 = arith.constant dense<0.000000e+00> : vector<32x64xf32>
    %255 = tpu.matmul %206, %254, %cst_160 {dimension_numbers = #tpu.dot_dimension_numbers<[1], [0], [0], [1], [0, 0, 1, 1], [], []>} : vector<32x32xf32>, vector<32x64xf32>, vector<32x64xf32> -> vector<32x64xf32>
    %256 = vector.extract_strided_slice %253 {offsets = [32, 0], sizes = [32, 64], strides = [1, 1]} : vector<64x64xf32> to vector<32x64xf32>
    %cst_161 = arith.constant dense<0.000000e+00> : vector<32x64xf32>
    %257 = tpu.matmul %251, %256, %cst_161 {dimension_numbers = #tpu.dot_dimension_numbers<[1], [0], [0], [1], [0, 0, 1, 1], [], []>} : vector<32x32xf32>, vector<32x64xf32>, vector<32x64xf32> -> vector<32x64xf32>
    %258 = arith.addf %255, %257 : vector<32x64xf32>
    %c2_162 = arith.constant 2 : index
    %c0_163 = arith.constant 0 : index
    %c0_164 = arith.constant 0 : index
    %259 = vector.load %arg15[%c2_162, %c0_163, %c0_164] : memref<4x1x64xf32, #tpu.memory_space<vmem>>, vector<1x1x64xf32>
    %260 = vector.shape_cast %259 : vector<1x1x64xf32> to vector<1x64xf32>
    %261 = vector.broadcast %260 : vector<1x64xf32> to vector<32x64xf32>
    %262 = arith.addf %258, %261 : vector<32x64xf32>
    %cst_165 = arith.constant 0.000000e+00 : f32
    %263 = vector.broadcast %cst_165 : f32 to vector<32x64xf32>
    %264 = arith.maximumf %262, %263 : vector<32x64xf32>
    %c2_166 = arith.constant 2 : index
    %c0_167 = arith.constant 0 : index
    %c0_168 = arith.constant 0 : index
    %265 = vector.load %arg16[%c2_166, %c0_167, %c0_168] : memref<4x64x32xf32, #tpu.memory_space<vmem>>, vector<1x64x32xf32>
    %266 = vector.shape_cast %265 : vector<1x64x32xf32> to vector<64x32xf32>
    %cst_169 = arith.constant dense<0.000000e+00> : vector<32x32xf32>
    %267 = tpu.matmul %264, %266, %cst_169 {dimension_numbers = #tpu.dot_dimension_numbers<[1], [0], [0], [1], [0, 0, 1, 1], [], []>} : vector<32x64xf32>, vector<64x32xf32>, vector<32x32xf32> -> vector<32x32xf32>
    %268 = arith.addf %206, %267 : vector<32x32xf32>
    %c2_170 = arith.constant 2 : index
    %c0_171 = arith.constant 0 : index
    %c0_172 = arith.constant 0 : index
    %269 = vector.load %arg17[%c2_170, %c0_171, %c0_172] : memref<4x1x32xf32, #tpu.memory_space<vmem>>, vector<1x1x32xf32>
    %270 = vector.shape_cast %269 : vector<1x1x32xf32> to vector<1x32xf32>
    %271 = vector.broadcast %270 : vector<1x32xf32> to vector<32x32xf32>
    %272 = arith.addf %268, %271 : vector<32x32xf32>
    %c3 = arith.constant 3 : index
    %c0_173 = arith.constant 0 : index
    %c0_174 = arith.constant 0 : index
    %273 = vector.load %arg6[%c3, %c0_173, %c0_174] : memref<4x32x32xf32, #tpu.memory_space<vmem>>, vector<1x32x32xf32>
    %274 = vector.shape_cast %273 : vector<1x32x32xf32> to vector<32x32xf32>
    %cst_175 = arith.constant dense<0.000000e+00> : vector<32x32xf32>
    %275 = tpu.matmul %272, %274, %cst_175 {dimension_numbers = #tpu.dot_dimension_numbers<[1], [0], [0], [1], [0, 0, 1, 1], [], []>} : vector<32x32xf32>, vector<32x32xf32>, vector<32x32xf32> -> vector<32x32xf32>
    %c3_176 = arith.constant 3 : index
    %c0_177 = arith.constant 0 : index
    %c0_178 = arith.constant 0 : index
    %276 = vector.load %arg9[%c3_176, %c0_177, %c0_178] : memref<4x1x32xf32, #tpu.memory_space<vmem>>, vector<1x1x32xf32>
    %277 = vector.shape_cast %276 : vector<1x1x32xf32> to vector<1x32xf32>
    %278 = vector.broadcast %277 : vector<1x32xf32> to vector<32x32xf32>
    %279 = arith.addf %275, %278 : vector<32x32xf32>
    %c3_179 = arith.constant 3 : index
    %c0_180 = arith.constant 0 : index
    %c0_181 = arith.constant 0 : index
    %280 = vector.load %arg7[%c3_179, %c0_180, %c0_181] : memref<4x32x32xf32, #tpu.memory_space<vmem>>, vector<1x32x32xf32>
    %281 = vector.shape_cast %280 : vector<1x32x32xf32> to vector<32x32xf32>
    %cst_182 = arith.constant dense<0.000000e+00> : vector<32x32xf32>
    %282 = tpu.matmul %272, %281, %cst_182 {dimension_numbers = #tpu.dot_dimension_numbers<[1], [0], [0], [1], [0, 0, 1, 1], [], []>} : vector<32x32xf32>, vector<32x32xf32>, vector<32x32xf32> -> vector<32x32xf32>
    %c3_183 = arith.constant 3 : index
    %c0_184 = arith.constant 0 : index
    %c0_185 = arith.constant 0 : index
    %283 = vector.load %arg10[%c3_183, %c0_184, %c0_185] : memref<4x1x32xf32, #tpu.memory_space<vmem>>, vector<1x1x32xf32>
    %284 = vector.shape_cast %283 : vector<1x1x32xf32> to vector<1x32xf32>
    %285 = vector.broadcast %284 : vector<1x32xf32> to vector<32x32xf32>
    %286 = arith.addf %282, %285 : vector<32x32xf32>
    %c3_186 = arith.constant 3 : index
    %c0_187 = arith.constant 0 : index
    %c0_188 = arith.constant 0 : index
    %287 = vector.load %arg8[%c3_186, %c0_187, %c0_188] : memref<4x32x32xf32, #tpu.memory_space<vmem>>, vector<1x32x32xf32>
    %288 = vector.shape_cast %287 : vector<1x32x32xf32> to vector<32x32xf32>
    %cst_189 = arith.constant dense<0.000000e+00> : vector<32x32xf32>
    %289 = tpu.matmul %272, %288, %cst_189 {dimension_numbers = #tpu.dot_dimension_numbers<[1], [0], [0], [1], [0, 0, 1, 1], [], []>} : vector<32x32xf32>, vector<32x32xf32>, vector<32x32xf32> -> vector<32x32xf32>
    %c3_190 = arith.constant 3 : index
    %c0_191 = arith.constant 0 : index
    %c0_192 = arith.constant 0 : index
    %290 = vector.load %arg11[%c3_190, %c0_191, %c0_192] : memref<4x1x32xf32, #tpu.memory_space<vmem>>, vector<1x1x32xf32>
    %291 = vector.shape_cast %290 : vector<1x1x32xf32> to vector<1x32xf32>
    %292 = vector.broadcast %291 : vector<1x32xf32> to vector<32x32xf32>
    %293 = arith.addf %289, %292 : vector<32x32xf32>
    %294 = tpu.concatenate %286, %286, %286, %286 in 0 : vector<32x32xf32>, vector<32x32xf32>, vector<32x32xf32>, vector<32x32xf32> -> vector<128x32xf32>
    %295 = arith.mulf %294, %41 : vector<128x32xf32>
    %296 = tpu.concatenate %293, %293, %293, %293 in 0 : vector<32x32xf32>, vector<32x32xf32>, vector<32x32xf32>, vector<32x32xf32> -> vector<128x32xf32>
    %297 = arith.mulf %296, %41 : vector<128x32xf32>
    %cst_193 = arith.constant dense<0.000000e+00> : vector<32x128xf32>
    %298 = tpu.matmul %279, %295, %cst_193 {dimension_numbers = #tpu.dot_dimension_numbers<[1], [1], [0], [0], [0, 0, 1, 0], [], []>} : vector<32x32xf32>, vector<128x32xf32>, vector<32x128xf32> -> vector<32x128xf32>
    %cst_194 = arith.constant -1.000000e+30 : f32
    %299 = vector.broadcast %cst_194 : f32 to vector<32x128xf32>
    %300 = arith.select %31, %298, %299 : vector<32x128xi1>, vector<32x128xf32>
    %cst_195 = arith.constant dense<0xFF800000> : vector<32xf32>
    %301 = vector.multi_reduction <maximumf>, %300, %cst_195 [1] : vector<32x128xf32> to vector<32xf32>
    %302 = vector.shape_cast %301 : vector<32xf32> to vector<32x1xf32>
    %303 = vector.broadcast %302 : vector<32x1xf32> to vector<32x128xf32>
    %304 = arith.subf %300, %303 : vector<32x128xf32>
    %305 = math.exp %304 : vector<32x128xf32>
    %cst_196 = arith.constant dense<0.000000e+00> : vector<32x32xf32>
    %306 = tpu.matmul %305, %41, %cst_196 {dimension_numbers = #tpu.dot_dimension_numbers<[1], [0], [0], [1], [0, 0, 1, 1], [], []>} : vector<32x128xf32>, vector<128x32xf32>, vector<32x32xf32> -> vector<32x32xf32>
    %cst_197 = arith.constant dense<0.000000e+00> : vector<32x32xf32>
    %307 = tpu.matmul %305, %297, %cst_197 {dimension_numbers = #tpu.dot_dimension_numbers<[1], [0], [0], [1], [0, 0, 1, 1], [], []>} : vector<32x128xf32>, vector<128x32xf32>, vector<32x32xf32> -> vector<32x32xf32>
    %cst_198 = arith.constant 1.000000e-30 : f32
    %308 = vector.broadcast %cst_198 : f32 to vector<32x32xf32>
    %309 = arith.maximumf %306, %308 : vector<32x32xf32>
    %310 = arith.divf %307, %309 : vector<32x32xf32>
    %c3_199 = arith.constant 3 : index
    %c0_200 = arith.constant 0 : index
    %c0_201 = arith.constant 0 : index
    %311 = vector.load %arg12[%c3_199, %c0_200, %c0_201] : memref<4x32x32xf32, #tpu.memory_space<vmem>>, vector<1x32x32xf32>
    %312 = vector.shape_cast %311 : vector<1x32x32xf32> to vector<32x32xf32>
    %cst_202 = arith.constant dense<0.000000e+00> : vector<32x32xf32>
    %313 = tpu.matmul %310, %312, %cst_202 {dimension_numbers = #tpu.dot_dimension_numbers<[1], [0], [0], [1], [0, 0, 1, 1], [], []>} : vector<32x32xf32>, vector<32x32xf32>, vector<32x32xf32> -> vector<32x32xf32>
    %c3_203 = arith.constant 3 : index
    %c0_204 = arith.constant 0 : index
    %c0_205 = arith.constant 0 : index
    %314 = vector.load %arg13[%c3_203, %c0_204, %c0_205] : memref<4x1x32xf32, #tpu.memory_space<vmem>>, vector<1x1x32xf32>
    %315 = vector.shape_cast %314 : vector<1x1x32xf32> to vector<1x32xf32>
    %316 = vector.broadcast %315 : vector<1x32xf32> to vector<32x32xf32>
    %317 = arith.addf %313, %316 : vector<32x32xf32>
    %c3_206 = arith.constant 3 : index
    %c0_207 = arith.constant 0 : index
    %c0_208 = arith.constant 0 : index
    %318 = vector.load %arg14[%c3_206, %c0_207, %c0_208] : memref<4x64x64xf32, #tpu.memory_space<vmem>>, vector<1x64x64xf32>
    %319 = vector.shape_cast %318 : vector<1x64x64xf32> to vector<64x64xf32>
    %320 = vector.extract_strided_slice %319 {offsets = [0, 0], sizes = [32, 64], strides = [1, 1]} : vector<64x64xf32> to vector<32x64xf32>
    %cst_209 = arith.constant dense<0.000000e+00> : vector<32x64xf32>
    %321 = tpu.matmul %272, %320, %cst_209 {dimension_numbers = #tpu.dot_dimension_numbers<[1], [0], [0], [1], [0, 0, 1, 1], [], []>} : vector<32x32xf32>, vector<32x64xf32>, vector<32x64xf32> -> vector<32x64xf32>
    %322 = vector.extract_strided_slice %319 {offsets = [32, 0], sizes = [32, 64], strides = [1, 1]} : vector<64x64xf32> to vector<32x64xf32>
    %cst_210 = arith.constant dense<0.000000e+00> : vector<32x64xf32>
    %323 = tpu.matmul %317, %322, %cst_210 {dimension_numbers = #tpu.dot_dimension_numbers<[1], [0], [0], [1], [0, 0, 1, 1], [], []>} : vector<32x32xf32>, vector<32x64xf32>, vector<32x64xf32> -> vector<32x64xf32>
    %324 = arith.addf %321, %323 : vector<32x64xf32>
    %c3_211 = arith.constant 3 : index
    %c0_212 = arith.constant 0 : index
    %c0_213 = arith.constant 0 : index
    %325 = vector.load %arg15[%c3_211, %c0_212, %c0_213] : memref<4x1x64xf32, #tpu.memory_space<vmem>>, vector<1x1x64xf32>
    %326 = vector.shape_cast %325 : vector<1x1x64xf32> to vector<1x64xf32>
    %327 = vector.broadcast %326 : vector<1x64xf32> to vector<32x64xf32>
    %328 = arith.addf %324, %327 : vector<32x64xf32>
    %cst_214 = arith.constant 0.000000e+00 : f32
    %329 = vector.broadcast %cst_214 : f32 to vector<32x64xf32>
    %330 = arith.maximumf %328, %329 : vector<32x64xf32>
    %c3_215 = arith.constant 3 : index
    %c0_216 = arith.constant 0 : index
    %c0_217 = arith.constant 0 : index
    %331 = vector.load %arg16[%c3_215, %c0_216, %c0_217] : memref<4x64x32xf32, #tpu.memory_space<vmem>>, vector<1x64x32xf32>
    %332 = vector.shape_cast %331 : vector<1x64x32xf32> to vector<64x32xf32>
    %cst_218 = arith.constant dense<0.000000e+00> : vector<32x32xf32>
    %333 = tpu.matmul %330, %332, %cst_218 {dimension_numbers = #tpu.dot_dimension_numbers<[1], [0], [0], [1], [0, 0, 1, 1], [], []>} : vector<32x64xf32>, vector<64x32xf32>, vector<32x32xf32> -> vector<32x32xf32>
    %334 = arith.addf %272, %333 : vector<32x32xf32>
    %c3_219 = arith.constant 3 : index
    %c0_220 = arith.constant 0 : index
    %c0_221 = arith.constant 0 : index
    %335 = vector.load %arg17[%c3_219, %c0_220, %c0_221] : memref<4x1x32xf32, #tpu.memory_space<vmem>>, vector<1x1x32xf32>
    %336 = vector.shape_cast %335 : vector<1x1x32xf32> to vector<1x32xf32>
    %337 = vector.broadcast %336 : vector<1x32xf32> to vector<32x32xf32>
    %338 = arith.addf %334, %337 : vector<32x32xf32>
    %c0_222 = arith.constant 0 : index
    %c0_223 = arith.constant 0 : index
    %339 = vector.load %arg20[%c0_222, %c0_223] : memref<32x16xf32, #tpu.memory_space<vmem>>, vector<32x16xf32>
    %cst_224 = arith.constant dense<0.000000e+00> : vector<16x16xf32>
    %340 = tpu.matmul %69, %339, %cst_224 {dimension_numbers = #tpu.dot_dimension_numbers<[1], [0], [0], [1], [0, 0, 1, 1], [], []>} : vector<16x32xf32>, vector<32x16xf32>, vector<16x16xf32> -> vector<16x16xf32>
    %c0_225 = arith.constant 0 : index
    %c0_226 = arith.constant 0 : index
    %341 = vector.load %arg21[%c0_225, %c0_226] : memref<1x16xf32, #tpu.memory_space<vmem>>, vector<1x16xf32>
    %342 = vector.broadcast %341 : vector<1x16xf32> to vector<16x16xf32>
    %343 = arith.addf %340, %342 : vector<16x16xf32>
    %cst_227 = arith.constant 0.000000e+00 : f32
    %344 = vector.broadcast %cst_227 : f32 to vector<16x16xf32>
    %345 = arith.maximumf %343, %344 : vector<16x16xf32>
    %c0_228 = arith.constant 0 : index
    %c0_229 = arith.constant 0 : index
    %346 = vector.load %arg22[%c0_228, %c0_229] : memref<16x2xf32, #tpu.memory_space<vmem>>, vector<16x2xf32>
    %cst_230 = arith.constant dense<0.000000e+00> : vector<16x2xf32>
    %347 = tpu.matmul %345, %346, %cst_230 {dimension_numbers = #tpu.dot_dimension_numbers<[1], [0], [0], [1], [0, 0, 1, 1], [], []>} : vector<16x16xf32>, vector<16x2xf32>, vector<16x2xf32> -> vector<16x2xf32>
    %c0_231 = arith.constant 0 : index
    %c0_232 = arith.constant 0 : index
    %348 = vector.load %arg23[%c0_231, %c0_232] : memref<1x2xf32, #tpu.memory_space<vmem>>, vector<1x2xf32>
    %349 = vector.broadcast %348 : vector<1x2xf32> to vector<16x2xf32>
    %350 = arith.addf %347, %349 : vector<16x2xf32>
    %c0_233 = arith.constant 0 : index
    %c0_234 = arith.constant 0 : index
    %351 = vector.load %arg26[%c0_233, %c0_234] : memref<16x2xf32, #tpu.memory_space<vmem>>, vector<16x2xf32>
    tpu.vector_store %arg26[%c0_233, %c0_234], %350 {strides = array<i32>} : memref<16x2xf32, #tpu.memory_space<vmem>>, vector<16x2xf32>,
    %c0_235 = arith.constant 0 : index
    %c0_236 = arith.constant 0 : index
    %352 = vector.load %arg18[%c0_235, %c0_236] : memref<32x32xf32, #tpu.memory_space<vmem>>, vector<32x32xf32>
    %cst_237 = arith.constant dense<0.000000e+00> : vector<32x32xf32>
    %353 = tpu.matmul %338, %352, %cst_237 {dimension_numbers = #tpu.dot_dimension_numbers<[1], [0], [0], [1], [0, 0, 1, 1], [], []>} : vector<32x32xf32>, vector<32x32xf32>, vector<32x32xf32> -> vector<32x32xf32>
    %c0_238 = arith.constant 0 : index
    %c0_239 = arith.constant 0 : index
    %354 = vector.load %arg19[%c0_238, %c0_239] : memref<1x32xf32, #tpu.memory_space<vmem>>, vector<1x32xf32>
    %355 = vector.broadcast %354 : vector<1x32xf32> to vector<32x32xf32>
    %356 = arith.addf %353, %355 : vector<32x32xf32>
    %357 = vector.extract_strided_slice %356 {offsets = [0, 0], sizes = [8, 32], strides = [1, 1]} : vector<32x32xf32> to vector<8x32xf32>
    %358 = vector.extract_strided_slice %356 {offsets = [8, 0], sizes = [8, 32], strides = [1, 1]} : vector<32x32xf32> to vector<8x32xf32>
    %cst_240 = arith.constant dense<0.000000e+00> : vector<8x8xf32>
    %359 = tpu.matmul %357, %358, %cst_240 {dimension_numbers = #tpu.dot_dimension_numbers<[1], [1], [0], [0], [0, 0, 1, 0], [], []>} : vector<8x32xf32>, vector<8x32xf32>, vector<8x8xf32> -> vector<8x8xf32>
    %cst_241 = arith.constant 0.176776692 : f32
    %360 = vector.broadcast %cst_241 : f32 to vector<8x8xf32>
    %361 = arith.mulf %359, %360 : vector<8x8xf32>
    %362 = vector.extract_strided_slice %356 {offsets = [16, 0], sizes = [8, 32], strides = [1, 1]} : vector<32x32xf32> to vector<8x32xf32>
    %363 = vector.extract_strided_slice %356 {offsets = [24, 0], sizes = [8, 32], strides = [1, 1]} : vector<32x32xf32> to vector<8x32xf32>
    %cst_242 = arith.constant dense<0.000000e+00> : vector<8x8xf32>
    %364 = tpu.matmul %362, %363, %cst_242 {dimension_numbers = #tpu.dot_dimension_numbers<[1], [1], [0], [0], [0, 0, 1, 0], [], []>} : vector<8x32xf32>, vector<8x32xf32>, vector<8x8xf32> -> vector<8x8xf32>
    %cst_243 = arith.constant 0.176776692 : f32
    %365 = vector.broadcast %cst_243 : f32 to vector<8x8xf32>
    %366 = arith.mulf %364, %365 : vector<8x8xf32>
    %367 = tpu.iota {dimensions = array<i32: 0>} : vector<9x7xi32>
    %368 = tpu.iota {dimensions = array<i32: 1>} : vector<9x7xi32>
    %c8_i32_244 = arith.constant 8 : i32
    %369 = vector.broadcast %c8_i32_244 : i32 to vector<9x7xi32>
    %370 = arith.cmpi slt, %367, %369 : vector<9x7xi32>
    %c6_i32 = arith.constant 6 : i32
    %371 = vector.broadcast %c6_i32 : i32 to vector<9x7xi32>
    %372 = arith.cmpi slt, %368, %371 : vector<9x7xi32>
    %373 = arith.andi %370, %372 : vector<9x7xi1>
    %cst_245 = arith.constant 0.000000e+00 : f32
    %374 = vector.broadcast %cst_245 : f32 to vector<1x8xf32>
    %375 = tpu.concatenate %361, %374 in 0 : vector<8x8xf32>, vector<1x8xf32> -> vector<9x8xf32>
    %376 = vector.extract_strided_slice %375 {offsets = [0, 0], sizes = [9, 7], strides = [1, 1]} : vector<9x8xf32> to vector<9x7xf32>
    %377 = vector.broadcast %0 : f32 to vector<9x7xf32>
    %378 = arith.select %373, %376, %377 : vector<9x7xi1>, vector<9x7xf32>
    %379 = vector.shape_cast %378 : vector<9x7xf32> to vector<1x9x7xf32>
    %380 = tpu.concatenate %366, %374 in 0 : vector<8x8xf32>, vector<1x8xf32> -> vector<9x8xf32>
    %381 = vector.extract_strided_slice %380 {offsets = [0, 0], sizes = [9, 7], strides = [1, 1]} : vector<9x8xf32> to vector<9x7xf32>
    %382 = vector.broadcast %0 : f32 to vector<9x7xf32>
    %383 = arith.select %373, %381, %382 : vector<9x7xi1>, vector<9x7xf32>
    %384 = vector.shape_cast %383 : vector<9x7xf32> to vector<1x9x7xf32>
    %385 = tpu.concatenate %379, %384 in 0 : vector<1x9x7xf32>, vector<1x9x7xf32> -> vector<2x9x7xf32>
    %386 = tpu.iota {dimensions = array<i32: 1>} : vector<1x9x1xi32>
    %387 = tpu.iota {dimensions = array<i32: 2>} : vector<1x1x7xi32>
    %c8_i32_246 = arith.constant 8 : i32
    %388 = vector.broadcast %c8_i32_246 : i32 to vector<1x9x1xi32>
    %389 = arith.cmpi eq, %386, %388 : vector<1x9x1xi32>
    %cst_247 = arith.constant -0.847297847 : f32
    %cst_248 = arith.constant -2.6390574 : f32
    %390 = vector.broadcast %cst_247 : f32 to vector<1x9x1xf32>
    %391 = vector.broadcast %cst_248 : f32 to vector<1x9x1xf32>
    %392 = arith.select %389, %390, %391 : vector<1x9x1xi1>, vector<1x9x1xf32>
    %c6_i32_249 = arith.constant 6 : i32
    %393 = vector.broadcast %c6_i32_249 : i32 to vector<1x1x7xi32>
    %394 = arith.cmpi eq, %387, %393 : vector<1x1x7xi32>
    %cst_250 = arith.constant -0.559615791 : f32
    %cst_251 = arith.constant -2.6390574 : f32
    %395 = vector.broadcast %cst_250 : f32 to vector<1x1x7xf32>
    %396 = vector.broadcast %cst_251 : f32 to vector<1x1x7xf32>
    %397 = arith.select %394, %395, %396 : vector<1x1x7xi1>, vector<1x1x7xf32>
    %cst_252 = arith.constant 0.000000e+00 : f32
    %398 = vector.broadcast %cst_252 : f32 to vector<2x1x7xf32>
    %399 = vector.broadcast %398 : vector<2x1x7xf32> to vector<2x9x7xf32>
    %400 = arith.addf %385, %399 : vector<2x9x7xf32>
    %cst_253 = arith.constant dense<0xFF800000> : vector<2x9xf32>
    %401 = vector.multi_reduction <maximumf>, %400, %cst_253 [2] : vector<2x9x7xf32> to vector<2x9xf32>
    %402 = vector.shape_cast %401 : vector<2x9xf32> to vector<2x9x1xf32>
    %403 = vector.broadcast %402 : vector<2x9x1xf32> to vector<2x9x7xf32>
    %404 = arith.subf %400, %403 : vector<2x9x7xf32>
    %405 = math.exp %404 : vector<2x9x7xf32>
    %cst_254 = arith.constant dense<0.000000e+00> : vector<2x9xf32>
    %406 = vector.multi_reduction <add>, %405, %cst_254 [2] : vector<2x9x7xf32> to vector<2x9xf32>
    %407 = vector.shape_cast %406 : vector<2x9xf32> to vector<2x9x1xf32>
    %408 = math.log %407 : vector<2x9x1xf32>
    %409 = arith.addf %402, %408 : vector<2x9x1xf32>
    %410 = vector.broadcast %392 : vector<1x9x1xf32> to vector<2x9x1xf32>
    %411 = arith.subf %410, %409 : vector<2x9x1xf32>
    %412 = vector.broadcast %411 : vector<2x9x1xf32> to vector<2x9x7xf32>
    %413 = arith.addf %385, %412 : vector<2x9x7xf32>
    %cst_255 = arith.constant dense<0xFF800000> : vector<2x7xf32>
    %414 = vector.multi_reduction <maximumf>, %413, %cst_255 [1] : vector<2x9x7xf32> to vector<2x7xf32>
    %415 = vector.shape_cast %414 : vector<2x7xf32> to vector<2x1x7xf32>
    %416 = vector.broadcast %415 : vector<2x1x7xf32> to vector<2x9x7xf32>
    %417 = arith.subf %413, %416 : vector<2x9x7xf32>
    %418 = math.exp %417 : vector<2x9x7xf32>
    %cst_256 = arith.constant dense<0.000000e+00> : vector<2x7xf32>
    %419 = vector.multi_reduction <add>, %418, %cst_256 [1] : vector<2x9x7xf32> to vector<2x7xf32>
    %420 = vector.shape_cast %419 : vector<2x7xf32> to vector<2x1x7xf32>
    %421 = math.log %420 : vector<2x1x7xf32>
    %422 = arith.addf %415, %421 : vector<2x1x7xf32>
    %423 = vector.broadcast %397 : vector<1x1x7xf32> to vector<2x1x7xf32>
    %424 = arith.subf %423, %422 : vector<2x1x7xf32>
    %425 = vector.broadcast %424 : vector<2x1x7xf32> to vector<2x9x7xf32>
    %426 = arith.addf %385, %425 : vector<2x9x7xf32>
    %cst_257 = arith.constant dense<0xFF800000> : vector<2x9xf32>
    %427 = vector.multi_reduction <maximumf>, %426, %cst_257 [2] : vector<2x9x7xf32> to vector<2x9xf32>
    %428 = vector.shape_cast %427 : vector<2x9xf32> to vector<2x9x1xf32>
    %429 = vector.broadcast %428 : vector<2x9x1xf32> to vector<2x9x7xf32>
    %430 = arith.subf %426, %429 : vector<2x9x7xf32>
    %431 = math.exp %430 : vector<2x9x7xf32>
    %cst_258 = arith.constant dense<0.000000e+00> : vector<2x9xf32>
    %432 = vector.multi_reduction <add>, %431, %cst_258 [2] : vector<2x9x7xf32> to vector<2x9xf32>
    %433 = vector.shape_cast %432 : vector<2x9xf32> to vector<2x9x1xf32>
    %434 = math.log %433 : vector<2x9x1xf32>
    %435 = arith.addf %428, %434 : vector<2x9x1xf32>
    %436 = vector.broadcast %392 : vector<1x9x1xf32> to vector<2x9x1xf32>
    %437 = arith.subf %436, %435 : vector<2x9x1xf32>
    %438 = vector.broadcast %437 : vector<2x9x1xf32> to vector<2x9x7xf32>
    %439 = arith.addf %385, %438 : vector<2x9x7xf32>
    %cst_259 = arith.constant dense<0xFF800000> : vector<2x7xf32>
    %440 = vector.multi_reduction <maximumf>, %439, %cst_259 [1] : vector<2x9x7xf32> to vector<2x7xf32>
    %441 = vector.shape_cast %440 : vector<2x7xf32> to vector<2x1x7xf32>
    %442 = vector.broadcast %441 : vector<2x1x7xf32> to vector<2x9x7xf32>
    %443 = arith.subf %439, %442 : vector<2x9x7xf32>
    %444 = math.exp %443 : vector<2x9x7xf32>
    %cst_260 = arith.constant dense<0.000000e+00> : vector<2x7xf32>
    %445 = vector.multi_reduction <add>, %444, %cst_260 [1] : vector<2x9x7xf32> to vector<2x7xf32>
    %446 = vector.shape_cast %445 : vector<2x7xf32> to vector<2x1x7xf32>
    %447 = math.log %446 : vector<2x1x7xf32>
    %448 = arith.addf %441, %447 : vector<2x1x7xf32>
    %449 = vector.broadcast %397 : vector<1x1x7xf32> to vector<2x1x7xf32>
    %450 = arith.subf %449, %448 : vector<2x1x7xf32>
    %451 = vector.broadcast %450 : vector<2x1x7xf32> to vector<2x9x7xf32>
    %452 = arith.addf %385, %451 : vector<2x9x7xf32>
    %cst_261 = arith.constant dense<0xFF800000> : vector<2x9xf32>
    %453 = vector.multi_reduction <maximumf>, %452, %cst_261 [2] : vector<2x9x7xf32> to vector<2x9xf32>
    %454 = vector.shape_cast %453 : vector<2x9xf32> to vector<2x9x1xf32>
    %455 = vector.broadcast %454 : vector<2x9x1xf32> to vector<2x9x7xf32>
    %456 = arith.subf %452, %455 : vector<2x9x7xf32>
    %457 = math.exp %456 : vector<2x9x7xf32>
    %cst_262 = arith.constant dense<0.000000e+00> : vector<2x9xf32>
    %458 = vector.multi_reduction <add>, %457, %cst_262 [2] : vector<2x9x7xf32> to vector<2x9xf32>
    %459 = vector.shape_cast %458 : vector<2x9xf32> to vector<2x9x1xf32>
    %460 = math.log %459 : vector<2x9x1xf32>
    %461 = arith.addf %454, %460 : vector<2x9x1xf32>
    %462 = vector.broadcast %392 : vector<1x9x1xf32> to vector<2x9x1xf32>
    %463 = arith.subf %462, %461 : vector<2x9x1xf32>
    %464 = vector.broadcast %463 : vector<2x9x1xf32> to vector<2x9x7xf32>
    %465 = arith.addf %385, %464 : vector<2x9x7xf32>
    %cst_263 = arith.constant dense<0xFF800000> : vector<2x7xf32>
    %466 = vector.multi_reduction <maximumf>, %465, %cst_263 [1] : vector<2x9x7xf32> to vector<2x7xf32>
    %467 = vector.shape_cast %466 : vector<2x7xf32> to vector<2x1x7xf32>
    %468 = vector.broadcast %467 : vector<2x1x7xf32> to vector<2x9x7xf32>
    %469 = arith.subf %465, %468 : vector<2x9x7xf32>
    %470 = math.exp %469 : vector<2x9x7xf32>
    %cst_264 = arith.constant dense<0.000000e+00> : vector<2x7xf32>
    %471 = vector.multi_reduction <add>, %470, %cst_264 [1] : vector<2x9x7xf32> to vector<2x7xf32>
    %472 = vector.shape_cast %471 : vector<2x7xf32> to vector<2x1x7xf32>
    %473 = math.log %472 : vector<2x1x7xf32>
    %474 = arith.addf %467, %473 : vector<2x1x7xf32>
    %475 = vector.broadcast %397 : vector<1x1x7xf32> to vector<2x1x7xf32>
    %476 = arith.subf %475, %474 : vector<2x1x7xf32>
    %477 = vector.broadcast %476 : vector<2x1x7xf32> to vector<2x9x7xf32>
    %478 = arith.addf %385, %477 : vector<2x9x7xf32>
    %cst_265 = arith.constant dense<0xFF800000> : vector<2x9xf32>
    %479 = vector.multi_reduction <maximumf>, %478, %cst_265 [2] : vector<2x9x7xf32> to vector<2x9xf32>
    %480 = vector.shape_cast %479 : vector<2x9xf32> to vector<2x9x1xf32>
    %481 = vector.broadcast %480 : vector<2x9x1xf32> to vector<2x9x7xf32>
    %482 = arith.subf %478, %481 : vector<2x9x7xf32>
    %483 = math.exp %482 : vector<2x9x7xf32>
    %cst_266 = arith.constant dense<0.000000e+00> : vector<2x9xf32>
    %484 = vector.multi_reduction <add>, %483, %cst_266 [2] : vector<2x9x7xf32> to vector<2x9xf32>
    %485 = vector.shape_cast %484 : vector<2x9xf32> to vector<2x9x1xf32>
    %486 = math.log %485 : vector<2x9x1xf32>
    %487 = arith.addf %480, %486 : vector<2x9x1xf32>
    %488 = vector.broadcast %392 : vector<1x9x1xf32> to vector<2x9x1xf32>
    %489 = arith.subf %488, %487 : vector<2x9x1xf32>
    %490 = vector.broadcast %489 : vector<2x9x1xf32> to vector<2x9x7xf32>
    %491 = arith.addf %385, %490 : vector<2x9x7xf32>
    %cst_267 = arith.constant dense<0xFF800000> : vector<2x7xf32>
    %492 = vector.multi_reduction <maximumf>, %491, %cst_267 [1] : vector<2x9x7xf32> to vector<2x7xf32>
    %493 = vector.shape_cast %492 : vector<2x7xf32> to vector<2x1x7xf32>
    %494 = vector.broadcast %493 : vector<2x1x7xf32> to vector<2x9x7xf32>
    %495 = arith.subf %491, %494 : vector<2x9x7xf32>
    %496 = math.exp %495 : vector<2x9x7xf32>
    %cst_268 = arith.constant dense<0.000000e+00> : vector<2x7xf32>
    %497 = vector.multi_reduction <add>, %496, %cst_268 [1] : vector<2x9x7xf32> to vector<2x7xf32>
    %498 = vector.shape_cast %497 : vector<2x7xf32> to vector<2x1x7xf32>
    %499 = math.log %498 : vector<2x1x7xf32>
    %500 = arith.addf %493, %499 : vector<2x1x7xf32>
    %501 = vector.broadcast %397 : vector<1x1x7xf32> to vector<2x1x7xf32>
    %502 = arith.subf %501, %500 : vector<2x1x7xf32>
    %503 = vector.broadcast %502 : vector<2x1x7xf32> to vector<2x9x7xf32>
    %504 = arith.addf %385, %503 : vector<2x9x7xf32>
    %cst_269 = arith.constant dense<0xFF800000> : vector<2x9xf32>
    %505 = vector.multi_reduction <maximumf>, %504, %cst_269 [2] : vector<2x9x7xf32> to vector<2x9xf32>
    %506 = vector.shape_cast %505 : vector<2x9xf32> to vector<2x9x1xf32>
    %507 = vector.broadcast %506 : vector<2x9x1xf32> to vector<2x9x7xf32>
    %508 = arith.subf %504, %507 : vector<2x9x7xf32>
    %509 = math.exp %508 : vector<2x9x7xf32>
    %cst_270 = arith.constant dense<0.000000e+00> : vector<2x9xf32>
    %510 = vector.multi_reduction <add>, %509, %cst_270 [2] : vector<2x9x7xf32> to vector<2x9xf32>
    %511 = vector.shape_cast %510 : vector<2x9xf32> to vector<2x9x1xf32>
    %512 = math.log %511 : vector<2x9x1xf32>
    %513 = arith.addf %506, %512 : vector<2x9x1xf32>
    %514 = vector.broadcast %392 : vector<1x9x1xf32> to vector<2x9x1xf32>
    %515 = arith.subf %514, %513 : vector<2x9x1xf32>
    %516 = vector.broadcast %515 : vector<2x9x1xf32> to vector<2x9x7xf32>
    %517 = arith.addf %385, %516 : vector<2x9x7xf32>
    %cst_271 = arith.constant dense<0xFF800000> : vector<2x7xf32>
    %518 = vector.multi_reduction <maximumf>, %517, %cst_271 [1] : vector<2x9x7xf32> to vector<2x7xf32>
    %519 = vector.shape_cast %518 : vector<2x7xf32> to vector<2x1x7xf32>
    %520 = vector.broadcast %519 : vector<2x1x7xf32> to vector<2x9x7xf32>
    %521 = arith.subf %517, %520 : vector<2x9x7xf32>
    %522 = math.exp %521 : vector<2x9x7xf32>
    %cst_272 = arith.constant dense<0.000000e+00> : vector<2x7xf32>
    %523 = vector.multi_reduction <add>, %522, %cst_272 [1] : vector<2x9x7xf32> to vector<2x7xf32>
    %524 = vector.shape_cast %523 : vector<2x7xf32> to vector<2x1x7xf32>
    %525 = math.log %524 : vector<2x1x7xf32>
    %526 = arith.addf %519, %525 : vector<2x1x7xf32>
    %527 = vector.broadcast %397 : vector<1x1x7xf32> to vector<2x1x7xf32>
    %528 = arith.subf %527, %526 : vector<2x1x7xf32>
    %529 = vector.broadcast %528 : vector<2x1x7xf32> to vector<2x9x7xf32>
    %530 = arith.addf %385, %529 : vector<2x9x7xf32>
    %cst_273 = arith.constant dense<0xFF800000> : vector<2x9xf32>
    %531 = vector.multi_reduction <maximumf>, %530, %cst_273 [2] : vector<2x9x7xf32> to vector<2x9xf32>
    %532 = vector.shape_cast %531 : vector<2x9xf32> to vector<2x9x1xf32>
    %533 = vector.broadcast %532 : vector<2x9x1xf32> to vector<2x9x7xf32>
    %534 = arith.subf %530, %533 : vector<2x9x7xf32>
    %535 = math.exp %534 : vector<2x9x7xf32>
    %cst_274 = arith.constant dense<0.000000e+00> : vector<2x9xf32>
    %536 = vector.multi_reduction <add>, %535, %cst_274 [2] : vector<2x9x7xf32> to vector<2x9xf32>
    %537 = vector.shape_cast %536 : vector<2x9xf32> to vector<2x9x1xf32>
    %538 = math.log %537 : vector<2x9x1xf32>
    %539 = arith.addf %532, %538 : vector<2x9x1xf32>
    %540 = vector.broadcast %392 : vector<1x9x1xf32> to vector<2x9x1xf32>
    %541 = arith.subf %540, %539 : vector<2x9x1xf32>
    %542 = vector.broadcast %541 : vector<2x9x1xf32> to vector<2x9x7xf32>
    %543 = arith.addf %385, %542 : vector<2x9x7xf32>
    %cst_275 = arith.constant dense<0xFF800000> : vector<2x7xf32>
    %544 = vector.multi_reduction <maximumf>, %543, %cst_275 [1] : vector<2x9x7xf32> to vector<2x7xf32>
    %545 = vector.shape_cast %544 : vector<2x7xf32> to vector<2x1x7xf32>
    %546 = vector.broadcast %545 : vector<2x1x7xf32> to vector<2x9x7xf32>
    %547 = arith.subf %543, %546 : vector<2x9x7xf32>
    %548 = math.exp %547 : vector<2x9x7xf32>
    %cst_276 = arith.constant dense<0.000000e+00> : vector<2x7xf32>
    %549 = vector.multi_reduction <add>, %548, %cst_276 [1] : vector<2x9x7xf32> to vector<2x7xf32>
    %550 = vector.shape_cast %549 : vector<2x7xf32> to vector<2x1x7xf32>
    %551 = math.log %550 : vector<2x1x7xf32>
    %552 = arith.addf %545, %551 : vector<2x1x7xf32>
    %553 = vector.broadcast %397 : vector<1x1x7xf32> to vector<2x1x7xf32>
    %554 = arith.subf %553, %552 : vector<2x1x7xf32>
    %555 = vector.broadcast %554 : vector<2x1x7xf32> to vector<2x9x7xf32>
    %556 = arith.addf %385, %555 : vector<2x9x7xf32>
    %cst_277 = arith.constant dense<0xFF800000> : vector<2x9xf32>
    %557 = vector.multi_reduction <maximumf>, %556, %cst_277 [2] : vector<2x9x7xf32> to vector<2x9xf32>
    %558 = vector.shape_cast %557 : vector<2x9xf32> to vector<2x9x1xf32>
    %559 = vector.broadcast %558 : vector<2x9x1xf32> to vector<2x9x7xf32>
    %560 = arith.subf %556, %559 : vector<2x9x7xf32>
    %561 = math.exp %560 : vector<2x9x7xf32>
    %cst_278 = arith.constant dense<0.000000e+00> : vector<2x9xf32>
    %562 = vector.multi_reduction <add>, %561, %cst_278 [2] : vector<2x9x7xf32> to vector<2x9xf32>
    %563 = vector.shape_cast %562 : vector<2x9xf32> to vector<2x9x1xf32>
    %564 = math.log %563 : vector<2x9x1xf32>
    %565 = arith.addf %558, %564 : vector<2x9x1xf32>
    %566 = vector.broadcast %392 : vector<1x9x1xf32> to vector<2x9x1xf32>
    %567 = arith.subf %566, %565 : vector<2x9x1xf32>
    %568 = vector.broadcast %567 : vector<2x9x1xf32> to vector<2x9x7xf32>
    %569 = arith.addf %385, %568 : vector<2x9x7xf32>
    %cst_279 = arith.constant dense<0xFF800000> : vector<2x7xf32>
    %570 = vector.multi_reduction <maximumf>, %569, %cst_279 [1] : vector<2x9x7xf32> to vector<2x7xf32>
    %571 = vector.shape_cast %570 : vector<2x7xf32> to vector<2x1x7xf32>
    %572 = vector.broadcast %571 : vector<2x1x7xf32> to vector<2x9x7xf32>
    %573 = arith.subf %569, %572 : vector<2x9x7xf32>
    %574 = math.exp %573 : vector<2x9x7xf32>
    %cst_280 = arith.constant dense<0.000000e+00> : vector<2x7xf32>
    %575 = vector.multi_reduction <add>, %574, %cst_280 [1] : vector<2x9x7xf32> to vector<2x7xf32>
    %576 = vector.shape_cast %575 : vector<2x7xf32> to vector<2x1x7xf32>
    %577 = math.log %576 : vector<2x1x7xf32>
    %578 = arith.addf %571, %577 : vector<2x1x7xf32>
    %579 = vector.broadcast %397 : vector<1x1x7xf32> to vector<2x1x7xf32>
    %580 = arith.subf %579, %578 : vector<2x1x7xf32>
    %581 = vector.broadcast %580 : vector<2x1x7xf32> to vector<2x9x7xf32>
    %582 = arith.addf %385, %581 : vector<2x9x7xf32>
    %cst_281 = arith.constant dense<0xFF800000> : vector<2x9xf32>
    %583 = vector.multi_reduction <maximumf>, %582, %cst_281 [2] : vector<2x9x7xf32> to vector<2x9xf32>
    %584 = vector.shape_cast %583 : vector<2x9xf32> to vector<2x9x1xf32>
    %585 = vector.broadcast %584 : vector<2x9x1xf32> to vector<2x9x7xf32>
    %586 = arith.subf %582, %585 : vector<2x9x7xf32>
    %587 = math.exp %586 : vector<2x9x7xf32>
    %cst_282 = arith.constant dense<0.000000e+00> : vector<2x9xf32>
    %588 = vector.multi_reduction <add>, %587, %cst_282 [2] : vector<2x9x7xf32> to vector<2x9xf32>
    %589 = vector.shape_cast %588 : vector<2x9xf32> to vector<2x9x1xf32>
    %590 = math.log %589 : vector<2x9x1xf32>
    %591 = arith.addf %584, %590 : vector<2x9x1xf32>
    %592 = vector.broadcast %392 : vector<1x9x1xf32> to vector<2x9x1xf32>
    %593 = arith.subf %592, %591 : vector<2x9x1xf32>
    %594 = vector.broadcast %593 : vector<2x9x1xf32> to vector<2x9x7xf32>
    %595 = arith.addf %385, %594 : vector<2x9x7xf32>
    %cst_283 = arith.constant dense<0xFF800000> : vector<2x7xf32>
    %596 = vector.multi_reduction <maximumf>, %595, %cst_283 [1] : vector<2x9x7xf32> to vector<2x7xf32>
    %597 = vector.shape_cast %596 : vector<2x7xf32> to vector<2x1x7xf32>
    %598 = vector.broadcast %597 : vector<2x1x7xf32> to vector<2x9x7xf32>
    %599 = arith.subf %595, %598 : vector<2x9x7xf32>
    %600 = math.exp %599 : vector<2x9x7xf32>
    %cst_284 = arith.constant dense<0.000000e+00> : vector<2x7xf32>
    %601 = vector.multi_reduction <add>, %600, %cst_284 [1] : vector<2x9x7xf32> to vector<2x7xf32>
    %602 = vector.shape_cast %601 : vector<2x7xf32> to vector<2x1x7xf32>
    %603 = math.log %602 : vector<2x1x7xf32>
    %604 = arith.addf %597, %603 : vector<2x1x7xf32>
    %605 = vector.broadcast %397 : vector<1x1x7xf32> to vector<2x1x7xf32>
    %606 = arith.subf %605, %604 : vector<2x1x7xf32>
    %607 = vector.broadcast %606 : vector<2x1x7xf32> to vector<2x9x7xf32>
    %608 = arith.addf %385, %607 : vector<2x9x7xf32>
    %cst_285 = arith.constant dense<0xFF800000> : vector<2x9xf32>
    %609 = vector.multi_reduction <maximumf>, %608, %cst_285 [2] : vector<2x9x7xf32> to vector<2x9xf32>
    %610 = vector.shape_cast %609 : vector<2x9xf32> to vector<2x9x1xf32>
    %611 = vector.broadcast %610 : vector<2x9x1xf32> to vector<2x9x7xf32>
    %612 = arith.subf %608, %611 : vector<2x9x7xf32>
    %613 = math.exp %612 : vector<2x9x7xf32>
    %cst_286 = arith.constant dense<0.000000e+00> : vector<2x9xf32>
    %614 = vector.multi_reduction <add>, %613, %cst_286 [2] : vector<2x9x7xf32> to vector<2x9xf32>
    %615 = vector.shape_cast %614 : vector<2x9xf32> to vector<2x9x1xf32>
    %616 = math.log %615 : vector<2x9x1xf32>
    %617 = arith.addf %610, %616 : vector<2x9x1xf32>
    %618 = vector.broadcast %392 : vector<1x9x1xf32> to vector<2x9x1xf32>
    %619 = arith.subf %618, %617 : vector<2x9x1xf32>
    %620 = vector.broadcast %619 : vector<2x9x1xf32> to vector<2x9x7xf32>
    %621 = arith.addf %385, %620 : vector<2x9x7xf32>
    %cst_287 = arith.constant dense<0xFF800000> : vector<2x7xf32>
    %622 = vector.multi_reduction <maximumf>, %621, %cst_287 [1] : vector<2x9x7xf32> to vector<2x7xf32>
    %623 = vector.shape_cast %622 : vector<2x7xf32> to vector<2x1x7xf32>
    %624 = vector.broadcast %623 : vector<2x1x7xf32> to vector<2x9x7xf32>
    %625 = arith.subf %621, %624 : vector<2x9x7xf32>
    %626 = math.exp %625 : vector<2x9x7xf32>
    %cst_288 = arith.constant dense<0.000000e+00> : vector<2x7xf32>
    %627 = vector.multi_reduction <add>, %626, %cst_288 [1] : vector<2x9x7xf32> to vector<2x7xf32>
    %628 = vector.shape_cast %627 : vector<2x7xf32> to vector<2x1x7xf32>
    %629 = math.log %628 : vector<2x1x7xf32>
    %630 = arith.addf %623, %629 : vector<2x1x7xf32>
    %631 = vector.broadcast %397 : vector<1x1x7xf32> to vector<2x1x7xf32>
    %632 = arith.subf %631, %630 : vector<2x1x7xf32>
    %633 = vector.broadcast %632 : vector<2x1x7xf32> to vector<2x9x7xf32>
    %634 = arith.addf %385, %633 : vector<2x9x7xf32>
    %cst_289 = arith.constant dense<0xFF800000> : vector<2x9xf32>
    %635 = vector.multi_reduction <maximumf>, %634, %cst_289 [2] : vector<2x9x7xf32> to vector<2x9xf32>
    %636 = vector.shape_cast %635 : vector<2x9xf32> to vector<2x9x1xf32>
    %637 = vector.broadcast %636 : vector<2x9x1xf32> to vector<2x9x7xf32>
    %638 = arith.subf %634, %637 : vector<2x9x7xf32>
    %639 = math.exp %638 : vector<2x9x7xf32>
    %cst_290 = arith.constant dense<0.000000e+00> : vector<2x9xf32>
    %640 = vector.multi_reduction <add>, %639, %cst_290 [2] : vector<2x9x7xf32> to vector<2x9xf32>
    %641 = vector.shape_cast %640 : vector<2x9xf32> to vector<2x9x1xf32>
    %642 = math.log %641 : vector<2x9x1xf32>
    %643 = arith.addf %636, %642 : vector<2x9x1xf32>
    %644 = vector.broadcast %392 : vector<1x9x1xf32> to vector<2x9x1xf32>
    %645 = arith.subf %644, %643 : vector<2x9x1xf32>
    %646 = vector.broadcast %645 : vector<2x9x1xf32> to vector<2x9x7xf32>
    %647 = arith.addf %385, %646 : vector<2x9x7xf32>
    %cst_291 = arith.constant dense<0xFF800000> : vector<2x7xf32>
    %648 = vector.multi_reduction <maximumf>, %647, %cst_291 [1] : vector<2x9x7xf32> to vector<2x7xf32>
    %649 = vector.shape_cast %648 : vector<2x7xf32> to vector<2x1x7xf32>
    %650 = vector.broadcast %649 : vector<2x1x7xf32> to vector<2x9x7xf32>
    %651 = arith.subf %647, %650 : vector<2x9x7xf32>
    %652 = math.exp %651 : vector<2x9x7xf32>
    %cst_292 = arith.constant dense<0.000000e+00> : vector<2x7xf32>
    %653 = vector.multi_reduction <add>, %652, %cst_292 [1] : vector<2x9x7xf32> to vector<2x7xf32>
    %654 = vector.shape_cast %653 : vector<2x7xf32> to vector<2x1x7xf32>
    %655 = math.log %654 : vector<2x1x7xf32>
    %656 = arith.addf %649, %655 : vector<2x1x7xf32>
    %657 = vector.broadcast %397 : vector<1x1x7xf32> to vector<2x1x7xf32>
    %658 = arith.subf %657, %656 : vector<2x1x7xf32>
    %659 = vector.broadcast %645 : vector<2x9x1xf32> to vector<2x9x7xf32>
    %660 = arith.addf %385, %659 : vector<2x9x7xf32>
    %661 = vector.broadcast %658 : vector<2x1x7xf32> to vector<2x9x7xf32>
    %662 = arith.addf %660, %661 : vector<2x9x7xf32>
    %cst_293 = arith.constant -2.6390574 : f32
    %663 = vector.broadcast %cst_293 : f32 to vector<2x9x7xf32>
    %664 = arith.subf %662, %663 : vector<2x9x7xf32>
    %c0_294 = arith.constant 0 : index
    %c0_295 = arith.constant 0 : index
    %c0_296 = arith.constant 0 : index
    %665 = vector.load %arg25[%c0_294, %c0_295, %c0_296] : memref<2x9x7xf32, #tpu.memory_space<vmem>>, vector<2x9x7xf32>
    tpu.vector_store %arg25[%c0_294, %c0_295, %c0_296], %664 {strides = array<i32>} : memref<2x9x7xf32, #tpu.memory_space<vmem>>, vector<2x9x7xf32>,
    %666 = vector.extract_strided_slice %664 {offsets = [0, 0, 0], sizes = [2, 8, 6], strides = [1, 1, 1]} : vector<2x9x7xf32> to vector<2x8x6xf32>
    %667 = tpu.iota {dimensions = array<i32: 1>} : vector<2x8x6xi32>
    %668 = arith.sitofp %667 : vector<2x8x6xi32> to vector<2x8x6xf32>
    %669 = tpu.iota {dimensions = array<i32: 2>} : vector<2x8x6xi32>
    %670 = arith.sitofp %669 : vector<2x8x6xi32> to vector<2x8x6xf32>
    %cst_297 = arith.constant dense<0xFF800000> : vector<2x8xf32>
    %671 = vector.multi_reduction <maximumf>, %666, %cst_297 [2] : vector<2x8x6xf32> to vector<2x8xf32>
    %672 = vector.shape_cast %671 : vector<2x8xf32> to vector<2x8x1xf32>
    %cst_298 = arith.constant dense<0xFF800000> : vector<2x6xf32>
    %673 = vector.multi_reduction <maximumf>, %666, %cst_298 [1] : vector<2x8x6xf32> to vector<2x6xf32>
    %674 = vector.shape_cast %673 : vector<2x6xf32> to vector<2x1x6xf32>
    %675 = vector.broadcast %672 : vector<2x8x1xf32> to vector<2x8x6xf32>
    %676 = arith.cmpf oeq, %666, %675 : vector<2x8x6xf32>
    %cst_299 = arith.constant 6.000000e+00 : f32
    %677 = vector.broadcast %cst_299 : f32 to vector<2x8x6xf32>
    %678 = arith.select %676, %670, %677 : vector<2x8x6xi1>, vector<2x8x6xf32>
    %cst_300 = arith.constant dense<0x7F800000> : vector<2x8xf32>
    %679 = vector.multi_reduction <minimumf>, %678, %cst_300 [2] : vector<2x8x6xf32> to vector<2x8xf32>
    %680 = vector.shape_cast %679 : vector<2x8xf32> to vector<2x8x1xf32>
    %681 = vector.broadcast %674 : vector<2x1x6xf32> to vector<2x8x6xf32>
    %682 = arith.cmpf oeq, %666, %681 : vector<2x8x6xf32>
    %cst_301 = arith.constant 8.000000e+00 : f32
    %683 = vector.broadcast %cst_301 : f32 to vector<2x8x6xf32>
    %684 = arith.select %682, %668, %683 : vector<2x8x6xi1>, vector<2x8x6xf32>
    %cst_302 = arith.constant dense<0x7F800000> : vector<2x6xf32>
    %685 = vector.multi_reduction <minimumf>, %684, %cst_302 [1] : vector<2x8x6xf32> to vector<2x6xf32>
    %686 = vector.shape_cast %685 : vector<2x6xf32> to vector<2x1x6xf32>
    %687 = vector.broadcast %680 : vector<2x8x1xf32> to vector<2x8x6xf32>
    %688 = arith.cmpf oeq, %670, %687 : vector<2x8x6xf32>
    %689 = vector.broadcast %686 : vector<2x1x6xf32> to vector<2x8x6xf32>
    %690 = arith.cmpf oeq, %668, %689 : vector<2x8x6xf32>
    %691 = arith.andi %688, %690 : vector<2x8x6xi1>
    %cst_303 = arith.constant 1.000000e+00 : f32
    %cst_304 = arith.constant 0.000000e+00 : f32
    %692 = vector.broadcast %cst_303 : f32 to vector<2x8x6xf32>
    %693 = vector.broadcast %cst_304 : f32 to vector<2x8x6xf32>
    %694 = arith.select %691, %692, %693 : vector<2x8x6xi1>, vector<2x8x6xf32>
    %cst_305 = arith.constant dense<0xFF800000> : vector<2x8xf32>
    %695 = vector.multi_reduction <maximumf>, %694, %cst_305 [2] : vector<2x8x6xf32> to vector<2x8xf32>
    %696 = vector.shape_cast %695 : vector<2x8xf32> to vector<2x8x1xf32>
    %cst_306 = arith.constant 5.000000e-01 : f32
    %697 = vector.broadcast %cst_306 : f32 to vector<2x8x1xf32>
    %698 = arith.cmpf ogt, %696, %697 : vector<2x8x1xf32>
    %cst_307 = arith.constant dense<0xFF800000> : vector<2x6xf32>
    %699 = vector.multi_reduction <maximumf>, %694, %cst_307 [1] : vector<2x8x6xf32> to vector<2x6xf32>
    %700 = vector.shape_cast %699 : vector<2x6xf32> to vector<2x1x6xf32>
    %cst_308 = arith.constant 5.000000e-01 : f32
    %701 = vector.broadcast %cst_308 : f32 to vector<2x1x6xf32>
    %702 = arith.cmpf ogt, %700, %701 : vector<2x1x6xf32>
    %703 = math.exp %672 : vector<2x8x1xf32>
    %cst_309 = arith.constant 0.000000e+00 : f32
    %704 = vector.broadcast %cst_309 : f32 to vector<2x8x1xf32>
    %705 = arith.select %698, %703, %704 : vector<2x8x1xi1>, vector<2x8x1xf32>
    %cst_310 = arith.constant 2.000000e-01 : f32
    %706 = vector.broadcast %cst_310 : f32 to vector<2x8x1xf32>
    %707 = arith.cmpf ogt, %705, %706 : vector<2x8x1xf32>
    %708 = arith.andi %698, %707 : vector<2x8x1xi1>
    %cst_311 = arith.constant 0.000000e+00 : f32
    %709 = vector.shape_cast %705 : vector<2x8x1xf32> to vector<2x8x1xf32>
    %710 = vector.broadcast %709 : vector<2x8x1xf32> to vector<2x8x6xf32>
    %711 = vector.broadcast %cst_311 : f32 to vector<2x8x6xf32>
    %712 = arith.select %690, %710, %711 : vector<2x8x6xi1>, vector<2x8x6xf32>
    %cst_312 = arith.constant dense<0.000000e+00> : vector<2x6xf32>
    %713 = vector.multi_reduction <add>, %712, %cst_312 [1] : vector<2x8x6xf32> to vector<2x6xf32>
    %714 = vector.shape_cast %713 : vector<2x6xf32> to vector<2x1x6xf32>
    %715 = vector.broadcast %708 : vector<2x8x1xi1> to vector<2x8x6xi1>
    %716 = arith.andi %690, %715 : vector<2x8x6xi1>
    %cst_313 = arith.constant 1.000000e+00 : f32
    %cst_314 = arith.constant 0.000000e+00 : f32
    %717 = vector.broadcast %cst_313 : f32 to vector<2x8x6xf32>
    %718 = vector.broadcast %cst_314 : f32 to vector<2x8x6xf32>
    %719 = arith.select %716, %717, %718 : vector<2x8x6xi1>, vector<2x8x6xf32>
    %cst_315 = arith.constant dense<0xFF800000> : vector<2x6xf32>
    %720 = vector.multi_reduction <maximumf>, %719, %cst_315 [1] : vector<2x8x6xf32> to vector<2x6xf32>
    %721 = vector.shape_cast %720 : vector<2x6xf32> to vector<2x1x6xf32>
    %cst_316 = arith.constant 5.000000e-01 : f32
    %722 = vector.broadcast %cst_316 : f32 to vector<2x1x6xf32>
    %723 = arith.cmpf ogt, %721, %722 : vector<2x1x6xf32>
    %cst_317 = arith.constant 0.000000e+00 : f32
    %724 = vector.broadcast %cst_317 : f32 to vector<2x1x6xf32>
    %725 = arith.select %702, %714, %724 : vector<2x1x6xi1>, vector<2x1x6xf32>
    %726 = arith.andi %702, %723 : vector<2x1x6xi1>
    %cst_318 = arith.constant -1.000000e+00 : f32
    %727 = vector.broadcast %cst_318 : f32 to vector<2x8x1xf32>
    %728 = arith.select %708, %680, %727 : vector<2x8x1xi1>, vector<2x8x1xf32>
    %729 = arith.fptosi %728 : vector<2x8x1xf32> to vector<2x8x1xi32>
    %c0_319 = arith.constant 0 : index
    %c0_320 = arith.constant 0 : index
    %c0_321 = arith.constant 0 : index
    %730 = vector.load %arg27[%c0_319, %c0_320, %c0_321] : memref<2x8x1xi32, #tpu.memory_space<vmem>>, vector<2x8x1xi32>
    tpu.vector_store %arg27[%c0_319, %c0_320, %c0_321], %729 {strides = array<i32>} : memref<2x8x1xi32, #tpu.memory_space<vmem>>, vector<2x8x1xi32>,
    %cst_322 = arith.constant -1.000000e+00 : f32
    %731 = vector.broadcast %cst_322 : f32 to vector<2x1x6xf32>
    %732 = arith.select %726, %686, %731 : vector<2x1x6xi1>, vector<2x1x6xf32>
    %733 = arith.fptosi %732 : vector<2x1x6xf32> to vector<2x1x6xi32>
    %c0_323 = arith.constant 0 : index
    %c0_324 = arith.constant 0 : index
    %c0_325 = arith.constant 0 : index
    %734 = vector.load %arg28[%c0_323, %c0_324, %c0_325] : memref<2x1x6xi32, #tpu.memory_space<vmem>>, vector<2x1x6xi32>
    tpu.vector_store %arg28[%c0_323, %c0_324, %c0_325], %733 {strides = array<i32>} : memref<2x1x6xi32, #tpu.memory_space<vmem>>, vector<2x1x6xi32>,
    %c0_326 = arith.constant 0 : index
    %c0_327 = arith.constant 0 : index
    %c0_328 = arith.constant 0 : index
    %735 = vector.load %arg29[%c0_326, %c0_327, %c0_328] : memref<2x8x1xf32, #tpu.memory_space<vmem>>, vector<2x8x1xf32>
    tpu.vector_store %arg29[%c0_326, %c0_327, %c0_328], %705 {strides = array<i32>} : memref<2x8x1xf32, #tpu.memory_space<vmem>>, vector<2x8x1xf32>,
    %c0_329 = arith.constant 0 : index
    %c0_330 = arith.constant 0 : index
    %c0_331 = arith.constant 0 : index
    %736 = vector.load %arg30[%c0_329, %c0_330, %c0_331] : memref<2x1x6xf32, #tpu.memory_space<vmem>>, vector<2x1x6xf32>
    tpu.vector_store %arg30[%c0_329, %c0_330, %c0_331], %725 {strides = array<i32>} : memref<2x1x6xf32, #tpu.memory_space<vmem>>, vector<2x1x6xf32>,
    return
  }
}

</mosaic_0001>

<bundles_post_ra>
// kernel: superglue_match_forward.1
= control target key start
LH: loop header
LB: loop body
LE: loop exit
PB: predicated region body
PF: predicated region fallthrough
CT: control target
= control target key end

     0   :  { %s9118_s6 = smov 1   ;;  %s9119_s10 = smov 2   ;;  %s11294_s0 = inlined_call_operand.smem [shape: u32[31], index: -1, kind: input, shape index: {}] }
   0x1   :  { %s9164_s5 = sld [smem:[%s11294_s0]]   ;;  %s9120_s14 = smov 3  }
   0x2   :  { %s9169_s9 = sld [smem:[%s11294_s0 + %s9118_s6]]   ;;  %s9121_s18 = smov 4  }
   0x3   :  { %s9174_s13 = sld [smem:[%s11294_s0 + %s9119_s10]]   ;;  %s9122_s22 = smov 5  }
   0x4   :  { %s9179_s17 = sld [smem:[%s11294_s0 + %s9120_s14]]   ;;  %s9123_s26 = smov 6  }
   0x5   :  { %s9184_s21 = sld [smem:[%s11294_s0 + %s9121_s18]]   ;;  %s9124_s30 = smov 7  }
   0x6   :  { %s9189_s25 = sld [smem:[%s11294_s0 + %s9122_s22]]   ;;  %s9125_s4 = smov 8  }
   0x7   :  { %s9194_s29 = sld [smem:[%s11294_s0 + %s9123_s26]]   ;;  %s9126_s10 = smov 9  }
   0x8   :  { %s9199_s3 = sld [smem:[%s11294_s0 + %s9124_s30]]   ;;  %s9127_s15 = smov 10  }
   0x9   :  { %s9204_s8 = sld [smem:[%s11294_s0 + %s9125_s4]]   ;;  %s9128_s20 = smov 11  }
   0xa   :  { %s9209_s14 = sld [smem:[%s11294_s0 + %s9126_s10]]   ;;  %s9129_s26 = smov 12  }
   0xb   :  { %s9214_s19 = sld [smem:[%s11294_s0 + %s9127_s15]]   ;;  %s9130_s1 = smov 13  }
   0xc   :  { %s9219_s24 = sld [smem:[%s11294_s0 + %s9128_s20]]   ;;  %s9131_s7 = smov 14  }
   0xd   :  { %s9224_s30 = sld [smem:[%s11294_s0 + %s9129_s26]]   ;;  %s9132_s15 = smov 15  }
   0xe   :  { %s9229_s6 = sld [smem:[%s11294_s0 + %s9130_s1]]   ;;  %s9133_s22 = smov 16  }
   0xf   :  { %s9234_s12 = sld [smem:[%s11294_s0 + %s9131_s7]]   ;;  %s9134_s28 = smov 17  }
  0x10   :  { %s9239_s20 = sld [smem:[%s11294_s0 + %s9132_s15]]   ;;  %s9135_s7 = smov 18  }
  0x11   :  { %s9244_s27 = sld [smem:[%s11294_s0 + %s9133_s22]]   ;;  %s9136_s15 = smov 19  }
  0x12   :  { %s9249_s4 = sld [smem:[%s11294_s0 + %s9134_s28]]   ;;  %s9137_s22 = smov 20  }
  0x13   :  { %s9138_s28 = smov 21  }
  0x14   :  { %11385 = sst [smem:[#allocation9_spill]] %s9229_s6 }
  0x15   :  { %s9254_s6 = sld [smem:[%s11294_s0 + %s9135_s7]]   ;;  %s9139_s7 = smov 22  }
  0x16   :  { %11386 = sst [smem:[#allocation10_spill]] %s9239_s20 }
  0x17   :  { %11387 = sst [smem:[#allocation11_spill]] %s9244_s27 }
  0x18   :  { %11388 = sst [smem:[#allocation12_spill]] %s9249_s4 }
  0x19   :  { %s9259_s20 = sld [smem:[%s11294_s0 + %s9136_s15]]   ;;  %s9140_s15 = smov 23  }
  0x1a   :  { %s9264_s27 = sld [smem:[%s11294_s0 + %s9137_s22]]   ;;  %s9141_s22 = smov 24  }
  0x1b   :  { %11389 = sst [smem:[#allocation13_spill]] %s9254_s6 }
  0x1c   :  { %s9269_s4 = sld [smem:[%s11294_s0 + %s9138_s28]]   ;;  %s9142_s28 = smov 25  }
  0x1d   :  { %s9274_s6 = sld [smem:[%s11294_s0 + %s9139_s7]]   ;;  %s9143_s7 = smov 26  }
  0x1f   :  { %11390 = sst [smem:[#allocation14_spill]] %s9259_s20 }
  0x20   :  { %11391 = sst [smem:[#allocation15_spill]] %s9264_s27 }
  0x21   :  { %s9279_s20 = sld [smem:[%s11294_s0 + %s9140_s15]]   ;;  %s9144_s15 = smov 27  }
  0x22   :  { %11392 = sst [smem:[#allocation16_spill]] %s9269_s4 }
  0x23   :  { %11393 = sst [smem:[#allocation17_spill]] %s9274_s6 }
  0x24   :  { %s9284_s27 = sld [smem:[%s11294_s0 + %s9141_s22]]   ;;  %s9145_s22 = smov 28  }
  0x25   :  { %s9289_s4 = sld [smem:[%s11294_s0 + %s9142_s28]]   ;;  %s9146_s28 = smov 29  }
  0x26   :  { %s9294_s6 = sld [smem:[%s11294_s0 + %s9143_s7]]   ;;  %s9147_s7 = smov 30  }
  0x27   :  { %11394 = sst [smem:[#allocation18_spill]] %s9279_s20 }
  0x28   :  { %s9299_s20 = sld [smem:[%s11294_s0 + %s9144_s15]]  }
  0x2a   :  { %11395 = sst [smem:[#allocation19_spill]] %s9284_s27 }
  0x2b   :  { %11396 = sst [smem:[#allocation20_spill]] %s9289_s4 }
  0x2c   :  { %11397 = sst [smem:[#allocation21_spill]] %s9294_s6 }
  0x2d   :  { %s9304_s27 = sld [smem:[%s11294_s0 + %s9145_s22]]  }
  0x2e   :  { %s9309_s4 = sld [smem:[%s11294_s0 + %s9146_s28]]  }
  0x2f   :  { %s9314_s6 = sld [smem:[%s11294_s0 + %s9147_s7]]  }
  0x30   :  { %68 = vsyncpa [#allocation4], 0  ;;  %v242_v0 = vld [vmem:[%s9174_s13 + $0x8] sm:$0xff]  ;;  %v241_v1 = vld [vmem:[%s9174_s13] sm:$0xff]  ;;  %vm11304_vm0 = vcmask 130048  }
  0x31   :  { %v350_v2 = vld [vmem:[%s9184_s21 + $0x8] sm:$0xff]  ;;  %7740 = vmatprep.subr.mxu0 %v242_v0  ;;  %v239_v3 = vld [vmem:[%s9164_s5] sm:$0xff] }
  0x32   :  { %7747 = vmatprep.subr.mxu1 %v350_v2  ;;  %v349_v4 = vld [vmem:[%s9184_s21] sm:$0xff]  ;;  %7741 = vmatpush3.msra.mxu0 %v242_v0  ;;  %v240_v5 = vld [vmem:[%s9164_s5 + $0x8] sm:$0xff] }
  0x33   :  { %7744 = vmatprep.mubr.msk.f32.mxu0 %vm11304_vm0, %v239_v3 }
  0x34   :  { %69 = vsyncpa [#allocation6], 0  ;;  %7742 = vmatprep.subr.mxu0 %v241_v1  ;;  %7748 = vmatpush3.msra.mxu1 %v350_v2  ;;  %v347_v6 = vld [vmem:[%s9169_s9] sm:$0xff]  ;;  %v348_v7 = vld [vmem:[%s9169_s9 + $0x8] sm:$0xff]  ;;  %vm11305_vm1 = vcmask 261120   ;;  %v121_v43 = vlaneseq  ;;  %v11402_v0 = vmov 0 }
  0x35   :  { %7743 = vmatpush3.msra.mxu0 %v241_v1  ;;  %7749 = vmatprep.subr.mxu1 %v349_v4  ;;  %v6807_v8 = vld [vmem:[%s9179_s17] ss:$0 sm:$0xff]  ;;  %v456_v26 = vld [vmem:[%s9194_s29 + $0x18] sm:$0xff]  ;;  %v455_v28 = vld [vmem:[%s9194_s29 + $0x10] sm:$0xff]  ;;  %v11404_v3 = vmov 0  ;;  %s11494_s0 = sld [smem:[#allocation11_spill]] }
  0x36   :  { %7745 = vmatmul.mubr.msk.f32.vlgmr.msra.gmra.mxu0 %vm11304_vm0, %v240_v5  ;;  %7750 = vmatpush3.msra.mxu1 %v349_v4  ;;  %v6810_v10 = vld [vmem:[%s9189_s25] ss:$0 sm:$0xff]  ;;  %v564_v27 = vld [vmem:[%s9199_s3 + $0x18] sm:$0xff]  ;;  %v563_v29 = vld [vmem:[%s9199_s3 + $0x10] sm:$0xff]  ;;  %v9353_v46 = vshrl.u32 %v121_v43, 7  ;;  %v9361_v50 = vand.u32 127, %v121_v43 }
  0x37   :  { %7751 = vmatprep.mubr.msk.f32.mxu1 %vm11304_vm0, %v347_v6  ;;  %7754 = vmatprep.subr.mxu0 %v456_v26  ;;  %v454_v30 = vld [vmem:[%s9194_s29 + $0x8] sm:$0xff]  ;;  %v453_v32 = vld [vmem:[%s9194_s29] sm:$0xff]  ;;  %v660_v34 = vld [vmem:[%s9204_s8 + $0x18] sm:$0xff]  ;;  %v11332_v6 = vmov 1.0   ;;  %s11496_s5 = sld [smem:[#allocation9_spill]] }
  0x38   :  { %7752 = vmatmul.mubr.msk.f32.vlgmr.msra.gmra.mxu1 %vm11304_vm0, %v348_v7  ;;  %7768 = vmatprep.subr.mxu1 %v564_v27  ;;  %v562_v31 = vld [vmem:[%s9199_s3 + $0x8] sm:$0xff]  ;;  %v561_v33 = vld [vmem:[%s9199_s3] sm:$0xff]  ;;  %11398 = vst [vmem:[#allocation22_spill] sm:$0xff] %v9353_v46  ;;  %11400 = vst [vmem:[#allocation24_spill] sm:$0xff] %v9361_v50  ;;  %v189_v51 = vadd.s32 120, %v9353_v46  ;;  %v188_v55 = vadd.s32 112, %v9353_v46 }
  0x39   :  { %7755 = vmatpush3.msra.mxu0 %v456_v26  ;;  %7769 = vmatpush3.msra.mxu1 %v564_v27  ;;  %v659_v54 = vld [vmem:[%s9204_s8 + $0x10] sm:$0xff]  ;;  %v658_v57 = vld [vmem:[%s9204_s8 + $0x8] sm:$0xff]  ;;  %v9382_v59 = vshra.s32 %v9361_v50, 3  ;;  %v187_v60 = vadd.s32 104, %v9353_v46  ;;  %v657_v61 = vld [vmem:[%s9204_s8] sm:$0xff]  ;;  %v186_v63 = vadd.s32 96, %v9353_v46 }
  0x3a   :  { %7756 = vmatprep.subr.mxu0 %v455_v28  ;;  %7770 = vmatprep.subr.mxu1 %v563_v29  ;;  %v205_v58 = vshra.s32 %v189_v51, 5  ;;  %v204_v62 = vshra.s32 %v188_v55, 5  ;;  %v185_v2 = vadd.s32 88, %v9353_v46  ;;  %v184_v5 = vadd.s32 80, %v9353_v46  ;;  %s11502_s9 = sld [smem:[#allocation10_spill]] }
  0x3b   :  { %7757 = vmatpush3.msra.mxu0 %v455_v28  ;;  %7771 = vmatpush3.msra.mxu1 %v563_v29  ;;  %v203_v1 = vshra.s32 %v187_v60, 5  ;;  %v202_v4 = vshra.s32 %v186_v63, 5  ;;  %v9504_v27 = vadd.s32 24, %v9353_v46  ;;  %v11420_v28 = vmov 0  ;;  %s11503_s13 = sld [smem:[#allocation12_spill]] }
  0x3c   :  { %7758 = vmatprep.subr.mxu0 %v454_v30  ;;  %7772 = vmatprep.subr.mxu1 %v562_v31  ;;  %vm9394_vm2 = vcmp.eq.s32.totalorder %v205_v58, %v9382_v59  ;;  %vm9400_vm3 = vcmp.eq.s32.totalorder %v204_v62, %v9382_v59  ;;  %v10710_v7 = vld [vmem:[%s9219_s24 + $0x3] ss:$0 sm:$0xff]  ;;  %s11729_s17 = sld [smem:[#allocation15_spill]] }
  0x3d   :  { %7759 = vmatpush3.msra.mxu0 %v454_v30  ;;  %7773 = vmatpush3.msra.mxu1 %v562_v31  ;;  %v11403_v0 = vsel %vm9394_vm2, 4294967295, %v11402_v0  ;;  %v11405_v3 = vsel %vm9400_vm3, 4294967295, %v11404_v3  ;;  %vm9416_vm4 = vcmp.eq.s32.totalorder %v203_v1, %v9382_v59  ;;  %vm9428_vm5 = vcmp.eq.s32.totalorder %v202_v4, %v9382_v59  ;;  %v9618_v4 = vld [vmem:[%s9219_s24] ss:$0 sm:$0xff]  ;;  %s11737_s21 = sld [smem:[#allocation17_spill]] }
  0x3e   :  { %7760 = vmatprep.subr.mxu0 %v453_v32  ;;  %7774 = vmatprep.subr.mxu1 %v561_v33  ;;  %v9518_v30 = vadd.s32 16, %v9353_v46  ;;  %v11422_v31 = vmov 0  ;;  %s11743_s25 = sld [smem:[#allocation16_spill]] }
  0x3f   :  { %7761 = vmatpush3.msra.mxu0 %v453_v32  ;;  %7775 = vmatpush3.msra.mxu1 %v561_v33  ;;  %v193_v32 = vshra.s32 %v9504_v27, 5  ;;  %v9530_v33 = vadd.s32 8, %v9353_v46 }
  0x40   :  { %7782 = vmatprep.subr.mxu0 %v660_v34 }
  0x41   :  { %11424 = vst [vmem:[#allocation26_spill] sm:$0xff] %v9530_v33  ;;  %vm9551_vm14 = vcmp.eq.s32.totalorder %v193_v32, %v9382_v59 }
  0xf6   :  { %v7746_v9 = vpop.f32.mrf.mxu0 }
  0xf7   :  { %v9330_v11 = vadd.f32 %v7746_v9, %v6807_v8  ;;  %v183_v9 = vadd.s32 72, %v9353_v46 }
  0xf8   :  { %v323_v12 = vpop.f32.mrf.mxu0  ;;  %v7753_v13 = vpop.f32.mrf.mxu1 }
  0xf9   :  { %v324_v14 = vadd.f32 %v6807_v8, %v323_v12  ;;  %v9332_v15 = vadd.f32 %v7753_v13, %v6810_v10  ;;  %v333_v16 = vmul.f32 %v9330_v11, %v9330_v11  ;;  %v201_v8 = vshra.s32 %v185_v2, 5 }
  0xfa   :  { %v430_v17 = vpop.f32.mrf.mxu1  ;;  %v182_v12 = vadd.s32 64, %v9353_v46  ;;  %v11410_v13 = vmov 0 }
  0xfb   :  { %v431_v18 = vadd.f32 %v6810_v10, %v430_v17  ;;  %v338_v19 = vsel %vm11305_vm1, %v333_v16, 0.0  ;;  %v332_v20 = vmul.f32 %v324_v14, %v324_v14  ;;  %v440_v21 = vmul.f32 %v9332_v15, %v9332_v15 }
  0xfc   :  { %339 = vadd.xlane.f32.xlu1 %v338_v19  ;;  %v11408_v10 = vmov 0  ;;  %vm9442_vm6 = vcmp.eq.s32.totalorder %v201_v8, %v9382_v59  ;;  %v198_v16 = vshra.s32 %v182_v12, 5  ;;  %v11414_v17 = vmov 0 }
  0xfd   :  { %v335_v22 = vsel %vm11305_vm1, %v332_v20, 0.0  ;;  %v444_v23 = vsel %vm11305_vm1, %v440_v21, 0.0  ;;  %v439_v24 = vmul.f32 %v431_v18, %v431_v18  ;;  %v11409_v10 = vsel %vm9428_vm5, 4294967295, %v11408_v10 }
  0xfe   :  { %336 = vadd.xlane.f32.xlu0 %v335_v22  ;;  %v11411_v13 = vsel %vm9442_vm6, 4294967295, %v11410_v13  ;;  %vm9475_vm9 = vcmp.eq.s32.totalorder %v198_v16, %v9382_v59  ;;  %v181_v19 = vadd.s32 56, %v9353_v46  ;;  %v179_v20 = vadd.s32 40, %v9353_v46 }
  0xff   :  { %v441_v25 = vsel %vm11305_vm1, %v439_v24, 0.0  ;;  %v180_v22 = vadd.s32 48, %v9353_v46  ;;  %v11418_v24 = vmov 0 }
 0x100   :  { %445 = vadd.xlane.f32.xlu1 %v444_v23  ;;  %v197_v21 = vshra.s32 %v181_v19, 5  ;;  %v178_v23 = vadd.s32 32, %v9353_v46  ;;  %v195_v26 = vshra.s32 %v179_v20, 5 }
 0x102   :  { %442 = vadd.xlane.f32.xlu0 %v441_v25  ;;  %vm9496_vm10 = vcmp.eq.s32.totalorder %v197_v21, %v9382_v59  ;;  %v196_v25 = vshra.s32 %v180_v22, 5  ;;  %v194_v29 = vshra.s32 %v178_v23, 5  ;;  %vm9524_vm12 = vcmp.eq.s32.totalorder %v195_v26, %v9382_v59 }
 0x103   :  { %v11419_v24 = vsel %vm9496_vm10, 4294967295, %v11418_v24  ;;  %v11423_v31 = vsel %vm9524_vm12, 4294967295, %v11422_v31 }
 0x104   :  { %vm9510_vm11 = vcmp.eq.s32.totalorder %v196_v25, %v9382_v59  ;;  %vm9539_vm13 = vcmp.eq.s32.totalorder %v194_v29, %v9382_v59 }
 0x105   :  { %v11421_v28 = vsel %vm9510_vm11, 4294967295, %v11420_v28 }
 0x185   :  { %v340_v35 = vpop.xlane.xlu1 %339 }
 0x186   :  { %v342_v38 = vmax.f32 %v340_v35, 1e-24  ;;  %v192_v35 = vshra.s32 %v9518_v30, 5 }
 0x187   :  { %v337_v36 = vpop.xlane.xlu0 %336 }
 0x188   :  { %v341_v37 = vmax.f32 %v337_v36, 1e-24  ;;  %v11427_v36 = vmov 0  ;;  %vm9563_vm15 = vcmp.eq.s32.totalorder %v192_v35, %v9382_v59 }
 0x189   :  { %v446_v39 = vpop.xlane.xlu1 %445  ;;  %v11428_v36 = vsel %vm9551_vm14, 4294967295, %v11427_v36 }
 0x18a   :  { %8722 = vrsqrt.f32 %v341_v37  ;;  %v448_v41 = vmax.f32 %v446_v39, 1e-24  ;;  %v191_v37 = vshra.s32 %v9530_v33, 5  ;;  %v190_v39 = vshra.s32 %v9353_v46, 5 }
 0x18b   :  { %v443_v40 = vpop.xlane.xlu0 %442  ;;  %8724 = vrsqrt.f32 %v342_v38  ;;  %v11429_v38 = vmov 0 }
 0x18c   :  { %v447_v42 = vmax.f32 %v443_v40, 1e-24  ;;  %v11430_v38 = vsel %vm9563_vm15, 4294967295, %v11429_v38  ;;  %vm9575_vm0 = vcmp.eq.s32.totalorder %v191_v37, %v9382_v59  ;;  %v11431_v40 = vmov 0 }
 0x18d   :  { %v11432_v40 = vsel %vm9575_vm0, 4294967295, %v11431_v40 }
 0x18e   :  { %8726 = vrsqrt.f32 %v447_v42  ;;  %v6813_v42 = vld [vmem:[%s9209_s14] ss:$0 sm:$0xff] }
 0x18f   :  { %8728 = vrsqrt.f32 %v448_v41  ;;  %v11433_v41 = vmov 0 }
 0x197   :  { %v8723_v44 = vpop.eup %8722 }
 0x198   :  { %v9351_v45 = vmul.f32 %v8723_v44, %v324_v14  ;;  %v8725_v47 = vpop.eup %8724  ;;  %v199_v14 = vshra.s32 %v183_v9, 5 }
 0x199   :  { %v9365_v53 = vmul.f32 %v8725_v47, %v9330_v11  ;;  %v200_v11 = vshra.s32 %v184_v5, 5 }
 0x19a   :  { %7762 = vmatprep.mubr.msk.f32.mxu0 %vm11305_vm1, %v9351_v45  ;;  %7776 = vmatprep.mubr.msk.f32.mxu1 %vm11305_vm1, %v9351_v45  ;;  %vm9464_vm8 = vcmp.eq.s32.totalorder %v199_v14, %v9382_v59 }
 0x19b   :  { %v8727_v48 = vpop.eup %8726  ;;  %vm9453_vm7 = vcmp.eq.s32.totalorder %v200_v11, %v9382_v59  ;;  %v11415_v17 = vsel %vm9464_vm8, 4294967295, %v11414_v17 }
 0x19c   :  { %v9359_v49 = vmul.f32 %v8727_v48, %v431_v18  ;;  %v8729_v52 = vpop.eup %8728  ;;  %v11416_v18 = vmov 0 }
 0x19d   :  { %v9378_v56 = vmul.f32 %v8729_v52, %v9332_v15  ;;  %v11412_v15 = vmov 0  ;;  %v11417_v18 = vsel %vm9475_vm9, 4294967295, %v11416_v18 }
 0x19e   :  { %11399 = vst [vmem:[#allocation23_spill] sm:$0xff] %v9359_v49  ;;  %7763 = vmatmul.mubr.msk.f32.vlgmr.msra.gmra.mxu0 %vm11305_vm1, %v9359_v49  ;;  %7777 = vmatmul.mubr.msk.f32.vlgmr.msra.gmra.mxu1 %vm11305_vm1, %v9359_v49  ;;  %v11413_v15 = vsel %vm9453_vm7, 4294967295, %v11412_v15 }
 0x19f   :  { %7765 = vmatprep.mubr.msk.f32.mxu0 %vm11305_vm1, %v9365_v53  ;;  %7779 = vmatprep.mubr.msk.f32.mxu1 %vm11305_vm1, %v9365_v53  ;;  %11401 = vst [vmem:[#allocation25_spill] sm:$0xff] %v9378_v56 }
 0x1a0   :  { %7783 = vmatpush3.msra.mxu0 %v660_v34  ;;  %v11425_v34 = vmov 0 }
 0x1a1   :  { %7784 = vmatprep.subr.mxu0 %v659_v54  ;;  %v11426_v34 = vsel %vm9539_vm13, 4294967295, %v11425_v34 }
 0x1a2   :  { %7785 = vmatpush3.msra.mxu0 %v659_v54  ;;  %7780 = vmatmul.mubr.msk.f32.gmra.mxu1 %vm11305_vm1, %v9378_v56  ;;  %v6818_v54 = vld [vmem:[%s9214_s19] ss:$0 sm:$0xff] }
 0x1a3   :  { %7766 = vmatmul.mubr.msk.f32.gmra.mxu0 %vm11305_vm1, %v9378_v56  ;;  %7786 = vmatprep.subr.mxu0 %v658_v57 }
 0x1a4   :  { %7787 = vmatpush3.msra.mxu0 %v658_v57  ;;  %7790 = vmatprep.mubr.msk.f32.mxu0 %vm11305_vm1, %v9351_v45  ;;  %v11330_v57 = vmov 0.0  }
 0x1a5   :  { %7788 = vmatprep.subr.mxu0 %v657_v61  ;;  %v9603_v58 = vsel %vm9394_vm2, 1.0, %v11330_v57  ;;  %v9613_v63 = vsel %vm9400_vm3, 1.0, %v11330_v57  ;;  %v9636_v16 = vsel %vm9416_vm4, 1.0, %v11330_v57  ;;  %v9651_v26 = vsel %vm9428_vm5, 1.0, %v11330_v57 }
 0x1a6   :  { %7789 = vmatpush3.msra.mxu0 %v657_v61  ;;  %v9664_v35 = vsel %vm9442_vm6, 1.0, %v11330_v57 }
 0x1a7   :  { %7791 = vmatmul.mubr.msk.f32.vlgmr.msra.gmra.mxu0 %vm11305_vm1, %v9359_v49  ;;  %7834 = vmatprep.subr.msk.mxu0 %vm9394_vm2, %v11332_v6 }
 0x1a8   :  { %7793 = vmatprep.mubr.msk.f32.mxu0 %vm11305_vm1, %v9365_v53  ;;  %7835 = vmatpush3.msk.msra.mxu0 %vm9394_vm2, %v11332_v6 }
 0x1a9   :  { %7836 = vmatprep.subr.msk.mxu0 %vm9400_vm3, %v11332_v6 }
 0x1aa   :  { %7837 = vmatpush3.msk.msra.mxu0 %vm9400_vm3, %v11332_v6 }
 0x1ab   :  { %7794 = vmatmul.mubr.msk.f32.gmra.mxu0 %vm11305_vm1, %v9378_v56  ;;  %7838 = vmatprep.subr.msk.mxu0 %vm9416_vm4, %v11332_v6  ;;  %vm9586_vm1 = vcmp.eq.s32.totalorder %v190_v39, %v9382_v59  ;;  %v9673_v39 = vsel %vm9453_vm7, 1.0, %v11330_v57 }
 0x1ac   :  { %7839 = vmatpush3.msk.msra.mxu0 %vm9416_vm4, %v11332_v6  ;;  %v11434_v41 = vsel %vm9586_vm1, 4294967295, %v11433_v41 }
 0x1ad   :  { %7840 = vmatprep.subr.msk.mxu0 %vm9428_vm5, %v11332_v6 }
 0x1ae   :  { %7841 = vmatpush3.msk.msra.mxu0 %vm9428_vm5, %v11332_v6 }
 0x1af   :  { %7842 = vmatprep.subr.msk.mxu0 %vm9442_vm6, %v11332_v6 }
 0x1b0   :  { %7843 = vmatpush3.msk.msra.mxu0 %vm9442_vm6, %v11332_v6 }
 0x1b1   :  { %7844 = vmatprep.subr.msk.mxu0 %vm9453_vm7, %v11332_v6 }
 0x1b2   :  { %7845 = vmatpush3.msk.msra.mxu0 %vm9453_vm7, %v11332_v6 }
 0x1b3   :  { %7846 = vmatprep.subr.msk.mxu0 %vm9464_vm8, %v11332_v6 }
 0x1b4   :  { %7847 = vmatpush3.msk.msra.mxu0 %vm9464_vm8, %v11332_v6 }
 0x1b5   :  { %7848 = vmatprep.subr.msk.mxu0 %vm9475_vm9, %v11332_v6 }
 0x1b6   :  { %7849 = vmatpush3.msk.msra.mxu0 %vm9475_vm9, %v11332_v6 }
 0x1b7   :  { %7850 = vmatprep.subr.msk.mxu0 %vm9496_vm10, %v11332_v6 }
 0x1b8   :  { %7851 = vmatpush3.msk.msra.mxu0 %vm9496_vm10, %v11332_v6 }
 0x1b9   :  { %7852 = vmatprep.subr.msk.mxu0 %vm9510_vm11, %v11332_v6 }
 0x1ba   :  { %7853 = vmatpush3.msk.msra.mxu0 %vm9510_vm11, %v11332_v6 }
 0x1bb   :  { %7854 = vmatprep.subr.msk.mxu0 %vm9524_vm12, %v11332_v6 }
 0x1bc   :  { %7855 = vmatpush3.msk.msra.mxu0 %vm9524_vm12, %v11332_v6 }
 0x1bd   :  { %7856 = vmatprep.subr.msk.mxu0 %vm9539_vm13, %v11332_v6 }
 0x1be   :  { %7857 = vmatpush3.msk.msra.mxu0 %vm9539_vm13, %v11332_v6 }
 0x1bf   :  { %7858 = vmatprep.subr.msk.mxu0 %vm9551_vm14, %v11332_v6 }
 0x1c0   :  { %7859 = vmatpush3.msk.msra.mxu0 %vm9551_vm14, %v11332_v6 }
 0x1c1   :  { %7860 = vmatprep.subr.msk.mxu0 %vm9563_vm15, %v11332_v6 }
 0x1c2   :  { %7861 = vmatpush3.msk.msra.mxu0 %vm9563_vm15, %v11332_v6 }
 0x1c3   :  { %7862 = vmatprep.subr.msk.mxu0 %vm9575_vm0, %v11332_v6 }
 0x1c4   :  { %7863 = vmatpush3.msk.msra.mxu0 %vm9575_vm0, %v11332_v6 }
 0x1c5   :  { %7864 = vmatprep.subr.msk.mxu0 %vm9586_vm1, %v11332_v6 }
 0x1c6   :  { %7865 = vmatpush3.msk.msra.mxu0 %vm9586_vm1, %v11332_v6  ;;  %vm11435_vm1 = vcmask 261120  }
 0x1c7   :  { %vm11436_vm3 = vmmov %vm11435_vm1 }
 0x1c8   :  { %vm11437_vm2 = vmmov %vm11435_vm1 }
 0x1c9   :  { %vm11441_vm5 = vmmov %vm11435_vm1 }
 0x25e   :  { %v7764_v43 = vpop.f32.mrf.mxu0  ;;  %v7778_v44 = vpop.f32.mrf.mxu1 }
 0x25f   :  { %v9597_v47 = vadd.f32 %v7764_v43, %v6813_v42  ;;  %v9624_v9 = vadd.f32 %v7778_v44, %v6818_v54  ;;  %v9682_v43 = vsel %vm9464_vm8, 1.0, %v11330_v57 }
 0x260   :  { %v542_v48 = vpop.f32.mrf.mxu0  ;;  %v638_v51 = vpop.f32.mrf.mxu1 }
 0x261   :  { %v543_v52 = vadd.f32 %v6813_v42, %v542_v48  ;;  %v639_v21 = vadd.f32 %v6818_v54, %v638_v51  ;;  %v766_v23 = vmul.f32 %v9624_v9, %v9636_v16  ;;  %v762_v44 = vmul.f32 %v9624_v9, %v9682_v43 }
 0x262   :  { %v7781_v55 = vpop.f32.mrf.mxu1  ;;  %v9691_v48 = vsel %vm9475_vm9, 1.0, %v11330_v57 }
 0x263   :  { %v7767_v59 = vpop.f32.mrf.mxu0  ;;  %v9605_v60 = vadd.f32 %v7781_v55, %v6818_v54  ;;  %7828 = vmatprep.mubr.msk.f32.mxu1 %vm11435_vm1, %v543_v52  ;;  %v765_v32 = vmul.f32 %v639_v21, %v9651_v26  ;;  %v761_v51 = vmul.f32 %v639_v21, %v9691_v48  ;;  %v9699_v52 = vsel %vm9496_vm10, 1.0, %v11330_v57 }
 0x264   :  { %v9608_v61 = vadd.f32 %v7767_v59, %v6813_v42  ;;  %v648_v62 = vpop.f32.mrf.mxu1  ;;  %v9708_v55 = vsel %vm9510_vm11, 1.0, %v11330_v57 }
 0x265   :  { %v552_v1 = vpop.f32.mrf.mxu0  ;;  %v9615_v2 = vadd.f32 %v6818_v54, %v648_v62  ;;  %v768_v5 = vmul.f32 %v9605_v60, %v9603_v58  ;;  %v764_v37 = vmul.f32 %v9605_v60, %v9664_v35  ;;  %v760_v54 = vmul.f32 %v9605_v60, %v9699_v52 }
 0x266   :  { %v9622_v8 = vadd.f32 %v6813_v42, %v552_v1  ;;  %v9717_v62 = vsel %vm9524_vm12, 1.0, %v11330_v57 }
 0x267   :  { %v7792_v11 = vpop.f32.mrf.mxu0  ;;  %7796 = vmatprep.subr.msk.mxu1 %vm11435_vm1, %v768_v5  ;;  %v767_v12 = vmul.f32 %v9615_v2, %v9613_v63  ;;  %v763_v42 = vmul.f32 %v9615_v2, %v9673_v39  ;;  %v759_v59 = vmul.f32 %v9615_v2, %v9708_v55  ;;  %v758_v1 = vmul.f32 %v9624_v9, %v9717_v62 }
 0x268   :  { %v9630_v14 = vadd.f32 %v7792_v11, %v9618_v4  ;;  %7797 = vmatpush3.xpose.msk.msra.mxu1 %vm11436_vm3, %v768_v5  ;;  %vm11438_vm3 = vmmov %vm11435_vm1  ;;  %v9726_v5 = vsel %vm9539_vm13, 1.0, %v11330_v57 }
 0x269   :  { %v734_v19 = vpop.f32.mrf.mxu0  ;;  %7798 = vmatprep.subr.msk.mxu1 %vm11437_vm2, %v767_v12  ;;  %vm11439_vm2 = vmmov %vm11435_vm1  ;;  %v757_v11 = vmul.f32 %v639_v21, %v9726_v5 }
 0x26a   :  { %v9640_v20 = vadd.f32 %v9618_v4, %v734_v19 }
 0x26b   :  { %v7795_v22 = vpop.f32.mrf.mxu0 }
 0x26c   :  { %v9645_v25 = vadd.f32 %v7795_v22, %v9618_v4  ;;  %7799 = vmatpush3.xpose.msk.msra.mxu1 %vm11438_vm3, %v767_v12  ;;  %vm11440_vm3 = vmmov %vm11435_vm1  ;;  %v9734_v12 = vsel %vm9551_vm14, 1.0, %v11330_v57  ;;  %v9743_v22 = vsel %vm9563_vm15, 1.0, %v11330_v57 }
 0x26d   :  { %7800 = vmatprep.subr.msk.mxu1 %vm11435_vm1, %v766_v23  ;;  %v756_v19 = vmul.f32 %v9605_v60, %v9734_v12  ;;  %vm11457_vm15 = vmmov %vm11435_vm1 }
 0x26e   :  { %v9656_v29 = vmul.f32 %v9645_v25, %v9603_v58 }
 0x270   :  { %7872 = vmatprep.subr.mxu0 %v9656_v29  ;;  %7801 = vmatpush3.xpose.msk.msra.mxu1 %vm11439_vm2, %v766_v23  ;;  %vm11442_vm2 = vmmov %vm11435_vm1  ;;  %v755_v23 = vmul.f32 %v9615_v2, %v9743_v22 }
 0x271   :  { %7802 = vmatprep.subr.msk.mxu1 %vm11440_vm3, %v765_v32  ;;  %vm11443_vm3 = vmmov %vm11435_vm1 }
 0x274   :  { %7803 = vmatpush3.xpose.msk.msra.mxu1 %vm11435_vm1, %v765_v32  ;;  %v9752_v32 = vsel %vm9575_vm0, 1.0, %v11330_v57  ;;  %vm11459_vm0 = vmmov %vm11435_vm1 }
 0x275   :  { %7804 = vmatprep.subr.msk.mxu1 %vm11441_vm5, %v764_v37  ;;  %vm11444_vm5 = vmmov %vm11435_vm1  ;;  %v754_v60 = vmul.f32 %v9624_v9, %v9752_v32  ;;  %v128_v9 = vand.u32 31, %v9361_v50 }
 0x276   :  { %vm11460_vm14 = vmmov %vm11459_vm0 }
 0x277   :  { %vm11463_vm13 = vmmov %vm11459_vm0 }
 0x278   :  { %7805 = vmatpush3.xpose.msk.msra.mxu1 %vm11442_vm2, %v764_v37  ;;  %vm11445_vm2 = vmmov %vm11435_vm1 }
 0x279   :  { %7806 = vmatprep.subr.msk.mxu1 %vm11443_vm3, %v763_v42  ;;  %vm11446_vm3 = vmmov %vm11435_vm1 }
 0x27c   :  { %7807 = vmatpush3.xpose.msk.msra.mxu1 %vm11435_vm1, %v763_v42  ;;  %v9775_v42 = vand.u32 15, %v128_v9 }
 0x27d   :  { %7808 = vmatprep.subr.msk.mxu1 %vm11444_vm5, %v762_v44  ;;  %vm11447_vm5 = vmmov %vm11435_vm1 }
 0x280   :  { %7809 = vmatpush3.xpose.msk.msra.mxu1 %vm11445_vm2, %v762_v44  ;;  %vm11448_vm2 = vmmov %vm11435_vm1  ;;  %v133_v44 = vshra.s32 %v128_v9, 4 }
 0x281   :  { %7810 = vmatprep.subr.msk.mxu1 %vm11446_vm3, %v761_v51  ;;  %vm11449_vm3 = vmmov %vm11435_vm1 }
 0x284   :  { %7811 = vmatpush3.xpose.msk.msra.mxu1 %vm11435_vm1, %v761_v51  ;;  %v129_v51 = vshra.s32 %v9353_v46, 4 }
 0x285   :  { %7812 = vmatprep.subr.msk.mxu1 %vm11447_vm5, %v760_v54  ;;  %vm11450_vm5 = vmmov %vm11435_vm1 }
 0x288   :  { %7813 = vmatpush3.xpose.msk.msra.mxu1 %vm11448_vm2, %v760_v54  ;;  %vm11451_vm2 = vmmov %vm11435_vm1  ;;  %v11464_v54 = vmov 0 }
 0x289   :  { %7814 = vmatprep.subr.msk.mxu1 %vm11449_vm3, %v759_v59  ;;  %vm11452_vm3 = vmmov %vm11435_vm1 }
 0x28c   :  { %7815 = vmatpush3.xpose.msk.msra.mxu1 %vm11435_vm1, %v759_v59  ;;  %v131_v59 = vshra.s32 %v9518_v30, 4  ;;  %v11477_v30 = vmov 0 }
 0x28d   :  { %7816 = vmatprep.subr.msk.mxu1 %vm11450_vm5, %v758_v1  ;;  %vm11453_vm5 = vmmov %vm11435_vm1 }
 0x28e   :  { %vm9815_vm11 = vcmp.eq.s32.totalorder %v131_v59, %v133_v44 }
 0x28f   :  { %v11478_v30 = vsel %vm9815_vm11, 4294967295, %v11477_v30 }
 0x290   :  { %7817 = vmatpush3.xpose.msk.msra.mxu1 %vm11451_vm2, %v758_v1  ;;  %vm11454_vm2 = vmmov %vm11435_vm1  ;;  %v11471_v1 = vmov 0  ;;  %11479 = vst [vmem:[#allocation30_spill] sm:$0xff] %v11478_v30 }
 0x291   :  { %7818 = vmatprep.subr.msk.mxu1 %vm11452_vm3, %v757_v11  ;;  %vm11455_vm3 = vmmov %vm11435_vm1 }
 0x294   :  { %7819 = vmatpush3.xpose.msk.msra.mxu1 %vm11435_vm1, %v757_v11 }
 0x295   :  { %7820 = vmatprep.subr.msk.mxu1 %vm11453_vm5, %v756_v19  ;;  %vm11456_vm5 = vnez %v11434_v41 }
 0x296   :  { %v9761_v37 = vsel %vm11456_vm5, 1.0, %v11330_v57 }
 0x297   :  { %v753_v2 = vmul.f32 %v639_v21, %v9761_v37  ;;  %v130_v21 = vshra.s32 %v9530_v33, 4 }
 0x298   :  { %7821 = vmatpush3.xpose.msk.msra.mxu1 %vm11454_vm2, %v756_v19  ;;  %vm11458_vm2 = vmmov %vm11435_vm1  ;;  %v11480_v19 = vmov 0 }
 0x299   :  { %7822 = vmatprep.subr.msk.mxu1 %vm11455_vm3, %v755_v23  ;;  %vm11461_vm3 = vmmov %vm11459_vm0 }
 0x29c   :  { %7823 = vmatpush3.xpose.msk.msra.mxu1 %vm11435_vm1, %v755_v23  ;;  %vm11462_vm1 = vmmov %vm11459_vm0 }
 0x29d   :  { %7824 = vmatprep.subr.msk.mxu1 %vm11457_vm15, %v754_v60 }
 0x2a0   :  { %7825 = vmatpush3.xpose.msk.msra.mxu1 %vm11458_vm2, %v754_v60  ;;  %vm11345_vm2 = vcmp.lt.s32.totalorder %v9775_v42, 14 }
 0x2a1   :  { %7826 = vmatprep.subr.msk.mxu1 %vm11459_vm0, %v753_v2  ;;  %vm11346_vm0 = vcmp.lt.s32.totalorder %v9775_v42, 8 }
 0x2a2   :  { %vm9786_vm15 = vmneg %vm11346_vm0 }
 0x2a4   :  { %7827 = vmatpush3.xpose.msk.msra.mxu1 %vm11460_vm14, %v753_v2  ;;  %vm9780_vm14 = vcmp.eq.s32.totalorder %v130_v21, %v133_v44  ;;  %v11483_v2 = vmov 0 }
 0x2a5   :  { %v11465_v54 = vsel %vm9780_vm14, 4294967295, %v11464_v54 }
 0x2a7   :  { %7829 = vmatmul.mubr.msk.f32.vlgmr.msra.gmra.mxu1 %vm11461_vm3, %v9597_v47  ;;  %vm159_vm3 = vmand %vm9780_vm14, %vm9786_vm15  ;;  %v11574_v47 = vmov 0 }
 0x2a8   :  { %7831 = vmatprep.mubr.msk.f32.mxu1 %vm11462_vm1, %v9622_v8  ;;  %v11468_v8 = vmov 0  ;;  %vm9811_vm12 = vmand %vm159_vm3, %vm11345_vm2 }
 0x2a9   :  { %vm160_vm3 = vmand %vm9815_vm11, %vm11346_vm0 }
 0x2ab   :  { %7832 = vmatmul.mubr.msk.f32.gmra.mxu1 %vm11463_vm13, %v9608_v61  ;;  %v132_v61 = vshra.s32 %v9504_v27, 4  ;;  %vm9791_vm13 = vcmp.eq.s32.totalorder %v129_v51, %v133_v44  ;;  %v11474_v27 = vmov 0 }
 0x2ac   :  { %v11469_v8 = vsel %vm9791_vm13, 4294967295, %v11468_v8  ;;  %vm158_vm5 = vmand %vm9791_vm13, %vm11346_vm0  ;;  %v11475_v27 = vsel %vm9811_vm12, 4294967295, %v11474_v27 }
 0x2ad   :  { %11470 = vst [vmem:[#allocation27_spill] sm:$0xff] %v11469_v8  ;;  %vm9801_vm1 = vcmp.eq.s32.totalorder %v132_v61, %v133_v44  ;;  %11476 = vst [vmem:[#allocation29_spill] sm:$0xff] %v11475_v27  ;;  %v11486_v44 = vmov 0 }
 0x2ae   :  { %v11472_v1 = vsel %vm9801_vm1, 4294967295, %v11471_v1  ;;  %vm161_vm14 = vmand %vm9801_vm1, %vm9786_vm15 }
 0x2af   :  { %11473 = vst [vmem:[#allocation28_spill] sm:$0xff] %v11472_v1  ;;  %vm9825_vm10 = vmand %vm158_vm5, %vm11345_vm2  ;;  %v744_v1 = vpop.f32.mrf.mxu0 }
 0x2b0   :  { %v11481_v19 = vsel %vm9825_vm10, 4294967295, %v11480_v19  ;;  %vm9837_vm1 = vmand %vm161_vm14, %vm11345_vm2  ;;  %vm11489_vm14 = vcmask 261120  }
 0x2b1   :  { %11482 = vst [vmem:[#allocation31_spill] sm:$0xff] %v11481_v19  ;;  %v11484_v2 = vsel %vm9837_vm1, 4294967295, %v11483_v2  ;;  %vm9845_vm5 = vmand %vm160_vm3, %vm11345_vm2 }
 0x2b2   :  { %11485 = vst [vmem:[#allocation32_spill] sm:$0xff] %v11484_v2  ;;  %v11487_v44 = vsel %vm9845_vm5, 4294967295, %v11486_v44  ;;  %vm11490_vm3 = vmmov %vm11489_vm14 }
 0x2b3   :  { %11488 = vst [vmem:[#allocation33_spill] sm:$0xff] %v11487_v44  ;;  %vm11491_vm2 = vmmov %vm11490_vm3 }
 0x2b4   :  { %vm11492_vm0 = vmmov %vm11491_vm2 }
 0x367   :  { %v7830_v11 = vpop.f32.mrf.mxu1 }
 0x368   :  { %v931_v23 = vsel %vm9811_vm12, %v7830_v11, -1e+30  ;;  %vm11521_vm12 = vnez %v11428_v36 }
 0x369   :  { %v911_v60 = vpop.f32.mrf.mxu1  ;;  %936 = vmax.xlane.f32.xlu1 %v931_v23 }
 0x36a   :  { %v930_v9 = vsel %vm9825_vm10, %v911_v60, -1e+30 }
 0x36b   :  { %934 = vmax.xlane.f32.xlu0 %v930_v9  ;;  %v7833_v21 = vpop.f32.mrf.mxu1 }
 0x36c   :  { %v933_v51 = vsel %vm9837_vm1, %v7833_v21, -1e+30 }
 0x36d   :  { %v921_v61 = vpop.f32.mrf.mxu1  ;;  %940 = vmax.xlane.f32.xlu1 %v933_v51 }
 0x36e   :  { %v932_v59 = vsel %vm9845_vm5, %v921_v61, -1e+30  ;;  %v745_v61 = vadd.f32 %v9618_v4, %v744_v1  ;;  %v780_v4 = vmul.f32 %v9645_v25, %v9664_v35  ;;  %v778_v1 = vmul.f32 %v9630_v14, %v9682_v43  ;;  %vm11497_vm5 = vmmov %vm11492_vm0 }
 0x36f   :  { %938 = vmax.xlane.f32.xlu0 %v932_v59 }
 0x3f2   :  { %v937_v11 = vpop.xlane.xlu1 %936 }
 0x3f3   :  { %v943_v57 = vsub.f32 %v931_v23, %v937_v11  ;;  %v774_v23 = vmul.f32 %v9630_v14, %v9717_v62  ;;  %v1138_v11 = vld [vmem:[%s9224_s30 + $0x10] sm:$0xff] }
 0x3f4   :  { %v935_v60 = vpop.xlane.xlu0 %934 }
 0x3f5   :  { %v942_v6 = vsub.f32 %v930_v9, %v935_v60  ;;  %v948_v46 = vmul.f32 1.442695, %v943_v57  ;;  %v783_v57 = vmul.f32 %v745_v61, %v9613_v63  ;;  %v772_v9 = vmul.f32 %v9645_v25, %v9734_v12  ;;  %v1136_v60 = vld [vmem:[%s9224_s30] sm:$0xff] }
 0x3f6   :  { %v941_v33 = vpop.xlane.xlu1 %940 }
 0x3f7   :  { %v946_v50 = vmul.f32 1.442695, %v942_v6  ;;  %v945_v19 = vsub.f32 %v933_v51, %v941_v33  ;;  %v781_v33 = vmul.f32 %v9640_v20, %v9651_v26  ;;  %v770_v51 = vmul.f32 %v9630_v14, %v9752_v32 }
 0x3f8   :  { %v939_v27 = vpop.xlane.xlu0 %938 }
 0x3f9   :  { %8730 = vpow2.f32 %v946_v50  ;;  %v944_v30 = vsub.f32 %v932_v59, %v939_v27  ;;  %v952_v2 = vmul.f32 1.442695, %v945_v19  ;;  %v777_v27 = vmul.f32 %v9640_v20, %v9691_v48 }
 0x3fa   :  { %8732 = vpow2.f32 %v948_v46  ;;  %v782_v46 = vmul.f32 %v9630_v14, %v9636_v16  ;;  %v775_v19 = vmul.f32 %v745_v61, %v9708_v55  ;;  %v769_v59 = vmul.f32 %v9640_v20, %v9761_v37  ;;  %v1137_v14 = vld [vmem:[%s9224_s30 + $0x8] sm:$0xff] }
 0x3fb   :  { %v950_v21 = vmul.f32 1.442695, %v944_v30  ;;  %v776_v30 = vmul.f32 %v9645_v25, %v9699_v52  ;;  %v1139_v25 = vld [vmem:[%s9224_s30 + $0x18] sm:$0xff] }
 0x3fc   :  { %7910 = vmatprep.subr.mxu1 %v1139_v25 }
 0x3fd   :  { %8734 = vpow2.f32 %v950_v21  ;;  %7911 = vmatpush3.msra.mxu1 %v1139_v25  ;;  %v1251_v21 = vld [vmem:[%s9234_s12 + $0x38] sm:$0xff] }
 0x3fe   :  { %8736 = vpow2.f32 %v952_v2  ;;  %v773_v2 = vmul.f32 %v9640_v20, %v9726_v5  ;;  %7912 = vmatprep.subr.mxu1 %v1138_v11  ;;  %v1247_v20 = vld [vmem:[%s9234_s12 + $0x18] sm:$0xff] }
 0x3ff   :  { %7913 = vmatpush3.msra.mxu1 %v1138_v11  ;;  %v1245_v11 = vld [vmem:[%s9234_s12 + $0x8] sm:$0xff] }
 0x400   :  { %7914 = vmatprep.subr.mxu1 %v1137_v14 }
 0x401   :  { %7915 = vmatpush3.msra.mxu1 %v1137_v14 }
 0x402   :  { %7916 = vmatprep.subr.mxu1 %v1136_v60 }
 0x403   :  { %7917 = vmatpush3.msra.mxu1 %v1136_v60  ;;  %v1244_v60 = vld [vmem:[%s9234_s12] sm:$0xff] }
 0x404   :  { %7938 = vmatprep.subr.mxu1 %v1247_v20 }
 0x406   :  { %v8731_v44 = vpop.eup %8730 }
 0x407   :  { %v8733_v8 = vpop.eup %8732  ;;  %7866 = vmatprep.mubr.f32.mxu0 %v8731_v44 }
 0x408   :  { %7867 = vmatmul.mubr.f32.vlgmr.msra.gmra.mxu0 %v8733_v8 }
 0x409   :  { %7873 = vmatpush3.msra.mxu0 %v9656_v29  ;;  %v779_v29 = vmul.f32 %v745_v61, %v9673_v39 }
 0x40a   :  { %v8735_v6 = vpop.eup %8734  ;;  %7874 = vmatprep.subr.mxu0 %v783_v57 }
 0x40b   :  { %v8737_v50 = vpop.eup %8736  ;;  %7875 = vmatpush3.msra.mxu0 %v783_v57  ;;  %7869 = vmatprep.mubr.f32.mxu0 %v8735_v6 }
 0x40c   :  { %7876 = vmatprep.subr.mxu0 %v782_v46  ;;  %7870 = vmatmul.mubr.f32.gmra.mxu0 %v8737_v50 }
 0x40d   :  { %7877 = vmatpush3.msra.mxu0 %v782_v46  ;;  %7904 = vmatprep.mubr.f32.mxu0 %v8731_v44  ;;  %v771_v44 = vmul.f32 %v745_v61, %v9743_v22 }
 0x40e   :  { %7878 = vmatprep.subr.mxu0 %v781_v33 }
 0x40f   :  { %7879 = vmatpush3.msra.mxu0 %v781_v33 }
 0x410   :  { %7880 = vmatprep.subr.mxu0 %v780_v4 }
 0x411   :  { %7881 = vmatpush3.msra.mxu0 %v780_v4 }
 0x412   :  { %7882 = vmatprep.subr.mxu0 %v779_v29 }
 0x413   :  { %7883 = vmatpush3.msra.mxu0 %v779_v29 }
 0x414   :  { %7884 = vmatprep.subr.mxu0 %v778_v1 }
 0x415   :  { %7885 = vmatpush3.msra.mxu0 %v778_v1 }
 0x416   :  { %7886 = vmatprep.subr.mxu0 %v777_v27 }
 0x417   :  { %7887 = vmatpush3.msra.mxu0 %v777_v27 }
 0x418   :  { %7888 = vmatprep.subr.mxu0 %v776_v30 }
 0x419   :  { %7889 = vmatpush3.msra.mxu0 %v776_v30 }
 0x41a   :  { %7890 = vmatprep.subr.mxu0 %v775_v19 }
 0x41b   :  { %7891 = vmatpush3.msra.mxu0 %v775_v19 }
 0x41c   :  { %7892 = vmatprep.subr.mxu0 %v774_v23 }
 0x41d   :  { %7893 = vmatpush3.msra.mxu0 %v774_v23 }
 0x41e   :  { %7894 = vmatprep.subr.mxu0 %v773_v2 }
 0x41f   :  { %7895 = vmatpush3.msra.mxu0 %v773_v2 }
 0x420   :  { %7896 = vmatprep.subr.mxu0 %v772_v9 }
 0x421   :  { %7897 = vmatpush3.msra.mxu0 %v772_v9  ;;  %v1246_v9 = vld [vmem:[%s9234_s12 + $0x10] sm:$0xff] }
 0x422   :  { %7898 = vmatprep.subr.mxu0 %v771_v44 }
 0x423   :  { %7899 = vmatpush3.msra.mxu0 %v771_v44 }
 0x424   :  { %7900 = vmatprep.subr.mxu0 %v770_v51 }
 0x425   :  { %7901 = vmatpush3.msra.mxu0 %v770_v51 }
 0x426   :  { %7902 = vmatprep.subr.mxu0 %v769_v59 }
 0x427   :  { %7903 = vmatpush3.msra.mxu0 %v769_v59 }
 0x428   :  { %7905 = vmatmul.mubr.f32.vlgmr.msra.gmra.mxu0 %v8733_v8  ;;  %7924 = vmatprep.subr.mxu0 %v1251_v21 }
 0x429   :  { %7907 = vmatprep.mubr.f32.mxu0 %v8735_v6  ;;  %7925 = vmatpush3.msra.mxu0 %v1251_v21  ;;  %v1249_v21 = vld [vmem:[%s9234_s12 + $0x28] sm:$0xff] }
 0x42c   :  { %7908 = vmatmul.mubr.f32.gmra.mxu0 %v8737_v50 }
 0x4c8   :  { %v7868_v8 = vpop.f32.mrf.mxu0 }
 0x4c9   :  { %v1125_v46 = vmax.f32 %v7868_v8, 1e-30  ;;  %v1248_v8 = vld [vmem:[%s9234_s12 + $0x20] sm:$0xff] }
 0x4ca   :  { %v1020_v61 = vpop.f32.mrf.mxu0 }
 0x4cb   :  { %v1124_v6 = vmax.f32 %v1020_v61, 1e-30  ;;  %v1456_v61 = vld [vmem:[%s11494_s0 + $0x38] sm:$0xff] }
 0x4cc   :  { %v7871_v57 = vpop.f32.mrf.mxu0 }
 0x4cd   :  { %8738 = vrcp.f32 %v1124_v6  ;;  %v1127_v4 = vmax.f32 %v7871_v57, 1e-30  ;;  %v6864_v6 = vld [vmem:[%s11496_s5] ss:$0 sm:$0xff] }
 0x4ce   :  { %v1030_v50 = vpop.f32.mrf.mxu0  ;;  %8740 = vrcp.f32 %v1125_v46 }
 0x4cf   :  { %v1126_v33 = vmax.f32 %v1030_v50, 1e-30 }
 0x4d1   :  { %8742 = vrcp.f32 %v1126_v33 }
 0x4d2   :  { %8744 = vrcp.f32 %v1127_v4 }
 0x4da   :  { %v8739_v1 = vpop.eup %8738 }
 0x4db   :  { %v8741_v30 = vpop.eup %8740 }
 0x4de   :  { %v8743_v44 = vpop.eup %8742 }
 0x4df   :  { %v8745_v59 = vpop.eup %8744 }
 0x4e8   :  { %v7906_v29 = vpop.f32.mrf.mxu0 }
 0x4e9   :  { %v1131_v23 = vmul.f32 %v8741_v30, %v7906_v29  ;;  %v1455_v29 = vld [vmem:[%s11494_s0 + $0x30] sm:$0xff]  ;;  %v1454_v30 = vld [vmem:[%s11494_s0 + $0x28] sm:$0xff] }
 0x4ea   :  { %v1105_v27 = vpop.f32.mrf.mxu0 }
 0x4eb   :  { %v1129_v19 = vmul.f32 %v8739_v1, %v1105_v27 }
 0x4ec   :  { %v7909_v2 = vpop.f32.mrf.mxu0 }
 0x4ed   :  { %7918 = vmatprep.mubr.msk.f32.mxu1 %vm11489_vm14, %v1129_v19  ;;  %v1135_v14 = vmul.f32 %v8745_v59, %v7909_v2  ;;  %vm11493_vm14 = vmmov %vm11492_vm0  ;;  %v1452_v2 = vld [vmem:[%s11494_s0 + $0x18] sm:$0xff] }
 0x4ee   :  { %v1115_v51 = vpop.f32.mrf.mxu0  ;;  %7919 = vmatmul.mubr.msk.f32.vlgmr.msra.gmra.mxu1 %vm11490_vm3, %v1131_v23  ;;  %vm11495_vm3 = vmmov %vm11492_vm0  ;;  %v1453_v23 = vld [vmem:[%s11494_s0 + $0x20] sm:$0xff] }
 0x4ef   :  { %v1133_v25 = vmul.f32 %v8743_v44, %v1115_v51  ;;  %7939 = vmatpush3.msra.mxu1 %v1247_v20  ;;  %v1250_v20 = vld [vmem:[%s9234_s12 + $0x30] sm:$0xff]  ;;  %v1450_v44 = vld [vmem:[%s11494_s0 + $0x8] sm:$0xff]  ;;  %v1449_v51 = vld [vmem:[%s11494_s0] sm:$0xff] }
 0x4f0   :  { %7940 = vmatprep.subr.mxu1 %v1246_v9  ;;  %7926 = vmatprep.subr.mxu0 %v1250_v20 }
 0x4f1   :  { %7921 = vmatprep.mubr.msk.f32.mxu1 %vm11491_vm2, %v1133_v25  ;;  %7941 = vmatpush3.msra.mxu1 %v1246_v9  ;;  %vm11498_vm2 = vmmov %vm11492_vm0  ;;  %v1451_v9 = vld [vmem:[%s11494_s0 + $0x10] sm:$0xff] }
 0x4f2   :  { %7922 = vmatmul.mubr.msk.f32.gmra.mxu1 %vm11492_vm0, %v1135_v14  ;;  %7942 = vmatprep.subr.mxu1 %v1245_v11 }
 0x4f3   :  { %7943 = vmatpush3.msra.mxu1 %v1245_v11  ;;  %7946 = vmatprep.mubr.msk.f32.mxu1 %vm11493_vm14, %v9351_v45  ;;  %vm11500_vm14 = vmmov %vm11492_vm0 }
 0x4f4   :  { %7944 = vmatprep.subr.mxu1 %v1244_v60  ;;  %7927 = vmatpush3.msra.mxu0 %v1250_v20 }
 0x4f5   :  { %7945 = vmatpush3.msra.mxu1 %v1244_v60  ;;  %7928 = vmatprep.subr.mxu0 %v1249_v21  ;;  %v6877_v60 = vld [vmem:[%s11502_s9] ss:$0 sm:$0xff] }
 0x4f6   :  { %7947 = vmatmul.mubr.msk.f32.vlgmr.msra.gmra.mxu1 %vm11495_vm3, %v9359_v49  ;;  %7929 = vmatpush3.msra.mxu0 %v1249_v21  ;;  %vm11501_vm3 = vmmov %vm11492_vm0 }
 0x4f7   :  { %7949 = vmatprep.mubr.msk.f32.mxu1 %vm11497_vm5, %v9365_v53  ;;  %7930 = vmatprep.subr.mxu0 %v1248_v8  ;;  %vm11499_vm5 = vmmov %vm11492_vm0 }
 0x4f8   :  { %7931 = vmatpush3.msra.mxu0 %v1248_v8 }
 0x4f9   :  { %7952 = vmatprep.subr.mxu0 %v1456_v61 }
 0x4fa   :  { %7950 = vmatmul.mubr.msk.f32.gmra.mxu1 %vm11498_vm2, %v9378_v56  ;;  %vm11348_vm2 = vcmask 523264  }
 0x5ae   :  { %v7920_v57 = vpop.f32.mrf.mxu1 }
 0x5af   :  { %v1231_v33 = vadd.f32 %v7920_v57, %v6864_v6 }
 0x5b0   :  { %v1225_v46 = vpop.f32.mrf.mxu1 }
 0x5b1   :  { %v1226_v50 = vadd.f32 %v6864_v6, %v1225_v46 }
 0x5b2   :  { %v7923_v4 = vpop.f32.mrf.mxu1 }
 0x5b3   :  { %7932 = vmatprep.mubr.msk.f32.mxu0 %vm11492_vm0, %v1226_v50  ;;  %v1241_v19 = vadd.f32 %v7923_v4, %v6864_v6  ;;  %vm11505_vm0 = vnez %v11403_v0  ;;  %v7109_v0 = vld [vmem:[%s9199_s3 + $0x60] sm:$0xff] }
 0x5b4   :  { %v1235_v1 = vpop.f32.mrf.mxu1  ;;  %7933 = vmatmul.mubr.msk.f32.vlgmr.msra.gmra.mxu0 %vm11499_vm5, %v1231_v33  ;;  %vm11506_vm5 = vmmov %vm11501_vm3 }
 0x5b5   :  { %v1236_v27 = vadd.f32 %v6864_v6, %v1235_v1  ;;  %7953 = vmatpush3.msra.mxu0 %v1456_v61 }
 0x5b6   :  { %7954 = vmatprep.subr.mxu0 %v1455_v29  ;;  %v7948_v59 = vpop.f32.mrf.mxu1 }
 0x5b7   :  { %7935 = vmatprep.mubr.msk.f32.mxu0 %vm11500_vm14, %v1236_v27  ;;  %7955 = vmatpush3.msra.mxu0 %v1455_v29  ;;  %vm11507_vm14 = vmmov %vm11501_vm3 }
 0x5b8   :  { %7936 = vmatmul.mubr.msk.f32.gmra.mxu0 %vm11501_vm3, %v1241_v19  ;;  %7956 = vmatprep.subr.mxu0 %v1454_v30  ;;  %v1415_v25 = vpop.f32.mrf.mxu1 }
 0x5b9   :  { %7957 = vmatpush3.msra.mxu0 %v1454_v30 }
 0x5ba   :  { %7958 = vmatprep.subr.mxu0 %v1453_v23  ;;  %v7951_v20 = vpop.f32.mrf.mxu1 }
 0x5bb   :  { %7959 = vmatpush3.msra.mxu0 %v1453_v23 }
 0x5bc   :  { %7960 = vmatprep.subr.mxu0 %v1452_v2  ;;  %v1425_v50 = vpop.f32.mrf.mxu1 }
 0x5bd   :  { %7961 = vmatpush3.msra.mxu0 %v1452_v2  ;;  %v6886_v2 = vld [vmem:[%s9194_s29 + $0x38] sm:$0xff] }
 0x5be   :  { %7962 = vmatprep.subr.mxu0 %v1451_v9  ;;  %7974 = vmatprep.subr.mxu1 %v6886_v2 }
 0x5bf   :  { %7963 = vmatpush3.msra.mxu0 %v1451_v9  ;;  %v6906_v9 = vld [vmem:[%s9204_s8 + $0x38] sm:$0xff]  ;;  %7975 = vmatpush3.msra.mxu1 %v6886_v2  ;;  %v10070_v2 = vld [vmem:[%s9219_s24 + $0x1] ss:$0 sm:$0xff] }
 0x5c0   :  { %7964 = vmatprep.subr.mxu0 %v1450_v44 }
 0x5c1   :  { %7965 = vmatpush3.msra.mxu0 %v1450_v44  ;;  %v6885_v44 = vld [vmem:[%s9194_s29 + $0x30] sm:$0xff] }
 0x5c2   :  { %7966 = vmatprep.subr.mxu0 %v1449_v51  ;;  %7976 = vmatprep.subr.mxu1 %v6885_v44 }
 0x5c3   :  { %7967 = vmatpush3.msra.mxu0 %v1449_v51  ;;  %v6905_v51 = vld [vmem:[%s9204_s8 + $0x30] sm:$0xff]  ;;  %7977 = vmatpush3.msra.mxu1 %v6885_v44 }
 0x5c4   :  { %8002 = vmatprep.subr.mxu0 %v6906_v9 }
 0x674   :  { %v7934_v11 = vpop.f32.mrf.mxu0 }
 0x675   :  { %v1421_v14 = vadd.f32 %v7948_v59, %v7934_v11  ;;  %v6884_v59 = vld [vmem:[%s9194_s29 + $0x28] sm:$0xff]  ;;  %v6883_v11 = vld [vmem:[%s9194_s29 + $0x20] sm:$0xff] }
 0x676   :  { %v1330_v21 = vpop.f32.mrf.mxu0  ;;  %7978 = vmatprep.subr.mxu1 %v6884_v59 }
 0x677   :  { %v1416_v8 = vadd.f32 %v1415_v25, %v1330_v21  ;;  %v1442_v61 = vadd.f32 %v6877_v60, %v1421_v14  ;;  %v6904_v25 = vld [vmem:[%s9204_s8 + $0x28] sm:$0xff]  ;;  %7979 = vmatpush3.msra.mxu1 %v6884_v59  ;;  %v6903_v14 = vld [vmem:[%s9204_s8 + $0x20] sm:$0xff] }
 0x678   :  { %v7937_v57 = vpop.f32.mrf.mxu0  ;;  %7980 = vmatprep.subr.mxu1 %v6883_v11 }
 0x679   :  { %v1441_v6 = vadd.f32 %v6877_v60, %v1416_v8  ;;  %v1431_v46 = vadd.f32 %v7951_v20, %v7937_v57  ;;  %v1446_v1 = vmax.f32 %v1442_v61, 0.0  ;;  %7981 = vmatpush3.msra.mxu1 %v6883_v11  ;;  %v11504_v20 = vmov 1.0   ;;  %v6882_v57 = vld [vmem:[%s11503_s13] ss:$0 sm:$0xff] }
 0x67a   :  { %v1340_v33 = vpop.f32.mrf.mxu0 }
 0x67b   :  { %v1445_v4 = vmax.f32 %v1441_v6, 0.0  ;;  %v1426_v29 = vadd.f32 %v1425_v50, %v1340_v33  ;;  %v1444_v27 = vadd.f32 %v6877_v60, %v1431_v46 }
 0x67d   :  { %v1443_v30 = vadd.f32 %v6877_v60, %v1426_v29  ;;  %7968 = vmatprep.mubr.msk.f32.mxu0 %vm11348_vm2, %v1445_v4  ;;  %v1448_v23 = vmax.f32 %v1444_v27, 0.0  ;;  %v6896_v60 = vld [vmem:[%s9199_s3 + $0x38] sm:$0xff]  ;;  %v6895_v27 = vld [vmem:[%s9199_s3 + $0x30] sm:$0xff] }
 0x67e   :  { %7969 = vmatmul.mubr.msk.f32.vlgmr.msra.gmra.mxu0 %vm11348_vm2, %v1446_v1  ;;  %7988 = vmatprep.subr.mxu1 %v6896_v60 }
 0x67f   :  { %v1447_v19 = vmax.f32 %v1443_v30, 0.0  ;;  %8003 = vmatpush3.msra.mxu0 %v6906_v9  ;;  %v6894_v30 = vld [vmem:[%s9199_s3 + $0x28] sm:$0xff] }
 0x680   :  { %8004 = vmatprep.subr.mxu0 %v6905_v51 }
 0x681   :  { %7971 = vmatprep.mubr.msk.f32.mxu0 %vm11348_vm2, %v1447_v19  ;;  %8005 = vmatpush3.msra.mxu0 %v6905_v51  ;;  %v6893_v19 = vld [vmem:[%s9199_s3 + $0x20] sm:$0xff] }
 0x682   :  { %7972 = vmatmul.mubr.msk.f32.gmra.mxu0 %vm11348_vm2, %v1448_v23  ;;  %8006 = vmatprep.subr.mxu0 %v6904_v25  ;;  %vm11508_vm2 = vmmov %vm11501_vm3  ;;  %v6888_v23 = vld [vmem:[%s9209_s14 + $0x1] ss:$0 sm:$0xff] }
 0x683   :  { %8007 = vmatpush3.msra.mxu0 %v6904_v25  ;;  %vm11512_vm1 = vmmov %vm11508_vm2 }
 0x684   :  { %8008 = vmatprep.subr.mxu0 %v6903_v14  ;;  %vm11513_vm10 = vmmov %vm11512_vm1 }
 0x685   :  { %8009 = vmatpush3.msra.mxu0 %v6903_v14 }
 0x686   :  { %8054 = vmatprep.subr.msk.mxu0 %vm11505_vm0, %v11504_v20 }
 0x73e   :  { %v7970_v21 = vpop.f32.mrf.mxu0 }
 0x73f   :  { %v1556_v8 = vadd.f32 %v7970_v21, %v9359_v49 }
 0x740   :  { %v1536_v61 = vpop.f32.mrf.mxu0 }
 0x741   :  { %v1555_v6 = vadd.f32 %v1536_v61, %v9351_v45  ;;  %v9940_v33 = vadd.f32 %v6882_v57, %v1556_v8 }
 0x742   :  { %v7973_v46 = vpop.f32.mrf.mxu0 }
 0x743   :  { %v9938_v50 = vadd.f32 %v6882_v57, %v1555_v6  ;;  %v1558_v4 = vadd.f32 %v7973_v46, %v9378_v56 }
 0x744   :  { %v1546_v29 = vpop.f32.mrf.mxu0 }
 0x745   :  { %v1557_v1 = vadd.f32 %v1546_v29, %v9365_v53  ;;  %7982 = vmatprep.mubr.msk.f32.mxu1 %vm11506_vm5, %v9938_v50  ;;  %8010 = vmatprep.mubr.msk.f32.mxu0 %vm11507_vm14, %v9938_v50  ;;  %v9958_v53 = vadd.f32 %v6882_v57, %v1558_v4  ;;  %vm11509_vm5 = vnez %v11405_v3  ;;  %vm11510_vm14 = vmmov %vm11508_vm2  ;;  %v7104_v3 = vld [vmem:[%s9209_s14 + $0x3] ss:$0 sm:$0xff] }
 0x746   :  { %7983 = vmatmul.mubr.msk.f32.vlgmr.msra.gmra.mxu1 %vm11501_vm3, %v9940_v33  ;;  %8011 = vmatmul.mubr.msk.f32.vlgmr.msra.gmra.mxu0 %vm11508_vm2, %v9940_v33  ;;  %vm11511_vm3 = vmmov %vm11508_vm2 }
 0x747   :  { %v9953_v45 = vadd.f32 %v6882_v57, %v1557_v1  ;;  %7989 = vmatpush3.msra.mxu1 %v6896_v60  ;;  %8055 = vmatpush3.msk.msra.mxu0 %vm11505_vm0, %v11504_v20 }
 0x748   :  { %7990 = vmatprep.subr.mxu1 %v6895_v27  ;;  %8056 = vmatprep.subr.msk.mxu0 %vm11509_vm5, %v11504_v20 }
 0x749   :  { %7985 = vmatprep.mubr.msk.f32.mxu1 %vm11510_vm14, %v9953_v45  ;;  %7991 = vmatpush3.msra.mxu1 %v6895_v27  ;;  %vm11514_vm14 = vmmov %vm11512_vm1  ;;  %v6898_v27 = vld [vmem:[%s9214_s19 + $0x1] ss:$0 sm:$0xff] }
 0x74a   :  { %8013 = vmatprep.mubr.msk.f32.mxu0 %vm11508_vm2, %v9953_v45  ;;  %7986 = vmatmul.mubr.msk.f32.gmra.mxu1 %vm11511_vm3, %v9958_v53  ;;  %vm11516_vm2 = vmmov %vm11512_vm1  ;;  %vm11517_vm3 = vnez %v11419_v24 }
 0x74b   :  { %7992 = vmatprep.subr.mxu1 %v6894_v30  ;;  %8014 = vmatmul.mubr.msk.f32.gmra.mxu0 %vm11512_vm1, %v9958_v53 }
 0x74c   :  { %7993 = vmatpush3.msra.mxu1 %v6894_v30  ;;  %7996 = vmatprep.mubr.msk.f32.mxu1 %vm11513_vm10, %v9938_v50  ;;  %vm11515_vm10 = vnez %v11409_v10 }
 0x74d   :  { %7994 = vmatprep.subr.mxu1 %v6893_v19  ;;  %8057 = vmatpush3.msk.msra.mxu0 %vm11509_vm5, %v11504_v20 }
 0x74e   :  { %7995 = vmatpush3.msra.mxu1 %v6893_v19  ;;  %8058 = vmatprep.subr.msk.mxu0 %vm9416_vm4, %v11504_v20 }
 0x74f   :  { %7997 = vmatmul.mubr.msk.f32.vlgmr.msra.gmra.mxu1 %vm11514_vm14, %v9940_v33  ;;  %8059 = vmatpush3.msk.msra.mxu0 %vm9416_vm4, %v11504_v20  ;;  %vm11518_vm14 = vnez %v11421_v28 }
 0x750   :  { %7999 = vmatprep.mubr.msk.f32.mxu1 %vm11512_vm1, %v9953_v45  ;;  %8060 = vmatprep.subr.msk.mxu0 %vm11515_vm10, %v11504_v20  ;;  %vm11519_vm1 = vnez %v11423_v31 }
 0x751   :  { %8061 = vmatpush3.msk.msra.mxu0 %vm11515_vm10, %v11504_v20 }
 0x752   :  { %8062 = vmatprep.subr.msk.mxu0 %vm9442_vm6, %v11504_v20 }
 0x753   :  { %8000 = vmatmul.mubr.msk.f32.gmra.mxu1 %vm11516_vm2, %v9958_v53  ;;  %8063 = vmatpush3.msk.msra.mxu0 %vm9442_vm6, %v11504_v20  ;;  %vm11520_vm2 = vnez %v11426_v34 }
 0x754   :  { %8064 = vmatprep.subr.msk.mxu0 %vm9453_vm7, %v11504_v20 }
 0x755   :  { %8065 = vmatpush3.msk.msra.mxu0 %vm9453_vm7, %v11504_v20 }
 0x756   :  { %8066 = vmatprep.subr.msk.mxu0 %vm9464_vm8, %v11504_v20 }
 0x757   :  { %8067 = vmatpush3.msk.msra.mxu0 %vm9464_vm8, %v11504_v20 }
 0x758   :  { %8068 = vmatprep.subr.msk.mxu0 %vm9475_vm9, %v11504_v20 }
 0x759   :  { %8069 = vmatpush3.msk.msra.mxu0 %vm9475_vm9, %v11504_v20 }
 0x75a   :  { %8070 = vmatprep.subr.msk.mxu0 %vm11517_vm3, %v11504_v20 }
 0x75b   :  { %8071 = vmatpush3.msk.msra.mxu0 %vm11517_vm3, %v11504_v20 }
 0x75c   :  { %8072 = vmatprep.subr.msk.mxu0 %vm11518_vm14, %v11504_v20 }
 0x75d   :  { %8073 = vmatpush3.msk.msra.mxu0 %vm11518_vm14, %v11504_v20  ;;  %vm11522_vm14 = vnez %v11430_v38 }
 0x75e   :  { %8074 = vmatprep.subr.msk.mxu0 %vm11519_vm1, %v11504_v20 }
 0x75f   :  { %8075 = vmatpush3.msk.msra.mxu0 %vm11519_vm1, %v11504_v20  ;;  %vm11523_vm1 = vnez %v11432_v40 }
 0x760   :  { %8076 = vmatprep.subr.msk.mxu0 %vm11520_vm2, %v11504_v20 }
 0x761   :  { %8077 = vmatpush3.msk.msra.mxu0 %vm11520_vm2, %v11504_v20  ;;  %vm11524_vm2 = vnez %v11434_v41 }
 0x762   :  { %8078 = vmatprep.subr.msk.mxu0 %vm11521_vm12, %v11504_v20 }
 0x763   :  { %8079 = vmatpush3.msk.msra.mxu0 %vm11521_vm12, %v11504_v20 }
 0x764   :  { %8080 = vmatprep.subr.msk.mxu0 %vm11522_vm14, %v11504_v20 }
 0x765   :  { %8081 = vmatpush3.msk.msra.mxu0 %vm11522_vm14, %v11504_v20 }
 0x766   :  { %8082 = vmatprep.subr.msk.mxu0 %vm11523_vm1, %v11504_v20 }
 0x767   :  { %8083 = vmatpush3.msk.msra.mxu0 %vm11523_vm1, %v11504_v20 }
 0x768   :  { %8084 = vmatprep.subr.msk.mxu0 %vm11524_vm2, %v11504_v20 }
 0x769   :  { %8085 = vmatpush3.msk.msra.mxu0 %vm11524_vm2, %v11504_v20  ;;  %vm11525_vm2 = vcmask 261120  }
 0x76a   :  { %vm11526_vm1 = vmmov %vm11525_vm2 }
 0x76b   :  { %vm11527_vm14 = vmmov %vm11526_vm1 }
 0x76c   :  { %vm11528_vm12 = vmmov %vm11526_vm1 }
 0x76d   :  { %vm11529_vm3 = vmmov %vm11526_vm1 }
 0x76e   :  { %vm11530_vm9 = vmmov %vm11526_vm1 }
 0x76f   :  { %vm11531_vm8 = vmmov %vm11526_vm1 }
 0x770   :  { %vm11534_vm7 = vmmov %vm11526_vm1 }
 0x806   :  { %v7984_v9 = vpop.f32.mrf.mxu1  ;;  %v8012_v44 = vpop.f32.mrf.mxu0 }
 0x807   :  { %v10072_v51 = vadd.f32 %v7984_v9, %v6888_v23  ;;  %v10075_v59 = vadd.f32 %v8012_v44, %v10070_v2 }
 0x808   :  { %v1661_v25 = vpop.f32.mrf.mxu1  ;;  %v1857_v11 = vpop.f32.mrf.mxu0 }
 0x809   :  { %v1662_v14 = vadd.f32 %v6888_v23, %v1661_v25  ;;  %v10078_v60 = vadd.f32 %v10070_v2, %v1857_v11 }
 0x80a   :  { %v7987_v21 = vpop.f32.mrf.mxu1 }
 0x80b   :  { %v10080_v8 = vadd.f32 %v7987_v21, %v6888_v23  ;;  %v8015_v61 = vpop.f32.mrf.mxu0  ;;  %8048 = vmatprep.mubr.msk.f32.mxu1 %vm11525_vm2, %v1662_v14 }
 0x80c   :  { %v10084_v57 = vadd.f32 %v8015_v61, %v10070_v2  ;;  %v1671_v6 = vpop.f32.mrf.mxu1 }
 0x80d   :  { %v1672_v46 = vadd.f32 %v6888_v23, %v1671_v6  ;;  %v1867_v49 = vpop.f32.mrf.mxu0 }
 0x80e   :  { %v10088_v4 = vmul.f32 %v10084_v57, %v9603_v58 }
 0x80f   :  { %v7998_v29 = vpop.f32.mrf.mxu1 }
 0x810   :  { %8092 = vmatprep.subr.mxu0 %v10088_v4  ;;  %v1765_v11 = vadd.f32 %v7998_v29, %v6898_v27 }
 0x811   :  { %v1759_v1 = vpop.f32.mrf.mxu1 }
 0x812   :  { %v1760_v14 = vadd.f32 %v6898_v27, %v1759_v1  ;;  %v1889_v21 = vmul.f32 %v1765_v11, %v9636_v16  ;;  %v1885_v1 = vmul.f32 %v1765_v11, %v9682_v43 }
 0x813   :  { %v8001_v30 = vpop.f32.mrf.mxu1 }
 0x814   :  { %v1775_v19 = vadd.f32 %v8001_v30, %v6898_v27  ;;  %v1888_v61 = vmul.f32 %v1760_v14, %v9651_v26 }
 0x815   :  { %v1769_v9 = vpop.f32.mrf.mxu1 }
 0x816   :  { %v1770_v44 = vadd.f32 %v6898_v27, %v1769_v9  ;;  %v1891_v25 = vmul.f32 %v1775_v19, %v9603_v58  ;;  %v1887_v6 = vmul.f32 %v1775_v19, %v9664_v35  ;;  %v1884_v27 = vmul.f32 %v1760_v14, %v9691_v48 }
 0x817   :  { %v1883_v30 = vmul.f32 %v1775_v19, %v9699_v52 }
 0x818   :  { %8016 = vmatprep.subr.msk.mxu1 %vm11525_vm2, %v1891_v25  ;;  %v1890_v23 = vmul.f32 %v1770_v44, %v9613_v63  ;;  %vm11532_vm2 = vmmov %vm11526_vm1  ;;  %v1886_v29 = vmul.f32 %v1770_v44, %v9673_v39  ;;  %v1882_v9 = vmul.f32 %v1770_v44, %v9708_v55 }
 0x819   :  { %8017 = vmatpush3.xpose.msk.msra.mxu1 %vm11526_vm1, %v1891_v25  ;;  %v1881_v25 = vmul.f32 %v1765_v11, %v9717_v62 }
 0x81a   :  { %8018 = vmatprep.subr.msk.mxu1 %vm11527_vm14, %v1890_v23  ;;  %vm11533_vm14 = vmmov %vm11526_vm1 }
 0x81d   :  { %8019 = vmatpush3.xpose.msk.msra.mxu1 %vm11528_vm12, %v1890_v23  ;;  %vm11535_vm12 = vmmov %vm11526_vm1  ;;  %v1880_v23 = vmul.f32 %v1760_v14, %v9726_v5 }
 0x81e   :  { %8020 = vmatprep.subr.msk.mxu1 %vm11529_vm3, %v1889_v21  ;;  %vm11536_vm3 = vmmov %vm11526_vm1 }
 0x821   :  { %8021 = vmatpush3.xpose.msk.msra.mxu1 %vm11530_vm9, %v1889_v21  ;;  %vm11538_vm9 = vmmov %vm11526_vm1  ;;  %v1879_v21 = vmul.f32 %v1775_v19, %v9734_v12 }
 0x822   :  { %8022 = vmatprep.subr.msk.mxu1 %vm11531_vm8, %v1888_v61  ;;  %vm11537_vm8 = vmmov %vm11526_vm1 }
 0x825   :  { %8023 = vmatpush3.xpose.msk.msra.mxu1 %vm11532_vm2, %v1888_v61  ;;  %vm11539_vm2 = vmmov %vm11526_vm1  ;;  %v1878_v61 = vmul.f32 %v1770_v44, %v9743_v22  ;;  %v11560_v44 = vmov 0 }
 0x826   :  { %8024 = vmatprep.subr.msk.mxu1 %vm11526_vm1, %v1887_v6 }
 0x829   :  { %8025 = vmatpush3.xpose.msk.msra.mxu1 %vm11533_vm14, %v1887_v6  ;;  %vm11541_vm14 = vmmov %vm11526_vm1  ;;  %v1877_v6 = vmul.f32 %v1765_v11, %v9752_v32 }
 0x82a   :  { %8026 = vmatprep.subr.msk.mxu1 %vm11534_vm7, %v1886_v29  ;;  %vm11540_vm7 = vmmov %vm11526_vm1 }
 0x82d   :  { %8027 = vmatpush3.xpose.msk.msra.mxu1 %vm11535_vm12, %v1886_v29  ;;  %vm11542_vm12 = vmmov %vm11526_vm1  ;;  %v1876_v29 = vmul.f32 %v1760_v14, %v9761_v37 }
 0x82e   :  { %8028 = vmatprep.subr.msk.mxu1 %vm11536_vm3, %v1885_v1  ;;  %vm11543_vm3 = vmmov %vm11526_vm1 }
 0x831   :  { %8029 = vmatpush3.xpose.msk.msra.mxu1 %vm11537_vm8, %v1885_v1  ;;  %vm11544_vm8 = vmmov %vm11526_vm1  ;;  %v11570_v1 = vmov 0 }
 0x832   :  { %8030 = vmatprep.subr.msk.mxu1 %vm11538_vm9, %v1884_v27  ;;  %vm11545_vm9 = vmmov %vm11526_vm1 }
 0x835   :  { %8031 = vmatpush3.xpose.msk.msra.mxu1 %vm11539_vm2, %v1884_v27  ;;  %vm11546_vm2 = vmmov %vm11526_vm1 }
 0x836   :  { %8032 = vmatprep.subr.msk.mxu1 %vm11526_vm1, %v1883_v30 }
 0x839   :  { %8033 = vmatpush3.xpose.msk.msra.mxu1 %vm11540_vm7, %v1883_v30  ;;  %vm11547_vm7 = vmmov %vm11526_vm1 }
 0x83a   :  { %8034 = vmatprep.subr.msk.mxu1 %vm11541_vm14, %v1882_v9  ;;  %vm11548_vm14 = vmmov %vm11526_vm1 }
 0x83d   :  { %8035 = vmatpush3.xpose.msk.msra.mxu1 %vm11542_vm12, %v1882_v9  ;;  %vm11549_vm12 = vmmov %vm11526_vm1 }
 0x83e   :  { %8036 = vmatprep.subr.msk.mxu1 %vm11543_vm3, %v1881_v25  ;;  %vm11550_vm3 = vmmov %vm11526_vm1 }
 0x841   :  { %8037 = vmatpush3.xpose.msk.msra.mxu1 %vm11544_vm8, %v1881_v25  ;;  %vm11551_vm8 = vmmov %vm11526_vm1 }
 0x842   :  { %8038 = vmatprep.subr.msk.mxu1 %vm11545_vm9, %v1880_v23  ;;  %vm11552_vm9 = vmmov %vm11526_vm1 }
 0x845   :  { %8039 = vmatpush3.xpose.msk.msra.mxu1 %vm11546_vm2, %v1880_v23  ;;  %vm11553_vm2 = vmmov %vm11526_vm1 }
 0x846   :  { %8040 = vmatprep.subr.msk.mxu1 %vm11526_vm1, %v1879_v21 }
 0x849   :  { %8041 = vmatpush3.xpose.msk.msra.mxu1 %vm11547_vm7, %v1879_v21  ;;  %vm11554_vm7 = vmmov %vm11526_vm1 }
 0x84a   :  { %8042 = vmatprep.subr.msk.mxu1 %vm11548_vm14, %v1878_v61  ;;  %vm11555_vm14 = vmmov %vm11526_vm1 }
 0x84d   :  { %8043 = vmatpush3.xpose.msk.msra.mxu1 %vm11549_vm12, %v1878_v61  ;;  %vm11556_vm12 = vcmp.lt.s32.totalorder %v9775_v42, 8 }
 0x84e   :  { %8044 = vmatprep.subr.msk.mxu1 %vm11550_vm3, %v1877_v6  ;;  %vm11557_vm3 = vnez %v11465_v54  ;;  %v11566_v54 = vmov 0 }
 0x84f   :  { %vm171_vm6 = vmand %vm11557_vm3, %vm11556_vm12 }
 0x851   :  { %8045 = vmatpush3.xpose.msk.msra.mxu1 %vm11551_vm8, %v1877_v6  ;;  %vm170_vm8 = vmand %vm9791_vm13, %vm9786_vm15 }
 0x852   :  { %8046 = vmatprep.subr.msk.mxu1 %vm11552_vm9, %v1876_v29  ;;  %vm11559_vm9 = vcmp.lt.s32.totalorder %v9775_v42, 14 }
 0x853   :  { %vm11565_vm10 = vmmov %vm11559_vm9 }
 0x854   :  { %vm11569_vm13 = vmmov %vm11559_vm9 }
 0x855   :  { %8047 = vmatpush3.xpose.msk.msra.mxu1 %vm11553_vm2, %v1876_v29  ;;  %vm10155_vm2 = vmand %vm171_vm6, %vm11559_vm9 }
 0x856   :  { %v11561_v44 = vsel %vm10155_vm2, 4294967295, %v11560_v44  ;;  %vm172_vm6 = vmand %vm9815_vm11, %vm9786_vm15  ;;  %vm11577_vm11 = vcmask 261120  }
 0x857   :  { %vm11578_vm15 = vmmov %vm11577_vm11 }
 0x858   :  { %8049 = vmatmul.mubr.msk.f32.vlgmr.msra.gmra.mxu1 %vm11526_vm1, %v10072_v51  ;;  %vm11562_vm1 = vmmov %vm11556_vm12  ;;  %v11563_v51 = vld [vmem:[#allocation28_spill] sm:$0xff] }
 0x859   :  { %8051 = vmatprep.mubr.msk.f32.mxu1 %vm11554_vm7, %v1672_v46  ;;  %vm11564_vm7 = vnez %v11563_v51  ;;  %vm10165_vm12 = vmand %vm170_vm8, %vm11565_vm10 }
 0x85a   :  { %v11567_v54 = vsel %vm10165_vm12, 4294967295, %v11566_v54  ;;  %vm11573_vm10 = vmmov %vm11559_vm9 }
 0x85b   :  { %vm10185_vm8 = vmand %vm172_vm6, %vm11573_vm10 }
 0x85c   :  { %8052 = vmatmul.mubr.msk.f32.gmra.mxu1 %vm11555_vm14, %v10080_v8  ;;  %vm173_vm14 = vmand %vm11564_vm7, %vm11562_vm1  ;;  %v11575_v47 = vsel %vm10185_vm8, 4294967295, %v11574_v47 }
 0x85d   :  { %vm10177_vm3 = vmand %vm173_vm14, %vm11569_vm13  ;;  %11576 = vst [vmem:[#allocation28_spill] sm:$0xff] %v11575_v47 }
 0x85e   :  { %v11571_v1 = vsel %vm10177_vm3, 4294967295, %v11570_v1  ;;  %vm11579_vm9 = vmmov %vm11577_vm11 }
 0x85f   :  { %11572 = vst [vmem:[#allocation27_spill] sm:$0xff] %v11571_v1  ;;  %vm11580_vm1 = vmmov %vm11579_vm9 }
 0x860   :  { %vm11581_vm7 = vmmov %vm11580_vm1 }
 0x861   :  { %vm11582_vm14 = vmmov %vm11580_vm1 }
 0x862   :  { %vm11583_vm6 = vmmov %vm11580_vm1 }
 0x863   :  { %vm11584_vm13 = vmmov %vm11580_vm1 }
 0x864   :  { %vm11585_vm10 = vmmov %vm11580_vm1 }
 0x918   :  { %v8050_v8 = vpop.f32.mrf.mxu1 }
 0x919   :  { %v2054_v46 = vsel %vm10155_vm2, %v8050_v8, -1e+30  ;;  %vm11616_vm2 = vnez %v11434_v41 }
 0x91a   :  { %2059 = vmax.xlane.f32.xlu1 %v2054_v46  ;;  %v2034_v14 = vpop.f32.mrf.mxu1 }
 0x91b   :  { %v2053_v27 = vsel %vm10165_vm12, %v2034_v14, -1e+30  ;;  %vm11615_vm12 = vnez %v11432_v40 }
 0x91c   :  { %2057 = vmax.xlane.f32.xlu0 %v2053_v27  ;;  %v8053_v30 = vpop.f32.mrf.mxu1 }
 0x91d   :  { %v2056_v9 = vsel %vm10177_vm3, %v8053_v30, -1e+30  ;;  %vm11614_vm3 = vnez %v11430_v38 }
 0x91e   :  { %2063 = vmax.xlane.f32.xlu1 %v2056_v9  ;;  %v2044_v25 = vpop.f32.mrf.mxu1 }
 0x91f   :  { %v2055_v23 = vsel %vm10185_vm8, %v2044_v25, -1e+30  ;;  %v1868_v25 = vadd.f32 %v10070_v2, %v1867_v49  ;;  %v1904_v49 = vmul.f32 %v10078_v60, %v9651_v26  ;;  %vm11613_vm8 = vnez %v11428_v36 }
 0x920   :  { %2061 = vmax.xlane.f32.xlu0 %v2055_v23 }
 0x921   :  { %v1902_v2 = vmul.f32 %v1868_v25, %v9673_v39 }
 0x9a3   :  { %v2060_v21 = vpop.xlane.xlu1 %2059 }
 0x9a4   :  { %v2066_v61 = vsub.f32 %v2054_v46, %v2060_v21  ;;  %v1906_v46 = vmul.f32 %v1868_v25, %v9613_v63  ;;  %v1900_v21 = vmul.f32 %v10078_v60, %v9691_v48 }
 0x9a5   :  { %v2058_v6 = vpop.xlane.xlu0 %2057 }
 0x9a6   :  { %v2065_v29 = vsub.f32 %v2053_v27, %v2058_v6  ;;  %v2071_v19 = vmul.f32 1.442695, %v2066_v61  ;;  %v1898_v61 = vmul.f32 %v1868_v25, %v9708_v55  ;;  %v1897_v6 = vmul.f32 %v10075_v59, %v9717_v62 }
 0x9a7   :  { %v2064_v51 = vpop.xlane.xlu1 %2063 }
 0x9a8   :  { %v2069_v42 = vmul.f32 1.442695, %v2065_v29  ;;  %v2068_v8 = vsub.f32 %v2056_v9, %v2064_v51  ;;  %v1905_v9 = vmul.f32 %v10075_v59, %v9636_v16  ;;  %v1896_v29 = vmul.f32 %v10078_v60, %v9726_v5 }
 0x9a9   :  { %v2062_v11 = vpop.xlane.xlu0 %2061  ;;  %v1894_v51 = vmul.f32 %v1868_v25, %v9743_v22 }
 0x9aa   :  { %8746 = vpow2.f32 %v2069_v42  ;;  %v2067_v14 = vsub.f32 %v2055_v23, %v2062_v11  ;;  %v2075_v56 = vmul.f32 1.442695, %v2068_v8  ;;  %v1893_v42 = vmul.f32 %v10075_v59, %v9752_v32  ;;  %v6951_v11 = vld [vmem:[%s9224_s30 + $0x30] sm:$0xff] }
 0x9ab   :  { %8748 = vpow2.f32 %v2071_v19  ;;  %v1895_v19 = vmul.f32 %v10084_v57, %v9734_v12  ;;  %v1892_v8 = vmul.f32 %v10078_v60, %v9761_v37  ;;  %v6962_v60 = vld [vmem:[%s9234_s12 + $0x58] sm:$0xff] }
 0x9ac   :  { %v2073_v30 = vmul.f32 1.442695, %v2067_v14  ;;  %v6949_v14 = vld [vmem:[%s9224_s30 + $0x20] sm:$0xff] }
 0x9ae   :  { %8750 = vpow2.f32 %v2073_v30  ;;  %v6966_v30 = vld [vmem:[%s9234_s12 + $0x78] sm:$0xff] }
 0x9af   :  { %8752 = vpow2.f32 %v2075_v56  ;;  %v1903_v56 = vmul.f32 %v10084_v57, %v9664_v35 }
 0x9b7   :  { %v8747_v47 = vpop.eup %8746 }
 0x9b8   :  { %v8749_v1 = vpop.eup %8748  ;;  %8086 = vmatprep.mubr.f32.mxu0 %v8747_v47 }
 0x9b9   :  { %8087 = vmatmul.mubr.f32.vlgmr.msra.gmra.mxu0 %v8749_v1 }
 0x9ba   :  { %8093 = vmatpush3.msra.mxu0 %v10088_v4  ;;  %v1901_v4 = vmul.f32 %v10075_v59, %v9682_v43  ;;  %v6950_v59 = vld [vmem:[%s9224_s30 + $0x28] sm:$0xff] }
 0x9bb   :  { %v8751_v27 = vpop.eup %8750  ;;  %8094 = vmatprep.subr.mxu0 %v1906_v46 }
 0x9bc   :  { %v8753_v23 = vpop.eup %8752  ;;  %8095 = vmatpush3.msra.mxu0 %v1906_v46  ;;  %8089 = vmatprep.mubr.f32.mxu0 %v8751_v27 }
 0x9bd   :  { %8096 = vmatprep.subr.mxu0 %v1905_v9  ;;  %8090 = vmatmul.mubr.f32.gmra.mxu0 %v8753_v23 }
 0x9be   :  { %8097 = vmatpush3.msra.mxu0 %v1905_v9  ;;  %8124 = vmatprep.mubr.f32.mxu0 %v8747_v47  ;;  %v1899_v47 = vmul.f32 %v10084_v57, %v9699_v52  ;;  %v6952_v57 = vld [vmem:[%s9224_s30 + $0x38] sm:$0xff] }
 0x9bf   :  { %8098 = vmatprep.subr.mxu0 %v1904_v49  ;;  %8130 = vmatprep.subr.mxu1 %v6952_v57 }
 0x9c0   :  { %8099 = vmatpush3.msra.mxu0 %v1904_v49  ;;  %8131 = vmatpush3.msra.mxu1 %v6952_v57 }
 0x9c1   :  { %8100 = vmatprep.subr.mxu0 %v1903_v56  ;;  %8132 = vmatprep.subr.mxu1 %v6951_v11 }
 0x9c2   :  { %8101 = vmatpush3.msra.mxu0 %v1903_v56  ;;  %8133 = vmatpush3.msra.mxu1 %v6951_v11  ;;  %v6960_v11 = vld [vmem:[%s9234_s12 + $0x48] sm:$0xff] }
 0x9c3   :  { %8102 = vmatprep.subr.mxu0 %v1902_v2  ;;  %8134 = vmatprep.subr.mxu1 %v6950_v59 }
 0x9c4   :  { %8103 = vmatpush3.msra.mxu0 %v1902_v2  ;;  %8135 = vmatpush3.msra.mxu1 %v6950_v59 }
 0x9c5   :  { %8104 = vmatprep.subr.mxu0 %v1901_v4  ;;  %8136 = vmatprep.subr.mxu1 %v6949_v14 }
 0x9c6   :  { %8105 = vmatpush3.msra.mxu0 %v1901_v4  ;;  %8137 = vmatpush3.msra.mxu1 %v6949_v14  ;;  %v6959_v14 = vld [vmem:[%s9234_s12 + $0x40] sm:$0xff] }
 0x9c7   :  { %8106 = vmatprep.subr.mxu0 %v1900_v21  ;;  %8158 = vmatprep.subr.mxu1 %v6962_v60 }
 0x9c8   :  { %8107 = vmatpush3.msra.mxu0 %v1900_v21 }
 0x9c9   :  { %8108 = vmatprep.subr.mxu0 %v1899_v47 }
 0x9ca   :  { %8109 = vmatpush3.msra.mxu0 %v1899_v47 }
 0x9cb   :  { %8110 = vmatprep.subr.mxu0 %v1898_v61 }
 0x9cc   :  { %8111 = vmatpush3.msra.mxu0 %v1898_v61 }
 0x9cd   :  { %8112 = vmatprep.subr.mxu0 %v1897_v6 }
 0x9ce   :  { %8113 = vmatpush3.msra.mxu0 %v1897_v6 }
 0x9cf   :  { %8114 = vmatprep.subr.mxu0 %v1896_v29 }
 0x9d0   :  { %8115 = vmatpush3.msra.mxu0 %v1896_v29 }
 0x9d1   :  { %8116 = vmatprep.subr.mxu0 %v1895_v19 }
 0x9d2   :  { %8117 = vmatpush3.msra.mxu0 %v1895_v19  ;;  %v6961_v19 = vld [vmem:[%s9234_s12 + $0x50] sm:$0xff] }
 0x9d3   :  { %8118 = vmatprep.subr.mxu0 %v1894_v51 }
 0x9d4   :  { %8119 = vmatpush3.msra.mxu0 %v1894_v51 }
 0x9d5   :  { %8120 = vmatprep.subr.mxu0 %v1893_v42 }
 0x9d6   :  { %8121 = vmatpush3.msra.mxu0 %v1893_v42 }
 0x9d7   :  { %8122 = vmatprep.subr.mxu0 %v1892_v8 }
 0x9d8   :  { %8123 = vmatpush3.msra.mxu0 %v1892_v8 }
 0x9d9   :  { %8125 = vmatmul.mubr.f32.vlgmr.msra.gmra.mxu0 %v8749_v1  ;;  %8144 = vmatprep.subr.mxu0 %v6966_v30 }
 0x9da   :  { %8127 = vmatprep.mubr.f32.mxu0 %v8751_v27  ;;  %8145 = vmatpush3.msra.mxu0 %v6966_v30  ;;  %v6964_v30 = vld [vmem:[%s9234_s12 + $0x68] sm:$0xff] }
 0x9dd   :  { %8128 = vmatmul.mubr.f32.gmra.mxu0 %v8753_v23 }
 0xa79   :  { %v8088_v1 = vpop.f32.mrf.mxu0 }
 0xa7a   :  { %v2248_v9 = vmax.f32 %v8088_v1, 1e-30  ;;  %v6963_v1 = vld [vmem:[%s9234_s12 + $0x60] sm:$0xff] }
 0xa7b   :  { %v2143_v25 = vpop.f32.mrf.mxu0 }
 0xa7c   :  { %v2247_v27 = vmax.f32 %v2143_v25, 1e-30  ;;  %v6984_v25 = vld [vmem:[%s11494_s0 + $0x78] sm:$0xff] }
 0xa7d   :  { %v8091_v46 = vpop.f32.mrf.mxu0 }
 0xa7e   :  { %8754 = vrcp.f32 %v2247_v27  ;;  %v2250_v56 = vmax.f32 %v8091_v46, 1e-30  ;;  %v6954_v27 = vld [vmem:[%s11496_s5 + $0x1] ss:$0 sm:$0xff] }
 0xa7f   :  { %v2153_v23 = vpop.f32.mrf.mxu0  ;;  %8756 = vrcp.f32 %v2248_v9 }
 0xa80   :  { %v2249_v49 = vmax.f32 %v2153_v23, 1e-30 }
 0xa82   :  { %8758 = vrcp.f32 %v2249_v49 }
 0xa83   :  { %8760 = vrcp.f32 %v2250_v56 }
 0xa8b   :  { %v8755_v4 = vpop.eup %8754 }
 0xa8c   :  { %v8757_v47 = vpop.eup %8756 }
 0xa8f   :  { %v8759_v51 = vpop.eup %8758 }
 0xa90   :  { %v8761_v8 = vpop.eup %8760 }
 0xa99   :  { %v8126_v2 = vpop.f32.mrf.mxu0 }
 0xa9a   :  { %v2254_v6 = vmul.f32 %v8757_v47, %v8126_v2  ;;  %v6983_v2 = vld [vmem:[%s11494_s0 + $0x70] sm:$0xff]  ;;  %v6982_v47 = vld [vmem:[%s11494_s0 + $0x68] sm:$0xff] }
 0xa9b   :  { %v2228_v21 = vpop.f32.mrf.mxu0 }
 0xa9c   :  { %v2252_v61 = vmul.f32 %v8755_v4, %v2228_v21 }
 0xa9d   :  { %v8129_v29 = vpop.f32.mrf.mxu0 }
 0xa9e   :  { %8138 = vmatprep.mubr.msk.f32.mxu1 %vm11577_vm11, %v2252_v61  ;;  %v2258_v59 = vmul.f32 %v8761_v8, %v8129_v29  ;;  %vm11586_vm11 = vmmov %vm11580_vm1  ;;  %v6980_v29 = vld [vmem:[%s11494_s0 + $0x58] sm:$0xff] }
 0xa9f   :  { %v2238_v42 = vpop.f32.mrf.mxu0  ;;  %8139 = vmatmul.mubr.msk.f32.vlgmr.msra.gmra.mxu1 %vm11578_vm15, %v2254_v6  ;;  %vm11587_vm15 = vmmov %vm11580_vm1  ;;  %v6981_v6 = vld [vmem:[%s11494_s0 + $0x60] sm:$0xff] }
 0xaa0   :  { %v2256_v57 = vmul.f32 %v8759_v51, %v2238_v42  ;;  %8159 = vmatpush3.msra.mxu1 %v6962_v60  ;;  %v6965_v60 = vld [vmem:[%s9234_s12 + $0x70] sm:$0xff]  ;;  %v6978_v51 = vld [vmem:[%s11494_s0 + $0x48] sm:$0xff]  ;;  %v6977_v42 = vld [vmem:[%s11494_s0 + $0x40] sm:$0xff] }
 0xaa1   :  { %8160 = vmatprep.subr.mxu1 %v6961_v19  ;;  %8146 = vmatprep.subr.mxu0 %v6965_v60 }
 0xaa2   :  { %8141 = vmatprep.mubr.msk.f32.mxu1 %vm11579_vm9, %v2256_v57  ;;  %8161 = vmatpush3.msra.mxu1 %v6961_v19  ;;  %vm11588_vm9 = vmmov %vm11580_vm1  ;;  %v6979_v19 = vld [vmem:[%s11494_s0 + $0x50] sm:$0xff] }
 0xaa3   :  { %8142 = vmatmul.mubr.msk.f32.gmra.mxu1 %vm11580_vm1, %v2258_v59  ;;  %8162 = vmatprep.subr.mxu1 %v6960_v11  ;;  %vm11589_vm1 = vcmask 523264  }
 0xaa4   :  { %8163 = vmatpush3.msra.mxu1 %v6960_v11  ;;  %8166 = vmatprep.mubr.msk.f32.mxu1 %vm11581_vm7, %v9938_v50  ;;  %vm11590_vm7 = vmmov %vm11589_vm1 }
 0xaa5   :  { %8164 = vmatprep.subr.mxu1 %v6959_v14  ;;  %8147 = vmatpush3.msra.mxu0 %v6965_v60 }
 0xaa6   :  { %8165 = vmatpush3.msra.mxu1 %v6959_v14  ;;  %8148 = vmatprep.subr.mxu0 %v6964_v30  ;;  %v6976_v14 = vld [vmem:[%s11502_s9 + $0x1] ss:$0 sm:$0xff] }
 0xaa7   :  { %8167 = vmatmul.mubr.msk.f32.vlgmr.msra.gmra.mxu1 %vm11582_vm14, %v9940_v33  ;;  %8149 = vmatpush3.msra.mxu0 %v6964_v30  ;;  %vm11591_vm14 = vmmov %vm11589_vm1 }
 0xaa8   :  { %8169 = vmatprep.mubr.msk.f32.mxu1 %vm11583_vm6, %v9953_v45  ;;  %8150 = vmatprep.subr.mxu0 %v6963_v1  ;;  %vm11592_vm6 = vmmov %vm11589_vm1 }
 0xaa9   :  { %8151 = vmatpush3.msra.mxu0 %v6963_v1 }
 0xaaa   :  { %8172 = vmatprep.subr.mxu0 %v6984_v25 }
 0xaab   :  { %8170 = vmatmul.mubr.msk.f32.gmra.mxu1 %vm11584_vm13, %v9958_v53  ;;  %vm11593_vm13 = vmmov %vm11588_vm9 }
 0xb5f   :  { %v8140_v46 = vpop.f32.mrf.mxu1 }
 0xb60   :  { %v2356_v49 = vadd.f32 %v8140_v46, %v6954_v27 }
 0xb61   :  { %v2350_v9 = vpop.f32.mrf.mxu1 }
 0xb62   :  { %v2351_v23 = vadd.f32 %v6954_v27, %v2350_v9 }
 0xb63   :  { %v8143_v56 = vpop.f32.mrf.mxu1 }
 0xb64   :  { %8152 = vmatprep.mubr.msk.f32.mxu0 %vm11585_vm10, %v2351_v23  ;;  %v2366_v61 = vadd.f32 %v8143_v56, %v6954_v27  ;;  %vm11594_vm10 = vmmov %vm11588_vm9 }
 0xb65   :  { %v2360_v4 = vpop.f32.mrf.mxu1  ;;  %8153 = vmatmul.mubr.msk.f32.vlgmr.msra.gmra.mxu0 %vm11586_vm11, %v2356_v49  ;;  %vm11595_vm11 = vmmov %vm11588_vm9 }
 0xb66   :  { %v2361_v21 = vadd.f32 %v6954_v27, %v2360_v4  ;;  %8173 = vmatpush3.msra.mxu0 %v6984_v25 }
 0xb67   :  { %8174 = vmatprep.subr.mxu0 %v6983_v2  ;;  %v8168_v8 = vpop.f32.mrf.mxu1 }
 0xb68   :  { %8155 = vmatprep.mubr.msk.f32.mxu0 %vm11587_vm15, %v2361_v21  ;;  %8175 = vmatpush3.msra.mxu0 %v6983_v2  ;;  %vm11596_vm15 = vmmov %vm11588_vm9 }
 0xb69   :  { %8156 = vmatmul.mubr.msk.f32.gmra.mxu0 %vm11588_vm9, %v2366_v61  ;;  %8176 = vmatprep.subr.mxu0 %v6982_v47  ;;  %v2541_v57 = vpop.f32.mrf.mxu1 }
 0xb6a   :  { %8177 = vmatpush3.msra.mxu0 %v6982_v47 }
 0xb6b   :  { %8178 = vmatprep.subr.mxu0 %v6981_v6  ;;  %v8171_v60 = vpop.f32.mrf.mxu1 }
 0xb6c   :  { %8179 = vmatpush3.msra.mxu0 %v6981_v6 }
 0xb6d   :  { %8180 = vmatprep.subr.mxu0 %v6980_v29  ;;  %v2551_v23 = vpop.f32.mrf.mxu1 }
 0xb6e   :  { %8181 = vmatpush3.msra.mxu0 %v6980_v29  ;;  %v6994_v29 = vld [vmem:[%s9194_s29 + $0x58] sm:$0xff] }
 0xb6f   :  { %8182 = vmatprep.subr.mxu0 %v6979_v19  ;;  %8194 = vmatprep.subr.mxu1 %v6994_v29 }
 0xb70   :  { %8183 = vmatpush3.msra.mxu0 %v6979_v19  ;;  %v7014_v19 = vld [vmem:[%s9204_s8 + $0x58] sm:$0xff]  ;;  %8195 = vmatpush3.msra.mxu1 %v6994_v29 }
 0xb71   :  { %8184 = vmatprep.subr.mxu0 %v6978_v51 }
 0xb72   :  { %8185 = vmatpush3.msra.mxu0 %v6978_v51  ;;  %v6993_v51 = vld [vmem:[%s9194_s29 + $0x50] sm:$0xff] }
 0xb73   :  { %8186 = vmatprep.subr.mxu0 %v6977_v42  ;;  %8196 = vmatprep.subr.mxu1 %v6993_v51 }
 0xb74   :  { %8187 = vmatpush3.msra.mxu0 %v6977_v42  ;;  %v7013_v42 = vld [vmem:[%s9204_s8 + $0x50] sm:$0xff]  ;;  %8197 = vmatpush3.msra.mxu1 %v6993_v51 }
 0xb75   :  { %8222 = vmatprep.subr.mxu0 %v7014_v19 }
 0xc25   :  { %v8154_v11 = vpop.f32.mrf.mxu0 }
 0xc26   :  { %v2547_v59 = vadd.f32 %v8168_v8, %v8154_v11  ;;  %v6992_v8 = vld [vmem:[%s9194_s29 + $0x48] sm:$0xff]  ;;  %v6991_v11 = vld [vmem:[%s9194_s29 + $0x40] sm:$0xff] }
 0xc27   :  { %v2456_v30 = vpop.f32.mrf.mxu0  ;;  %8198 = vmatprep.subr.mxu1 %v6992_v8 }
 0xc28   :  { %v2542_v1 = vadd.f32 %v2541_v57, %v2456_v30  ;;  %v2569_v25 = vadd.f32 %v6976_v14, %v2547_v59  ;;  %v7012_v57 = vld [vmem:[%s9204_s8 + $0x48] sm:$0xff]  ;;  %8199 = vmatpush3.msra.mxu1 %v6992_v8  ;;  %v7011_v59 = vld [vmem:[%s9204_s8 + $0x40] sm:$0xff] }
 0xc29   :  { %v8157_v46 = vpop.f32.mrf.mxu0  ;;  %8200 = vmatprep.subr.mxu1 %v6991_v11 }
 0xc2a   :  { %v2568_v27 = vadd.f32 %v6976_v14, %v2542_v1  ;;  %v2557_v9 = vadd.f32 %v8171_v60, %v8157_v46  ;;  %v2573_v4 = vmax.f32 %v2569_v25, 0.0  ;;  %8201 = vmatpush3.msra.mxu1 %v6991_v11  ;;  %v6990_v25 = vld [vmem:[%s11503_s13 + $0x1] ss:$0 sm:$0xff] }
 0xc2b   :  { %v2466_v49 = vpop.f32.mrf.mxu0 }
 0xc2c   :  { %v2572_v56 = vmax.f32 %v2568_v27, 0.0  ;;  %v2552_v2 = vadd.f32 %v2551_v23, %v2466_v49  ;;  %v2571_v21 = vadd.f32 %v6976_v14, %v2557_v9 }
 0xc2e   :  { %v2570_v47 = vadd.f32 %v6976_v14, %v2552_v2  ;;  %8188 = vmatprep.mubr.msk.f32.mxu0 %vm11589_vm1, %v2572_v56  ;;  %v2575_v6 = vmax.f32 %v2571_v21, 0.0  ;;  %v7004_v14 = vld [vmem:[%s9199_s3 + $0x58] sm:$0xff]  ;;  %vm11597_vm1 = vmmov %vm11588_vm9  ;;  %v6996_v21 = vld [vmem:[%s9209_s14 + $0x2] ss:$0 sm:$0xff]  ;;  %s11756_s14 = sld [smem:[#allocation19_spill]] }
 0xc2f   :  { %8189 = vmatmul.mubr.msk.f32.vlgmr.msra.gmra.mxu0 %vm11590_vm7, %v2573_v4  ;;  %8208 = vmatprep.subr.mxu1 %v7004_v14  ;;  %vm11598_vm7 = vmmov %vm11597_vm1  ;;  %v7001_v4 = vld [vmem:[%s9199_s3 + $0x40] sm:$0xff] }
 0xc30   :  { %v2574_v61 = vmax.f32 %v2570_v47, 0.0  ;;  %8223 = vmatpush3.msra.mxu0 %v7014_v19  ;;  %v10410_v47 = vld [vmem:[%s9219_s24 + $0x2] ss:$0 sm:$0xff]  ;;  %s11767_s24 = sld [smem:[#allocation20_spill]] }
 0xc31   :  { %8224 = vmatprep.subr.mxu0 %v7013_v42 }
 0xc32   :  { %8191 = vmatprep.mubr.msk.f32.mxu0 %vm11591_vm14, %v2574_v61  ;;  %8225 = vmatpush3.msra.mxu0 %v7013_v42  ;;  %vm11599_vm14 = vmmov %vm11597_vm1 }
 0xc33   :  { %8192 = vmatmul.mubr.msk.f32.gmra.mxu0 %vm11592_vm6, %v2575_v6  ;;  %8226 = vmatprep.subr.mxu0 %v7012_v57  ;;  %vm11600_vm6 = vmmov %vm11597_vm1 }
 0xc34   :  { %8227 = vmatpush3.msra.mxu0 %v7012_v57 }
 0xc35   :  { %8228 = vmatprep.subr.mxu0 %v7011_v59 }
 0xc36   :  { %8229 = vmatpush3.msra.mxu0 %v7011_v59 }
 0xc37   :  { %8274 = vmatprep.subr.msk.mxu0 %vm11505_vm0, %v11504_v20 }
 0xcef   :  { %v8190_v60 = vpop.f32.mrf.mxu0 }
 0xcf0   :  { %v2683_v30 = vadd.f32 %v8190_v60, %v9940_v33  ;;  %v7003_v33 = vld [vmem:[%s9199_s3 + $0x50] sm:$0xff] }
 0xcf1   :  { %v2663_v1 = vpop.f32.mrf.mxu0 }
 0xcf2   :  { %v2682_v46 = vadd.f32 %v2663_v1, %v9938_v50  ;;  %v10280_v23 = vadd.f32 %v6990_v25, %v2683_v30 }
 0xcf3   :  { %v8193_v27 = vpop.f32.mrf.mxu0 }
 0xcf4   :  { %v10278_v9 = vadd.f32 %v6990_v25, %v2682_v46  ;;  %v2685_v49 = vadd.f32 %v8193_v27, %v9958_v53  ;;  %v7002_v53 = vld [vmem:[%s9199_s3 + $0x48] sm:$0xff] }
 0xcf5   :  { %v2673_v56 = vpop.f32.mrf.mxu0 }
 0xcf6   :  { %v2684_v2 = vadd.f32 %v2673_v56, %v9953_v45  ;;  %8202 = vmatprep.mubr.msk.f32.mxu1 %vm11593_vm13, %v10278_v9  ;;  %8230 = vmatprep.mubr.msk.f32.mxu0 %vm11594_vm10, %v10278_v9  ;;  %v10298_v45 = vadd.f32 %v6990_v25, %v2685_v49  ;;  %vm11601_vm13 = vmmov %vm11597_vm1  ;;  %v7006_v49 = vld [vmem:[%s9214_s19 + $0x2] ss:$0 sm:$0xff] }
 0xcf7   :  { %8203 = vmatmul.mubr.msk.f32.vlgmr.msra.gmra.mxu1 %vm11595_vm11, %v10280_v23  ;;  %8231 = vmatmul.mubr.msk.f32.vlgmr.msra.gmra.mxu0 %vm11596_vm15, %v10280_v23  ;;  %vm11602_vm10 = vmmov %vm11597_vm1  ;;  %vm11603_vm11 = vnez %v11409_v10  ;;  %vm11604_vm15 = vnez %v11411_v13 }
 0xcf8   :  { %v10293_v50 = vadd.f32 %v6990_v25, %v2684_v2  ;;  %8209 = vmatpush3.msra.mxu1 %v7004_v14  ;;  %8275 = vmatpush3.msk.msra.mxu0 %vm11505_vm0, %v11504_v20 }
 0xcf9   :  { %8210 = vmatprep.subr.mxu1 %v7003_v33  ;;  %8276 = vmatprep.subr.msk.mxu0 %vm11509_vm5, %v11504_v20 }
 0xcfa   :  { %8205 = vmatprep.mubr.msk.f32.mxu1 %vm11588_vm9, %v10293_v50  ;;  %8211 = vmatpush3.msra.mxu1 %v7003_v33  ;;  %vm11605_vm9 = vmmov %vm11597_vm1 }
 0xcfb   :  { %8233 = vmatprep.mubr.msk.f32.mxu0 %vm11597_vm1, %v10293_v50  ;;  %8206 = vmatmul.mubr.msk.f32.gmra.mxu1 %vm11598_vm7, %v10298_v45  ;;  %vm11606_vm1 = vnez %v11413_v15  ;;  %vm11607_vm7 = vnez %v11415_v17 }
 0xcfc   :  { %8212 = vmatprep.subr.mxu1 %v7002_v53  ;;  %8234 = vmatmul.mubr.msk.f32.gmra.mxu0 %vm11599_vm14, %v10298_v45  ;;  %vm11608_vm14 = vnez %v11417_v18 }
 0xcfd   :  { %8213 = vmatpush3.msra.mxu1 %v7002_v53  ;;  %8216 = vmatprep.mubr.msk.f32.mxu1 %vm11600_vm6, %v10278_v9  ;;  %vm11609_vm6 = vnez %v11419_v24 }
 0xcfe   :  { %8214 = vmatprep.subr.mxu1 %v7001_v4  ;;  %8277 = vmatpush3.msk.msra.mxu0 %vm11509_vm5, %v11504_v20 }
 0xcff   :  { %8215 = vmatpush3.msra.mxu1 %v7001_v4  ;;  %8278 = vmatprep.subr.msk.mxu0 %vm9416_vm4, %v11504_v20 }
 0xd00   :  { %8217 = vmatmul.mubr.msk.f32.vlgmr.msra.gmra.mxu1 %vm11601_vm13, %v10280_v23  ;;  %8279 = vmatpush3.msk.msra.mxu0 %vm9416_vm4, %v11504_v20  ;;  %vm11610_vm13 = vnez %v11421_v28 }
 0xd01   :  { %8219 = vmatprep.mubr.msk.f32.mxu1 %vm11602_vm10, %v10293_v50  ;;  %8280 = vmatprep.subr.msk.mxu0 %vm11603_vm11, %v11504_v20  ;;  %vm11611_vm10 = vnez %v11423_v31 }
 0xd02   :  { %8281 = vmatpush3.msk.msra.mxu0 %vm11603_vm11, %v11504_v20 }
 0xd03   :  { %8282 = vmatprep.subr.msk.mxu0 %vm11604_vm15, %v11504_v20 }
 0xd04   :  { %8220 = vmatmul.mubr.msk.f32.gmra.mxu1 %vm11605_vm9, %v10298_v45  ;;  %8283 = vmatpush3.msk.msra.mxu0 %vm11604_vm15, %v11504_v20  ;;  %vm11612_vm9 = vnez %v11426_v34 }
 0xd05   :  { %8284 = vmatprep.subr.msk.mxu0 %vm11606_vm1, %v11504_v20 }
 0xd06   :  { %8285 = vmatpush3.msk.msra.mxu0 %vm11606_vm1, %v11504_v20 }
 0xd07   :  { %8286 = vmatprep.subr.msk.mxu0 %vm11607_vm7, %v11504_v20 }
 0xd08   :  { %8287 = vmatpush3.msk.msra.mxu0 %vm11607_vm7, %v11504_v20 }
 0xd09   :  { %8288 = vmatprep.subr.msk.mxu0 %vm11608_vm14, %v11504_v20 }
 0xd0a   :  { %8289 = vmatpush3.msk.msra.mxu0 %vm11608_vm14, %v11504_v20 }
 0xd0b   :  { %8290 = vmatprep.subr.msk.mxu0 %vm11609_vm6, %v11504_v20 }
 0xd0c   :  { %8291 = vmatpush3.msk.msra.mxu0 %vm11609_vm6, %v11504_v20 }
 0xd0d   :  { %8292 = vmatprep.subr.msk.mxu0 %vm11610_vm13, %v11504_v20 }
 0xd0e   :  { %8293 = vmatpush3.msk.msra.mxu0 %vm11610_vm13, %v11504_v20 }
 0xd0f   :  { %8294 = vmatprep.subr.msk.mxu0 %vm11611_vm10, %v11504_v20 }
 0xd10   :  { %8295 = vmatpush3.msk.msra.mxu0 %vm11611_vm10, %v11504_v20 }
 0xd11   :  { %8296 = vmatprep.subr.msk.mxu0 %vm11612_vm9, %v11504_v20 }
 0xd12   :  { %8297 = vmatpush3.msk.msra.mxu0 %vm11612_vm9, %v11504_v20 }
 0xd13   :  { %8298 = vmatprep.subr.msk.mxu0 %vm11613_vm8, %v11504_v20 }
 0xd14   :  { %8299 = vmatpush3.msk.msra.mxu0 %vm11613_vm8, %v11504_v20 }
 0xd15   :  { %8300 = vmatprep.subr.msk.mxu0 %vm11614_vm3, %v11504_v20 }
 0xd16   :  { %8301 = vmatpush3.msk.msra.mxu0 %vm11614_vm3, %v11504_v20 }
 0xd17   :  { %8302 = vmatprep.subr.msk.mxu0 %vm11615_vm12, %v11504_v20 }
 0xd18   :  { %8303 = vmatpush3.msk.msra.mxu0 %vm11615_vm12, %v11504_v20 }
 0xd19   :  { %8304 = vmatprep.subr.msk.mxu0 %vm11616_vm2, %v11504_v20 }
 0xd1a   :  { %8305 = vmatpush3.msk.msra.mxu0 %vm11616_vm2, %v11504_v20  ;;  %vm11617_vm2 = vcmask 261120  }
 0xd1b   :  { %vm11618_vm12 = vmmov %vm11617_vm2 }
 0xd1c   :  { %vm11619_vm3 = vmmov %vm11617_vm2 }
 0xd1d   :  { %vm11620_vm8 = vmmov %vm11617_vm2 }
 0xd1e   :  { %vm11621_vm9 = vmmov %vm11617_vm2 }
 0xd1f   :  { %vm11622_vm10 = vmmov %vm11617_vm2 }
 0xd20   :  { %vm11623_vm13 = vmmov %vm11617_vm2 }
 0xd21   :  { %vm11626_vm6 = vmmov %vm11617_vm2 }
 0xdb7   :  { %v8204_v61 = vpop.f32.mrf.mxu1  ;;  %v8232_v6 = vpop.f32.mrf.mxu0 }
 0xdb8   :  { %v10412_v29 = vadd.f32 %v8204_v61, %v6996_v21  ;;  %v10415_v19 = vadd.f32 %v8232_v6, %v10410_v47 }
 0xdb9   :  { %v2789_v51 = vpop.f32.mrf.mxu1  ;;  %v2985_v42 = vpop.f32.mrf.mxu0 }
 0xdba   :  { %v2790_v8 = vadd.f32 %v6996_v21, %v2789_v51  ;;  %v10418_v57 = vadd.f32 %v10410_v47, %v2985_v42 }
 0xdbb   :  { %v8207_v11 = vpop.f32.mrf.mxu1 }
 0xdbc   :  { %v10420_v59 = vadd.f32 %v8207_v11, %v6996_v21  ;;  %v8235_v14 = vpop.f32.mrf.mxu0  ;;  %8268 = vmatprep.mubr.msk.f32.mxu1 %vm11617_vm2, %v2790_v8 }
 0xdbd   :  { %v10424_v60 = vadd.f32 %v8235_v14, %v10410_v47  ;;  %v2799_v30 = vpop.f32.mrf.mxu1 }
 0xdbe   :  { %v2800_v1 = vadd.f32 %v6996_v21, %v2799_v30 }
 0xdbf   :  { %v10428_v25 = vmul.f32 %v10424_v60, %v9603_v58 }
 0xdc0   :  { %v8218_v46 = vpop.f32.mrf.mxu1 }
 0xdc1   :  { %8312 = vmatprep.subr.mxu0 %v10428_v25  ;;  %v2893_v61 = vadd.f32 %v8218_v46, %v7006_v49 }
 0xdc2   :  { %v2887_v27 = vpop.f32.mrf.mxu1 }
 0xdc3   :  { %v2888_v6 = vadd.f32 %v7006_v49, %v2887_v27  ;;  %v3017_v51 = vmul.f32 %v2893_v61, %v9636_v16  ;;  %v3013_v14 = vmul.f32 %v2893_v61, %v9682_v43 }
 0xdc4   :  { %v8221_v56 = vpop.f32.mrf.mxu1 }
 0xdc5   :  { %v2903_v2 = vadd.f32 %v8221_v56, %v7006_v49  ;;  %v3016_v42 = vmul.f32 %v2888_v6, %v9651_v26  ;;  %v3012_v30 = vmul.f32 %v2888_v6, %v9691_v48  ;;  %v3008_v56 = vmul.f32 %v2888_v6, %v9726_v5 }
 0xdc6   :  { %v2897_v33 = vpop.f32.mrf.mxu1 }
 0xdc7   :  { %v2898_v53 = vadd.f32 %v7006_v49, %v2897_v33  ;;  %v3019_v4 = vmul.f32 %v2903_v2, %v9603_v58  ;;  %v3015_v8 = vmul.f32 %v2903_v2, %v9664_v35  ;;  %v3011_v46 = vmul.f32 %v2903_v2, %v9699_v52 }
 0xdc8   :  { %v3009_v49 = vmul.f32 %v2893_v61, %v9717_v62  ;;  %v3007_v33 = vmul.f32 %v2903_v2, %v9734_v12 }
 0xdc9   :  { %8236 = vmatprep.subr.msk.mxu1 %vm11617_vm2, %v3019_v4  ;;  %v3018_v21 = vmul.f32 %v2898_v53, %v9613_v63  ;;  %v3014_v11 = vmul.f32 %v2898_v53, %v9673_v39  ;;  %v3010_v27 = vmul.f32 %v2898_v53, %v9708_v55 }
 0xdca   :  { %8237 = vmatpush3.xpose.msk.msra.mxu1 %vm11618_vm12, %v3019_v4  ;;  %vm11624_vm12 = vmmov %vm11617_vm2  ;;  %v3006_v4 = vmul.f32 %v2898_v53, %v9743_v22  ;;  %v11648_v53 = vld [vmem:[#allocation29_spill] sm:$0xff] }
 0xdcb   :  { %8238 = vmatprep.subr.msk.mxu1 %vm11619_vm3, %v3018_v21  ;;  %vm11625_vm3 = vmmov %vm11617_vm2 }
 0xdce   :  { %8239 = vmatpush3.xpose.msk.msra.mxu1 %vm11620_vm8, %v3018_v21  ;;  %vm11627_vm8 = vmmov %vm11617_vm2  ;;  %v3005_v21 = vmul.f32 %v2893_v61, %v9752_v32 }
 0xdcf   :  { %8240 = vmatprep.subr.msk.mxu1 %vm11621_vm9, %v3017_v51  ;;  %vm11628_vm9 = vmmov %vm11617_vm2 }
 0xdd2   :  { %8241 = vmatpush3.xpose.msk.msra.mxu1 %vm11622_vm10, %v3017_v51  ;;  %vm11630_vm10 = vmmov %vm11617_vm2  ;;  %v3004_v51 = vmul.f32 %v2888_v6, %v9761_v37 }
 0xdd3   :  { %8242 = vmatprep.subr.msk.mxu1 %vm11623_vm13, %v3016_v42  ;;  %vm11629_vm13 = vmmov %vm11617_vm2 }
 0xdd6   :  { %8243 = vmatpush3.xpose.msk.msra.mxu1 %vm11617_vm2, %v3016_v42  ;;  %v11650_v42 = vld [vmem:[#allocation31_spill] sm:$0xff] }
 0xdd7   :  { %8244 = vmatprep.subr.msk.mxu1 %vm11624_vm12, %v3015_v8  ;;  %vm11631_vm12 = vmmov %vm11617_vm2 }
 0xdda   :  { %8245 = vmatpush3.xpose.msk.msra.mxu1 %vm11625_vm3, %v3015_v8  ;;  %vm11633_vm3 = vmmov %vm11617_vm2 }
 0xddb   :  { %8246 = vmatprep.subr.msk.mxu1 %vm11626_vm6, %v3014_v11  ;;  %vm11632_vm6 = vmmov %vm11617_vm2 }
 0xdde   :  { %8247 = vmatpush3.xpose.msk.msra.mxu1 %vm11627_vm8, %v3014_v11  ;;  %vm11634_vm8 = vmmov %vm11617_vm2 }
 0xddf   :  { %8248 = vmatprep.subr.msk.mxu1 %vm11628_vm9, %v3013_v14  ;;  %vm11635_vm9 = vmmov %vm11617_vm2 }
 0xde2   :  { %8249 = vmatpush3.xpose.msk.msra.mxu1 %vm11629_vm13, %v3013_v14  ;;  %vm11636_vm13 = vmmov %vm11617_vm2  ;;  %v11652_v14 = vld [vmem:[#allocation32_spill] sm:$0xff] }
 0xde3   :  { %8250 = vmatprep.subr.msk.mxu1 %vm11630_vm10, %v3012_v30  ;;  %vm11637_vm10 = vmmov %vm11617_vm2 }
 0xde6   :  { %8251 = vmatpush3.xpose.msk.msra.mxu1 %vm11617_vm2, %v3012_v30 }
 0xde7   :  { %8252 = vmatprep.subr.msk.mxu1 %vm11631_vm12, %v3011_v46  ;;  %vm11638_vm12 = vmmov %vm11617_vm2 }
 0xdea   :  { %8253 = vmatpush3.xpose.msk.msra.mxu1 %vm11632_vm6, %v3011_v46  ;;  %vm11639_vm6 = vmmov %vm11617_vm2 }
 0xdeb   :  { %8254 = vmatprep.subr.msk.mxu1 %vm11633_vm3, %v3010_v27  ;;  %vm11640_vm3 = vmmov %vm11617_vm2 }
 0xdee   :  { %8255 = vmatpush3.xpose.msk.msra.mxu1 %vm11634_vm8, %v3010_v27  ;;  %vm11641_vm8 = vmmov %vm11617_vm2 }
 0xdef   :  { %8256 = vmatprep.subr.msk.mxu1 %vm11635_vm9, %v3009_v49  ;;  %vm11642_vm9 = vmmov %vm11617_vm2 }
 0xdf2   :  { %8257 = vmatpush3.xpose.msk.msra.mxu1 %vm11636_vm13, %v3009_v49  ;;  %vm11643_vm13 = vmmov %vm11617_vm2 }
 0xdf3   :  { %8258 = vmatprep.subr.msk.mxu1 %vm11637_vm10, %v3008_v56  ;;  %vm11644_vm10 = vmmov %vm11617_vm2 }
 0xdf6   :  { %8259 = vmatpush3.xpose.msk.msra.mxu1 %vm11617_vm2, %v3008_v56 }
 0xdf7   :  { %8260 = vmatprep.subr.msk.mxu1 %vm11638_vm12, %v3007_v33  ;;  %vm11645_vm12 = vmmov %vm11617_vm2 }
 0xdfa   :  { %8261 = vmatpush3.xpose.msk.msra.mxu1 %vm11639_vm6, %v3007_v33  ;;  %vm11646_vm6 = vmmov %vm11617_vm2 }
 0xdfb   :  { %8262 = vmatprep.subr.msk.mxu1 %vm11640_vm3, %v3006_v4  ;;  %vm11647_vm3 = vmmov %vm11617_vm2 }
 0xdfe   :  { %8263 = vmatpush3.xpose.msk.msra.mxu1 %vm11641_vm8, %v3006_v4  ;;  %vm11649_vm8 = vnez %v11648_v53 }
 0xdff   :  { %8264 = vmatprep.subr.msk.mxu1 %vm11642_vm9, %v3005_v21  ;;  %vm11651_vm9 = vnez %v11650_v42 }
 0xe02   :  { %8265 = vmatpush3.xpose.msk.msra.mxu1 %vm11643_vm13, %v3005_v21  ;;  %vm11653_vm13 = vnez %v11652_v14 }
 0xe03   :  { %8266 = vmatprep.subr.msk.mxu1 %vm11644_vm10, %v3004_v51 }
 0xe06   :  { %8267 = vmatpush3.xpose.msk.msra.mxu1 %vm11617_vm2, %v3004_v51 }
 0xe09   :  { %8269 = vmatmul.mubr.msk.f32.vlgmr.msra.gmra.mxu1 %vm11645_vm12, %v10412_v29  ;;  %vm11656_vm12 = vmmov %vm11617_vm2 }
 0xe0a   :  { %8271 = vmatprep.mubr.msk.f32.mxu1 %vm11646_vm6, %v2800_v1  ;;  %v11654_v1 = vld [vmem:[#allocation33_spill] sm:$0xff]  ;;  %vm11657_vm6 = vmmov %vm11617_vm2 }
 0xe0b   :  { %vm11655_vm10 = vnez %v11654_v1 }
 0xe0d   :  { %8272 = vmatmul.mubr.msk.f32.gmra.mxu1 %vm11647_vm3, %v10420_v59  ;;  %vm11658_vm3 = vmmov %vm11617_vm2 }
 0xec9   :  { %v8270_v2 = vpop.f32.mrf.mxu1 }
 0xeca   :  { %v3182_v61 = vsel %vm11649_vm8, %v8270_v2, -1e+30  ;;  %vm11659_vm8 = vmmov %vm11617_vm2 }
 0xecb   :  { %3187 = vmax.xlane.f32.xlu1 %v3182_v61  ;;  %v3162_v6 = vpop.f32.mrf.mxu1 }
 0xecc   :  { %v3181_v8 = vsel %vm11651_vm9, %v3162_v6, -1e+30  ;;  %vm11660_vm9 = vmmov %vm11617_vm2 }
 0xecd   :  { %3185 = vmax.xlane.f32.xlu0 %v3181_v8  ;;  %v8273_v11 = vpop.f32.mrf.mxu1 }
 0xece   :  { %v3184_v30 = vsel %vm11653_vm13, %v8273_v11, -1e+30  ;;  %v2995_v11 = vpop.f32.mrf.mxu0  ;;  %vm11661_vm13 = vmmov %vm11617_vm2 }
 0xecf   :  { %3191 = vmax.xlane.f32.xlu1 %v3184_v30  ;;  %v3172_v29 = vpop.f32.mrf.mxu1  ;;  %v2996_v14 = vadd.f32 %v10410_v47, %v2995_v11  ;;  %v3032_v47 = vmul.f32 %v10418_v57, %v9651_v26  ;;  %v7057_v11 = vld [vmem:[%s9224_s30 + $0x40] sm:$0xff] }
 0xed0   :  { %v3183_v46 = vsel %vm11655_vm10, %v3172_v29, -1e+30  ;;  %vm11662_vm10 = vmmov %vm11617_vm2 }
 0xed1   :  { %3189 = vmax.xlane.f32.xlu0 %v3183_v46 }
 0xf54   :  { %v3188_v59 = vpop.xlane.xlu1 %3187 }
 0xf55   :  { %v3194_v27 = vsub.f32 %v3182_v61, %v3188_v59  ;;  %v3034_v61 = vmul.f32 %v2996_v14, %v9613_v63  ;;  %v3031_v59 = vmul.f32 %v10424_v60, %v9664_v35 }
 0xf56   :  { %v3186_v49 = vpop.xlane.xlu0 %3185 }
 0xf57   :  { %v3193_v56 = vsub.f32 %v3181_v8, %v3186_v49  ;;  %v3199_v33 = vmul.f32 1.442695, %v3194_v27  ;;  %v3029_v27 = vmul.f32 %v10415_v19, %v9682_v43  ;;  %v3028_v49 = vmul.f32 %v10418_v57, %v9691_v48 }
 0xf58   :  { %v3192_v4 = vpop.xlane.xlu1 %3191 }
 0xf59   :  { %v3197_v21 = vmul.f32 1.442695, %v3193_v56  ;;  %v3196_v51 = vsub.f32 %v3184_v30, %v3192_v4  ;;  %v3033_v30 = vmul.f32 %v10415_v19, %v9636_v16  ;;  %v3027_v56 = vmul.f32 %v10424_v60, %v9699_v52 }
 0xf5a   :  { %v3190_v2 = vpop.xlane.xlu0 %3189  ;;  %v3025_v4 = vmul.f32 %v10415_v19, %v9717_v62 }
 0xf5b   :  { %8762 = vpow2.f32 %v3197_v21  ;;  %v3195_v53 = vsub.f32 %v3183_v46, %v3190_v2  ;;  %v3203_v6 = vmul.f32 1.442695, %v3196_v51  ;;  %v3024_v21 = vmul.f32 %v10418_v57, %v9726_v5 }
 0xf5c   :  { %8764 = vpow2.f32 %v3199_v33  ;;  %v3026_v33 = vmul.f32 %v2996_v14, %v9708_v55  ;;  %v3023_v51 = vmul.f32 %v10424_v60, %v9734_v12  ;;  %v3022_v2 = vmul.f32 %v2996_v14, %v9743_v22  ;;  %v7060_v60 = vld [vmem:[%s9224_s30 + $0x58] sm:$0xff] }
 0xf5d   :  { %v3201_v42 = vmul.f32 1.442695, %v3195_v53  ;;  %v3021_v53 = vmul.f32 %v10415_v19, %v9752_v32  ;;  %8350 = vmatprep.subr.mxu1 %v7060_v60  ;;  %v7058_v19 = vld [vmem:[%s9224_s30 + $0x48] sm:$0xff] }
 0xf5e   :  { %8351 = vmatpush3.msra.mxu1 %v7060_v60 }
 0xf5f   :  { %8766 = vpow2.f32 %v3201_v42  ;;  %v7059_v42 = vld [vmem:[%s9224_s30 + $0x50] sm:$0xff] }
 0xf60   :  { %8768 = vpow2.f32 %v3203_v6  ;;  %v3020_v6 = vmul.f32 %v10418_v57, %v9761_v37  ;;  %8352 = vmatprep.subr.mxu1 %v7059_v42  ;;  %v7070_v57 = vld [vmem:[%s9234_s12 + $0x98] sm:$0xff] }
 0xf61   :  { %8353 = vmatpush3.msra.mxu1 %v7059_v42  ;;  %v7068_v42 = vld [vmem:[%s9234_s12 + $0x88] sm:$0xff] }
 0xf62   :  { %8354 = vmatprep.subr.mxu1 %v7058_v19 }
 0xf63   :  { %8355 = vmatpush3.msra.mxu1 %v7058_v19 }
 0xf64   :  { %8356 = vmatprep.subr.mxu1 %v7057_v11 }
 0xf65   :  { %8357 = vmatpush3.msra.mxu1 %v7057_v11  ;;  %v7067_v11 = vld [vmem:[%s9234_s12 + $0x80] sm:$0xff] }
 0xf66   :  { %8378 = vmatprep.subr.mxu1 %v7070_v57 }
 0xf68   :  { %v8763_v29 = vpop.eup %8762 }
 0xf69   :  { %v8765_v1 = vpop.eup %8764  ;;  %8306 = vmatprep.mubr.f32.mxu0 %v8763_v29 }
 0xf6a   :  { %8307 = vmatmul.mubr.f32.vlgmr.msra.gmra.mxu0 %v8765_v1 }
 0xf6b   :  { %8313 = vmatpush3.msra.mxu0 %v10428_v25  ;;  %v3030_v25 = vmul.f32 %v2996_v14, %v9673_v39  ;;  %v7074_v14 = vld [vmem:[%s9234_s12 + $0xb8] sm:$0xff] }
 0xf6c   :  { %v8767_v8 = vpop.eup %8766  ;;  %8314 = vmatprep.subr.mxu0 %v3034_v61 }
 0xf6d   :  { %v8769_v46 = vpop.eup %8768  ;;  %8315 = vmatpush3.msra.mxu0 %v3034_v61  ;;  %8309 = vmatprep.mubr.f32.mxu0 %v8767_v8 }
 0xf6e   :  { %8316 = vmatprep.subr.mxu0 %v3033_v30  ;;  %8310 = vmatmul.mubr.f32.gmra.mxu0 %v8769_v46 }
 0xf6f   :  { %8317 = vmatpush3.msra.mxu0 %v3033_v30  ;;  %8344 = vmatprep.mubr.f32.mxu0 %v8763_v29 }
 0xf70   :  { %8318 = vmatprep.subr.mxu0 %v3032_v47 }
 0xf71   :  { %8319 = vmatpush3.msra.mxu0 %v3032_v47 }
 0xf72   :  { %8320 = vmatprep.subr.mxu0 %v3031_v59 }
 0xf73   :  { %8321 = vmatpush3.msra.mxu0 %v3031_v59 }
 0xf74   :  { %8322 = vmatprep.subr.mxu0 %v3030_v25 }
 0xf75   :  { %8323 = vmatpush3.msra.mxu0 %v3030_v25 }
 0xf76   :  { %8324 = vmatprep.subr.mxu0 %v3029_v27 }
 0xf77   :  { %8325 = vmatpush3.msra.mxu0 %v3029_v27 }
 0xf78   :  { %8326 = vmatprep.subr.mxu0 %v3028_v49 }
 0xf79   :  { %8327 = vmatpush3.msra.mxu0 %v3028_v49 }
 0xf7a   :  { %8328 = vmatprep.subr.mxu0 %v3027_v56 }
 0xf7b   :  { %8329 = vmatpush3.msra.mxu0 %v3027_v56 }
 0xf7c   :  { %8330 = vmatprep.subr.mxu0 %v3026_v33 }
 0xf7d   :  { %8331 = vmatpush3.msra.mxu0 %v3026_v33 }
 0xf7e   :  { %8332 = vmatprep.subr.mxu0 %v3025_v4 }
 0xf7f   :  { %8333 = vmatpush3.msra.mxu0 %v3025_v4 }
 0xf80   :  { %8334 = vmatprep.subr.mxu0 %v3024_v21 }
 0xf81   :  { %8335 = vmatpush3.msra.mxu0 %v3024_v21 }
 0xf82   :  { %8336 = vmatprep.subr.mxu0 %v3023_v51 }
 0xf83   :  { %8337 = vmatpush3.msra.mxu0 %v3023_v51  ;;  %v7069_v51 = vld [vmem:[%s9234_s12 + $0x90] sm:$0xff] }
 0xf84   :  { %8338 = vmatprep.subr.mxu0 %v3022_v2 }
 0xf85   :  { %8339 = vmatpush3.msra.mxu0 %v3022_v2 }
 0xf86   :  { %8340 = vmatprep.subr.mxu0 %v3021_v53 }
 0xf87   :  { %8341 = vmatpush3.msra.mxu0 %v3021_v53 }
 0xf88   :  { %8342 = vmatprep.subr.mxu0 %v3020_v6 }
 0xf89   :  { %8343 = vmatpush3.msra.mxu0 %v3020_v6 }
 0xf8a   :  { %8345 = vmatmul.mubr.f32.vlgmr.msra.gmra.mxu0 %v8765_v1  ;;  %8364 = vmatprep.subr.mxu0 %v7074_v14 }
 0xf8b   :  { %8347 = vmatprep.mubr.f32.mxu0 %v8767_v8  ;;  %8365 = vmatpush3.msra.mxu0 %v7074_v14  ;;  %v7072_v14 = vld [vmem:[%s9234_s12 + $0xa8] sm:$0xff] }
 0xf8e   :  { %8348 = vmatmul.mubr.f32.gmra.mxu0 %v8769_v46 }
0x102a   :  { %v8308_v29 = vpop.f32.mrf.mxu0 }
0x102b   :  { %v3376_v30 = vmax.f32 %v8308_v29, 1e-30  ;;  %v7071_v29 = vld [vmem:[%s9234_s12 + $0xa0] sm:$0xff] }
0x102c   :  { %v3271_v1 = vpop.f32.mrf.mxu0 }
0x102d   :  { %v3375_v8 = vmax.f32 %v3271_v1, 1e-30  ;;  %v7092_v1 = vld [vmem:[%s11494_s0 + $0xb8] sm:$0xff] }
0x102e   :  { %v8311_v61 = vpop.f32.mrf.mxu0 }
0x102f   :  { %8770 = vrcp.f32 %v3375_v8  ;;  %v3378_v59 = vmax.f32 %v8311_v61, 1e-30  ;;  %v7062_v8 = vld [vmem:[%s11496_s5 + $0x2] ss:$0 sm:$0xff] }
0x1030   :  { %v3281_v46 = vpop.f32.mrf.mxu0  ;;  %8772 = vrcp.f32 %v3376_v30 }
0x1031   :  { %v3377_v47 = vmax.f32 %v3281_v46, 1e-30 }
0x1033   :  { %8774 = vrcp.f32 %v3377_v47 }
0x1034   :  { %8776 = vrcp.f32 %v3378_v59 }
0x103c   :  { %v8771_v27 = vpop.eup %8770 }
0x103d   :  { %v8773_v56 = vpop.eup %8772 }
0x1040   :  { %v8775_v2 = vpop.eup %8774 }
0x1041   :  { %v8777_v6 = vpop.eup %8776 }
0x104a   :  { %v8346_v25 = vpop.f32.mrf.mxu0 }
0x104b   :  { %v3382_v4 = vmul.f32 %v8773_v56, %v8346_v25  ;;  %v7091_v25 = vld [vmem:[%s11494_s0 + $0xb0] sm:$0xff]  ;;  %v7090_v56 = vld [vmem:[%s11494_s0 + $0xa8] sm:$0xff] }
0x104c   :  { %v3356_v49 = vpop.f32.mrf.mxu0 }
0x104d   :  { %v3380_v33 = vmul.f32 %v8771_v27, %v3356_v49 }
0x104e   :  { %v8349_v21 = vpop.f32.mrf.mxu0 }
0x104f   :  { %8358 = vmatprep.mubr.msk.f32.mxu1 %vm11617_vm2, %v3380_v33  ;;  %v3386_v19 = vmul.f32 %v8777_v6, %v8349_v21  ;;  %v7088_v21 = vld [vmem:[%s11494_s0 + $0x98] sm:$0xff] }
0x1050   :  { %v3366_v53 = vpop.f32.mrf.mxu0  ;;  %8359 = vmatmul.mubr.msk.f32.vlgmr.msra.gmra.mxu1 %vm11656_vm12, %v3382_v4  ;;  %vm11663_vm12 = vmmov %vm11617_vm2  ;;  %v7089_v4 = vld [vmem:[%s11494_s0 + $0xa0] sm:$0xff] }
0x1051   :  { %v3384_v60 = vmul.f32 %v8775_v2, %v3366_v53  ;;  %8379 = vmatpush3.msra.mxu1 %v7070_v57  ;;  %v7073_v57 = vld [vmem:[%s9234_s12 + $0xb0] sm:$0xff]  ;;  %v7086_v2 = vld [vmem:[%s11494_s0 + $0x88] sm:$0xff]  ;;  %v7085_v53 = vld [vmem:[%s11494_s0 + $0x80] sm:$0xff] }
0x1052   :  { %8380 = vmatprep.subr.mxu1 %v7069_v51  ;;  %8366 = vmatprep.subr.mxu0 %v7073_v57 }
0x1053   :  { %8361 = vmatprep.mubr.msk.f32.mxu1 %vm11657_vm6, %v3384_v60  ;;  %8381 = vmatpush3.msra.mxu1 %v7069_v51  ;;  %vm11664_vm6 = vmmov %vm11617_vm2  ;;  %v7087_v51 = vld [vmem:[%s11494_s0 + $0x90] sm:$0xff] }
0x1054   :  { %8362 = vmatmul.mubr.msk.f32.gmra.mxu1 %vm11658_vm3, %v3386_v19  ;;  %8382 = vmatprep.subr.mxu1 %v7068_v42  ;;  %vm11665_vm3 = vmmov %vm11617_vm2 }
0x1055   :  { %8383 = vmatpush3.msra.mxu1 %v7068_v42  ;;  %8386 = vmatprep.mubr.msk.f32.mxu1 %vm11659_vm8, %v10278_v9  ;;  %vm11666_vm8 = vcmask 523264  }
0x1056   :  { %8384 = vmatprep.subr.mxu1 %v7067_v11  ;;  %8367 = vmatpush3.msra.mxu0 %v7073_v57 }
0x1057   :  { %8385 = vmatpush3.msra.mxu1 %v7067_v11  ;;  %8368 = vmatprep.subr.mxu0 %v7072_v14  ;;  %v7084_v11 = vld [vmem:[%s11502_s9 + $0x2] ss:$0 sm:$0xff] }
0x1058   :  { %8387 = vmatmul.mubr.msk.f32.vlgmr.msra.gmra.mxu1 %vm11660_vm9, %v10280_v23  ;;  %8369 = vmatpush3.msra.mxu0 %v7072_v14  ;;  %vm11667_vm9 = vmmov %vm11666_vm8 }
0x1059   :  { %8389 = vmatprep.mubr.msk.f32.mxu1 %vm11661_vm13, %v10293_v50  ;;  %8370 = vmatprep.subr.mxu0 %v7071_v29  ;;  %vm11668_vm13 = vmmov %vm11666_vm8 }
0x105a   :  { %8371 = vmatpush3.msra.mxu0 %v7071_v29 }
0x105b   :  { %8392 = vmatprep.subr.mxu0 %v7092_v1 }
0x105c   :  { %8390 = vmatmul.mubr.msk.f32.gmra.mxu1 %vm11662_vm10, %v10298_v45  ;;  %vm11669_vm10 = vmmov %vm11666_vm8 }
0x1110   :  { %v8360_v61 = vpop.f32.mrf.mxu1 }
0x1111   :  { %v3484_v47 = vadd.f32 %v8360_v61, %v7062_v8 }
0x1112   :  { %v3478_v30 = vpop.f32.mrf.mxu1 }
0x1113   :  { %v3479_v46 = vadd.f32 %v7062_v8, %v3478_v30 }
0x1114   :  { %v8363_v59 = vpop.f32.mrf.mxu1 }
0x1115   :  { %8372 = vmatprep.mubr.msk.f32.mxu0 %vm11617_vm2, %v3479_v46  ;;  %v3494_v33 = vadd.f32 %v8363_v59, %v7062_v8 }
0x1116   :  { %v3488_v27 = vpop.f32.mrf.mxu1  ;;  %8373 = vmatmul.mubr.msk.f32.vlgmr.msra.gmra.mxu0 %vm11663_vm12, %v3484_v47  ;;  %vm11670_vm12 = vmmov %vm11617_vm2 }
0x1117   :  { %v3489_v49 = vadd.f32 %v7062_v8, %v3488_v27  ;;  %8393 = vmatpush3.msra.mxu0 %v7092_v1 }
0x1118   :  { %8394 = vmatprep.subr.mxu0 %v7091_v25  ;;  %v8388_v6 = vpop.f32.mrf.mxu1 }
0x1119   :  { %8375 = vmatprep.mubr.msk.f32.mxu0 %vm11664_vm6, %v3489_v49  ;;  %8395 = vmatpush3.msra.mxu0 %v7091_v25  ;;  %vm11671_vm6 = vmmov %vm11617_vm2 }
0x111a   :  { %8376 = vmatmul.mubr.msk.f32.gmra.mxu0 %vm11665_vm3, %v3494_v33  ;;  %8396 = vmatprep.subr.mxu0 %v7090_v56  ;;  %v3669_v60 = vpop.f32.mrf.mxu1  ;;  %vm11672_vm3 = vmmov %vm11617_vm2 }
0x111b   :  { %8397 = vmatpush3.msra.mxu0 %v7090_v56 }
0x111c   :  { %8398 = vmatprep.subr.mxu0 %v7089_v4  ;;  %v8391_v57 = vpop.f32.mrf.mxu1 }
0x111d   :  { %8399 = vmatpush3.msra.mxu0 %v7089_v4 }
0x111e   :  { %8400 = vmatprep.subr.mxu0 %v7088_v21  ;;  %v3679_v46 = vpop.f32.mrf.mxu1 }
0x111f   :  { %8401 = vmatpush3.msra.mxu0 %v7088_v21  ;;  %v7102_v21 = vld [vmem:[%s9194_s29 + $0x78] sm:$0xff] }
0x1120   :  { %8402 = vmatprep.subr.mxu0 %v7087_v51  ;;  %8414 = vmatprep.subr.mxu1 %v7102_v21 }
0x1121   :  { %8403 = vmatpush3.msra.mxu0 %v7087_v51  ;;  %v7122_v51 = vld [vmem:[%s9204_s8 + $0x78] sm:$0xff]  ;;  %8415 = vmatpush3.msra.mxu1 %v7102_v21 }
0x1122   :  { %8404 = vmatprep.subr.mxu0 %v7086_v2 }
0x1123   :  { %8405 = vmatpush3.msra.mxu0 %v7086_v2  ;;  %v7101_v2 = vld [vmem:[%s9194_s29 + $0x70] sm:$0xff] }
0x1124   :  { %8406 = vmatprep.subr.mxu0 %v7085_v53  ;;  %8416 = vmatprep.subr.mxu1 %v7101_v2 }
0x1125   :  { %8407 = vmatpush3.msra.mxu0 %v7085_v53  ;;  %v7121_v53 = vld [vmem:[%s9204_s8 + $0x70] sm:$0xff]  ;;  %8417 = vmatpush3.msra.mxu1 %v7101_v2 }
0x1126   :  { %8442 = vmatprep.subr.mxu0 %v7122_v51 }
0x11d6   :  { %v8374_v42 = vpop.f32.mrf.mxu0 }
0x11d7   :  { %v3675_v19 = vadd.f32 %v8388_v6, %v8374_v42  ;;  %v7100_v6 = vld [vmem:[%s9194_s29 + $0x68] sm:$0xff]  ;;  %v7099_v42 = vld [vmem:[%s9194_s29 + $0x60] sm:$0xff]  ;;  %s11749_s29 = sld [smem:[#allocation18_spill]] }
0x11d8   :  { %v3584_v14 = vpop.f32.mrf.mxu0  ;;  %8418 = vmatprep.subr.mxu1 %v7100_v6 }
0x11d9   :  { %v3670_v29 = vadd.f32 %v3669_v60, %v3584_v14  ;;  %v3697_v1 = vadd.f32 %v7084_v11, %v3675_v19  ;;  %v7120_v60 = vld [vmem:[%s9204_s8 + $0x68] sm:$0xff]  ;;  %8419 = vmatpush3.msra.mxu1 %v7100_v6  ;;  %v7119_v19 = vld [vmem:[%s9204_s8 + $0x60] sm:$0xff]  ;;  %s11751_s8 = sld [smem:[#allocation13_spill]] }
0x11da   :  { %v8377_v61 = vpop.f32.mrf.mxu0  ;;  %8420 = vmatprep.subr.mxu1 %v7099_v42 }
0x11db   :  { %v3696_v8 = vadd.f32 %v7084_v11, %v3670_v29  ;;  %v3685_v30 = vadd.f32 %v8391_v57, %v8377_v61  ;;  %v3701_v27 = vmax.f32 %v3697_v1, 0.0  ;;  %8421 = vmatpush3.msra.mxu1 %v7099_v42  ;;  %v7098_v1 = vld [vmem:[%s11503_s13 + $0x2] ss:$0 sm:$0xff] }
0x11dc   :  { %v3594_v47 = vpop.f32.mrf.mxu0 }
0x11dd   :  { %v3700_v59 = vmax.f32 %v3696_v8, 0.0  ;;  %v3680_v25 = vadd.f32 %v3679_v46, %v3594_v47  ;;  %v3699_v49 = vadd.f32 %v7084_v11, %v3685_v30 }
0x11df   :  { %v3698_v56 = vadd.f32 %v7084_v11, %v3680_v25  ;;  %8408 = vmatprep.mubr.msk.f32.mxu0 %vm11666_vm8, %v3700_v59  ;;  %v3703_v4 = vmax.f32 %v3699_v49, 0.0  ;;  %v7112_v11 = vld [vmem:[%s9199_s3 + $0x78] sm:$0xff]  ;;  %vm11673_vm8 = vmmov %vm11617_vm2 }
0x11e0   :  { %8409 = vmatmul.mubr.msk.f32.vlgmr.msra.gmra.mxu0 %vm11667_vm9, %v3701_v27  ;;  %8428 = vmatprep.subr.mxu1 %v7112_v11  ;;  %vm11674_vm9 = vmmov %vm11617_vm2 }
0x11e1   :  { %v3702_v33 = vmax.f32 %v3698_v56, 0.0  ;;  %8443 = vmatpush3.msra.mxu0 %v7122_v51 }
0x11e2   :  { %8444 = vmatprep.subr.mxu0 %v7121_v53 }
0x11e3   :  { %8411 = vmatprep.mubr.msk.f32.mxu0 %vm11668_vm13, %v3702_v33  ;;  %8445 = vmatpush3.msra.mxu0 %v7121_v53  ;;  %vm11675_vm13 = vmmov %vm11617_vm2  ;;  %v7114_v33 = vld [vmem:[%s9214_s19 + $0x3] ss:$0 sm:$0xff]  ;;  %s11757_s19 = sld [smem:[#allocation14_spill]] }
0x11e4   :  { %8412 = vmatmul.mubr.msk.f32.gmra.mxu0 %vm11669_vm10, %v3703_v4  ;;  %8446 = vmatprep.subr.mxu0 %v7120_v60 }
0x11e5   :  { %8447 = vmatpush3.msra.mxu0 %v7120_v60 }
0x11e6   :  { %8448 = vmatprep.subr.mxu0 %v7119_v19 }
0x11e7   :  { %8449 = vmatpush3.msra.mxu0 %v7119_v19 }
0x11e8   :  { %8494 = vmatprep.subr.msk.mxu0 %vm11505_vm0, %v11504_v20 }
0x12a0   :  { %v8410_v57 = vpop.f32.mrf.mxu0 }
0x12a1   :  { %v3811_v14 = vadd.f32 %v8410_v57, %v10280_v23  ;;  %v7111_v23 = vld [vmem:[%s9199_s3 + $0x70] sm:$0xff] }
0x12a2   :  { %v3791_v29 = vpop.f32.mrf.mxu0 }
0x12a3   :  { %v3810_v61 = vadd.f32 %v3791_v29, %v10278_v9  ;;  %v10580_v46 = vadd.f32 %v7098_v1, %v3811_v14 }
0x12a4   :  { %v8413_v8 = vpop.f32.mrf.mxu0 }
0x12a5   :  { %v10578_v30 = vadd.f32 %v7098_v1, %v3810_v61  ;;  %v3813_v47 = vadd.f32 %v8413_v8, %v10298_v45  ;;  %v7110_v45 = vld [vmem:[%s9199_s3 + $0x68] sm:$0xff]  ;;  %s11750_s3 = sld [smem:[#allocation21_spill]] }
0x12a6   :  { %v3801_v59 = vpop.f32.mrf.mxu0 }
0x12a7   :  { %v3812_v25 = vadd.f32 %v3801_v59, %v10293_v50  ;;  %8422 = vmatprep.mubr.msk.f32.mxu1 %vm11617_vm2, %v10578_v30  ;;  %8450 = vmatprep.mubr.msk.f32.mxu0 %vm11670_vm12, %v10578_v30  ;;  %v10598_v50 = vadd.f32 %v7098_v1, %v3813_v47 }
0x12a8   :  { %8423 = vmatmul.mubr.msk.f32.vlgmr.msra.gmra.mxu1 %vm11671_vm6, %v10580_v46  ;;  %8451 = vmatmul.mubr.msk.f32.vlgmr.msra.gmra.mxu0 %vm11672_vm3, %v10580_v46  ;;  %vm11687_vm6 = vnez %v11432_v40  ;;  %vm11688_vm3 = vnez %v11434_v41 }
0x12a9   :  { %v10593_v9 = vadd.f32 %v7098_v1, %v3812_v25  ;;  %8429 = vmatpush3.msra.mxu1 %v7112_v11  ;;  %8495 = vmatpush3.msk.msra.mxu0 %vm11505_vm0, %v11504_v20  ;;  %vm11676_vm0 = vmmov %vm11617_vm2 }
0x12aa   :  { %8430 = vmatprep.subr.mxu1 %v7111_v23  ;;  %8496 = vmatprep.subr.msk.mxu0 %vm11509_vm5, %v11504_v20  ;;  %vm11677_vm10 = vmmov %vm11676_vm0 }
0x12ab   :  { %8425 = vmatprep.mubr.msk.f32.mxu1 %vm11673_vm8, %v10593_v9  ;;  %8431 = vmatpush3.msra.mxu1 %v7111_v23  ;;  %vm11678_vm2 = vmmov %vm11676_vm0 }
0x12ac   :  { %8453 = vmatprep.mubr.msk.f32.mxu0 %vm11674_vm9, %v10593_v9  ;;  %8426 = vmatmul.mubr.msk.f32.gmra.mxu1 %vm11675_vm13, %v10598_v50  ;;  %vm11679_vm12 = vmmov %vm11676_vm0 }
0x12ad   :  { %8432 = vmatprep.subr.mxu1 %v7110_v45  ;;  %8454 = vmatmul.mubr.msk.f32.gmra.mxu0 %vm11676_vm0, %v10598_v50  ;;  %vm11689_vm8 = vmmov %vm11676_vm0 }
0x12ae   :  { %8433 = vmatpush3.msra.mxu1 %v7110_v45  ;;  %8436 = vmatprep.mubr.msk.f32.mxu1 %vm11677_vm10, %v10578_v30  ;;  %vm11690_vm9 = vmmov %vm11676_vm0 }
0x12af   :  { %8434 = vmatprep.subr.mxu1 %v7109_v0  ;;  %8497 = vmatpush3.msk.msra.mxu0 %vm11509_vm5, %v11504_v20  ;;  %vm11680_vm5 = vmmov %vm11676_vm0 }
0x12b0   :  { %8435 = vmatpush3.msra.mxu1 %v7109_v0  ;;  %8498 = vmatprep.subr.msk.mxu0 %vm9416_vm4, %v11504_v20  ;;  %vm11691_vm13 = vmmov %vm11676_vm0 }
0x12b1   :  { %8437 = vmatmul.mubr.msk.f32.vlgmr.msra.gmra.mxu1 %vm11678_vm2, %v10580_v46  ;;  %8499 = vmatpush3.msk.msra.mxu0 %vm9416_vm4, %v11504_v20  ;;  %vm11681_vm4 = vnez %v11419_v24  ;;  %vm11692_vm10 = vmmov %vm11676_vm0 }
0x12b2   :  { %8439 = vmatprep.mubr.msk.f32.mxu1 %vm11679_vm12, %v10593_v9  ;;  %8500 = vmatprep.subr.msk.mxu0 %vm11603_vm11, %v11504_v20  ;;  %vm11693_vm2 = vmmov %vm11676_vm0 }
0x12b3   :  { %8501 = vmatpush3.msk.msra.mxu0 %vm11603_vm11, %v11504_v20  ;;  %vm11682_vm11 = vnez %v11421_v28  ;;  %vm11694_vm12 = vmmov %vm11676_vm0 }
0x12b4   :  { %8502 = vmatprep.subr.msk.mxu0 %vm11604_vm15, %v11504_v20 }
0x12b5   :  { %8440 = vmatmul.mubr.msk.f32.gmra.mxu1 %vm11680_vm5, %v10598_v50  ;;  %8503 = vmatpush3.msk.msra.mxu0 %vm11604_vm15, %v11504_v20  ;;  %vm11683_vm15 = vnez %v11423_v31  ;;  %vm11695_vm5 = vmmov %vm11676_vm0 }
0x12b6   :  { %8504 = vmatprep.subr.msk.mxu0 %vm11606_vm1, %v11504_v20 }
0x12b7   :  { %8505 = vmatpush3.msk.msra.mxu0 %vm11606_vm1, %v11504_v20  ;;  %vm11684_vm1 = vnez %v11426_v34 }
0x12b8   :  { %8506 = vmatprep.subr.msk.mxu0 %vm11607_vm7, %v11504_v20 }
0x12b9   :  { %8507 = vmatpush3.msk.msra.mxu0 %vm11607_vm7, %v11504_v20  ;;  %vm11685_vm7 = vnez %v11428_v36 }
0x12ba   :  { %8508 = vmatprep.subr.msk.mxu0 %vm11608_vm14, %v11504_v20 }
0x12bb   :  { %8509 = vmatpush3.msk.msra.mxu0 %vm11608_vm14, %v11504_v20  ;;  %vm11686_vm14 = vnez %v11430_v38 }
0x12bc   :  { %8510 = vmatprep.subr.msk.mxu0 %vm11681_vm4, %v11504_v20 }
0x12bd   :  { %8511 = vmatpush3.msk.msra.mxu0 %vm11681_vm4, %v11504_v20  ;;  %vm11696_vm4 = vmmov %vm11676_vm0 }
0x12be   :  { %8512 = vmatprep.subr.msk.mxu0 %vm11682_vm11, %v11504_v20 }
0x12bf   :  { %8513 = vmatpush3.msk.msra.mxu0 %vm11682_vm11, %v11504_v20  ;;  %vm11697_vm11 = vmmov %vm11676_vm0 }
0x12c0   :  { %8514 = vmatprep.subr.msk.mxu0 %vm11683_vm15, %v11504_v20 }
0x12c1   :  { %8515 = vmatpush3.msk.msra.mxu0 %vm11683_vm15, %v11504_v20  ;;  %vm11698_vm15 = vmmov %vm11676_vm0 }
0x12c2   :  { %8516 = vmatprep.subr.msk.mxu0 %vm11684_vm1, %v11504_v20 }
0x12c3   :  { %8517 = vmatpush3.msk.msra.mxu0 %vm11684_vm1, %v11504_v20  ;;  %vm11699_vm1 = vmmov %vm11676_vm0 }
0x12c4   :  { %8518 = vmatprep.subr.msk.mxu0 %vm11685_vm7, %v11504_v20 }
0x12c5   :  { %8519 = vmatpush3.msk.msra.mxu0 %vm11685_vm7, %v11504_v20  ;;  %vm11700_vm7 = vmmov %vm11676_vm0 }
0x12c6   :  { %8520 = vmatprep.subr.msk.mxu0 %vm11686_vm14, %v11504_v20 }
0x12c7   :  { %8521 = vmatpush3.msk.msra.mxu0 %vm11686_vm14, %v11504_v20  ;;  %vm11701_vm14 = vmmov %vm11676_vm0 }
0x12c8   :  { %8522 = vmatprep.subr.msk.mxu0 %vm11687_vm6, %v11504_v20 }
0x12c9   :  { %8523 = vmatpush3.msk.msra.mxu0 %vm11687_vm6, %v11504_v20  ;;  %vm11702_vm6 = vmmov %vm11676_vm0 }
0x12ca   :  { %8524 = vmatprep.subr.msk.mxu0 %vm11688_vm3, %v11504_v20 }
0x12cb   :  { %8525 = vmatpush3.msk.msra.mxu0 %vm11688_vm3, %v11504_v20  ;;  %vm11703_vm3 = vmmov %vm11676_vm0 }
0x1368   :  { %v8424_v10 = vpop.f32.mrf.mxu1  ;;  %v8452_v13 = vpop.f32.mrf.mxu0 }
0x1369   :  { %v10712_v15 = vadd.f32 %v8424_v10, %v7104_v3  ;;  %v10715_v17 = vadd.f32 %v8452_v13, %v10710_v7 }
0x136a   :  { %v3917_v18 = vpop.f32.mrf.mxu1  ;;  %v4113_v24 = vpop.f32.mrf.mxu0 }
0x136b   :  { %v3918_v28 = vadd.f32 %v7104_v3, %v3917_v18  ;;  %v10718_v31 = vadd.f32 %v10710_v7, %v4113_v24  ;;  %v11724_v24 = vld [vmem:[#allocation27_spill] sm:$0xff] }
0x136c   :  { %v8427_v34 = vpop.f32.mrf.mxu1 }
0x136d   :  { %v10720_v36 = vadd.f32 %v8427_v34, %v7104_v3  ;;  %v8455_v38 = vpop.f32.mrf.mxu0  ;;  %8488 = vmatprep.mubr.msk.f32.mxu1 %vm11689_vm8, %v3918_v28  ;;  %vm11704_vm8 = vmmov %vm11676_vm0  ;;  %v11726_v34 = vld [vmem:[#allocation28_spill] sm:$0xff] }
0x136e   :  { %v10724_v40 = vadd.f32 %v8455_v38, %v10710_v7  ;;  %v3927_v41 = vpop.f32.mrf.mxu1 }
0x136f   :  { %v3928_v20 = vadd.f32 %v7104_v3, %v3927_v41 }
0x1370   :  { %v10728_v27 = vmul.f32 %v10724_v40, %v9603_v58 }
0x1371   :  { %v8438_v49 = vpop.f32.mrf.mxu1 }
0x1372   :  { %8532 = vmatprep.subr.mxu0 %v10728_v27  ;;  %v4021_v6 = vadd.f32 %v8438_v49, %v7114_v33 }
0x1373   :  { %v4015_v56 = vpop.f32.mrf.mxu1 }
0x1374   :  { %v4016_v42 = vadd.f32 %v7114_v33, %v4015_v56  ;;  %v4145_v19 = vmul.f32 %v4021_v6, %v9636_v16  ;;  %v4141_v14 = vmul.f32 %v4021_v6, %v9682_v43  ;;  %v4137_v8 = vmul.f32 %v4021_v6, %v9717_v62 }
0x1375   :  { %v8441_v4 = vpop.f32.mrf.mxu1  ;;  %v4133_v23 = vmul.f32 %v4021_v6, %v9752_v32 }
0x1376   :  { %v4031_v21 = vadd.f32 %v8441_v4, %v7114_v33  ;;  %v4144_v11 = vmul.f32 %v4016_v42, %v9651_v26  ;;  %v4140_v29 = vmul.f32 %v4016_v42, %v9691_v48  ;;  %v4136_v47 = vmul.f32 %v4016_v42, %v9726_v5 }
0x1377   :  { %v4025_v51 = vpop.f32.mrf.mxu1  ;;  %v4132_v45 = vmul.f32 %v4016_v42, %v9761_v37 }
0x1378   :  { %v4026_v2 = vadd.f32 %v7114_v33, %v4025_v51  ;;  %v4147_v53 = vmul.f32 %v4031_v21, %v9603_v58  ;;  %v4143_v58 = vmul.f32 %v4031_v21, %v9664_v35  ;;  %v4139_v1 = vmul.f32 %v4031_v21, %v9699_v52 }
0x1379   :  { %v4135_v59 = vmul.f32 %v4031_v21, %v9734_v12 }
0x137a   :  { %8456 = vmatprep.subr.msk.mxu1 %vm11690_vm9, %v4147_v53  ;;  %v4146_v60 = vmul.f32 %v4026_v2, %v9613_v63  ;;  %v4142_v57 = vmul.f32 %v4026_v2, %v9673_v39  ;;  %vm11705_vm9 = vmmov %vm11676_vm0  ;;  %v4138_v61 = vmul.f32 %v4026_v2, %v9708_v55  ;;  %v4134_v25 = vmul.f32 %v4026_v2, %v9743_v22 }
0x137b   :  { %8457 = vmatpush3.xpose.msk.msra.mxu1 %vm11691_vm13, %v4147_v53  ;;  %vm11706_vm13 = vmmov %vm11676_vm0  ;;  %v4123_v53 = vpop.f32.mrf.mxu0 }
0x137c   :  { %8458 = vmatprep.subr.msk.mxu1 %vm11676_vm0, %v4146_v60  ;;  %v4124_v6 = vadd.f32 %v10710_v7, %v4123_v53  ;;  %v4160_v7 = vmul.f32 %v10718_v31, %v9651_v26  ;;  %v4156_v26 = vmul.f32 %v10718_v31, %v9691_v48  ;;  %v4151_v48 = vmul.f32 %v10724_v40, %v9734_v12  ;;  %v7167_v12 = vld [vmem:[%s9224_s30 + $0x70] sm:$0xff]  ;;  %v5042_v53 = vld [vmem:[%s11737_s21] sm:$0xff] }
0x137f   :  { %8459 = vmatpush3.xpose.msk.msra.mxu1 %vm11692_vm10, %v4146_v60  ;;  %vm11707_vm10 = vmmov %vm11676_vm0 }
0x1380   :  { %8460 = vmatprep.subr.msk.mxu1 %vm11693_vm2, %v4145_v19  ;;  %vm11708_vm2 = vmmov %vm11676_vm0 }
0x1383   :  { %8461 = vmatpush3.xpose.msk.msra.mxu1 %vm11694_vm12, %v4145_v19  ;;  %vm11709_vm12 = vmmov %vm11676_vm0  ;;  %v4162_v19 = vmul.f32 %v4124_v6, %v9613_v63  ;;  %v4159_v63 = vmul.f32 %v10724_v40, %v9664_v35  ;;  %v4154_v35 = vmul.f32 %v4124_v6, %v9708_v55  ;;  %v4149_v55 = vmul.f32 %v10715_v17, %v9752_v32  ;;  %v7165_v32 = vld [vmem:[%s9224_s30 + $0x60] sm:$0xff] }
0x1384   :  { %8462 = vmatprep.subr.msk.mxu1 %vm11695_vm5, %v4144_v11  ;;  %vm11710_vm5 = vmmov %vm11676_vm0 }
0x1387   :  { %8463 = vmatpush3.xpose.msk.msra.mxu1 %vm11696_vm4, %v4144_v11  ;;  %vm11711_vm4 = vmmov %vm11676_vm0 }
0x1388   :  { %8464 = vmatprep.subr.msk.mxu1 %vm11697_vm11, %v4143_v58  ;;  %vm11712_vm11 = vmmov %vm11676_vm0 }
0x138b   :  { %8465 = vmatpush3.xpose.msk.msra.mxu1 %vm11698_vm15, %v4143_v58  ;;  %vm11713_vm15 = vmmov %vm11676_vm0  ;;  %v4161_v58 = vmul.f32 %v10715_v17, %v9636_v16  ;;  %v4157_v16 = vmul.f32 %v10715_v17, %v9682_v43  ;;  %v4152_v43 = vmul.f32 %v10718_v31, %v9726_v5  ;;  %v7168_v5 = vld [vmem:[%s9224_s30 + $0x78] sm:$0xff] }
0x138c   :  { %8466 = vmatprep.subr.msk.mxu1 %vm11699_vm1, %v4142_v57  ;;  %vm11714_vm1 = vmmov %vm11676_vm0 }
0x138f   :  { %8467 = vmatpush3.xpose.msk.msra.mxu1 %vm11700_vm7, %v4142_v57  ;;  %vm11715_vm7 = vmmov %vm11676_vm0 }
0x1390   :  { %8468 = vmatprep.subr.msk.mxu1 %vm11701_vm14, %v4141_v14  ;;  %vm11716_vm14 = vmmov %vm11676_vm0 }
0x1393   :  { %8469 = vmatpush3.xpose.msk.msra.mxu1 %vm11702_vm6, %v4141_v14  ;;  %vm11717_vm6 = vmmov %vm11676_vm0  ;;  %v4155_v14 = vmul.f32 %v10724_v40, %v9699_v52  ;;  %v4150_v52 = vmul.f32 %v4124_v6, %v9743_v22  ;;  %v7166_v22 = vld [vmem:[%s9224_s30 + $0x68] sm:$0xff]  ;;  %s9152_s30 = smov [#allocation5]  }
0x1394   :  { %8470 = vmatprep.subr.msk.mxu1 %vm11703_vm3, %v4140_v29  ;;  %vm11718_vm3 = vmmov %vm11676_vm0 }
0x1397   :  { %8471 = vmatpush3.xpose.msk.msra.mxu1 %vm11704_vm8, %v4140_v29  ;;  %vm11719_vm8 = vmmov %vm11676_vm0 }
0x1398   :  { %8472 = vmatprep.subr.msk.mxu1 %vm11705_vm9, %v4139_v1  ;;  %vm11720_vm9 = vmmov %vm11676_vm0 }
0x139b   :  { %8473 = vmatpush3.xpose.msk.msra.mxu1 %vm11706_vm13, %v4139_v1  ;;  %vm11721_vm13 = vmmov %vm11676_vm0 }
0x139c   :  { %8474 = vmatprep.subr.msk.mxu1 %vm11676_vm0, %v4138_v61 }
0x139f   :  { %8475 = vmatpush3.xpose.msk.msra.mxu1 %vm11707_vm10, %v4138_v61  ;;  %vm11722_vm10 = vnez %v11561_v44 }
0x13a0   :  { %8476 = vmatprep.subr.msk.mxu1 %vm11708_vm2, %v4137_v8  ;;  %vm11723_vm2 = vnez %v11567_v54 }
0x13a3   :  { %8477 = vmatpush3.xpose.msk.msra.mxu1 %vm11709_vm12, %v4137_v8  ;;  %vm11725_vm12 = vnez %v11724_v24 }
0x13a4   :  { %8478 = vmatprep.subr.msk.mxu1 %vm11710_vm5, %v4136_v47  ;;  %vm11727_vm5 = vnez %v11726_v34 }
0x13a7   :  { %8479 = vmatpush3.xpose.msk.msra.mxu1 %vm11711_vm4, %v4136_v47  ;;  %vm11728_vm4 = vmmov %vm11676_vm0 }
0x13a8   :  { %8480 = vmatprep.subr.msk.mxu1 %vm11712_vm11, %v4135_v59  ;;  %vm11730_vm11 = vmmov %vm11676_vm0 }
0x13ab   :  { %8481 = vmatpush3.xpose.msk.msra.mxu1 %vm11713_vm15, %v4135_v59  ;;  %vm11731_vm15 = vmmov %vm11676_vm0 }
0x13ac   :  { %8482 = vmatprep.subr.msk.mxu1 %vm11714_vm1, %v4134_v25  ;;  %vm11732_vm1 = vmmov %vm11676_vm0 }
0x13af   :  { %8483 = vmatpush3.xpose.msk.msra.mxu1 %vm11715_vm7, %v4134_v25  ;;  %vm11733_vm7 = vmmov %vm11676_vm0 }
0x13b0   :  { %8484 = vmatprep.subr.msk.mxu1 %vm11716_vm14, %v4133_v23  ;;  %vm11734_vm14 = vmmov %vm11676_vm0 }
0x13b3   :  { %8485 = vmatpush3.xpose.msk.msra.mxu1 %vm11717_vm6, %v4133_v23  ;;  %vm11735_vm6 = vmmov %vm11676_vm0 }
0x13b4   :  { %8486 = vmatprep.subr.msk.mxu1 %vm11718_vm3, %v4132_v45  ;;  %vm11736_vm3 = vmmov %vm11676_vm0 }
0x13b7   :  { %8487 = vmatpush3.xpose.msk.msra.mxu1 %vm11719_vm8, %v4132_v45  ;;  %vm11739_vm8 = vmmov %vm11676_vm0 }
0x13b8   :  { %8570 = vmatprep.subr.mxu1 %v7168_v5 }
0x13ba   :  { %8489 = vmatmul.mubr.msk.f32.vlgmr.msra.gmra.mxu1 %vm11720_vm9, %v10712_v15  ;;  %vm11741_vm9 = vmmov %vm11676_vm0 }
0x13bb   :  { %8491 = vmatprep.mubr.msk.f32.mxu1 %vm11721_vm13, %v3928_v20  ;;  %8571 = vmatpush3.msra.mxu1 %v7168_v5  ;;  %vm11742_vm13 = vmmov %vm11676_vm0 }
0x13bc   :  { %8572 = vmatprep.subr.mxu1 %v7167_v12 }
0x13bd   :  { %8573 = vmatpush3.msra.mxu1 %v7167_v12 }
0x13be   :  { %8492 = vmatmul.mubr.msk.f32.gmra.mxu1 %vm11676_vm0, %v10720_v36  ;;  %8574 = vmatprep.subr.mxu1 %v7166_v22 }
0x13bf   :  { %8575 = vmatpush3.msra.mxu1 %v7166_v22 }
0x13c0   :  { %8576 = vmatprep.subr.mxu1 %v7165_v32 }
0x13c1   :  { %8577 = vmatpush3.msra.mxu1 %v7165_v32  ;;  %v7197_v32 = vld [vmem:[%s11494_s0 + $0xe0] sm:$0xff] }
0x147a   :  { %v8490_v0 = vpop.f32.mrf.mxu1 }
0x147b   :  { %v4310_v3 = vsel %vm11722_vm10, %v8490_v0, -1e+30  ;;  %vm11744_vm10 = vmmov %vm11676_vm0 }
0x147c   :  { %4315 = vmax.xlane.f32.xlu1 %v4310_v3  ;;  %v4290_v10 = vpop.f32.mrf.mxu1 }
0x147d   :  { %v4309_v13 = vsel %vm11723_vm2, %v4290_v10, -1e+30  ;;  %vm11745_vm2 = vmmov %vm11676_vm0 }
0x147e   :  { %4313 = vmax.xlane.f32.xlu0 %v4309_v13  ;;  %v8493_v18 = vpop.f32.mrf.mxu1 }
0x147f   :  { %v4312_v28 = vsel %vm11725_vm12, %v8493_v18, -1e+30  ;;  %v7177_v18 = vld [vmem:[%s9234_s12 + $0xd0] sm:$0xff]  ;;  %vm11746_vm12 = vcmask 130048  }
0x1480   :  { %4319 = vmax.xlane.f32.xlu1 %v4312_v28  ;;  %v4300_v15 = vpop.f32.mrf.mxu1 }
0x1481   :  { %v4311_v38 = vsel %vm11727_vm5, %v4300_v15, -1e+30  ;;  %vm11747_vm5 = vmmov %vm11746_vm12 }
0x1482   :  { %4317 = vmax.xlane.f32.xlu0 %v4311_v38 }
0x1505   :  { %v4316_v36 = vpop.xlane.xlu1 %4315 }
0x1506   :  { %v4322_v41 = vsub.f32 %v4310_v3, %v4316_v36 }
0x1507   :  { %v4314_v44 = vpop.xlane.xlu0 %4313 }
0x1508   :  { %v4321_v20 = vsub.f32 %v4309_v13, %v4314_v44  ;;  %v4327_v49 = vmul.f32 1.442695, %v4322_v41  ;;  %v7175_v41 = vld [vmem:[%s9234_s12 + $0xc0] sm:$0xff]  ;;  %v4957_v44 = vld [vmem:[%s11729_s17 + $0x18] sm:$0xff] }
0x1509   :  { %v4320_v56 = vpop.xlane.xlu1 %4319 }
0x150a   :  { %v4325_v33 = vmul.f32 1.442695, %v4321_v20  ;;  %v4324_v54 = vsub.f32 %v4312_v28, %v4320_v56  ;;  %v4956_v20 = vld [vmem:[%s11729_s17 + $0x10] sm:$0xff]  ;;  %v4954_v56 = vld [vmem:[%s11729_s17] sm:$0xff] }
0x150b   :  { %v4318_v4 = vpop.xlane.xlu0 %4317 }
0x150c   :  { %8778 = vpow2.f32 %v4325_v33  ;;  %v4323_v21 = vsub.f32 %v4311_v38, %v4318_v4  ;;  %v4331_v51 = vmul.f32 1.442695, %v4324_v54  ;;  %v7176_v38 = vld [vmem:[%s9234_s12 + $0xc8] sm:$0xff]  ;;  %v11740_v54 = vld [vmem:[#allocation25_spill] sm:$0xff]  ;;  %v7181_v4 = vld [vmem:[%s9234_s12 + $0xf0] sm:$0xff] }
0x150d   :  { %8780 = vpow2.f32 %v4327_v49  ;;  %v4955_v49 = vld [vmem:[%s11729_s17 + $0x8] sm:$0xff] }
0x150e   :  { %v4329_v2 = vmul.f32 1.442695, %v4323_v21  ;;  %v11738_v33 = vld [vmem:[#allocation23_spill] sm:$0xff] }
0x150f   :  { %v7180_v21 = vld [vmem:[%s9234_s12 + $0xe8] sm:$0xff] }
0x1510   :  { %8782 = vpow2.f32 %v4329_v2  ;;  %v5043_v2 = vld [vmem:[%s11737_s21 + $0x8] sm:$0xff] }
0x1511   :  { %8784 = vpow2.f32 %v4331_v51  ;;  %v7179_v51 = vld [vmem:[%s9234_s12 + $0xe0] sm:$0xff] }
0x1519   :  { %v8779_v60 = vpop.eup %8778 }
0x151a   :  { %v8781_v42 = vpop.eup %8780  ;;  %8526 = vmatprep.mubr.f32.mxu0 %v8779_v60 }
0x151b   :  { %8527 = vmatmul.mubr.f32.vlgmr.msra.gmra.mxu0 %v8781_v42 }
0x151c   :  { %8533 = vmatpush3.msra.mxu0 %v10728_v27  ;;  %v4158_v27 = vmul.f32 %v4124_v6, %v9673_v39  ;;  %v4153_v39 = vmul.f32 %v10715_v17, %v9717_v62  ;;  %v4148_v62 = vmul.f32 %v10718_v31, %v9761_v37  ;;  %v7178_v37 = vld [vmem:[%s9234_s12 + $0xd8] sm:$0xff] }
0x151d   :  { %v8783_v11 = vpop.eup %8782  ;;  %8534 = vmatprep.subr.mxu0 %v4162_v19  ;;  %8598 = vmatprep.subr.mxu1 %v7178_v37  ;;  %v7182_v17 = vld [vmem:[%s9234_s12 + $0xf8] sm:$0xff]  ;;  %s6746_s12 = sshll.u32 %s9152_s30, 4  ;;  %s6747_s12 = int_to_ptr.vmem [resolvable:$true] %s6746_s12 }
0x151e   :  { %v8785_v57 = vpop.eup %8784  ;;  %8535 = vmatpush3.msra.mxu0 %v4162_v19  ;;  %8529 = vmatprep.mubr.f32.mxu0 %v8783_v11  ;;  %v7200_v6 = vld [vmem:[%s11494_s0 + $0xf8] sm:$0xff]  ;;  %p9079_p1 = scmp.lt.s32.totalorder %s6747_s12, %s6747_s12 }
0x151f   :  { %8536 = vmatprep.subr.mxu0 %v4161_v58  ;;  %8530 = vmatmul.mubr.f32.gmra.mxu0 %v8785_v57 }
0x1520   :  { %8537 = vmatpush3.msra.mxu0 %v4161_v58  ;;  %8564 = vmatprep.mubr.f32.mxu0 %v8779_v60 }
0x1521   :  { %8538 = vmatprep.subr.mxu0 %v4160_v7 }
0x1522   :  { %8539 = vmatpush3.msra.mxu0 %v4160_v7  ;;  %v7199_v7 = vld [vmem:[%s11494_s0 + $0xf0] sm:$0xff] }
0x1523   :  { %8540 = vmatprep.subr.mxu0 %v4159_v63 }
0x1524   :  { %8541 = vmatpush3.msra.mxu0 %v4159_v63 }
0x1525   :  { %8542 = vmatprep.subr.mxu0 %v4158_v27 }
0x1526   :  { %8543 = vmatpush3.msra.mxu0 %v4158_v27 }
0x1527   :  { %8544 = vmatprep.subr.mxu0 %v4157_v16 }
0x1528   :  { %8545 = vmatpush3.msra.mxu0 %v4157_v16  ;;  %v7198_v16 = vld [vmem:[%s11494_s0 + $0xe8] sm:$0xff] }
0x1529   :  { %8546 = vmatprep.subr.mxu0 %v4156_v26 }
0x152a   :  { %8547 = vmatpush3.msra.mxu0 %v4156_v26 }
0x152b   :  { %8548 = vmatprep.subr.mxu0 %v4155_v14 }
0x152c   :  { %8549 = vmatpush3.msra.mxu0 %v4155_v14 }
0x152d   :  { %8550 = vmatprep.subr.mxu0 %v4154_v35 }
0x152e   :  { %8551 = vmatpush3.msra.mxu0 %v4154_v35 }
0x152f   :  { %8552 = vmatprep.subr.mxu0 %v4153_v39 }
0x1530   :  { %8553 = vmatpush3.msra.mxu0 %v4153_v39 }
0x1531   :  { %8554 = vmatprep.subr.mxu0 %v4152_v43 }
0x1532   :  { %8555 = vmatpush3.msra.mxu0 %v4152_v43 }
0x1533   :  { %8556 = vmatprep.subr.mxu0 %v4151_v48 }
0x1534   :  { %8557 = vmatpush3.msra.mxu0 %v4151_v48  ;;  %v7207_v48 = vld [vmem:[%s11743_s25] ss:$0 sm:$0xff] }
0x1535   :  { %8558 = vmatprep.subr.mxu0 %v4150_v52 }
0x1536   :  { %8559 = vmatpush3.msra.mxu0 %v4150_v52 }
0x1537   :  { %8560 = vmatprep.subr.mxu0 %v4149_v55 }
0x1538   :  { %8561 = vmatpush3.msra.mxu0 %v4149_v55 }
0x1539   :  { %8562 = vmatprep.subr.mxu0 %v4148_v62 }
0x153a   :  { %8563 = vmatpush3.msra.mxu0 %v4148_v62 }
0x153b   :  { %8565 = vmatmul.mubr.f32.vlgmr.msra.gmra.mxu0 %v8781_v42  ;;  %8584 = vmatprep.subr.mxu0 %v7182_v17  ;;  %v7170_v42 = vld [vmem:[%s11496_s5 + $0x3] ss:$0 sm:$0xff] }
0x153c   :  { %8567 = vmatprep.mubr.f32.mxu0 %v8783_v11  ;;  %8585 = vmatpush3.msra.mxu0 %v7182_v17  ;;  %v7195_v17 = vld [vmem:[%s11494_s0 + $0xd0] sm:$0xff] }
0x153d   :  { %8586 = vmatprep.subr.mxu0 %v7181_v4 }
0x153e   :  { %8587 = vmatpush3.msra.mxu0 %v7181_v4 }
0x153f   :  { %8568 = vmatmul.mubr.f32.gmra.mxu0 %v8785_v57  ;;  %8588 = vmatprep.subr.mxu0 %v7180_v21 }
0x1540   :  { %8589 = vmatpush3.msra.mxu0 %v7180_v21 }
0x1541   :  { %8590 = vmatprep.subr.mxu0 %v7179_v51 }
0x1542   :  { %8591 = vmatpush3.msra.mxu0 %v7179_v51 }
0x1543   :  { %8612 = vmatprep.subr.mxu0 %v7200_v6 }
0x15db   :  { %v8528_v31 = vpop.f32.mrf.mxu0 }
0x15dc   :  { %v4504_v61 = vmax.f32 %v8528_v31, 1e-30  ;;  %v7194_v31 = vld [vmem:[%s11494_s0 + $0xc8] sm:$0xff] }
0x15dd   :  { %v4399_v40 = vpop.f32.mrf.mxu0 }
0x15de   :  { %v4503_v1 = vmax.f32 %v4399_v40, 1e-30  ;;  %v7193_v40 = vld [vmem:[%s11494_s0 + $0xc0] sm:$0xff] }
0x15df   :  { %v8531_v29 = vpop.f32.mrf.mxu0 }
0x15e0   :  { %8786 = vrcp.f32 %v4503_v1  ;;  %v4506_v59 = vmax.f32 %v8531_v29, 1e-30  ;;  %v11748_v29 = vmov 0.0  }
0x15e1   :  { %v4409_v8 = vpop.f32.mrf.mxu0  ;;  %8788 = vrcp.f32 %v4504_v61 }
0x15e2   :  { %v4505_v47 = vmax.f32 %v4409_v8, 1e-30  ;;  %v7192_v8 = vld [vmem:[%s11502_s9 + $0x3] ss:$0 sm:$0xff] }
0x15e4   :  { %8790 = vrcp.f32 %v4505_v47 }
0x15e5   :  { %8792 = vrcp.f32 %v4506_v59 }
0x15ed   :  { %v8787_v23 = vpop.eup %8786 }
0x15ee   :  { %v8789_v0 = vpop.eup %8788 }
0x15f1   :  { %v8791_v24 = vpop.eup %8790 }
0x15f2   :  { %v8793_v15 = vpop.eup %8792 }
0x15fb   :  { %v8566_v25 = vpop.f32.mrf.mxu0 }
0x15fc   :  { %v4510_v10 = vmul.f32 %v8789_v0, %v8566_v25 }
0x15fd   :  { %v4484_v45 = vpop.f32.mrf.mxu0 }
0x15fe   :  { %v4508_v3 = vmul.f32 %v8787_v23, %v4484_v45 }
0x15ff   :  { %v8569_v13 = vpop.f32.mrf.mxu0 }
0x1600   :  { %8578 = vmatprep.mubr.msk.f32.mxu1 %vm11728_vm4, %v4508_v3  ;;  %v4514_v36 = vmul.f32 %v8793_v15, %v8569_v13  ;;  %vm11752_vm4 = vcmask 523264  }
0x1601   :  { %v4494_v28 = vpop.f32.mrf.mxu0  ;;  %8579 = vmatmul.mubr.msk.f32.vlgmr.msra.gmra.mxu1 %vm11730_vm11, %v4510_v10  ;;  %vm11753_vm11 = vmmov %vm11752_vm4 }
0x1602   :  { %v4512_v34 = vmul.f32 %v8791_v24, %v4494_v28  ;;  %8599 = vmatpush3.msra.mxu1 %v7178_v37  ;;  %v7196_v37 = vld [vmem:[%s11494_s0 + $0xd8] sm:$0xff] }
0x1603   :  { %8600 = vmatprep.subr.mxu1 %v7177_v18 }
0x1604   :  { %8581 = vmatprep.mubr.msk.f32.mxu1 %vm11731_vm15, %v4512_v34  ;;  %8601 = vmatpush3.msra.mxu1 %v7177_v18  ;;  %vm11754_vm15 = vmmov %vm11752_vm4 }
0x1605   :  { %8582 = vmatmul.mubr.msk.f32.gmra.mxu1 %vm11732_vm1, %v4514_v36  ;;  %8602 = vmatprep.subr.mxu1 %v7176_v38  ;;  %vm11755_vm1 = vmmov %vm11752_vm4 }
0x1606   :  { %8603 = vmatpush3.msra.mxu1 %v7176_v38  ;;  %8606 = vmatprep.mubr.msk.f32.mxu1 %vm11733_vm7, %v10578_v30  ;;  %v7210_v38 = vld [vmem:[%s11749_s29] ss:$0 sm:$0xff]  ;;  %vm5132_vm7 = vcmask 15360  }
0x1607   :  { %8604 = vmatprep.subr.mxu1 %v7175_v41 }
0x1608   :  { %8605 = vmatpush3.msra.mxu1 %v7175_v41 }
0x1609   :  { %8607 = vmatmul.mubr.msk.f32.vlgmr.msra.gmra.mxu1 %vm11734_vm14, %v10580_v46  ;;  %8634 = vmatprep.subr.mxu1 %v4957_v44  ;;  %vm11758_vm14 = vmmov %vm11676_vm0 }
0x160a   :  { %8609 = vmatprep.mubr.msk.f32.mxu1 %vm11735_vm6, %v10593_v9  ;;  %8635 = vmatpush3.msra.mxu1 %v4957_v44  ;;  %vm11759_vm6 = vmmov %vm11676_vm0 }
0x160b   :  { %8636 = vmatprep.subr.mxu1 %v4956_v20 }
0x160c   :  { %8637 = vmatpush3.msra.mxu1 %v4956_v20 }
0x160d   :  { %8610 = vmatmul.mubr.msk.f32.gmra.mxu1 %vm11736_vm3, %v10598_v50  ;;  %8638 = vmatprep.subr.mxu1 %v4955_v49  ;;  %vm11760_vm3 = vmmov %vm11676_vm0 }
0x160e   :  { %8639 = vmatpush3.msra.mxu1 %v4955_v49  ;;  %8642 = vmatprep.mubr.msk.f32.mxu1 %vm11739_vm8, %v11738_v33  ;;  %v5138_v49 = vld [vmem:[%s11751_s8 + $0x18] sm:$0xff]  ;;  %v5136_v33 = vld [vmem:[%s11751_s8 + $0x8] sm:$0xff]  ;;  %vm11761_vm8 = vmmov %vm11676_vm0 }
0x160f   :  { %8640 = vmatprep.subr.mxu1 %v4954_v56 }
0x1610   :  { %8641 = vmatpush3.msra.mxu1 %v4954_v56  ;;  %v5137_v56 = vld [vmem:[%s11751_s8 + $0x10] sm:$0xff] }
0x1611   :  { %8643 = vmatmul.mubr.msk.f32.vlgmr.msra.gmra.mxu1 %vm11741_vm9, %v11740_v54  ;;  %8645 = vmatprep.subr.mxu1 %v5043_v2  ;;  %v5135_v54 = vld [vmem:[%s11751_s8] sm:$0xff]  ;;  %vm9150_vm9 = vmmov 0  }
0x1612   :  { %8646 = vmatpush3.msra.mxu1 %v5043_v2  ;;  %v7206_v2 = vld [vmem:[%s11503_s13 + $0x3] ss:$0 sm:$0xff] }
0x1613   :  { %8647 = vmatprep.subr.mxu1 %v5042_v53 }
0x1614   :  { %8648 = vmatpush3.msra.mxu1 %v5042_v53 }
0x1615   :  { %8652 = vmatprep.subr.mxu1 %v5138_v49 }
0x16c1   :  { %v8580_v60 = vpop.f32.mrf.mxu1 }
0x16c2   :  { %v4612_v58 = vadd.f32 %v8580_v60, %v7170_v42 }
0x16c3   :  { %v4606_v19 = vpop.f32.mrf.mxu1 }
0x16c4   :  { %v4607_v11 = vadd.f32 %v7170_v42, %v4606_v19 }
0x16c5   :  { %v8583_v57 = vpop.f32.mrf.mxu1 }
0x16c6   :  { %8592 = vmatprep.mubr.msk.f32.mxu0 %vm11742_vm13, %v4607_v11  ;;  %v4622_v26 = vadd.f32 %v8583_v57, %v7170_v42  ;;  %vm5419_vm13 = vcmask 49152  }
0x16c7   :  { %v4616_v63 = vpop.f32.mrf.mxu1  ;;  %8593 = vmatmul.mubr.msk.f32.vlgmr.msra.gmra.mxu0 %vm11676_vm0, %v4612_v58 }
0x16c8   :  { %v4617_v27 = vadd.f32 %v7170_v42, %v4616_v63  ;;  %8613 = vmatpush3.msra.mxu0 %v7200_v6 }
0x16c9   :  { %v8608_v14 = vpop.f32.mrf.mxu1  ;;  %8614 = vmatprep.subr.mxu0 %v7199_v7 }
0x16ca   :  { %8595 = vmatprep.mubr.msk.f32.mxu0 %vm11744_vm10, %v4617_v27  ;;  %8615 = vmatpush3.msra.mxu0 %v7199_v7  ;;  %vm11762_vm10 = vmmov %vm11676_vm0 }
0x16cb   :  { %8596 = vmatmul.mubr.msk.f32.gmra.mxu0 %vm11745_vm2, %v4622_v26  ;;  %v4797_v35 = vpop.f32.mrf.mxu1  ;;  %8616 = vmatprep.subr.mxu0 %v7198_v16  ;;  %vm11763_vm2 = vmmov %vm11676_vm0 }
0x16cc   :  { %8617 = vmatpush3.msra.mxu0 %v7198_v16 }
0x16cd   :  { %v8611_v39 = vpop.f32.mrf.mxu1  ;;  %8618 = vmatprep.subr.mxu0 %v7197_v32 }
0x16ce   :  { %8619 = vmatpush3.msra.mxu0 %v7197_v32 }
0x16cf   :  { %v4807_v43 = vpop.f32.mrf.mxu1  ;;  %8620 = vmatprep.subr.mxu0 %v7196_v37 }
0x16d0   :  { %8621 = vmatpush3.msra.mxu0 %v7196_v37 }
0x16d1   :  { %v8644_v52 = vpop.f32.mrf.mxu1  ;;  %8622 = vmatprep.subr.mxu0 %v7195_v17 }
0x16d2   :  { %v5037_v55 = vadd.f32 %v8644_v52, %v7207_v48  ;;  %8623 = vmatpush3.msra.mxu0 %v7195_v17 }
0x16d3   :  { %v5031_v62 = vpop.f32.mrf.mxu1  ;;  %8624 = vmatprep.subr.mxu0 %v7194_v31 }
0x16d4   :  { %v5032_v5 = vadd.f32 %v7207_v48, %v5031_v62  ;;  %v5041_v22 = vmax.f32 %v5037_v55, 0.0  ;;  %8625 = vmatpush3.msra.mxu0 %v7194_v31  ;;  %v11765_v62 = vld [vmem:[#allocation24_spill] sm:$0xff] }
0x16d5   :  { %8626 = vmatprep.subr.mxu0 %v7193_v40 }
0x16d6   :  { %v5040_v12 = vmax.f32 %v5032_v5, 0.0  ;;  %8627 = vmatpush3.msra.mxu0 %v7193_v40 }
0x16d7   :  { %8666 = vmatprep.subr.mxu0 %v11748_v29 }
0x16d8   :  { %8649 = vmatprep.mubr.msk.f32.mxu1 %vm11746_vm12, %v5040_v12  ;;  %vm11764_vm12 = vmmov %vm11676_vm0 }
0x16d9   :  { %8650 = vmatmul.mubr.msk.f32.vlgmr.msra.gmra.mxu1 %vm11747_vm5, %v5041_v22  ;;  %vm5399_vm5 = vcmp.lt.s32.totalorder %v11765_v62, 6 }
0x16da   :  { %8653 = vmatpush3.msra.mxu1 %v5138_v49 }
0x16db   :  { %8654 = vmatprep.subr.mxu1 %v5137_v56 }
0x16dc   :  { %8655 = vmatpush3.msra.mxu1 %v5137_v56 }
0x16dd   :  { %8656 = vmatprep.subr.mxu1 %v5136_v33 }
0x16de   :  { %8657 = vmatpush3.msra.mxu1 %v5136_v33 }
0x16df   :  { %8658 = vmatprep.subr.mxu1 %v5135_v54 }
0x16e0   :  { %8659 = vmatpush3.msra.mxu1 %v5135_v54 }
0x1787   :  { %v8594_v1 = vpop.f32.mrf.mxu0 }
0x1788   :  { %v4803_v61 = vadd.f32 %v8608_v14, %v8594_v1 }
0x1789   :  { %v4712_v47 = vpop.f32.mrf.mxu0 }
0x178a   :  { %v4798_v59 = vadd.f32 %v4797_v35, %v4712_v47  ;;  %v4825_v25 = vadd.f32 %v7192_v8, %v4803_v61 }
0x178b   :  { %v8597_v23 = vpop.f32.mrf.mxu0 }
0x178c   :  { %v4824_v45 = vadd.f32 %v7192_v8, %v4798_v59  ;;  %v4813_v0 = vadd.f32 %v8611_v39, %v8597_v23  ;;  %v4829_v18 = vmax.f32 %v4825_v25, 0.0 }
0x178d   :  { %v4722_v3 = vpop.f32.mrf.mxu0 }
0x178e   :  { %v4828_v10 = vmax.f32 %v4824_v45, 0.0  ;;  %v4808_v13 = vadd.f32 %v4807_v43, %v4722_v3  ;;  %v4827_v24 = vadd.f32 %v7192_v8, %v4813_v0 }
0x1790   :  { %v4826_v28 = vadd.f32 %v7192_v8, %v4808_v13  ;;  %8628 = vmatprep.mubr.msk.f32.mxu0 %vm11752_vm4, %v4828_v10  ;;  %v4831_v34 = vmax.f32 %v4827_v24, 0.0  ;;  %vm5415_vm4 = vcmask 56320  }
0x1791   :  { %8629 = vmatmul.mubr.msk.f32.vlgmr.msra.gmra.mxu0 %vm11753_vm11, %v4829_v18 }
0x1792   :  { %v4830_v15 = vmax.f32 %v4826_v28, 0.0 }
0x1794   :  { %8631 = vmatprep.mubr.msk.f32.mxu0 %vm11754_vm15, %v4830_v15  ;;  %vm5410_vm15 = vcmp.eq.s32.totalorder %v11765_v62, 6 }
0x1795   :  { %8632 = vmatmul.mubr.msk.f32.gmra.mxu0 %vm11755_vm1, %v4831_v34  ;;  %vm6572_vm1 = vcmask 48128  }
0x1796   :  { %8668 = vmatprep.mubr.msk.f32.mxu0 %vm9150_vm9, %v11748_v29 }
0x1799   :  { %v8651_v36 = vpop.f32.mrf.mxu1 }
0x179a   :  { %v5129_v41 = vadd.f32 %v8651_v36, %v7210_v38  ;;  %v11766_v36 = vld [vmem:[#allocation26_spill] sm:$0xff] }
0x179b   :  { %v5123_v44 = vpop.f32.mrf.mxu1  ;;  %vm5407_vm11 = vcmp.eq.s32.totalorder %v11766_v36, 8 }
0x179c   :  { %5134 = vst.msk [vmem:[%s11750_s3 + $0x8] sm:$0xff] %vm5132_vm7, %v5129_v41  ;;  %v5124_v20 = vadd.f32 %v7210_v38, %v5123_v44  ;;  %v9151_v44 = vmov -2.6390574  }
0x179e   :  { %5133 = vst.msk [vmem:[%s11750_s3] sm:$0xff] %vm5132_vm7, %v5124_v20  ;;  %v10927_v20 = vsel %vm5407_vm11, -0.84729785, %v9151_v44 }
0x1851   :  { %v8630_v4 = vpop.f32.mrf.mxu0 }
0x1852   :  { %v4939_v21 = vadd.f32 %v8630_v4, %v10580_v46 }
0x1853   :  { %v4919_v51 = vpop.f32.mrf.mxu0 }
0x1854   :  { %v4938_v53 = vadd.f32 %v4919_v51, %v10578_v30  ;;  %v4951_v42 = vadd.f32 %v7206_v2, %v4939_v21  ;;  %v10896_v30 = vstv %s11756_s14 }
0x1855   :  { %v8633_v6 = vpop.f32.mrf.mxu0 }
0x1856   :  { %v4950_v60 = vadd.f32 %v7206_v2, %v4938_v53  ;;  %v4941_v19 = vadd.f32 %v8633_v6, %v10598_v50  ;;  %v7213_v50 = vld [vmem:[%s11757_s19] ss:$0 sm:$0xff] }
0x1857   :  { %v4929_v11 = vpop.f32.mrf.mxu0 }
0x1858   :  { %v4940_v58 = vadd.f32 %v4929_v11, %v10593_v9  ;;  %8660 = vmatprep.mubr.msk.f32.mxu1 %vm11758_vm14, %v4950_v60  ;;  %v4953_v46 = vadd.f32 %v7206_v2, %v4941_v19  ;;  %v5420_v9 = vsel %vm5419_vm13, %v10896_v30, -inf }
0x1859   :  { %8661 = vmatmul.mubr.msk.f32.vlgmr.msra.gmra.mxu1 %vm11759_vm6, %v4951_v42  ;;  %5421 = vmax.xlane.f32.xlu1 %v5420_v9 }
0x185a   :  { %v4952_v57 = vadd.f32 %v7206_v2, %v4940_v58 }
0x185c   :  { %8663 = vmatprep.mubr.msk.f32.mxu1 %vm11760_vm3, %v4952_v57 }
0x185d   :  { %8664 = vmatmul.mubr.msk.f32.gmra.mxu1 %vm11761_vm8, %v4953_v46 }
0x18e2   :  { %v5422_v43 = vpop.xlane.xlu1 %5421 }
0x18e3   :  { %v5427_v48 = vsub.f32 %v10896_v30, %v5422_v43 }
0x18e5   :  { %v5431_v52 = vmul.f32 1.442695, %v5427_v48 }
0x18e7   :  { %8794 = vpow2.f32 %v5431_v52 }
0x18f4   :  { %v8795_v40 = vpop.eup %8794 }
0x18f5   :  { %v5438_v8 = vsel %vm5419_vm13, %v8795_v40, 0.0 }
0x1919   :  { %v8662_v7 = vpop.f32.mrf.mxu1 }
0x191a   :  { %v5230_v63 = vadd.f32 %v8662_v7, %v7213_v50 }
0x191b   :  { %v5224_v27 = vpop.f32.mrf.mxu1 }
0x191c   :  { %v5225_v16 = vadd.f32 %v7213_v50, %v5224_v27  ;;  %8667 = vmatpush3.xpose.msk.msra.mxu0 %vm11676_vm0, %v5230_v63 }
0x191d   :  { %v8665_v26 = vpop.f32.mrf.mxu1  ;;  %8671 = vmatprep.subr.mxu0 %v11748_v29 }
0x191e   :  { %v5240_v14 = vadd.f32 %v8665_v26, %v7213_v50 }
0x191f   :  { %v5234_v35 = vpop.f32.mrf.mxu1  ;;  %8669 = vmatmul.mubr.msk.f32.vlgmr.msra.gmra.mxu0 %vm11762_vm10, %v5225_v16 }
0x1920   :  { %v5235_v39 = vadd.f32 %v7213_v50, %v5234_v35  ;;  %8672 = vmatpush3.xpose.msk.msra.mxu0 %vm11763_vm2, %v5240_v14  ;;  %8673 = vmatprep.mubr.msk.f32.mxu0 %vm9150_vm9, %v11748_v29 }
0x1923   :  { %8674 = vmatmul.mubr.msk.f32.vlgmr.msra.gmra.mxu0 %vm11764_vm12, %v5235_v39  ;;  %vm6707_vm12 = vcmask 7168  }
0x19df   :  { %v5315_v55 = vpop.f32.mrf.mxu0 }
0x19e0   :  { %v5319_v5 = vmul.f32 0.17677669, %v5315_v55 }
0x19e1   :  { %v8670_v12 = vpop.f32.mrf.mxu0 }
0x19e2   :  { %v10911_v22 = vsel %vm5399_vm5, %v5319_v5, %v10896_v30 }
0x19e3   :  { %v5392_v32 = vpop.f32.mrf.mxu0  ;;  %v5416_v37 = vsel %vm5415_vm4, %v10911_v22, -inf }
0x19e4   :  { %v5396_v17 = vmul.f32 0.17677669, %v5392_v32  ;;  %5417 = vmax.xlane.f32.xlu0 %v5416_v37 }
0x19e5   :  { %v8675_v31 = vpop.f32.mrf.mxu0 }
0x19e6   :  { %v10916_v1 = vsel %vm5399_vm5, %v5396_v17, %v10896_v30 }
0x19e7   :  { %v5423_v61 = vsel %vm5415_vm4, %v10916_v1, -inf }
0x19e8   :  { %5424 = vmax.xlane.f32.xlu0 %v5423_v61 }
0x19ec   :  { %5439 = vadd.xlane.f32.xlu0 %v5438_v8 }
0x1a6d   :  { %v5418_v47 = vpop.xlane.xlu0 %5417 }
0x1a6e   :  { %v5426_v59 = vsub.f32 %v10911_v22, %v5418_v47 }
0x1a70   :  { %v5429_v25 = vmul.f32 1.442695, %v5426_v59 }
0x1a71   :  { %v5425_v23 = vpop.xlane.xlu0 %5424 }
0x1a72   :  { %8796 = vpow2.f32 %v5429_v25  ;;  %v5428_v45 = vsub.f32 %v10916_v1, %v5425_v23 }
0x1a74   :  { %v5433_v0 = vmul.f32 1.442695, %v5428_v45 }
0x1a75   :  { %v5440_v24 = vpop.xlane.xlu0 %5439 }
0x1a76   :  { %8798 = vpow2.f32 %v5433_v0 }
0x1a77   :  { %8800 = vlog2.f32 %v5440_v24 }
0x1a7f   :  { %v8797_v3 = vpop.eup %8796 }
0x1a80   :  { %v5435_v10 = vsel %vm5415_vm4, %v8797_v3, 0.0 }
0x1a81   :  { %5436 = vadd.xlane.f32.xlu1 %v5435_v10 }
0x1a83   :  { %v8799_v13 = vpop.eup %8798 }
0x1a84   :  { %v5441_v18 = vsel %vm5415_vm4, %v8799_v13, 0.0  ;;  %v8801_v15 = vpop.eup %8800 }
0x1a85   :  { %5442 = vadd.xlane.f32.xlu1 %v5441_v18  ;;  %v5447_v38 = vmul.f32 0.6931472, %v8801_v15 }
0x1a87   :  { %v5451_v41 = vadd.f32 %v5447_v38, %v5422_v43 }
0x1a89   :  { %v5454_v56 = vsub.f32 %v10927_v20, %v5451_v41 }
0x1a8b   :  { %v5457_v21 = vadd.f32 %v5454_v56, %v10896_v30 }
0x1a8d   :  { %v5460_v42 = vsel %vm5419_vm13, %v5457_v21, -inf }
0x1b0a   :  { %v5437_v28 = vpop.xlane.xlu1 %5436 }
0x1b0b   :  { %8802 = vlog2.f32 %v5437_v28 }
0x1b0e   :  { %v5443_v34 = vpop.xlane.xlu1 %5442 }
0x1b0f   :  { %8804 = vlog2.f32 %v5443_v34 }
0x1b18   :  { %v8803_v49 = vpop.eup %8802 }
0x1b19   :  { %v5445_v33 = vmul.f32 0.6931472, %v8803_v49 }
0x1b1b   :  { %v5450_v54 = vadd.f32 %v5445_v33, %v5418_v47 }
0x1b1c   :  { %v8805_v4 = vpop.eup %8804 }
0x1b1d   :  { %v5453_v51 = vsub.f32 -2.6390574, %v5450_v54  ;;  %v5449_v2 = vmul.f32 0.6931472, %v8805_v4  ;;  %v10942_v4 = vsel %vm5410_vm15, -0.5596158, %v9151_v44 }
0x1b1f   :  { %v5456_v53 = vadd.f32 %v5453_v51, %v10911_v22  ;;  %v5452_v6 = vadd.f32 %v5449_v2, %v5425_v23 }
0x1b21   :  { %v5459_v60 = vsel %vm5415_vm4, %v5456_v53, -inf  ;;  %v5455_v19 = vsub.f32 -2.6390574, %v5452_v6 }
0x1b22   :  { %v5461_v11 = vmax.f32 %v5459_v60, %v5460_v42 }
0x1b23   :  { %v5458_v58 = vadd.f32 %v5455_v19, %v10916_v1 }
0x1b24   :  { %v5462_v57 = vrot.slane %v5461_v11, 4 }
0x1b25   :  { %v5468_v46 = vsel %vm5415_vm4, %v5458_v58, -inf }
0x1b26   :  { %v5463_v9 = vmax.f32 %v5461_v11, %v5462_v57  ;;  %v5469_v50 = vmax.f32 %v5468_v46, %v5460_v42 }
0x1b28   :  { %v5464_v7 = vrot.slane %v5463_v9, 2  ;;  %v5470_v63 = vrot.slane %v5469_v50, 4 }
0x1b2a   :  { %v5465_v27 = vmax.f32 %v5463_v9, %v5464_v7  ;;  %v5471_v16 = vmax.f32 %v5469_v50, %v5470_v63 }
0x1b2c   :  { %v5466_v26 = vrot.slane %v5465_v27, 1  ;;  %v5472_v14 = vrot.slane %v5471_v16, 2 }
0x1b2e   :  { %v5467_v35 = vmax.f32 %v5465_v27, %v5466_v26  ;;  %v5473_v39 = vmax.f32 %v5471_v16, %v5472_v14 }
0x1b30   :  { %v5476_v43 = vsub.f32 %v5456_v53, %v5467_v35  ;;  %v5477_v48 = vsub.f32 %v5457_v21, %v5467_v35  ;;  %v5474_v52 = vrot.slane %v5473_v39, 1 }
0x1b32   :  { %v5480_v55 = vmul.f32 1.442695, %v5476_v43  ;;  %v5482_v5 = vmul.f32 1.442695, %v5477_v48  ;;  %v5475_v12 = vmax.f32 %v5473_v39, %v5474_v52 }
0x1b34   :  { %8806 = vpow2.f32 %v5480_v55  ;;  %v5478_v32 = vsub.f32 %v5458_v58, %v5475_v12  ;;  %v5479_v37 = vsub.f32 %v5457_v21, %v5475_v12 }
0x1b35   :  { %8808 = vpow2.f32 %v5482_v5 }
0x1b36   :  { %v5484_v17 = vmul.f32 1.442695, %v5478_v32  ;;  %v5486_v31 = vmul.f32 1.442695, %v5479_v37 }
0x1b38   :  { %8810 = vpow2.f32 %v5484_v17 }
0x1b39   :  { %8812 = vpow2.f32 %v5486_v31 }
0x1b41   :  { %v8807_v40 = vpop.eup %8806 }
0x1b42   :  { %v8809_v61 = vpop.eup %8808  ;;  %v5488_v8 = vsel %vm5415_vm4, %v8807_v40, 0.0 }
0x1b43   :  { %v5489_v47 = vsel %vm5419_vm13, %v8809_v61, 0.0 }
0x1b44   :  { %v5490_v59 = vadd.f32 %v5489_v47, %v5488_v8 }
0x1b45   :  { %v8811_v25 = vpop.eup %8810 }
0x1b46   :  { %v8813_v23 = vpop.eup %8812  ;;  %v5491_v45 = vrot.slane %v5490_v59, 4  ;;  %v5497_v0 = vsel %vm5415_vm4, %v8811_v25, 0.0 }
0x1b47   :  { %v5498_v3 = vsel %vm5419_vm13, %v8813_v23, 0.0 }
0x1b48   :  { %v5492_v10 = vadd.f32 %v5491_v45, %v5490_v59  ;;  %v5499_v13 = vadd.f32 %v5498_v3, %v5497_v0 }
0x1b4a   :  { %v5493_v18 = vrot.slane %v5492_v10, 2  ;;  %v5500_v24 = vrot.slane %v5499_v13, 4 }
0x1b4c   :  { %v5494_v28 = vadd.f32 %v5493_v18, %v5492_v10  ;;  %v5501_v15 = vadd.f32 %v5500_v24, %v5499_v13 }
0x1b4e   :  { %v5495_v34 = vrot.slane %v5494_v28, 1  ;;  %v5502_v38 = vrot.slane %v5501_v15, 2 }
0x1b50   :  { %v5496_v36 = vadd.f32 %v5495_v34, %v5494_v28  ;;  %v5503_v41 = vadd.f32 %v5502_v38, %v5501_v15 }
0x1b52   :  { %8814 = vlog2.f32 %v5496_v36  ;;  %v5504_v49 = vrot.slane %v5503_v41, 1 }
0x1b54   :  { %v5505_v56 = vadd.f32 %v5504_v49, %v5503_v41 }
0x1b56   :  { %8816 = vlog2.f32 %v5505_v56 }
0x1b5f   :  { %v8815_v33 = vpop.eup %8814 }
0x1b60   :  { %v5507_v54 = vmul.f32 0.6931472, %v8815_v33 }
0x1b62   :  { %v5510_v21 = vadd.f32 %v5507_v54, %v5467_v35 }
0x1b63   :  { %v8817_v51 = vpop.eup %8816 }
0x1b64   :  { %v5512_v2 = vsub.f32 %v10942_v4, %v5510_v21  ;;  %v5509_v53 = vmul.f32 0.6931472, %v8817_v51 }
0x1b66   :  { %v5515_v6 = vadd.f32 %v5512_v2, %v10896_v30  ;;  %v5514_v60 = vadd.f32 %v5512_v2, %v10911_v22  ;;  %v5511_v42 = vadd.f32 %v5509_v53, %v5475_v12 }
0x1b68   :  { %v5521_v19 = vsel %vm5419_vm13, %v5515_v6, -inf  ;;  %v5518_v11 = vsel %vm5415_vm4, %v5514_v60, -inf  ;;  %v5513_v58 = vsub.f32 %v10942_v4, %v5511_v42 }
0x1b69   :  { %5522 = vmax.xlane.f32.xlu1 %v5521_v19  ;;  %5519 = vmax.xlane.f32.xlu0 %v5518_v11 }
0x1b6a   :  { %v5517_v44 = vadd.f32 %v5513_v58, %v10896_v30  ;;  %v5516_v57 = vadd.f32 %v5513_v58, %v10916_v1 }
0x1b6c   :  { %v5527_v46 = vsel %vm5419_vm13, %v5517_v44, -inf  ;;  %v5524_v9 = vsel %vm5415_vm4, %v5516_v57, -inf }
0x1b6d   :  { %5528 = vmax.xlane.f32.xlu1 %v5527_v46  ;;  %5525 = vmax.xlane.f32.xlu0 %v5524_v9 }
0x1bf2   :  { %v5523_v50 = vpop.xlane.xlu1 %5522  ;;  %v5520_v7 = vpop.xlane.xlu0 %5519 }
0x1bf3   :  { %v5531_v63 = vsub.f32 %v5515_v6, %v5523_v50  ;;  %v5530_v27 = vsub.f32 %v5514_v60, %v5520_v7 }
0x1bf5   :  { %v5536_v16 = vmul.f32 1.442695, %v5531_v63  ;;  %v5534_v26 = vmul.f32 1.442695, %v5530_v27 }
0x1bf6   :  { %v5529_v14 = vpop.xlane.xlu1 %5528  ;;  %v5526_v35 = vpop.xlane.xlu0 %5525 }
0x1bf7   :  { %8818 = vpow2.f32 %v5536_v16  ;;  %v5533_v39 = vsub.f32 %v5517_v44, %v5529_v14  ;;  %v5532_v43 = vsub.f32 %v5516_v57, %v5526_v35 }
0x1bf8   :  { %8820 = vpow2.f32 %v5534_v26 }
0x1bf9   :  { %v5540_v48 = vmul.f32 1.442695, %v5533_v39  ;;  %v5538_v52 = vmul.f32 1.442695, %v5532_v43 }
0x1bfb   :  { %8822 = vpow2.f32 %v5540_v48 }
0x1bfc   :  { %8824 = vpow2.f32 %v5538_v52 }
0x1c04   :  { %v8819_v55 = vpop.eup %8818 }
0x1c05   :  { %v8821_v5 = vpop.eup %8820  ;;  %v5545_v12 = vsel %vm5419_vm13, %v8819_v55, 0.0 }
0x1c06   :  { %5546 = vadd.xlane.f32.xlu1 %v5545_v12  ;;  %v5542_v32 = vsel %vm5415_vm4, %v8821_v5, 0.0 }
0x1c07   :  { %5543 = vadd.xlane.f32.xlu0 %v5542_v32 }
0x1c08   :  { %v8823_v37 = vpop.eup %8822 }
0x1c09   :  { %v8825_v17 = vpop.eup %8824  ;;  %v5551_v31 = vsel %vm5419_vm13, %v8823_v37, 0.0 }
0x1c0a   :  { %5552 = vadd.xlane.f32.xlu1 %v5551_v31  ;;  %v5548_v40 = vsel %vm5415_vm4, %v8825_v17, 0.0 }
0x1c0b   :  { %5549 = vadd.xlane.f32.xlu0 %v5548_v40 }
0x1c8f   :  { %v5547_v61 = vpop.xlane.xlu1 %5546 }
0x1c90   :  { %8826 = vlog2.f32 %v5547_v61  ;;  %v5544_v8 = vpop.xlane.xlu0 %5543 }
0x1c91   :  { %8828 = vlog2.f32 %v5544_v8 }
0x1c93   :  { %v5553_v47 = vpop.xlane.xlu1 %5552 }
0x1c94   :  { %8830 = vlog2.f32 %v5553_v47  ;;  %v5550_v59 = vpop.xlane.xlu0 %5549 }
0x1c95   :  { %8832 = vlog2.f32 %v5550_v59 }
0x1c9d   :  { %v8827_v25 = vpop.eup %8826 }
0x1c9e   :  { %v8829_v23 = vpop.eup %8828  ;;  %v5557_v45 = vmul.f32 0.6931472, %v8827_v25 }
0x1c9f   :  { %v5555_v0 = vmul.f32 0.6931472, %v8829_v23 }
0x1ca0   :  { %v5563_v3 = vadd.f32 %v5557_v45, %v5523_v50 }
0x1ca1   :  { %v8831_v10 = vpop.eup %8830  ;;  %v5562_v13 = vadd.f32 %v5555_v0, %v5520_v7 }
0x1ca2   :  { %v8833_v18 = vpop.eup %8832  ;;  %v5567_v24 = vsub.f32 %v10927_v20, %v5563_v3  ;;  %v5561_v28 = vmul.f32 0.6931472, %v8831_v10 }
0x1ca3   :  { %v5566_v15 = vsub.f32 -2.6390574, %v5562_v13  ;;  %v5559_v34 = vmul.f32 0.6931472, %v8833_v18 }
0x1ca4   :  { %v5571_v38 = vadd.f32 %v5567_v24, %v10896_v30  ;;  %v5565_v36 = vadd.f32 %v5561_v28, %v5529_v14 }
0x1ca5   :  { %v5570_v41 = vadd.f32 %v5566_v15, %v10911_v22  ;;  %v5564_v49 = vadd.f32 %v5559_v34, %v5526_v35 }
0x1ca6   :  { %v5575_v56 = vsel %vm5419_vm13, %v5571_v38, -inf  ;;  %v5569_v33 = vsub.f32 %v10927_v20, %v5565_v36 }
0x1ca7   :  { %v5574_v54 = vsel %vm5415_vm4, %v5570_v41, -inf  ;;  %v5568_v21 = vsub.f32 -2.6390574, %v5564_v49 }
0x1ca8   :  { %v5576_v51 = vmax.f32 %v5574_v54, %v5575_v56  ;;  %v5573_v2 = vadd.f32 %v5569_v33, %v10896_v30 }
0x1ca9   :  { %v5572_v53 = vadd.f32 %v5568_v21, %v10916_v1 }
0x1caa   :  { %v5577_v6 = vrot.slane %v5576_v51, 4  ;;  %v5584_v60 = vsel %vm5419_vm13, %v5573_v2, -inf }
0x1cab   :  { %v5583_v42 = vsel %vm5415_vm4, %v5572_v53, -inf }
0x1cac   :  { %v5578_v19 = vmax.f32 %v5576_v51, %v5577_v6  ;;  %v5585_v11 = vmax.f32 %v5583_v42, %v5584_v60 }
0x1cae   :  { %v5579_v58 = vrot.slane %v5578_v19, 2  ;;  %v5586_v44 = vrot.slane %v5585_v11, 4 }
0x1cb0   :  { %v5580_v57 = vmax.f32 %v5578_v19, %v5579_v58  ;;  %v5587_v46 = vmax.f32 %v5585_v11, %v5586_v44 }
0x1cb2   :  { %v5581_v9 = vrot.slane %v5580_v57, 1  ;;  %v5588_v50 = vrot.slane %v5587_v46, 2 }
0x1cb4   :  { %v5582_v7 = vmax.f32 %v5580_v57, %v5581_v9  ;;  %v5589_v63 = vmax.f32 %v5587_v46, %v5588_v50 }
0x1cb6   :  { %v5592_v27 = vsub.f32 %v5570_v41, %v5582_v7  ;;  %v5593_v16 = vsub.f32 %v5571_v38, %v5582_v7  ;;  %v5590_v26 = vrot.slane %v5589_v63, 1 }
0x1cb8   :  { %v5596_v14 = vmul.f32 1.442695, %v5592_v27  ;;  %v5598_v35 = vmul.f32 1.442695, %v5593_v16  ;;  %v5591_v39 = vmax.f32 %v5589_v63, %v5590_v26 }
0x1cba   :  { %8834 = vpow2.f32 %v5596_v14  ;;  %v5594_v43 = vsub.f32 %v5572_v53, %v5591_v39  ;;  %v5595_v48 = vsub.f32 %v5573_v2, %v5591_v39 }
0x1cbb   :  { %8836 = vpow2.f32 %v5598_v35 }
0x1cbc   :  { %v5600_v52 = vmul.f32 1.442695, %v5594_v43  ;;  %v5602_v55 = vmul.f32 1.442695, %v5595_v48 }
0x1cbe   :  { %8838 = vpow2.f32 %v5600_v52 }
0x1cbf   :  { %8840 = vpow2.f32 %v5602_v55 }
0x1cc7   :  { %v8835_v5 = vpop.eup %8834 }
0x1cc8   :  { %v8837_v12 = vpop.eup %8836  ;;  %v5604_v32 = vsel %vm5415_vm4, %v8835_v5, 0.0 }
0x1cc9   :  { %v5605_v37 = vsel %vm5419_vm13, %v8837_v12, 0.0 }
0x1cca   :  { %v5606_v17 = vadd.f32 %v5605_v37, %v5604_v32 }
0x1ccb   :  { %v8839_v31 = vpop.eup %8838 }
0x1ccc   :  { %v8841_v40 = vpop.eup %8840  ;;  %v5607_v61 = vrot.slane %v5606_v17, 4  ;;  %v5613_v8 = vsel %vm5415_vm4, %v8839_v31, 0.0 }
0x1ccd   :  { %v5614_v47 = vsel %vm5419_vm13, %v8841_v40, 0.0 }
0x1cce   :  { %v5608_v59 = vadd.f32 %v5607_v61, %v5606_v17  ;;  %v5615_v25 = vadd.f32 %v5614_v47, %v5613_v8 }
0x1cd0   :  { %v5609_v23 = vrot.slane %v5608_v59, 2  ;;  %v5616_v45 = vrot.slane %v5615_v25, 4 }
0x1cd2   :  { %v5610_v0 = vadd.f32 %v5609_v23, %v5608_v59  ;;  %v5617_v3 = vadd.f32 %v5616_v45, %v5615_v25 }
0x1cd4   :  { %v5611_v10 = vrot.slane %v5610_v0, 1  ;;  %v5618_v13 = vrot.slane %v5617_v3, 2 }
0x1cd6   :  { %v5612_v18 = vadd.f32 %v5611_v10, %v5610_v0  ;;  %v5619_v24 = vadd.f32 %v5618_v13, %v5617_v3 }
0x1cd8   :  { %8842 = vlog2.f32 %v5612_v18  ;;  %v5620_v28 = vrot.slane %v5619_v24, 1 }
0x1cda   :  { %v5621_v15 = vadd.f32 %v5620_v28, %v5619_v24 }
0x1cdc   :  { %8844 = vlog2.f32 %v5621_v15 }
0x1ce5   :  { %v8843_v34 = vpop.eup %8842 }
0x1ce6   :  { %v5623_v38 = vmul.f32 0.6931472, %v8843_v34 }
0x1ce8   :  { %v5626_v36 = vadd.f32 %v5623_v38, %v5582_v7 }
0x1ce9   :  { %v8845_v41 = vpop.eup %8844 }
0x1cea   :  { %v5628_v49 = vsub.f32 %v10942_v4, %v5626_v36  ;;  %v5625_v56 = vmul.f32 0.6931472, %v8845_v41 }
0x1cec   :  { %v5631_v33 = vadd.f32 %v5628_v49, %v10896_v30  ;;  %v5630_v54 = vadd.f32 %v5628_v49, %v10911_v22  ;;  %v5627_v21 = vadd.f32 %v5625_v56, %v5591_v39 }
0x1cee   :  { %v5637_v51 = vsel %vm5419_vm13, %v5631_v33, -inf  ;;  %v5634_v2 = vsel %vm5415_vm4, %v5630_v54, -inf  ;;  %v5629_v53 = vsub.f32 %v10942_v4, %v5627_v21 }
0x1cef   :  { %5638 = vmax.xlane.f32.xlu1 %v5637_v51  ;;  %5635 = vmax.xlane.f32.xlu0 %v5634_v2 }
0x1cf0   :  { %v5633_v6 = vadd.f32 %v5629_v53, %v10896_v30  ;;  %v5632_v60 = vadd.f32 %v5629_v53, %v10916_v1 }
0x1cf2   :  { %v5643_v42 = vsel %vm5419_vm13, %v5633_v6, -inf  ;;  %v5640_v19 = vsel %vm5415_vm4, %v5632_v60, -inf }
0x1cf3   :  { %5644 = vmax.xlane.f32.xlu1 %v5643_v42  ;;  %5641 = vmax.xlane.f32.xlu0 %v5640_v19 }
0x1d78   :  { %v5639_v11 = vpop.xlane.xlu1 %5638  ;;  %v5636_v58 = vpop.xlane.xlu0 %5635 }
0x1d79   :  { %v5647_v44 = vsub.f32 %v5631_v33, %v5639_v11  ;;  %v5646_v57 = vsub.f32 %v5630_v54, %v5636_v58 }
0x1d7b   :  { %v5652_v46 = vmul.f32 1.442695, %v5647_v44  ;;  %v5650_v9 = vmul.f32 1.442695, %v5646_v57 }
0x1d7c   :  { %v5645_v50 = vpop.xlane.xlu1 %5644  ;;  %v5642_v7 = vpop.xlane.xlu0 %5641 }
0x1d7d   :  { %8846 = vpow2.f32 %v5652_v46  ;;  %v5649_v63 = vsub.f32 %v5633_v6, %v5645_v50  ;;  %v5648_v27 = vsub.f32 %v5632_v60, %v5642_v7 }
0x1d7e   :  { %8848 = vpow2.f32 %v5650_v9 }
0x1d7f   :  { %v5656_v16 = vmul.f32 1.442695, %v5649_v63  ;;  %v5654_v26 = vmul.f32 1.442695, %v5648_v27 }
0x1d81   :  { %8850 = vpow2.f32 %v5656_v16 }
0x1d82   :  { %8852 = vpow2.f32 %v5654_v26 }
0x1d8a   :  { %v8847_v14 = vpop.eup %8846 }
0x1d8b   :  { %v8849_v35 = vpop.eup %8848  ;;  %v5661_v39 = vsel %vm5419_vm13, %v8847_v14, 0.0 }
0x1d8c   :  { %5662 = vadd.xlane.f32.xlu1 %v5661_v39  ;;  %v5658_v43 = vsel %vm5415_vm4, %v8849_v35, 0.0 }
0x1d8d   :  { %5659 = vadd.xlane.f32.xlu0 %v5658_v43 }
0x1d8e   :  { %v8851_v48 = vpop.eup %8850 }
0x1d8f   :  { %v8853_v52 = vpop.eup %8852  ;;  %v5667_v55 = vsel %vm5419_vm13, %v8851_v48, 0.0 }
0x1d90   :  { %5668 = vadd.xlane.f32.xlu1 %v5667_v55  ;;  %v5664_v5 = vsel %vm5415_vm4, %v8853_v52, 0.0 }
0x1d91   :  { %5665 = vadd.xlane.f32.xlu0 %v5664_v5 }
0x1e15   :  { %v5663_v12 = vpop.xlane.xlu1 %5662 }
0x1e16   :  { %8854 = vlog2.f32 %v5663_v12  ;;  %v5660_v32 = vpop.xlane.xlu0 %5659 }
0x1e17   :  { %8856 = vlog2.f32 %v5660_v32 }
0x1e19   :  { %v5669_v37 = vpop.xlane.xlu1 %5668 }
0x1e1a   :  { %8858 = vlog2.f32 %v5669_v37  ;;  %v5666_v17 = vpop.xlane.xlu0 %5665 }
0x1e1b   :  { %8860 = vlog2.f32 %v5666_v17 }
0x1e23   :  { %v8855_v31 = vpop.eup %8854 }
0x1e24   :  { %v8857_v40 = vpop.eup %8856  ;;  %v5673_v61 = vmul.f32 0.6931472, %v8855_v31 }
0x1e25   :  { %v5671_v8 = vmul.f32 0.6931472, %v8857_v40 }
0x1e26   :  { %v5679_v47 = vadd.f32 %v5673_v61, %v5639_v11 }
0x1e27   :  { %v8859_v59 = vpop.eup %8858  ;;  %v5678_v25 = vadd.f32 %v5671_v8, %v5636_v58 }
0x1e28   :  { %v8861_v23 = vpop.eup %8860  ;;  %v5683_v45 = vsub.f32 %v10927_v20, %v5679_v47  ;;  %v5677_v0 = vmul.f32 0.6931472, %v8859_v59 }
0x1e29   :  { %v5682_v3 = vsub.f32 -2.6390574, %v5678_v25  ;;  %v5675_v10 = vmul.f32 0.6931472, %v8861_v23 }
0x1e2a   :  { %v5687_v13 = vadd.f32 %v5683_v45, %v10896_v30  ;;  %v5681_v18 = vadd.f32 %v5677_v0, %v5645_v50 }
0x1e2b   :  { %v5686_v24 = vadd.f32 %v5682_v3, %v10911_v22  ;;  %v5680_v28 = vadd.f32 %v5675_v10, %v5642_v7 }
0x1e2c   :  { %v5691_v15 = vsel %vm5419_vm13, %v5687_v13, -inf  ;;  %v5685_v34 = vsub.f32 %v10927_v20, %v5681_v18 }
0x1e2d   :  { %v5690_v38 = vsel %vm5415_vm4, %v5686_v24, -inf  ;;  %v5684_v36 = vsub.f32 -2.6390574, %v5680_v28 }
0x1e2e   :  { %v5692_v41 = vmax.f32 %v5690_v38, %v5691_v15  ;;  %v5689_v49 = vadd.f32 %v5685_v34, %v10896_v30 }
0x1e2f   :  { %v5688_v56 = vadd.f32 %v5684_v36, %v10916_v1 }
0x1e30   :  { %v5693_v33 = vrot.slane %v5692_v41, 4  ;;  %v5700_v54 = vsel %vm5419_vm13, %v5689_v49, -inf }
0x1e31   :  { %v5699_v21 = vsel %vm5415_vm4, %v5688_v56, -inf }
0x1e32   :  { %v5694_v51 = vmax.f32 %v5692_v41, %v5693_v33  ;;  %v5701_v2 = vmax.f32 %v5699_v21, %v5700_v54 }
0x1e34   :  { %v5695_v53 = vrot.slane %v5694_v51, 2  ;;  %v5702_v6 = vrot.slane %v5701_v2, 4 }
0x1e36   :  { %v5696_v60 = vmax.f32 %v5694_v51, %v5695_v53  ;;  %v5703_v42 = vmax.f32 %v5701_v2, %v5702_v6 }
0x1e38   :  { %v5697_v19 = vrot.slane %v5696_v60, 1  ;;  %v5704_v11 = vrot.slane %v5703_v42, 2 }
0x1e3a   :  { %v5698_v58 = vmax.f32 %v5696_v60, %v5697_v19  ;;  %v5705_v44 = vmax.f32 %v5703_v42, %v5704_v11 }
0x1e3c   :  { %v5708_v57 = vsub.f32 %v5686_v24, %v5698_v58  ;;  %v5709_v46 = vsub.f32 %v5687_v13, %v5698_v58  ;;  %v5706_v9 = vrot.slane %v5705_v44, 1 }
0x1e3e   :  { %v5712_v50 = vmul.f32 1.442695, %v5708_v57  ;;  %v5714_v7 = vmul.f32 1.442695, %v5709_v46  ;;  %v5707_v63 = vmax.f32 %v5705_v44, %v5706_v9 }
0x1e40   :  { %8862 = vpow2.f32 %v5712_v50  ;;  %v5710_v27 = vsub.f32 %v5688_v56, %v5707_v63  ;;  %v5711_v16 = vsub.f32 %v5689_v49, %v5707_v63 }
0x1e41   :  { %8864 = vpow2.f32 %v5714_v7 }
0x1e42   :  { %v5716_v26 = vmul.f32 1.442695, %v5710_v27  ;;  %v5718_v14 = vmul.f32 1.442695, %v5711_v16 }
0x1e44   :  { %8866 = vpow2.f32 %v5716_v26 }
0x1e45   :  { %8868 = vpow2.f32 %v5718_v14 }
0x1e4d   :  { %v8863_v35 = vpop.eup %8862 }
0x1e4e   :  { %v8865_v39 = vpop.eup %8864  ;;  %v5720_v43 = vsel %vm5415_vm4, %v8863_v35, 0.0 }
0x1e4f   :  { %v5721_v48 = vsel %vm5419_vm13, %v8865_v39, 0.0 }
0x1e50   :  { %v5722_v52 = vadd.f32 %v5721_v48, %v5720_v43 }
0x1e51   :  { %v8867_v55 = vpop.eup %8866 }
0x1e52   :  { %v8869_v5 = vpop.eup %8868  ;;  %v5723_v12 = vrot.slane %v5722_v52, 4  ;;  %v5729_v32 = vsel %vm5415_vm4, %v8867_v55, 0.0 }
0x1e53   :  { %v5730_v37 = vsel %vm5419_vm13, %v8869_v5, 0.0 }
0x1e54   :  { %v5724_v17 = vadd.f32 %v5723_v12, %v5722_v52  ;;  %v5731_v31 = vadd.f32 %v5730_v37, %v5729_v32 }
0x1e56   :  { %v5725_v40 = vrot.slane %v5724_v17, 2  ;;  %v5732_v61 = vrot.slane %v5731_v31, 4 }
0x1e58   :  { %v5726_v8 = vadd.f32 %v5725_v40, %v5724_v17  ;;  %v5733_v47 = vadd.f32 %v5732_v61, %v5731_v31 }
0x1e5a   :  { %v5727_v59 = vrot.slane %v5726_v8, 1  ;;  %v5734_v25 = vrot.slane %v5733_v47, 2 }
0x1e5c   :  { %v5728_v23 = vadd.f32 %v5727_v59, %v5726_v8  ;;  %v5735_v45 = vadd.f32 %v5734_v25, %v5733_v47 }
0x1e5e   :  { %8870 = vlog2.f32 %v5728_v23  ;;  %v5736_v0 = vrot.slane %v5735_v45, 1 }
0x1e60   :  { %v5737_v3 = vadd.f32 %v5736_v0, %v5735_v45 }
0x1e62   :  { %8872 = vlog2.f32 %v5737_v3 }
0x1e6b   :  { %v8871_v10 = vpop.eup %8870 }
0x1e6c   :  { %v5739_v13 = vmul.f32 0.6931472, %v8871_v10 }
0x1e6e   :  { %v5742_v18 = vadd.f32 %v5739_v13, %v5698_v58 }
0x1e6f   :  { %v8873_v24 = vpop.eup %8872 }
0x1e70   :  { %v5744_v28 = vsub.f32 %v10942_v4, %v5742_v18  ;;  %v5741_v15 = vmul.f32 0.6931472, %v8873_v24 }
0x1e72   :  { %v5747_v34 = vadd.f32 %v5744_v28, %v10896_v30  ;;  %v5746_v38 = vadd.f32 %v5744_v28, %v10911_v22  ;;  %v5743_v36 = vadd.f32 %v5741_v15, %v5707_v63 }
0x1e74   :  { %v5753_v41 = vsel %vm5419_vm13, %v5747_v34, -inf  ;;  %v5750_v49 = vsel %vm5415_vm4, %v5746_v38, -inf  ;;  %v5745_v56 = vsub.f32 %v10942_v4, %v5743_v36 }
0x1e75   :  { %5754 = vmax.xlane.f32.xlu1 %v5753_v41  ;;  %5751 = vmax.xlane.f32.xlu0 %v5750_v49 }
0x1e76   :  { %v5749_v33 = vadd.f32 %v5745_v56, %v10896_v30  ;;  %v5748_v54 = vadd.f32 %v5745_v56, %v10916_v1 }
0x1e78   :  { %v5759_v21 = vsel %vm5419_vm13, %v5749_v33, -inf  ;;  %v5756_v51 = vsel %vm5415_vm4, %v5748_v54, -inf }
0x1e79   :  { %5760 = vmax.xlane.f32.xlu1 %v5759_v21  ;;  %5757 = vmax.xlane.f32.xlu0 %v5756_v51 }
0x1efe   :  { %v5755_v2 = vpop.xlane.xlu1 %5754  ;;  %v5752_v53 = vpop.xlane.xlu0 %5751 }
0x1eff   :  { %v5763_v6 = vsub.f32 %v5747_v34, %v5755_v2  ;;  %v5762_v60 = vsub.f32 %v5746_v38, %v5752_v53 }
0x1f01   :  { %v5768_v42 = vmul.f32 1.442695, %v5763_v6  ;;  %v5766_v19 = vmul.f32 1.442695, %v5762_v60 }
0x1f02   :  { %v5761_v11 = vpop.xlane.xlu1 %5760  ;;  %v5758_v58 = vpop.xlane.xlu0 %5757 }
0x1f03   :  { %8874 = vpow2.f32 %v5768_v42  ;;  %v5765_v44 = vsub.f32 %v5749_v33, %v5761_v11  ;;  %v5764_v57 = vsub.f32 %v5748_v54, %v5758_v58 }
0x1f04   :  { %8876 = vpow2.f32 %v5766_v19 }
0x1f05   :  { %v5772_v46 = vmul.f32 1.442695, %v5765_v44  ;;  %v5770_v9 = vmul.f32 1.442695, %v5764_v57 }
0x1f07   :  { %8878 = vpow2.f32 %v5772_v46 }
0x1f08   :  { %8880 = vpow2.f32 %v5770_v9 }
0x1f10   :  { %v8875_v50 = vpop.eup %8874 }
0x1f11   :  { %v8877_v7 = vpop.eup %8876  ;;  %v5777_v63 = vsel %vm5419_vm13, %v8875_v50, 0.0 }
0x1f12   :  { %5778 = vadd.xlane.f32.xlu1 %v5777_v63  ;;  %v5774_v27 = vsel %vm5415_vm4, %v8877_v7, 0.0 }
0x1f13   :  { %5775 = vadd.xlane.f32.xlu0 %v5774_v27 }
0x1f14   :  { %v8879_v16 = vpop.eup %8878 }
0x1f15   :  { %v8881_v26 = vpop.eup %8880  ;;  %v5783_v14 = vsel %vm5419_vm13, %v8879_v16, 0.0 }
0x1f16   :  { %5784 = vadd.xlane.f32.xlu1 %v5783_v14  ;;  %v5780_v35 = vsel %vm5415_vm4, %v8881_v26, 0.0 }
0x1f17   :  { %5781 = vadd.xlane.f32.xlu0 %v5780_v35 }
0x1f9b   :  { %v5779_v39 = vpop.xlane.xlu1 %5778 }
0x1f9c   :  { %8882 = vlog2.f32 %v5779_v39  ;;  %v5776_v43 = vpop.xlane.xlu0 %5775 }
0x1f9d   :  { %8884 = vlog2.f32 %v5776_v43 }
0x1f9f   :  { %v5785_v48 = vpop.xlane.xlu1 %5784 }
0x1fa0   :  { %8886 = vlog2.f32 %v5785_v48  ;;  %v5782_v52 = vpop.xlane.xlu0 %5781 }
0x1fa1   :  { %8888 = vlog2.f32 %v5782_v52 }
0x1fa9   :  { %v8883_v55 = vpop.eup %8882 }
0x1faa   :  { %v8885_v5 = vpop.eup %8884  ;;  %v5789_v12 = vmul.f32 0.6931472, %v8883_v55 }
0x1fab   :  { %v5787_v32 = vmul.f32 0.6931472, %v8885_v5 }
0x1fac   :  { %v5795_v37 = vadd.f32 %v5789_v12, %v5755_v2 }
0x1fad   :  { %v8887_v17 = vpop.eup %8886  ;;  %v5794_v31 = vadd.f32 %v5787_v32, %v5752_v53 }
0x1fae   :  { %v8889_v40 = vpop.eup %8888  ;;  %v5799_v61 = vsub.f32 %v10927_v20, %v5795_v37  ;;  %v5793_v8 = vmul.f32 0.6931472, %v8887_v17 }
0x1faf   :  { %v5798_v47 = vsub.f32 -2.6390574, %v5794_v31  ;;  %v5791_v59 = vmul.f32 0.6931472, %v8889_v40 }
0x1fb0   :  { %v5803_v25 = vadd.f32 %v5799_v61, %v10896_v30  ;;  %v5797_v23 = vadd.f32 %v5793_v8, %v5761_v11 }
0x1fb1   :  { %v5802_v45 = vadd.f32 %v5798_v47, %v10911_v22  ;;  %v5796_v0 = vadd.f32 %v5791_v59, %v5758_v58 }
0x1fb2   :  { %v5807_v3 = vsel %vm5419_vm13, %v5803_v25, -inf  ;;  %v5801_v10 = vsub.f32 %v10927_v20, %v5797_v23 }
0x1fb3   :  { %v5806_v13 = vsel %vm5415_vm4, %v5802_v45, -inf  ;;  %v5800_v18 = vsub.f32 -2.6390574, %v5796_v0 }
0x1fb4   :  { %v5808_v24 = vmax.f32 %v5806_v13, %v5807_v3  ;;  %v5805_v28 = vadd.f32 %v5801_v10, %v10896_v30 }
0x1fb5   :  { %v5804_v15 = vadd.f32 %v5800_v18, %v10916_v1 }
0x1fb6   :  { %v5809_v34 = vrot.slane %v5808_v24, 4  ;;  %v5816_v38 = vsel %vm5419_vm13, %v5805_v28, -inf }
0x1fb7   :  { %v5815_v36 = vsel %vm5415_vm4, %v5804_v15, -inf }
0x1fb8   :  { %v5810_v41 = vmax.f32 %v5808_v24, %v5809_v34  ;;  %v5817_v49 = vmax.f32 %v5815_v36, %v5816_v38 }
0x1fba   :  { %v5811_v56 = vrot.slane %v5810_v41, 2  ;;  %v5818_v33 = vrot.slane %v5817_v49, 4 }
0x1fbc   :  { %v5812_v54 = vmax.f32 %v5810_v41, %v5811_v56  ;;  %v5819_v21 = vmax.f32 %v5817_v49, %v5818_v33 }
0x1fbe   :  { %v5813_v51 = vrot.slane %v5812_v54, 1  ;;  %v5820_v2 = vrot.slane %v5819_v21, 2 }
0x1fc0   :  { %v5814_v53 = vmax.f32 %v5812_v54, %v5813_v51  ;;  %v5821_v6 = vmax.f32 %v5819_v21, %v5820_v2 }
0x1fc2   :  { %v5824_v60 = vsub.f32 %v5802_v45, %v5814_v53  ;;  %v5825_v42 = vsub.f32 %v5803_v25, %v5814_v53  ;;  %v5822_v19 = vrot.slane %v5821_v6, 1 }
0x1fc4   :  { %v5828_v11 = vmul.f32 1.442695, %v5824_v60  ;;  %v5830_v58 = vmul.f32 1.442695, %v5825_v42  ;;  %v5823_v44 = vmax.f32 %v5821_v6, %v5822_v19 }
0x1fc6   :  { %8890 = vpow2.f32 %v5828_v11  ;;  %v5826_v57 = vsub.f32 %v5804_v15, %v5823_v44  ;;  %v5827_v46 = vsub.f32 %v5805_v28, %v5823_v44 }
0x1fc7   :  { %8892 = vpow2.f32 %v5830_v58 }
0x1fc8   :  { %v5832_v9 = vmul.f32 1.442695, %v5826_v57  ;;  %v5834_v50 = vmul.f32 1.442695, %v5827_v46 }
0x1fca   :  { %8894 = vpow2.f32 %v5832_v9 }
0x1fcb   :  { %8896 = vpow2.f32 %v5834_v50 }
0x1fd3   :  { %v8891_v7 = vpop.eup %8890 }
0x1fd4   :  { %v8893_v63 = vpop.eup %8892  ;;  %v5836_v27 = vsel %vm5415_vm4, %v8891_v7, 0.0 }
0x1fd5   :  { %v5837_v16 = vsel %vm5419_vm13, %v8893_v63, 0.0 }
0x1fd6   :  { %v5838_v26 = vadd.f32 %v5837_v16, %v5836_v27 }
0x1fd7   :  { %v8895_v14 = vpop.eup %8894 }
0x1fd8   :  { %v8897_v35 = vpop.eup %8896  ;;  %v5839_v39 = vrot.slane %v5838_v26, 4  ;;  %v5845_v43 = vsel %vm5415_vm4, %v8895_v14, 0.0 }
0x1fd9   :  { %v5846_v48 = vsel %vm5419_vm13, %v8897_v35, 0.0 }
0x1fda   :  { %v5840_v52 = vadd.f32 %v5839_v39, %v5838_v26  ;;  %v5847_v55 = vadd.f32 %v5846_v48, %v5845_v43 }
0x1fdc   :  { %v5841_v5 = vrot.slane %v5840_v52, 2  ;;  %v5848_v12 = vrot.slane %v5847_v55, 4 }
0x1fde   :  { %v5842_v32 = vadd.f32 %v5841_v5, %v5840_v52  ;;  %v5849_v37 = vadd.f32 %v5848_v12, %v5847_v55 }
0x1fe0   :  { %v5843_v17 = vrot.slane %v5842_v32, 1  ;;  %v5850_v31 = vrot.slane %v5849_v37, 2 }
0x1fe2   :  { %v5844_v40 = vadd.f32 %v5843_v17, %v5842_v32  ;;  %v5851_v61 = vadd.f32 %v5850_v31, %v5849_v37 }
0x1fe4   :  { %8898 = vlog2.f32 %v5844_v40  ;;  %v5852_v8 = vrot.slane %v5851_v61, 1 }
0x1fe6   :  { %v5853_v47 = vadd.f32 %v5852_v8, %v5851_v61 }
0x1fe8   :  { %8900 = vlog2.f32 %v5853_v47 }
0x1ff1   :  { %v8899_v59 = vpop.eup %8898 }
0x1ff2   :  { %v5855_v25 = vmul.f32 0.6931472, %v8899_v59 }
0x1ff4   :  { %v5858_v23 = vadd.f32 %v5855_v25, %v5814_v53 }
0x1ff5   :  { %v8901_v45 = vpop.eup %8900 }
0x1ff6   :  { %v5860_v0 = vsub.f32 %v10942_v4, %v5858_v23  ;;  %v5857_v3 = vmul.f32 0.6931472, %v8901_v45 }
0x1ff8   :  { %v5863_v10 = vadd.f32 %v5860_v0, %v10896_v30  ;;  %v5862_v13 = vadd.f32 %v5860_v0, %v10911_v22  ;;  %v5859_v18 = vadd.f32 %v5857_v3, %v5823_v44 }
0x1ffa   :  { %v5869_v24 = vsel %vm5419_vm13, %v5863_v10, -inf  ;;  %v5866_v28 = vsel %vm5415_vm4, %v5862_v13, -inf  ;;  %v5861_v15 = vsub.f32 %v10942_v4, %v5859_v18 }
0x1ffb   :  { %5870 = vmax.xlane.f32.xlu1 %v5869_v24  ;;  %5867 = vmax.xlane.f32.xlu0 %v5866_v28 }
0x1ffc   :  { %v5865_v34 = vadd.f32 %v5861_v15, %v10896_v30  ;;  %v5864_v38 = vadd.f32 %v5861_v15, %v10916_v1 }
0x1ffe   :  { %v5875_v36 = vsel %vm5419_vm13, %v5865_v34, -inf  ;;  %v5872_v41 = vsel %vm5415_vm4, %v5864_v38, -inf }
0x1fff   :  { %5876 = vmax.xlane.f32.xlu1 %v5875_v36  ;;  %5873 = vmax.xlane.f32.xlu0 %v5872_v41 }
0x2084   :  { %v5871_v49 = vpop.xlane.xlu1 %5870  ;;  %v5868_v56 = vpop.xlane.xlu0 %5867 }
0x2085   :  { %v5879_v33 = vsub.f32 %v5863_v10, %v5871_v49  ;;  %v5878_v54 = vsub.f32 %v5862_v13, %v5868_v56 }
0x2087   :  { %v5884_v21 = vmul.f32 1.442695, %v5879_v33  ;;  %v5882_v51 = vmul.f32 1.442695, %v5878_v54 }
0x2088   :  { %v5877_v2 = vpop.xlane.xlu1 %5876  ;;  %v5874_v53 = vpop.xlane.xlu0 %5873 }
0x2089   :  { %8902 = vpow2.f32 %v5884_v21  ;;  %v5881_v6 = vsub.f32 %v5865_v34, %v5877_v2  ;;  %v5880_v60 = vsub.f32 %v5864_v38, %v5874_v53 }
0x208a   :  { %8904 = vpow2.f32 %v5882_v51 }
0x208b   :  { %v5888_v42 = vmul.f32 1.442695, %v5881_v6  ;;  %v5886_v19 = vmul.f32 1.442695, %v5880_v60 }
0x208d   :  { %8906 = vpow2.f32 %v5888_v42 }
0x208e   :  { %8908 = vpow2.f32 %v5886_v19 }
0x2096   :  { %v8903_v11 = vpop.eup %8902 }
0x2097   :  { %v8905_v58 = vpop.eup %8904  ;;  %v5893_v44 = vsel %vm5419_vm13, %v8903_v11, 0.0 }
0x2098   :  { %5894 = vadd.xlane.f32.xlu1 %v5893_v44  ;;  %v5890_v57 = vsel %vm5415_vm4, %v8905_v58, 0.0 }
0x2099   :  { %5891 = vadd.xlane.f32.xlu0 %v5890_v57 }
0x209a   :  { %v8907_v46 = vpop.eup %8906 }
0x209b   :  { %v8909_v9 = vpop.eup %8908  ;;  %v5899_v50 = vsel %vm5419_vm13, %v8907_v46, 0.0 }
0x209c   :  { %5900 = vadd.xlane.f32.xlu1 %v5899_v50  ;;  %v5896_v7 = vsel %vm5415_vm4, %v8909_v9, 0.0 }
0x209d   :  { %5897 = vadd.xlane.f32.xlu0 %v5896_v7 }
0x2121   :  { %v5895_v63 = vpop.xlane.xlu1 %5894 }
0x2122   :  { %8910 = vlog2.f32 %v5895_v63  ;;  %v5892_v27 = vpop.xlane.xlu0 %5891 }
0x2123   :  { %8912 = vlog2.f32 %v5892_v27 }
0x2125   :  { %v5901_v16 = vpop.xlane.xlu1 %5900 }
0x2126   :  { %8914 = vlog2.f32 %v5901_v16  ;;  %v5898_v26 = vpop.xlane.xlu0 %5897 }
0x2127   :  { %8916 = vlog2.f32 %v5898_v26 }
0x212f   :  { %v8911_v14 = vpop.eup %8910 }
0x2130   :  { %v8913_v35 = vpop.eup %8912  ;;  %v5905_v39 = vmul.f32 0.6931472, %v8911_v14 }
0x2131   :  { %v5903_v43 = vmul.f32 0.6931472, %v8913_v35 }
0x2132   :  { %v5911_v48 = vadd.f32 %v5905_v39, %v5871_v49 }
0x2133   :  { %v8915_v52 = vpop.eup %8914  ;;  %v5910_v55 = vadd.f32 %v5903_v43, %v5868_v56 }
0x2134   :  { %v8917_v5 = vpop.eup %8916  ;;  %v5915_v12 = vsub.f32 %v10927_v20, %v5911_v48  ;;  %v5909_v32 = vmul.f32 0.6931472, %v8915_v52 }
0x2135   :  { %v5914_v37 = vsub.f32 -2.6390574, %v5910_v55  ;;  %v5907_v17 = vmul.f32 0.6931472, %v8917_v5 }
0x2136   :  { %v5919_v31 = vadd.f32 %v5915_v12, %v10896_v30  ;;  %v5913_v40 = vadd.f32 %v5909_v32, %v5877_v2 }
0x2137   :  { %v5918_v61 = vadd.f32 %v5914_v37, %v10911_v22  ;;  %v5912_v8 = vadd.f32 %v5907_v17, %v5874_v53 }
0x2138   :  { %v5923_v47 = vsel %vm5419_vm13, %v5919_v31, -inf  ;;  %v5917_v59 = vsub.f32 %v10927_v20, %v5913_v40 }
0x2139   :  { %v5922_v25 = vsel %vm5415_vm4, %v5918_v61, -inf  ;;  %v5916_v23 = vsub.f32 -2.6390574, %v5912_v8 }
0x213a   :  { %v5924_v45 = vmax.f32 %v5922_v25, %v5923_v47  ;;  %v5921_v0 = vadd.f32 %v5917_v59, %v10896_v30 }
0x213b   :  { %v5920_v3 = vadd.f32 %v5916_v23, %v10916_v1 }
0x213c   :  { %v5925_v10 = vrot.slane %v5924_v45, 4  ;;  %v5932_v13 = vsel %vm5419_vm13, %v5921_v0, -inf }
0x213d   :  { %v5931_v18 = vsel %vm5415_vm4, %v5920_v3, -inf }
0x213e   :  { %v5926_v24 = vmax.f32 %v5924_v45, %v5925_v10  ;;  %v5933_v28 = vmax.f32 %v5931_v18, %v5932_v13 }
0x2140   :  { %v5927_v15 = vrot.slane %v5926_v24, 2  ;;  %v5934_v34 = vrot.slane %v5933_v28, 4 }
0x2142   :  { %v5928_v38 = vmax.f32 %v5926_v24, %v5927_v15  ;;  %v5935_v36 = vmax.f32 %v5933_v28, %v5934_v34 }
0x2144   :  { %v5929_v41 = vrot.slane %v5928_v38, 1  ;;  %v5936_v49 = vrot.slane %v5935_v36, 2 }
0x2146   :  { %v5930_v56 = vmax.f32 %v5928_v38, %v5929_v41  ;;  %v5937_v33 = vmax.f32 %v5935_v36, %v5936_v49 }
0x2148   :  { %v5940_v54 = vsub.f32 %v5918_v61, %v5930_v56  ;;  %v5941_v21 = vsub.f32 %v5919_v31, %v5930_v56  ;;  %v5938_v51 = vrot.slane %v5937_v33, 1 }
0x214a   :  { %v5944_v2 = vmul.f32 1.442695, %v5940_v54  ;;  %v5946_v53 = vmul.f32 1.442695, %v5941_v21  ;;  %v5939_v6 = vmax.f32 %v5937_v33, %v5938_v51 }
0x214c   :  { %8918 = vpow2.f32 %v5944_v2  ;;  %v5942_v60 = vsub.f32 %v5920_v3, %v5939_v6  ;;  %v5943_v42 = vsub.f32 %v5921_v0, %v5939_v6 }
0x214d   :  { %8920 = vpow2.f32 %v5946_v53 }
0x214e   :  { %v5948_v19 = vmul.f32 1.442695, %v5942_v60  ;;  %v5950_v11 = vmul.f32 1.442695, %v5943_v42 }
0x2150   :  { %8922 = vpow2.f32 %v5948_v19 }
0x2151   :  { %8924 = vpow2.f32 %v5950_v11 }
0x2159   :  { %v8919_v58 = vpop.eup %8918 }
0x215a   :  { %v8921_v44 = vpop.eup %8920  ;;  %v5952_v57 = vsel %vm5415_vm4, %v8919_v58, 0.0 }
0x215b   :  { %v5953_v46 = vsel %vm5419_vm13, %v8921_v44, 0.0 }
0x215c   :  { %v5954_v9 = vadd.f32 %v5953_v46, %v5952_v57 }
0x215d   :  { %v8923_v50 = vpop.eup %8922 }
0x215e   :  { %v8925_v7 = vpop.eup %8924  ;;  %v5955_v63 = vrot.slane %v5954_v9, 4  ;;  %v5961_v27 = vsel %vm5415_vm4, %v8923_v50, 0.0 }
0x215f   :  { %v5962_v16 = vsel %vm5419_vm13, %v8925_v7, 0.0 }
0x2160   :  { %v5956_v26 = vadd.f32 %v5955_v63, %v5954_v9  ;;  %v5963_v14 = vadd.f32 %v5962_v16, %v5961_v27 }
0x2162   :  { %v5957_v35 = vrot.slane %v5956_v26, 2  ;;  %v5964_v39 = vrot.slane %v5963_v14, 4 }
0x2164   :  { %v5958_v43 = vadd.f32 %v5957_v35, %v5956_v26  ;;  %v5965_v48 = vadd.f32 %v5964_v39, %v5963_v14 }
0x2166   :  { %v5959_v52 = vrot.slane %v5958_v43, 1  ;;  %v5966_v55 = vrot.slane %v5965_v48, 2 }
0x2168   :  { %v5960_v5 = vadd.f32 %v5959_v52, %v5958_v43  ;;  %v5967_v12 = vadd.f32 %v5966_v55, %v5965_v48 }
0x216a   :  { %8926 = vlog2.f32 %v5960_v5  ;;  %v5968_v32 = vrot.slane %v5967_v12, 1 }
0x216c   :  { %v5969_v37 = vadd.f32 %v5968_v32, %v5967_v12 }
0x216e   :  { %8928 = vlog2.f32 %v5969_v37 }
0x2177   :  { %v8927_v17 = vpop.eup %8926 }
0x2178   :  { %v5971_v31 = vmul.f32 0.6931472, %v8927_v17 }
0x217a   :  { %v5974_v40 = vadd.f32 %v5971_v31, %v5930_v56 }
0x217b   :  { %v8929_v61 = vpop.eup %8928 }
0x217c   :  { %v5976_v8 = vsub.f32 %v10942_v4, %v5974_v40  ;;  %v5973_v47 = vmul.f32 0.6931472, %v8929_v61 }
0x217e   :  { %v5979_v59 = vadd.f32 %v5976_v8, %v10896_v30  ;;  %v5978_v25 = vadd.f32 %v5976_v8, %v10911_v22  ;;  %v5975_v23 = vadd.f32 %v5973_v47, %v5939_v6 }
0x2180   :  { %v5985_v45 = vsel %vm5419_vm13, %v5979_v59, -inf  ;;  %v5982_v0 = vsel %vm5415_vm4, %v5978_v25, -inf  ;;  %v5977_v3 = vsub.f32 %v10942_v4, %v5975_v23 }
0x2181   :  { %5986 = vmax.xlane.f32.xlu1 %v5985_v45  ;;  %5983 = vmax.xlane.f32.xlu0 %v5982_v0 }
0x2182   :  { %v5981_v10 = vadd.f32 %v5977_v3, %v10896_v30  ;;  %v5980_v13 = vadd.f32 %v5977_v3, %v10916_v1 }
0x2184   :  { %v5991_v18 = vsel %vm5419_vm13, %v5981_v10, -inf  ;;  %v5988_v24 = vsel %vm5415_vm4, %v5980_v13, -inf }
0x2185   :  { %5992 = vmax.xlane.f32.xlu1 %v5991_v18  ;;  %5989 = vmax.xlane.f32.xlu0 %v5988_v24 }
0x220a   :  { %v5987_v28 = vpop.xlane.xlu1 %5986  ;;  %v5984_v15 = vpop.xlane.xlu0 %5983 }
0x220b   :  { %v5995_v34 = vsub.f32 %v5979_v59, %v5987_v28  ;;  %v5994_v38 = vsub.f32 %v5978_v25, %v5984_v15 }
0x220d   :  { %v6000_v36 = vmul.f32 1.442695, %v5995_v34  ;;  %v5998_v41 = vmul.f32 1.442695, %v5994_v38 }
0x220e   :  { %v5993_v49 = vpop.xlane.xlu1 %5992  ;;  %v5990_v56 = vpop.xlane.xlu0 %5989 }
0x220f   :  { %8930 = vpow2.f32 %v6000_v36  ;;  %v5997_v33 = vsub.f32 %v5981_v10, %v5993_v49  ;;  %v5996_v54 = vsub.f32 %v5980_v13, %v5990_v56 }
0x2210   :  { %8932 = vpow2.f32 %v5998_v41 }
0x2211   :  { %v6004_v21 = vmul.f32 1.442695, %v5997_v33  ;;  %v6002_v51 = vmul.f32 1.442695, %v5996_v54 }
0x2213   :  { %8934 = vpow2.f32 %v6004_v21 }
0x2214   :  { %8936 = vpow2.f32 %v6002_v51 }
0x221c   :  { %v8931_v2 = vpop.eup %8930 }
0x221d   :  { %v8933_v53 = vpop.eup %8932  ;;  %v6009_v6 = vsel %vm5419_vm13, %v8931_v2, 0.0 }
0x221e   :  { %6010 = vadd.xlane.f32.xlu1 %v6009_v6  ;;  %v6006_v60 = vsel %vm5415_vm4, %v8933_v53, 0.0 }
0x221f   :  { %6007 = vadd.xlane.f32.xlu0 %v6006_v60 }
0x2220   :  { %v8935_v42 = vpop.eup %8934 }
0x2221   :  { %v8937_v19 = vpop.eup %8936  ;;  %v6015_v11 = vsel %vm5419_vm13, %v8935_v42, 0.0 }
0x2222   :  { %6016 = vadd.xlane.f32.xlu1 %v6015_v11  ;;  %v6012_v58 = vsel %vm5415_vm4, %v8937_v19, 0.0 }
0x2223   :  { %6013 = vadd.xlane.f32.xlu0 %v6012_v58 }
0x22a7   :  { %v6011_v44 = vpop.xlane.xlu1 %6010 }
0x22a8   :  { %8938 = vlog2.f32 %v6011_v44  ;;  %v6008_v57 = vpop.xlane.xlu0 %6007 }
0x22a9   :  { %8940 = vlog2.f32 %v6008_v57 }
0x22ab   :  { %v6017_v46 = vpop.xlane.xlu1 %6016 }
0x22ac   :  { %8942 = vlog2.f32 %v6017_v46  ;;  %v6014_v9 = vpop.xlane.xlu0 %6013 }
0x22ad   :  { %8944 = vlog2.f32 %v6014_v9 }
0x22b5   :  { %v8939_v50 = vpop.eup %8938 }
0x22b6   :  { %v8941_v7 = vpop.eup %8940  ;;  %v6021_v63 = vmul.f32 0.6931472, %v8939_v50 }
0x22b7   :  { %v6019_v27 = vmul.f32 0.6931472, %v8941_v7 }
0x22b8   :  { %v6027_v16 = vadd.f32 %v6021_v63, %v5987_v28 }
0x22b9   :  { %v8943_v26 = vpop.eup %8942  ;;  %v6026_v14 = vadd.f32 %v6019_v27, %v5984_v15 }
0x22ba   :  { %v8945_v35 = vpop.eup %8944  ;;  %v6031_v39 = vsub.f32 %v10927_v20, %v6027_v16  ;;  %v6025_v43 = vmul.f32 0.6931472, %v8943_v26 }
0x22bb   :  { %v6030_v48 = vsub.f32 -2.6390574, %v6026_v14  ;;  %v6023_v52 = vmul.f32 0.6931472, %v8945_v35 }
0x22bc   :  { %v6035_v55 = vadd.f32 %v6031_v39, %v10896_v30  ;;  %v6029_v5 = vadd.f32 %v6025_v43, %v5993_v49 }
0x22bd   :  { %v6034_v12 = vadd.f32 %v6030_v48, %v10911_v22  ;;  %v6028_v32 = vadd.f32 %v6023_v52, %v5990_v56 }
0x22be   :  { %v6039_v37 = vsel %vm5419_vm13, %v6035_v55, -inf  ;;  %v6033_v17 = vsub.f32 %v10927_v20, %v6029_v5 }
0x22bf   :  { %v6038_v31 = vsel %vm5415_vm4, %v6034_v12, -inf  ;;  %v6032_v40 = vsub.f32 -2.6390574, %v6028_v32 }
0x22c0   :  { %v6040_v61 = vmax.f32 %v6038_v31, %v6039_v37  ;;  %v6037_v8 = vadd.f32 %v6033_v17, %v10896_v30 }
0x22c1   :  { %v6036_v47 = vadd.f32 %v6032_v40, %v10916_v1 }
0x22c2   :  { %v6041_v59 = vrot.slane %v6040_v61, 4  ;;  %v6048_v25 = vsel %vm5419_vm13, %v6037_v8, -inf }
0x22c3   :  { %v6047_v23 = vsel %vm5415_vm4, %v6036_v47, -inf }
0x22c4   :  { %v6042_v45 = vmax.f32 %v6040_v61, %v6041_v59  ;;  %v6049_v0 = vmax.f32 %v6047_v23, %v6048_v25 }
0x22c6   :  { %v6043_v3 = vrot.slane %v6042_v45, 2  ;;  %v6050_v10 = vrot.slane %v6049_v0, 4 }
0x22c8   :  { %v6044_v13 = vmax.f32 %v6042_v45, %v6043_v3  ;;  %v6051_v18 = vmax.f32 %v6049_v0, %v6050_v10 }
0x22ca   :  { %v6045_v24 = vrot.slane %v6044_v13, 1  ;;  %v6052_v28 = vrot.slane %v6051_v18, 2 }
0x22cc   :  { %v6046_v15 = vmax.f32 %v6044_v13, %v6045_v24  ;;  %v6053_v34 = vmax.f32 %v6051_v18, %v6052_v28 }
0x22ce   :  { %v6056_v38 = vsub.f32 %v6034_v12, %v6046_v15  ;;  %v6057_v36 = vsub.f32 %v6035_v55, %v6046_v15  ;;  %v6054_v41 = vrot.slane %v6053_v34, 1 }
0x22d0   :  { %v6060_v49 = vmul.f32 1.442695, %v6056_v38  ;;  %v6062_v56 = vmul.f32 1.442695, %v6057_v36  ;;  %v6055_v33 = vmax.f32 %v6053_v34, %v6054_v41 }
0x22d2   :  { %8946 = vpow2.f32 %v6060_v49  ;;  %v6058_v54 = vsub.f32 %v6036_v47, %v6055_v33  ;;  %v6059_v21 = vsub.f32 %v6037_v8, %v6055_v33 }
0x22d3   :  { %8948 = vpow2.f32 %v6062_v56 }
0x22d4   :  { %v6064_v51 = vmul.f32 1.442695, %v6058_v54  ;;  %v6066_v2 = vmul.f32 1.442695, %v6059_v21 }
0x22d6   :  { %8950 = vpow2.f32 %v6064_v51 }
0x22d7   :  { %8952 = vpow2.f32 %v6066_v2 }
0x22df   :  { %v8947_v53 = vpop.eup %8946 }
0x22e0   :  { %v8949_v6 = vpop.eup %8948  ;;  %v6068_v60 = vsel %vm5415_vm4, %v8947_v53, 0.0 }
0x22e1   :  { %v6069_v42 = vsel %vm5419_vm13, %v8949_v6, 0.0 }
0x22e2   :  { %v6070_v19 = vadd.f32 %v6069_v42, %v6068_v60 }
0x22e3   :  { %v8951_v11 = vpop.eup %8950 }
0x22e4   :  { %v8953_v58 = vpop.eup %8952  ;;  %v6071_v44 = vrot.slane %v6070_v19, 4  ;;  %v6077_v57 = vsel %vm5415_vm4, %v8951_v11, 0.0 }
0x22e5   :  { %v6078_v46 = vsel %vm5419_vm13, %v8953_v58, 0.0 }
0x22e6   :  { %v6072_v9 = vadd.f32 %v6071_v44, %v6070_v19  ;;  %v6079_v50 = vadd.f32 %v6078_v46, %v6077_v57 }
0x22e8   :  { %v6073_v7 = vrot.slane %v6072_v9, 2  ;;  %v6080_v63 = vrot.slane %v6079_v50, 4 }
0x22ea   :  { %v6074_v27 = vadd.f32 %v6073_v7, %v6072_v9  ;;  %v6081_v16 = vadd.f32 %v6080_v63, %v6079_v50 }
0x22ec   :  { %v6075_v26 = vrot.slane %v6074_v27, 1  ;;  %v6082_v14 = vrot.slane %v6081_v16, 2 }
0x22ee   :  { %v6076_v35 = vadd.f32 %v6075_v26, %v6074_v27  ;;  %v6083_v39 = vadd.f32 %v6082_v14, %v6081_v16 }
0x22f0   :  { %8954 = vlog2.f32 %v6076_v35  ;;  %v6084_v43 = vrot.slane %v6083_v39, 1 }
0x22f2   :  { %v6085_v48 = vadd.f32 %v6084_v43, %v6083_v39 }
0x22f4   :  { %8956 = vlog2.f32 %v6085_v48 }
0x22fd   :  { %v8955_v52 = vpop.eup %8954 }
0x22fe   :  { %v6087_v55 = vmul.f32 0.6931472, %v8955_v52 }
0x2300   :  { %v6090_v5 = vadd.f32 %v6087_v55, %v6046_v15 }
0x2301   :  { %v8957_v12 = vpop.eup %8956 }
0x2302   :  { %v6092_v32 = vsub.f32 %v10942_v4, %v6090_v5  ;;  %v6089_v37 = vmul.f32 0.6931472, %v8957_v12 }
0x2304   :  { %v6095_v17 = vadd.f32 %v6092_v32, %v10896_v30  ;;  %v6094_v31 = vadd.f32 %v6092_v32, %v10911_v22  ;;  %v6091_v40 = vadd.f32 %v6089_v37, %v6055_v33 }
0x2306   :  { %v6101_v61 = vsel %vm5419_vm13, %v6095_v17, -inf  ;;  %v6098_v8 = vsel %vm5415_vm4, %v6094_v31, -inf  ;;  %v6093_v47 = vsub.f32 %v10942_v4, %v6091_v40 }
0x2307   :  { %6102 = vmax.xlane.f32.xlu1 %v6101_v61  ;;  %6099 = vmax.xlane.f32.xlu0 %v6098_v8 }
0x2308   :  { %v6097_v59 = vadd.f32 %v6093_v47, %v10896_v30  ;;  %v6096_v25 = vadd.f32 %v6093_v47, %v10916_v1 }
0x230a   :  { %v6107_v23 = vsel %vm5419_vm13, %v6097_v59, -inf  ;;  %v6104_v45 = vsel %vm5415_vm4, %v6096_v25, -inf }
0x230b   :  { %6108 = vmax.xlane.f32.xlu1 %v6107_v23  ;;  %6105 = vmax.xlane.f32.xlu0 %v6104_v45 }
0x2390   :  { %v6103_v0 = vpop.xlane.xlu1 %6102  ;;  %v6100_v3 = vpop.xlane.xlu0 %6099 }
0x2391   :  { %v6111_v10 = vsub.f32 %v6095_v17, %v6103_v0  ;;  %v6110_v13 = vsub.f32 %v6094_v31, %v6100_v3 }
0x2393   :  { %v6116_v18 = vmul.f32 1.442695, %v6111_v10  ;;  %v6114_v24 = vmul.f32 1.442695, %v6110_v13 }
0x2394   :  { %v6109_v28 = vpop.xlane.xlu1 %6108  ;;  %v6106_v15 = vpop.xlane.xlu0 %6105 }
0x2395   :  { %8958 = vpow2.f32 %v6116_v18  ;;  %v6113_v34 = vsub.f32 %v6097_v59, %v6109_v28  ;;  %v6112_v38 = vsub.f32 %v6096_v25, %v6106_v15 }
0x2396   :  { %8960 = vpow2.f32 %v6114_v24 }
0x2397   :  { %v6120_v36 = vmul.f32 1.442695, %v6113_v34  ;;  %v6118_v41 = vmul.f32 1.442695, %v6112_v38 }
0x2399   :  { %8962 = vpow2.f32 %v6120_v36 }
0x239a   :  { %8964 = vpow2.f32 %v6118_v41 }
0x23a2   :  { %v8959_v49 = vpop.eup %8958 }
0x23a3   :  { %v8961_v56 = vpop.eup %8960  ;;  %v6125_v33 = vsel %vm5419_vm13, %v8959_v49, 0.0 }
0x23a4   :  { %6126 = vadd.xlane.f32.xlu1 %v6125_v33  ;;  %v6122_v54 = vsel %vm5415_vm4, %v8961_v56, 0.0 }
0x23a5   :  { %6123 = vadd.xlane.f32.xlu0 %v6122_v54 }
0x23a6   :  { %v8963_v21 = vpop.eup %8962 }
0x23a7   :  { %v8965_v51 = vpop.eup %8964  ;;  %v6131_v2 = vsel %vm5419_vm13, %v8963_v21, 0.0 }
0x23a8   :  { %6132 = vadd.xlane.f32.xlu1 %v6131_v2  ;;  %v6128_v53 = vsel %vm5415_vm4, %v8965_v51, 0.0 }
0x23a9   :  { %6129 = vadd.xlane.f32.xlu0 %v6128_v53 }
0x242d   :  { %v6127_v6 = vpop.xlane.xlu1 %6126 }
0x242e   :  { %8966 = vlog2.f32 %v6127_v6  ;;  %v6124_v60 = vpop.xlane.xlu0 %6123 }
0x242f   :  { %8968 = vlog2.f32 %v6124_v60 }
0x2431   :  { %v6133_v42 = vpop.xlane.xlu1 %6132 }
0x2432   :  { %8970 = vlog2.f32 %v6133_v42  ;;  %v6130_v19 = vpop.xlane.xlu0 %6129 }
0x2433   :  { %8972 = vlog2.f32 %v6130_v19 }
0x243b   :  { %v8967_v11 = vpop.eup %8966 }
0x243c   :  { %v8969_v58 = vpop.eup %8968  ;;  %v6137_v44 = vmul.f32 0.6931472, %v8967_v11 }
0x243d   :  { %v6135_v57 = vmul.f32 0.6931472, %v8969_v58 }
0x243e   :  { %v6143_v46 = vadd.f32 %v6137_v44, %v6103_v0 }
0x243f   :  { %v8971_v9 = vpop.eup %8970  ;;  %v6142_v50 = vadd.f32 %v6135_v57, %v6100_v3 }
0x2440   :  { %v8973_v7 = vpop.eup %8972  ;;  %v6147_v63 = vsub.f32 %v10927_v20, %v6143_v46  ;;  %v6141_v27 = vmul.f32 0.6931472, %v8971_v9 }
0x2441   :  { %v6146_v16 = vsub.f32 -2.6390574, %v6142_v50  ;;  %v6139_v26 = vmul.f32 0.6931472, %v8973_v7 }
0x2442   :  { %v6151_v14 = vadd.f32 %v6147_v63, %v10896_v30  ;;  %v6145_v35 = vadd.f32 %v6141_v27, %v6109_v28 }
0x2443   :  { %v6150_v39 = vadd.f32 %v6146_v16, %v10911_v22  ;;  %v6144_v43 = vadd.f32 %v6139_v26, %v6106_v15 }
0x2444   :  { %v6155_v48 = vsel %vm5419_vm13, %v6151_v14, -inf  ;;  %v6149_v52 = vsub.f32 %v10927_v20, %v6145_v35 }
0x2445   :  { %v6154_v55 = vsel %vm5415_vm4, %v6150_v39, -inf  ;;  %v6148_v5 = vsub.f32 -2.6390574, %v6144_v43 }
0x2446   :  { %v6156_v12 = vmax.f32 %v6154_v55, %v6155_v48  ;;  %v6153_v32 = vadd.f32 %v6149_v52, %v10896_v30 }
0x2447   :  { %v6152_v37 = vadd.f32 %v6148_v5, %v10916_v1 }
0x2448   :  { %v6157_v17 = vrot.slane %v6156_v12, 4  ;;  %v6164_v31 = vsel %vm5419_vm13, %v6153_v32, -inf }
0x2449   :  { %v6163_v40 = vsel %vm5415_vm4, %v6152_v37, -inf }
0x244a   :  { %v6158_v61 = vmax.f32 %v6156_v12, %v6157_v17  ;;  %v6165_v8 = vmax.f32 %v6163_v40, %v6164_v31 }
0x244c   :  { %v6159_v47 = vrot.slane %v6158_v61, 2  ;;  %v6166_v59 = vrot.slane %v6165_v8, 4 }
0x244e   :  { %v6160_v25 = vmax.f32 %v6158_v61, %v6159_v47  ;;  %v6167_v23 = vmax.f32 %v6165_v8, %v6166_v59 }
0x2450   :  { %v6161_v45 = vrot.slane %v6160_v25, 1  ;;  %v6168_v0 = vrot.slane %v6167_v23, 2 }
0x2452   :  { %v6162_v3 = vmax.f32 %v6160_v25, %v6161_v45  ;;  %v6169_v10 = vmax.f32 %v6167_v23, %v6168_v0 }
0x2454   :  { %v6172_v13 = vsub.f32 %v6150_v39, %v6162_v3  ;;  %v6173_v18 = vsub.f32 %v6151_v14, %v6162_v3  ;;  %v6170_v24 = vrot.slane %v6169_v10, 1 }
0x2456   :  { %v6176_v28 = vmul.f32 1.442695, %v6172_v13  ;;  %v6178_v15 = vmul.f32 1.442695, %v6173_v18  ;;  %v6171_v34 = vmax.f32 %v6169_v10, %v6170_v24 }
0x2458   :  { %8974 = vpow2.f32 %v6176_v28  ;;  %v6174_v38 = vsub.f32 %v6152_v37, %v6171_v34  ;;  %v6175_v36 = vsub.f32 %v6153_v32, %v6171_v34 }
0x2459   :  { %8976 = vpow2.f32 %v6178_v15 }
0x245a   :  { %v6180_v41 = vmul.f32 1.442695, %v6174_v38  ;;  %v6182_v49 = vmul.f32 1.442695, %v6175_v36 }
0x245c   :  { %8978 = vpow2.f32 %v6180_v41 }
0x245d   :  { %8980 = vpow2.f32 %v6182_v49 }
0x2465   :  { %v8975_v56 = vpop.eup %8974 }
0x2466   :  { %v8977_v33 = vpop.eup %8976  ;;  %v6184_v54 = vsel %vm5415_vm4, %v8975_v56, 0.0 }
0x2467   :  { %v6185_v21 = vsel %vm5419_vm13, %v8977_v33, 0.0 }
0x2468   :  { %v6186_v51 = vadd.f32 %v6185_v21, %v6184_v54 }
0x2469   :  { %v8979_v2 = vpop.eup %8978 }
0x246a   :  { %v8981_v53 = vpop.eup %8980  ;;  %v6187_v6 = vrot.slane %v6186_v51, 4  ;;  %v6193_v60 = vsel %vm5415_vm4, %v8979_v2, 0.0 }
0x246b   :  { %v6194_v42 = vsel %vm5419_vm13, %v8981_v53, 0.0 }
0x246c   :  { %v6188_v19 = vadd.f32 %v6187_v6, %v6186_v51  ;;  %v6195_v11 = vadd.f32 %v6194_v42, %v6193_v60 }
0x246e   :  { %v6189_v58 = vrot.slane %v6188_v19, 2  ;;  %v6196_v44 = vrot.slane %v6195_v11, 4 }
0x2470   :  { %v6190_v57 = vadd.f32 %v6189_v58, %v6188_v19  ;;  %v6197_v46 = vadd.f32 %v6196_v44, %v6195_v11 }
0x2472   :  { %v6191_v9 = vrot.slane %v6190_v57, 1  ;;  %v6198_v50 = vrot.slane %v6197_v46, 2 }
0x2474   :  { %v6192_v7 = vadd.f32 %v6191_v9, %v6190_v57  ;;  %v6199_v63 = vadd.f32 %v6198_v50, %v6197_v46 }
0x2476   :  { %8982 = vlog2.f32 %v6192_v7  ;;  %v6200_v27 = vrot.slane %v6199_v63, 1 }
0x2478   :  { %v6201_v16 = vadd.f32 %v6200_v27, %v6199_v63 }
0x247a   :  { %8984 = vlog2.f32 %v6201_v16 }
0x2483   :  { %v8983_v26 = vpop.eup %8982 }
0x2484   :  { %v6203_v14 = vmul.f32 0.6931472, %v8983_v26 }
0x2486   :  { %v6206_v35 = vadd.f32 %v6203_v14, %v6162_v3 }
0x2487   :  { %v8985_v39 = vpop.eup %8984 }
0x2488   :  { %v6208_v43 = vsub.f32 %v10942_v4, %v6206_v35  ;;  %v6205_v48 = vmul.f32 0.6931472, %v8985_v39 }
0x248a   :  { %v6211_v52 = vadd.f32 %v6208_v43, %v10896_v30  ;;  %v6210_v55 = vadd.f32 %v6208_v43, %v10911_v22  ;;  %v6207_v5 = vadd.f32 %v6205_v48, %v6171_v34 }
0x248c   :  { %v6217_v12 = vsel %vm5419_vm13, %v6211_v52, -inf  ;;  %v6214_v32 = vsel %vm5415_vm4, %v6210_v55, -inf  ;;  %v6209_v37 = vsub.f32 %v10942_v4, %v6207_v5 }
0x248d   :  { %6218 = vmax.xlane.f32.xlu1 %v6217_v12  ;;  %6215 = vmax.xlane.f32.xlu0 %v6214_v32 }
0x248e   :  { %v6213_v17 = vadd.f32 %v6209_v37, %v10896_v30  ;;  %v6212_v31 = vadd.f32 %v6209_v37, %v10916_v1 }
0x2490   :  { %v6223_v40 = vsel %vm5419_vm13, %v6213_v17, -inf  ;;  %v6220_v61 = vsel %vm5415_vm4, %v6212_v31, -inf }
0x2491   :  { %6224 = vmax.xlane.f32.xlu1 %v6223_v40  ;;  %6221 = vmax.xlane.f32.xlu0 %v6220_v61 }
0x2516   :  { %v6219_v8 = vpop.xlane.xlu1 %6218  ;;  %v6216_v47 = vpop.xlane.xlu0 %6215 }
0x2517   :  { %v6227_v59 = vsub.f32 %v6211_v52, %v6219_v8  ;;  %v6226_v25 = vsub.f32 %v6210_v55, %v6216_v47 }
0x2519   :  { %v6232_v23 = vmul.f32 1.442695, %v6227_v59  ;;  %v6230_v45 = vmul.f32 1.442695, %v6226_v25 }
0x251a   :  { %v6225_v0 = vpop.xlane.xlu1 %6224  ;;  %v6222_v3 = vpop.xlane.xlu0 %6221 }
0x251b   :  { %8986 = vpow2.f32 %v6232_v23  ;;  %v6229_v10 = vsub.f32 %v6213_v17, %v6225_v0  ;;  %v6228_v13 = vsub.f32 %v6212_v31, %v6222_v3 }
0x251c   :  { %8988 = vpow2.f32 %v6230_v45 }
0x251d   :  { %v6236_v18 = vmul.f32 1.442695, %v6229_v10  ;;  %v6234_v24 = vmul.f32 1.442695, %v6228_v13 }
0x251f   :  { %8990 = vpow2.f32 %v6236_v18 }
0x2520   :  { %8992 = vpow2.f32 %v6234_v24 }
0x2528   :  { %v8987_v28 = vpop.eup %8986 }
0x2529   :  { %v8989_v15 = vpop.eup %8988  ;;  %v6241_v34 = vsel %vm5419_vm13, %v8987_v28, 0.0 }
0x252a   :  { %6242 = vadd.xlane.f32.xlu1 %v6241_v34  ;;  %v6238_v38 = vsel %vm5415_vm4, %v8989_v15, 0.0 }
0x252b   :  { %6239 = vadd.xlane.f32.xlu0 %v6238_v38 }
0x252c   :  { %v8991_v36 = vpop.eup %8990 }
0x252d   :  { %v8993_v41 = vpop.eup %8992  ;;  %v6247_v49 = vsel %vm5419_vm13, %v8991_v36, 0.0 }
0x252e   :  { %6248 = vadd.xlane.f32.xlu1 %v6247_v49  ;;  %v6244_v56 = vsel %vm5415_vm4, %v8993_v41, 0.0 }
0x252f   :  { %6245 = vadd.xlane.f32.xlu0 %v6244_v56 }
0x25b3   :  { %v6243_v33 = vpop.xlane.xlu1 %6242 }
0x25b4   :  { %8994 = vlog2.f32 %v6243_v33  ;;  %v6240_v54 = vpop.xlane.xlu0 %6239 }
0x25b5   :  { %8996 = vlog2.f32 %v6240_v54 }
0x25b7   :  { %v6249_v21 = vpop.xlane.xlu1 %6248 }
0x25b8   :  { %8998 = vlog2.f32 %v6249_v21  ;;  %v6246_v51 = vpop.xlane.xlu0 %6245 }
0x25b9   :  { %9000 = vlog2.f32 %v6246_v51 }
0x25c1   :  { %v8995_v2 = vpop.eup %8994 }
0x25c2   :  { %v8997_v53 = vpop.eup %8996  ;;  %v6253_v6 = vmul.f32 0.6931472, %v8995_v2 }
0x25c3   :  { %v6251_v60 = vmul.f32 0.6931472, %v8997_v53 }
0x25c4   :  { %v6259_v42 = vadd.f32 %v6253_v6, %v6219_v8 }
0x25c5   :  { %v8999_v19 = vpop.eup %8998  ;;  %v6258_v11 = vadd.f32 %v6251_v60, %v6216_v47 }
0x25c6   :  { %v9001_v58 = vpop.eup %9000  ;;  %v6263_v44 = vsub.f32 %v10927_v20, %v6259_v42  ;;  %v6257_v57 = vmul.f32 0.6931472, %v8999_v19 }
0x25c7   :  { %v6262_v46 = vsub.f32 -2.6390574, %v6258_v11  ;;  %v6255_v9 = vmul.f32 0.6931472, %v9001_v58 }
0x25c8   :  { %v6267_v50 = vadd.f32 %v6263_v44, %v10896_v30  ;;  %v6261_v7 = vadd.f32 %v6257_v57, %v6225_v0 }
0x25c9   :  { %v6266_v63 = vadd.f32 %v6262_v46, %v10911_v22  ;;  %v6260_v27 = vadd.f32 %v6255_v9, %v6222_v3 }
0x25ca   :  { %v6271_v16 = vsel %vm5419_vm13, %v6267_v50, -inf  ;;  %v6265_v26 = vsub.f32 %v10927_v20, %v6261_v7 }
0x25cb   :  { %v6270_v14 = vsel %vm5415_vm4, %v6266_v63, -inf  ;;  %v6264_v35 = vsub.f32 -2.6390574, %v6260_v27 }
0x25cc   :  { %v6272_v39 = vmax.f32 %v6270_v14, %v6271_v16  ;;  %v6269_v43 = vadd.f32 %v6265_v26, %v10896_v30 }
0x25cd   :  { %v6268_v48 = vadd.f32 %v6264_v35, %v10916_v1 }
0x25ce   :  { %v6273_v52 = vrot.slane %v6272_v39, 4  ;;  %v6280_v55 = vsel %vm5419_vm13, %v6269_v43, -inf }
0x25cf   :  { %v6279_v5 = vsel %vm5415_vm4, %v6268_v48, -inf }
0x25d0   :  { %v6274_v12 = vmax.f32 %v6272_v39, %v6273_v52  ;;  %v6281_v32 = vmax.f32 %v6279_v5, %v6280_v55 }
0x25d2   :  { %v6275_v37 = vrot.slane %v6274_v12, 2  ;;  %v6282_v17 = vrot.slane %v6281_v32, 4 }
0x25d4   :  { %v6276_v31 = vmax.f32 %v6274_v12, %v6275_v37  ;;  %v6283_v40 = vmax.f32 %v6281_v32, %v6282_v17 }
0x25d6   :  { %v6277_v61 = vrot.slane %v6276_v31, 1  ;;  %v6284_v8 = vrot.slane %v6283_v40, 2 }
0x25d8   :  { %v6278_v47 = vmax.f32 %v6276_v31, %v6277_v61  ;;  %v6285_v59 = vmax.f32 %v6283_v40, %v6284_v8 }
0x25da   :  { %v6288_v25 = vsub.f32 %v6266_v63, %v6278_v47  ;;  %v6289_v23 = vsub.f32 %v6267_v50, %v6278_v47  ;;  %v6286_v45 = vrot.slane %v6285_v59, 1 }
0x25dc   :  { %v6292_v0 = vmul.f32 1.442695, %v6288_v25  ;;  %v6294_v3 = vmul.f32 1.442695, %v6289_v23  ;;  %v6287_v10 = vmax.f32 %v6285_v59, %v6286_v45 }
0x25de   :  { %9002 = vpow2.f32 %v6292_v0  ;;  %v6290_v13 = vsub.f32 %v6268_v48, %v6287_v10  ;;  %v6291_v18 = vsub.f32 %v6269_v43, %v6287_v10 }
0x25df   :  { %9004 = vpow2.f32 %v6294_v3 }
0x25e0   :  { %v6296_v24 = vmul.f32 1.442695, %v6290_v13  ;;  %v6298_v28 = vmul.f32 1.442695, %v6291_v18 }
0x25e2   :  { %9006 = vpow2.f32 %v6296_v24 }
0x25e3   :  { %9008 = vpow2.f32 %v6298_v28 }
0x25eb   :  { %v9003_v15 = vpop.eup %9002 }
0x25ec   :  { %v9005_v34 = vpop.eup %9004  ;;  %v6300_v38 = vsel %vm5415_vm4, %v9003_v15, 0.0 }
0x25ed   :  { %v6301_v36 = vsel %vm5419_vm13, %v9005_v34, 0.0 }
0x25ee   :  { %v6302_v41 = vadd.f32 %v6301_v36, %v6300_v38 }
0x25ef   :  { %v9007_v49 = vpop.eup %9006 }
0x25f0   :  { %v9009_v56 = vpop.eup %9008  ;;  %v6303_v33 = vrot.slane %v6302_v41, 4  ;;  %v6309_v54 = vsel %vm5415_vm4, %v9007_v49, 0.0 }
0x25f1   :  { %v6310_v21 = vsel %vm5419_vm13, %v9009_v56, 0.0 }
0x25f2   :  { %v6304_v51 = vadd.f32 %v6303_v33, %v6302_v41  ;;  %v6311_v2 = vadd.f32 %v6310_v21, %v6309_v54 }
0x25f4   :  { %v6305_v53 = vrot.slane %v6304_v51, 2  ;;  %v6312_v6 = vrot.slane %v6311_v2, 4 }
0x25f6   :  { %v6306_v60 = vadd.f32 %v6305_v53, %v6304_v51  ;;  %v6313_v42 = vadd.f32 %v6312_v6, %v6311_v2 }
0x25f8   :  { %v6307_v19 = vrot.slane %v6306_v60, 1  ;;  %v6314_v11 = vrot.slane %v6313_v42, 2 }
0x25fa   :  { %v6308_v58 = vadd.f32 %v6307_v19, %v6306_v60  ;;  %v6315_v44 = vadd.f32 %v6314_v11, %v6313_v42 }
0x25fc   :  { %9010 = vlog2.f32 %v6308_v58  ;;  %v6316_v57 = vrot.slane %v6315_v44, 1 }
0x25fe   :  { %v6317_v46 = vadd.f32 %v6316_v57, %v6315_v44 }
0x2600   :  { %9012 = vlog2.f32 %v6317_v46 }
0x2609   :  { %v9011_v9 = vpop.eup %9010 }
0x260a   :  { %v6319_v50 = vmul.f32 0.6931472, %v9011_v9 }
0x260c   :  { %v6322_v7 = vadd.f32 %v6319_v50, %v6278_v47 }
0x260d   :  { %v9013_v63 = vpop.eup %9012 }
0x260e   :  { %v6324_v27 = vsub.f32 %v10942_v4, %v6322_v7  ;;  %v6321_v16 = vmul.f32 0.6931472, %v9013_v63 }
0x2610   :  { %v6327_v26 = vadd.f32 %v6324_v27, %v10896_v30  ;;  %v6326_v14 = vadd.f32 %v6324_v27, %v10911_v22  ;;  %v6323_v35 = vadd.f32 %v6321_v16, %v6287_v10 }
0x2612   :  { %v6333_v39 = vsel %vm5419_vm13, %v6327_v26, -inf  ;;  %v6330_v43 = vsel %vm5415_vm4, %v6326_v14, -inf  ;;  %v6325_v48 = vsub.f32 %v10942_v4, %v6323_v35 }
0x2613   :  { %6334 = vmax.xlane.f32.xlu1 %v6333_v39  ;;  %6331 = vmax.xlane.f32.xlu0 %v6330_v43 }
0x2614   :  { %v6329_v52 = vadd.f32 %v6325_v48, %v10896_v30  ;;  %v6328_v55 = vadd.f32 %v6325_v48, %v10916_v1 }
0x2616   :  { %v6339_v5 = vsel %vm5419_vm13, %v6329_v52, -inf  ;;  %v6336_v12 = vsel %vm5415_vm4, %v6328_v55, -inf }
0x2617   :  { %6340 = vmax.xlane.f32.xlu1 %v6339_v5  ;;  %6337 = vmax.xlane.f32.xlu0 %v6336_v12 }
0x269c   :  { %v6335_v32 = vpop.xlane.xlu1 %6334  ;;  %v6332_v37 = vpop.xlane.xlu0 %6331 }
0x269d   :  { %v6343_v17 = vsub.f32 %v6327_v26, %v6335_v32  ;;  %v6342_v31 = vsub.f32 %v6326_v14, %v6332_v37 }
0x269f   :  { %v6348_v40 = vmul.f32 1.442695, %v6343_v17  ;;  %v6346_v61 = vmul.f32 1.442695, %v6342_v31 }
0x26a0   :  { %v6341_v8 = vpop.xlane.xlu1 %6340  ;;  %v6338_v47 = vpop.xlane.xlu0 %6337 }
0x26a1   :  { %9014 = vpow2.f32 %v6348_v40  ;;  %v6345_v59 = vsub.f32 %v6329_v52, %v6341_v8  ;;  %v6344_v25 = vsub.f32 %v6328_v55, %v6338_v47 }
0x26a2   :  { %9016 = vpow2.f32 %v6346_v61 }
0x26a3   :  { %v6352_v23 = vmul.f32 1.442695, %v6345_v59  ;;  %v6350_v45 = vmul.f32 1.442695, %v6344_v25 }
0x26a5   :  { %9018 = vpow2.f32 %v6352_v23 }
0x26a6   :  { %9020 = vpow2.f32 %v6350_v45 }
0x26ae   :  { %v9015_v0 = vpop.eup %9014 }
0x26af   :  { %v9017_v3 = vpop.eup %9016  ;;  %v6357_v10 = vsel %vm5419_vm13, %v9015_v0, 0.0 }
0x26b0   :  { %6358 = vadd.xlane.f32.xlu1 %v6357_v10  ;;  %v6354_v13 = vsel %vm5415_vm4, %v9017_v3, 0.0 }
0x26b1   :  { %6355 = vadd.xlane.f32.xlu0 %v6354_v13 }
0x26b2   :  { %v9019_v18 = vpop.eup %9018 }
0x26b3   :  { %v9021_v24 = vpop.eup %9020  ;;  %v6363_v28 = vsel %vm5419_vm13, %v9019_v18, 0.0 }
0x26b4   :  { %6364 = vadd.xlane.f32.xlu1 %v6363_v28  ;;  %v6360_v15 = vsel %vm5415_vm4, %v9021_v24, 0.0 }
0x26b5   :  { %6361 = vadd.xlane.f32.xlu0 %v6360_v15 }
0x2739   :  { %v6359_v34 = vpop.xlane.xlu1 %6358 }
0x273a   :  { %9022 = vlog2.f32 %v6359_v34  ;;  %v6356_v38 = vpop.xlane.xlu0 %6355 }
0x273b   :  { %9024 = vlog2.f32 %v6356_v38 }
0x273d   :  { %v6365_v36 = vpop.xlane.xlu1 %6364 }
0x273e   :  { %9026 = vlog2.f32 %v6365_v36  ;;  %v6362_v41 = vpop.xlane.xlu0 %6361 }
0x273f   :  { %9028 = vlog2.f32 %v6362_v41 }
0x2747   :  { %v9023_v49 = vpop.eup %9022 }
0x2748   :  { %v9025_v56 = vpop.eup %9024  ;;  %v6369_v33 = vmul.f32 0.6931472, %v9023_v49 }
0x2749   :  { %v6367_v54 = vmul.f32 0.6931472, %v9025_v56 }
0x274a   :  { %v6375_v21 = vadd.f32 %v6369_v33, %v6335_v32 }
0x274b   :  { %v9027_v51 = vpop.eup %9026  ;;  %v6374_v2 = vadd.f32 %v6367_v54, %v6332_v37 }
0x274c   :  { %v9029_v53 = vpop.eup %9028  ;;  %v6379_v6 = vsub.f32 %v10927_v20, %v6375_v21  ;;  %v6373_v60 = vmul.f32 0.6931472, %v9027_v51 }
0x274d   :  { %v6378_v42 = vsub.f32 -2.6390574, %v6374_v2  ;;  %v6371_v19 = vmul.f32 0.6931472, %v9029_v53 }
0x274e   :  { %v6383_v11 = vadd.f32 %v6379_v6, %v10896_v30  ;;  %v6377_v58 = vadd.f32 %v6373_v60, %v6341_v8 }
0x274f   :  { %v6382_v44 = vadd.f32 %v6378_v42, %v10911_v22  ;;  %v6376_v57 = vadd.f32 %v6371_v19, %v6338_v47 }
0x2750   :  { %v6387_v46 = vsel %vm5419_vm13, %v6383_v11, -inf  ;;  %v6381_v9 = vsub.f32 %v10927_v20, %v6377_v58 }
0x2751   :  { %v6386_v50 = vsel %vm5415_vm4, %v6382_v44, -inf  ;;  %v6380_v7 = vsub.f32 -2.6390574, %v6376_v57 }
0x2752   :  { %v6388_v63 = vmax.f32 %v6386_v50, %v6387_v46  ;;  %v6385_v27 = vadd.f32 %v6381_v9, %v10896_v30 }
0x2753   :  { %v6384_v16 = vadd.f32 %v6380_v7, %v10916_v1 }
0x2754   :  { %v6389_v26 = vrot.slane %v6388_v63, 4  ;;  %v6396_v14 = vsel %vm5419_vm13, %v6385_v27, -inf }
0x2755   :  { %v6395_v35 = vsel %vm5415_vm4, %v6384_v16, -inf }
0x2756   :  { %v6390_v39 = vmax.f32 %v6388_v63, %v6389_v26  ;;  %v6397_v43 = vmax.f32 %v6395_v35, %v6396_v14 }
0x2758   :  { %v6391_v48 = vrot.slane %v6390_v39, 2  ;;  %v6398_v52 = vrot.slane %v6397_v43, 4 }
0x275a   :  { %v6392_v55 = vmax.f32 %v6390_v39, %v6391_v48  ;;  %v6399_v5 = vmax.f32 %v6397_v43, %v6398_v52 }
0x275c   :  { %v6393_v12 = vrot.slane %v6392_v55, 1  ;;  %v6400_v32 = vrot.slane %v6399_v5, 2 }
0x275e   :  { %v6394_v37 = vmax.f32 %v6392_v55, %v6393_v12  ;;  %v6401_v17 = vmax.f32 %v6399_v5, %v6400_v32 }
0x2760   :  { %v6404_v31 = vsub.f32 %v6382_v44, %v6394_v37  ;;  %v6405_v40 = vsub.f32 %v6383_v11, %v6394_v37  ;;  %v6402_v61 = vrot.slane %v6401_v17, 1 }
0x2762   :  { %v6408_v8 = vmul.f32 1.442695, %v6404_v31  ;;  %v6410_v47 = vmul.f32 1.442695, %v6405_v40  ;;  %v6403_v59 = vmax.f32 %v6401_v17, %v6402_v61 }
0x2764   :  { %9030 = vpow2.f32 %v6408_v8  ;;  %v6406_v25 = vsub.f32 %v6384_v16, %v6403_v59  ;;  %v6407_v23 = vsub.f32 %v6385_v27, %v6403_v59 }
0x2765   :  { %9032 = vpow2.f32 %v6410_v47 }
0x2766   :  { %v6412_v45 = vmul.f32 1.442695, %v6406_v25  ;;  %v6414_v0 = vmul.f32 1.442695, %v6407_v23 }
0x2768   :  { %9034 = vpow2.f32 %v6412_v45 }
0x2769   :  { %9036 = vpow2.f32 %v6414_v0 }
0x2771   :  { %v9031_v3 = vpop.eup %9030 }
0x2772   :  { %v9033_v10 = vpop.eup %9032  ;;  %v6416_v13 = vsel %vm5415_vm4, %v9031_v3, 0.0 }
0x2773   :  { %v6417_v18 = vsel %vm5419_vm13, %v9033_v10, 0.0 }
0x2774   :  { %v6418_v24 = vadd.f32 %v6417_v18, %v6416_v13 }
0x2775   :  { %v9035_v28 = vpop.eup %9034 }
0x2776   :  { %v9037_v15 = vpop.eup %9036  ;;  %v6419_v34 = vrot.slane %v6418_v24, 4  ;;  %v6425_v38 = vsel %vm5415_vm4, %v9035_v28, 0.0 }
0x2777   :  { %v6426_v36 = vsel %vm5419_vm13, %v9037_v15, 0.0 }
0x2778   :  { %v6420_v41 = vadd.f32 %v6419_v34, %v6418_v24  ;;  %v6427_v49 = vadd.f32 %v6426_v36, %v6425_v38 }
0x277a   :  { %v6421_v56 = vrot.slane %v6420_v41, 2  ;;  %v6428_v33 = vrot.slane %v6427_v49, 4 }
0x277c   :  { %v6422_v54 = vadd.f32 %v6421_v56, %v6420_v41  ;;  %v6429_v21 = vadd.f32 %v6428_v33, %v6427_v49 }
0x277e   :  { %v6423_v51 = vrot.slane %v6422_v54, 1  ;;  %v6430_v2 = vrot.slane %v6429_v21, 2 }
0x2780   :  { %v6424_v53 = vadd.f32 %v6423_v51, %v6422_v54  ;;  %v6431_v6 = vadd.f32 %v6430_v2, %v6429_v21 }
0x2782   :  { %9038 = vlog2.f32 %v6424_v53  ;;  %v6432_v60 = vrot.slane %v6431_v6, 1 }
0x2784   :  { %v6433_v42 = vadd.f32 %v6432_v60, %v6431_v6 }
0x2786   :  { %9040 = vlog2.f32 %v6433_v42 }
0x278f   :  { %v9039_v19 = vpop.eup %9038 }
0x2790   :  { %v6435_v11 = vmul.f32 0.6931472, %v9039_v19 }
0x2792   :  { %v6438_v58 = vadd.f32 %v6435_v11, %v6394_v37 }
0x2793   :  { %v9041_v44 = vpop.eup %9040 }
0x2794   :  { %v6440_v57 = vsub.f32 %v10942_v4, %v6438_v58  ;;  %v6437_v46 = vmul.f32 0.6931472, %v9041_v44 }
0x2796   :  { %v6443_v9 = vadd.f32 %v6440_v57, %v10896_v30  ;;  %v6442_v50 = vadd.f32 %v6440_v57, %v10911_v22  ;;  %v6439_v7 = vadd.f32 %v6437_v46, %v6403_v59 }
0x2798   :  { %v6449_v63 = vsel %vm5419_vm13, %v6443_v9, -inf  ;;  %v6446_v27 = vsel %vm5415_vm4, %v6442_v50, -inf  ;;  %v6441_v16 = vsub.f32 %v10942_v4, %v6439_v7 }
0x2799   :  { %6450 = vmax.xlane.f32.xlu1 %v6449_v63  ;;  %6447 = vmax.xlane.f32.xlu0 %v6446_v27 }
0x279a   :  { %v6445_v26 = vadd.f32 %v6441_v16, %v10896_v30  ;;  %v6444_v14 = vadd.f32 %v6441_v16, %v10916_v1 }
0x279c   :  { %v6455_v35 = vsel %vm5419_vm13, %v6445_v26, -inf  ;;  %v6452_v39 = vsel %vm5415_vm4, %v6444_v14, -inf }
0x279d   :  { %6456 = vmax.xlane.f32.xlu1 %v6455_v35  ;;  %6453 = vmax.xlane.f32.xlu0 %v6452_v39 }
0x2822   :  { %v6451_v43 = vpop.xlane.xlu1 %6450  ;;  %v6448_v48 = vpop.xlane.xlu0 %6447 }
0x2823   :  { %v6459_v52 = vsub.f32 %v6443_v9, %v6451_v43  ;;  %v6458_v55 = vsub.f32 %v6442_v50, %v6448_v48 }
0x2825   :  { %v6464_v5 = vmul.f32 1.442695, %v6459_v52  ;;  %v6462_v12 = vmul.f32 1.442695, %v6458_v55 }
0x2826   :  { %v6457_v32 = vpop.xlane.xlu1 %6456  ;;  %v6454_v37 = vpop.xlane.xlu0 %6453 }
0x2827   :  { %9042 = vpow2.f32 %v6464_v5  ;;  %v6461_v17 = vsub.f32 %v6445_v26, %v6457_v32  ;;  %v6460_v31 = vsub.f32 %v6444_v14, %v6454_v37 }
0x2828   :  { %9044 = vpow2.f32 %v6462_v12 }
0x2829   :  { %v6468_v40 = vmul.f32 1.442695, %v6461_v17  ;;  %v6466_v61 = vmul.f32 1.442695, %v6460_v31 }
0x282b   :  { %9046 = vpow2.f32 %v6468_v40 }
0x282c   :  { %9048 = vpow2.f32 %v6466_v61 }
0x2834   :  { %v9043_v8 = vpop.eup %9042 }
0x2835   :  { %v9045_v47 = vpop.eup %9044  ;;  %v6473_v59 = vsel %vm5419_vm13, %v9043_v8, 0.0 }
0x2836   :  { %6474 = vadd.xlane.f32.xlu1 %v6473_v59  ;;  %v6470_v25 = vsel %vm5415_vm4, %v9045_v47, 0.0 }
0x2837   :  { %6471 = vadd.xlane.f32.xlu0 %v6470_v25 }
0x2838   :  { %v9047_v23 = vpop.eup %9046 }
0x2839   :  { %v9049_v45 = vpop.eup %9048  ;;  %v6479_v0 = vsel %vm5419_vm13, %v9047_v23, 0.0 }
0x283a   :  { %6480 = vadd.xlane.f32.xlu1 %v6479_v0  ;;  %v6476_v3 = vsel %vm5415_vm4, %v9049_v45, 0.0 }
0x283b   :  { %6477 = vadd.xlane.f32.xlu0 %v6476_v3 }
0x28bf   :  { %v6475_v10 = vpop.xlane.xlu1 %6474 }
0x28c0   :  { %9050 = vlog2.f32 %v6475_v10  ;;  %v6472_v13 = vpop.xlane.xlu0 %6471 }
0x28c1   :  { %9052 = vlog2.f32 %v6472_v13 }
0x28c3   :  { %v6481_v18 = vpop.xlane.xlu1 %6480 }
0x28c4   :  { %9054 = vlog2.f32 %v6481_v18  ;;  %v6478_v24 = vpop.xlane.xlu0 %6477 }
0x28c5   :  { %9056 = vlog2.f32 %v6478_v24 }
0x28cd   :  { %v9051_v28 = vpop.eup %9050 }
0x28ce   :  { %v9053_v15 = vpop.eup %9052  ;;  %v6485_v34 = vmul.f32 0.6931472, %v9051_v28 }
0x28cf   :  { %v6483_v38 = vmul.f32 0.6931472, %v9053_v15 }
0x28d0   :  { %v6491_v36 = vadd.f32 %v6485_v34, %v6451_v43 }
0x28d1   :  { %v9055_v41 = vpop.eup %9054  ;;  %v6490_v49 = vadd.f32 %v6483_v38, %v6448_v48 }
0x28d2   :  { %v9057_v56 = vpop.eup %9056  ;;  %v6495_v33 = vsub.f32 %v10927_v20, %v6491_v36  ;;  %v6489_v54 = vmul.f32 0.6931472, %v9055_v41 }
0x28d3   :  { %v6494_v21 = vsub.f32 -2.6390574, %v6490_v49  ;;  %v6487_v51 = vmul.f32 0.6931472, %v9057_v56 }
0x28d4   :  { %v11184_v2 = vadd.f32 %v6495_v33, %v10896_v30  ;;  %v6493_v53 = vadd.f32 %v6489_v54, %v6457_v32 }
0x28d5   :  { %v11187_v6 = vadd.f32 %v6494_v21, %v10911_v22  ;;  %v6492_v60 = vadd.f32 %v6487_v51, %v6454_v37 }
0x28d6   :  { %v6503_v42 = vsel %vm5419_vm13, %v11184_v2, -inf  ;;  %v6497_v19 = vsub.f32 %v10927_v20, %v6493_v53 }
0x28d7   :  { %v6502_v11 = vsel %vm5415_vm4, %v11187_v6, -inf  ;;  %v6496_v58 = vsub.f32 -2.6390574, %v6492_v60 }
0x28d8   :  { %v6504_v44 = vmax.f32 %v6502_v11, %v6503_v42  ;;  %v11195_v57 = vadd.f32 %v6497_v19, %v10896_v30 }
0x28d9   :  { %v11198_v46 = vadd.f32 %v6496_v58, %v10916_v1 }
0x28da   :  { %v6505_v9 = vrot.slane %v6504_v44, 4  ;;  %v6512_v22 = vsel %vm5419_vm13, %v11195_v57, -inf }
0x28db   :  { %v6511_v50 = vsel %vm5415_vm4, %v11198_v46, -inf }
0x28dc   :  { %v6506_v7 = vmax.f32 %v6504_v44, %v6505_v9  ;;  %v6513_v20 = vmax.f32 %v6511_v50, %v6512_v22 }
0x28de   :  { %v6507_v63 = vrot.slane %v6506_v7, 2  ;;  %v6514_v27 = vrot.slane %v6513_v20, 4 }
0x28e0   :  { %v6508_v16 = vmax.f32 %v6506_v7, %v6507_v63  ;;  %v6515_v26 = vmax.f32 %v6513_v20, %v6514_v27 }
0x28e2   :  { %v6509_v14 = vrot.slane %v6508_v16, 1  ;;  %v6516_v35 = vrot.slane %v6515_v26, 2 }
0x28e4   :  { %v6510_v30 = vmax.f32 %v6508_v16, %v6509_v14  ;;  %v6517_v39 = vmax.f32 %v6515_v26, %v6516_v35 }
0x28e6   :  { %v6520_v1 = vsub.f32 %v11187_v6, %v6510_v30  ;;  %v6521_v43 = vsub.f32 %v11184_v2, %v6510_v30  ;;  %v6518_v48 = vrot.slane %v6517_v39, 1 }
0x28e8   :  { %v6524_v52 = vmul.f32 1.442695, %v6520_v1  ;;  %v6526_v55 = vmul.f32 1.442695, %v6521_v43  ;;  %v6519_v5 = vmax.f32 %v6517_v39, %v6518_v48 }
0x28ea   :  { %9058 = vpow2.f32 %v6524_v52  ;;  %v6522_v12 = vsub.f32 %v11198_v46, %v6519_v5  ;;  %v6523_v32 = vsub.f32 %v11195_v57, %v6519_v5 }
0x28eb   :  { %9060 = vpow2.f32 %v6526_v55 }
0x28ec   :  { %v6528_v37 = vmul.f32 1.442695, %v6522_v12  ;;  %v6530_v17 = vmul.f32 1.442695, %v6523_v32 }
0x28ee   :  { %9062 = vpow2.f32 %v6528_v37 }
0x28ef   :  { %9064 = vpow2.f32 %v6530_v17 }
0x28f7   :  { %v9059_v31 = vpop.eup %9058 }
0x28f8   :  { %v9061_v40 = vpop.eup %9060  ;;  %v6532_v61 = vsel %vm5415_vm4, %v9059_v31, 0.0 }
0x28f9   :  { %v6533_v8 = vsel %vm5419_vm13, %v9061_v40, 0.0 }
0x28fa   :  { %v6534_v47 = vadd.f32 %v6533_v8, %v6532_v61 }
0x28fb   :  { %v9063_v59 = vpop.eup %9062 }
0x28fc   :  { %v9065_v25 = vpop.eup %9064  ;;  %v6535_v23 = vrot.slane %v6534_v47, 4  ;;  %v6541_v45 = vsel %vm5415_vm4, %v9063_v59, 0.0 }
0x28fd   :  { %v6542_v0 = vsel %vm5419_vm13, %v9065_v25, 0.0 }
0x28fe   :  { %v6536_v3 = vadd.f32 %v6535_v23, %v6534_v47  ;;  %v6543_v10 = vadd.f32 %v6542_v0, %v6541_v45 }
0x2900   :  { %v6537_v13 = vrot.slane %v6536_v3, 2  ;;  %v6544_v18 = vrot.slane %v6543_v10, 4 }
0x2902   :  { %v6538_v24 = vadd.f32 %v6537_v13, %v6536_v3  ;;  %v6545_v28 = vadd.f32 %v6544_v18, %v6543_v10 }
0x2904   :  { %v6539_v15 = vrot.slane %v6538_v24, 1  ;;  %v6546_v34 = vrot.slane %v6545_v28, 2 }
0x2906   :  { %v6540_v38 = vadd.f32 %v6539_v15, %v6538_v24  ;;  %v6547_v36 = vadd.f32 %v6546_v34, %v6545_v28 }
0x2908   :  { %9066 = vlog2.f32 %v6540_v38  ;;  %v6548_v41 = vrot.slane %v6547_v36, 1 }
0x290a   :  { %v6549_v49 = vadd.f32 %v6548_v41, %v6547_v36 }
0x290c   :  { %9068 = vlog2.f32 %v6549_v49 }
0x2915   :  { %v9067_v56 = vpop.eup %9066 }
0x2916   :  { %v6551_v33 = vmul.f32 0.6931472, %v9067_v56 }
0x2918   :  { %v6554_v54 = vadd.f32 %v6551_v33, %v6510_v30 }
0x2919   :  { %v9069_v21 = vpop.eup %9068 }
0x291a   :  { %v6556_v51 = vsub.f32 %v10942_v4, %v6554_v54  ;;  %v6553_v53 = vmul.f32 0.6931472, %v9069_v21 }
0x291c   :  { %v6558_v60 = vadd.f32 %v6556_v51, %v11187_v6  ;;  %v6559_v42 = vadd.f32 %v6556_v51, %v11184_v2  ;;  %v6555_v19 = vadd.f32 %v6553_v53, %v6519_v5  ;;  %v11768_v5 = vld [vmem:[#allocation22_spill] sm:$0xff] }
0x291d   :  { %v11232_v12 = vcvt.s32.f32 %v11768_v5 }
0x291e   :  { %v7222_v11 = vadd.f32 2.6390574, %v6558_v60  ;;  %v7223_v58 = vadd.f32 2.6390574, %v6559_v42  ;;  %v6557_v44 = vsub.f32 %v10942_v4, %v6555_v19  ;;  %v6571_v4 = vcvt.s32.f32 %v11765_v62 }
0x2920   :  { %6567 = vst.msk [vmem:[%s11767_s24 + $0x8] sm:$0x1] %vm5419_vm13, %v7223_v58  ;;  %v6573_v9 = vsel %vm6572_vm1, %v7222_v11, -inf  ;;  %v6560_v22 = vadd.f32 %v6557_v44, %v11198_v46  ;;  %v6561_v50 = vadd.f32 %v6557_v44, %v11195_v57 }
0x2921   :  { %6566 = vst.msk [vmem:[%s11767_s24] sm:$0xff] %vm5415_vm4, %v7222_v11  ;;  %6574 = vmax.xlane.f32.xlu0 %v6573_v9  ;;  %v6579_v26 = vrot.slane %v6573_v9, 4 }
0x2922   :  { %v7224_v6 = vadd.f32 2.6390574, %v6560_v22  ;;  %v7225_v2 = vadd.f32 2.6390574, %v6561_v50 }
0x2923   :  { %v6580_v14 = vmax.f32 %v6573_v9, %v6579_v26 }
0x2924   :  { %6569 = vst.msk [vmem:[%s11767_s24 + $0x18] sm:$0x1] %vm5419_vm13, %v7225_v2  ;;  %v6576_v7 = vsel %vm6572_vm1, %v7224_v6, -inf }
0x2925   :  { %6568 = vst.msk [vmem:[%s11767_s24 + $0x10] sm:$0xff] %vm5415_vm4, %v7224_v6  ;;  %6577 = vmax.xlane.f32.xlu1 %v6576_v7  ;;  %v6585_v35 = vrot.slane %v6576_v7, 4  ;;  %v6581_v30 = vrot.slane %v6580_v14, 2 }
0x2927   :  { %v6586_v39 = vmax.f32 %v6576_v7, %v6585_v35  ;;  %v6582_v1 = vmax.f32 %v6580_v14, %v6581_v30 }
0x2929   :  { %v6587_v43 = vrot.slane %v6586_v39, 2  ;;  %v6583_v62 = vrot.slane %v6582_v1, 1 }
0x292b   :  { %v6588_v48 = vmax.f32 %v6586_v39, %v6587_v43  ;;  %v6584_v52 = vmax.f32 %v6582_v1, %v6583_v62 }
0x292d   :  { %v6589_v55 = vrot.slane %v6588_v48, 1  ;;  %vm6601_vm6 = vcmp.eq.f32.partialorder %v7222_v11, %v6584_v52 }
0x292e   :  { %v6603_v37 = vsel %vm6601_vm6, %v11232_v12, 8.0 }
0x292f   :  { %v6590_v32 = vmax.f32 %v6588_v48, %v6589_v55  ;;  %v6605_v17 = vsel %vm6572_vm1, %v6603_v37, inf }
0x2930   :  { %v6606_v40 = vrot.slane %v6605_v17, 4 }
0x2931   :  { %vm6602_vm3 = vcmp.eq.f32.partialorder %v7224_v6, %v6590_v32 }
0x2932   :  { %v6604_v31 = vsel %vm6602_vm3, %v11232_v12, 8.0  ;;  %v6607_v8 = vmin.f32 %v6605_v17, %v6606_v40 }
0x2933   :  { %v6612_v61 = vsel %vm6572_vm1, %v6604_v31, inf }
0x2934   :  { %v6613_v47 = vrot.slane %v6612_v61, 4  ;;  %v6608_v59 = vrot.slane %v6607_v8, 2 }
0x2936   :  { %v6614_v25 = vmin.f32 %v6612_v61, %v6613_v47  ;;  %v6609_v23 = vmin.f32 %v6607_v8, %v6608_v59 }
0x2938   :  { %v6615_v45 = vrot.slane %v6614_v25, 2  ;;  %v6610_v0 = vrot.slane %v6609_v23, 1 }
0x293a   :  { %v6616_v3 = vmin.f32 %v6614_v25, %v6615_v45  ;;  %v11238_v10 = vmin.f32 %v6609_v23, %v6610_v0 }
0x293c   :  { %v6617_v13 = vrot.slane %v6616_v3, 1  ;;  %vm6621_vm8 = vcmp.eq.f32.partialorder %v11232_v12, %v11238_v10 }
0x293e   :  { %v11242_v24 = vmin.f32 %v6616_v3, %v6617_v13 }
0x2940   :  { %vm6622_vm10 = vcmp.eq.f32.partialorder %v11232_v12, %v11242_v24 }
0x29aa   :  { %v6575_v20 = vpop.xlane.xlu0 %6574 }
0x29ab   :  { %vm6591_vm7 = vcmp.eq.f32.partialorder %v7222_v11, %v6575_v20  ;;  %v6649_v41 = vmul.f32 1.442695, %v6575_v20 }
0x29ac   :  { %v6593_v63 = vsel %vm6591_vm7, %v6571_v4, 6.0 }
0x29ad   :  { %v6595_v27 = vsel %vm6572_vm1, %v6593_v63, inf  ;;  %9070 = vpow2.f32 %v6649_v41 }
0x29ae   :  { %v6578_v46 = vpop.xlane.xlu1 %6577  ;;  %6596 = vmin.xlane.f32.xlu0 %v6595_v27 }
0x29af   :  { %vm6592_vm14 = vcmp.eq.f32.partialorder %v7224_v6, %v6578_v46  ;;  %v6651_v49 = vmul.f32 1.442695, %v6578_v46 }
0x29b0   :  { %v6594_v57 = vsel %vm6592_vm14, %v6571_v4, 6.0 }
0x29b1   :  { %v6598_v16 = vsel %vm6572_vm1, %v6594_v57, inf  ;;  %9072 = vpow2.f32 %v6651_v49 }
0x29b2   :  { %6599 = vmin.xlane.f32.xlu1 %v6598_v16 }
0x29ba   :  { %v9071_v60 = vpop.eup %9070 }
0x29be   :  { %v9073_v22 = vpop.eup %9072 }
0x2a37   :  { %v6597_v18 = vpop.xlane.xlu0 %6596 }
0x2a38   :  { %vm6619_vm9 = vcmp.eq.f32.partialorder %v6571_v4, %v6597_v18 }
0x2a39   :  { %vm6623_vm13 = vmand %vm6619_vm9, %vm6621_vm8 }
0x2a3a   :  { %v6625_v28 = vsel %vm6623_vm13, 1.0, %v11748_v29 }
0x2a3b   :  { %v6600_v15 = vpop.xlane.xlu1 %6599  ;;  %v6627_v34 = vsel %vm6572_vm1, %v6625_v28, -inf }
0x2a3c   :  { %vm6620_vm0 = vcmp.eq.f32.partialorder %v6571_v4, %v6600_v15  ;;  %6628 = vmax.xlane.f32.xlu0 %v6627_v34  ;;  %v6635_v56 = vrot.slane %v6627_v34, 4 }
0x2a3d   :  { %vm6624_vm2 = vmand %vm6620_vm0, %vm6622_vm10 }
0x2a3e   :  { %v6626_v38 = vsel %vm6624_vm2, 1.0, %v11748_v29  ;;  %v6636_v33 = vmax.f32 %v6627_v34, %v6635_v56 }
0x2a3f   :  { %v6630_v36 = vsel %vm6572_vm1, %v6626_v38, -inf }
0x2a40   :  { %6631 = vmax.xlane.f32.xlu1 %v6630_v36  ;;  %v6641_v54 = vrot.slane %v6630_v36, 4  ;;  %v6637_v21 = vrot.slane %v6636_v33, 2 }
0x2a42   :  { %v6642_v51 = vmax.f32 %v6630_v36, %v6641_v54  ;;  %v6638_v42 = vmax.f32 %v6636_v33, %v6637_v21 }
0x2a44   :  { %v6643_v58 = vrot.slane %v6642_v51, 2  ;;  %v6639_v2 = vrot.slane %v6638_v42, 1 }
0x2a46   :  { %v6644_v57 = vmax.f32 %v6642_v51, %v6643_v58  ;;  %v6640_v48 = vmax.f32 %v6638_v42, %v6639_v2 }
0x2a48   :  { %v6645_v32 = vrot.slane %v6644_v57, 1  ;;  %vm6647_vm9 = vcmp.gt.f32.partialorder %v6640_v48, 0.5 }
0x2ac5   :  { %v6629_v53 = vpop.xlane.xlu0 %6628 }
0x2ac6   :  { %vm6633_vm5 = vcmp.gt.f32.partialorder %v6629_v53, 0.5 }
0x2ac7   :  { %v6653_v19 = vsel %vm6633_vm5, %v9071_v60, 0.0 }
0x2ac8   :  { %vm6655_vm4 = vcmp.gt.f32.partialorder %v6653_v19, 0.2  ;;  %v6659_v11 = vsel %vm6621_vm8, %v6653_v19, 0.0  ;;  %6717 = vst.msk [vmem:[%s9309_s4] sm:$0xff] %vm6707_vm12, %v6653_v19 }
0x2ac9   :  { %vm6657_vm11 = vmand %vm6633_vm5, %vm6655_vm4  ;;  %v6661_v44 = vsel %vm6572_vm1, %v6659_v11, 0.0  ;;  %v6632_v9 = vpop.xlane.xlu1 %6631 }
0x2aca   :  { %v6662_v50 = vrot.slane %v6661_v44, 4  ;;  %vm6679_vm15 = vmand %vm6621_vm8, %vm6657_vm11  ;;  %v6703_v6 = vsel %vm6657_vm11, %v6597_v18, -1.0  ;;  %vm6634_vm7 = vcmp.gt.f32.partialorder %v6632_v9, 0.5  ;;  %vm6714_vm8 = vcmask 40960  }
0x2acb   :  { %v6681_v7 = vsel %vm6679_vm15, 1.0, %v11748_v29  ;;  %v8676_v4 = vtrunc.f32 %v6703_v6  ;;  %v6654_v20 = vsel %vm6634_vm7, %v9073_v22, 0.0 }
0x2acc   :  { %v6663_v63 = vadd.f32 %v6662_v50, %v6661_v44  ;;  %v6683_v27 = vsel %vm6572_vm1, %v6681_v7, -inf  ;;  %vm6656_vm14 = vcmp.gt.f32.partialorder %v6654_v20, 0.2  ;;  %v6660_v46 = vsel %vm6622_vm10, %v6654_v20, 0.0  ;;  %6718 = vst.msk [vmem:[%s9309_s4 + $0x8] sm:$0xff] %vm6707_vm12, %v6654_v20 }
0x2acd   :  { %v6684_v16 = vrot.slane %v6683_v27, 4  ;;  %v8677_v26 = vcvt.f32.s32 %v8676_v4  ;;  %vm6658_vm6 = vmand %vm6634_vm7, %vm6656_vm14  ;;  %v6668_v14 = vsel %vm6572_vm1, %v6660_v46, 0.0 }
0x2ace   :  { %v6664_v35 = vrot.slane %v6663_v63, 2  ;;  %v6669_v30 = vrot.slane %v6668_v14, 4  ;;  %vm6680_vm3 = vmand %vm6622_vm10, %vm6658_vm6  ;;  %v6704_v39 = vsel %vm6658_vm6, %v6600_v15, -1.0 }
0x2acf   :  { %v6685_v1 = vmax.f32 %v6683_v27, %v6684_v16  ;;  %6708 = vst.msk [vmem:[%s9299_s20] sm:$0xff] %vm6707_vm12, %v8677_v26  ;;  %v6682_v43 = vsel %vm6680_vm3, 1.0, %v11748_v29  ;;  %v8678_v62 = vtrunc.f32 %v6704_v39  ;;  %v6646_v29 = vmax.f32 %v6644_v57, %v6645_v32 }
0x2ad0   :  { %v6665_v52 = vadd.f32 %v6664_v35, %v6663_v63  ;;  %v6670_v55 = vadd.f32 %v6669_v30, %v6668_v14  ;;  %v6690_v5 = vsel %vm6572_vm1, %v6682_v43, -inf }
0x2ad1   :  { %v6686_v37 = vrot.slane %v6685_v1, 2  ;;  %v6691_v17 = vrot.slane %v6690_v5, 4  ;;  %v8679_v31 = vcvt.f32.s32 %v8678_v62  ;;  %vm6648_vm1 = vcmp.gt.f32.partialorder %v6646_v29, 0.5 }
0x2ad2   :  { %v6666_v40 = vrot.slane %v6665_v52, 1  ;;  %v6671_v12 = vrot.slane %v6670_v55, 2 }
0x2ad3   :  { %v6687_v61 = vmax.f32 %v6685_v1, %v6686_v37  ;;  %v6692_v8 = vmax.f32 %v6690_v5, %v6691_v17  ;;  %6709 = vst.msk [vmem:[%s9299_s20 + $0x8] sm:$0xff] %vm6707_vm12, %v8679_v31  ;;  %s9074_s20 = scalar_lea.vmem %s6747_s12, 32 }
0x2ad4   :  { %v6667_v47 = vadd.f32 %v6666_v40, %v6665_v52  ;;  %v6672_v59 = vadd.f32 %v6671_v12, %v6670_v55  ;;  %p9075_p0 = scmp.ne.s32.totalorder %s6747_s12, %s9074_s20  ;;  %p9080_p2 = scmp.lt.s32.totalorder %s9074_s20, %s9074_s20 }
0x2ad5   :  { %v6688_v25 = vrot.slane %v6687_v61, 1  ;;  %v6693_v23 = vrot.slane %v6692_v8, 2 }
0x2ad6   :  { %v6673_v45 = vrot.slane %v6672_v59, 1  ;;  %v6699_v0 = vsel %vm6647_vm9, %v6667_v47, 0.0  ;;  %p9081_p3 = por %p9080_p2, %p9079_p1 }
0x2ad7   :  { %v6689_v3 = vmax.f32 %v6687_v61, %v6688_v25  ;;  %v6694_v13 = vmax.f32 %v6692_v8, %v6693_v23  ;;  %6719 = vst.msk [vmem:[#allocation5] sm:$0x1] %vm6714_vm8, %v6699_v0 }
0x2ad8   :  { %v6674_v18 = vadd.f32 %v6673_v45, %v6672_v59  ;;  %p9082_p4 = pnand %p9081_p3, %p9075_p0 }
0x2ad9   :  { %vm6697_vm13 = vcmp.gt.f32.partialorder %v6689_v3, 0.5  ;;  %v6695_v28 = vrot.slane %v6694_v13, 1 }
0x2ada   :  { %vm6701_vm0 = vmand %vm6647_vm9, %vm6697_vm13  ;;  %v6700_v15 = vsel %vm6648_vm1, %v6674_v18, 0.0 }
0x2adb   :  { %v6696_v34 = vmax.f32 %v6694_v13, %v6695_v28  ;;  %v6710_v38 = vsel %vm6701_vm0, %v11238_v10, -1.0  ;;  %6720 = vst.msk [vmem:[#allocation5 + $0x1] sm:$0x1] %vm6714_vm8, %v6700_v15 }
0x2adc   :  { %v8680_v36 = vtrunc.f32 %v6710_v38 }
0x2add   :  { %9085 = shalt.err (!%p9082_p4)
}
0x2ade   :  { %s9153_s4 = smov 16   ;;  %s9154_s15 = smov 1   ;;  %vm6698_vm10 = vcmp.gt.f32.partialorder %v6696_v34, 0.5  ;;  %v8681_v41 = vcvt.f32.s32 %v8680_v36 }
0x2adf   :  { %6752 = dma.vmem_to_hbm [thread:$0]  %s6747_s12, 32, %s9314_s6, [#allocation6], %s9153_s4, %s9153_s4, %s9154_s15   ;;  %vm6702_vm2 = vmand %vm6648_vm1, %vm6698_vm10 }
0x2ae0   :  { %v6711_v10 = vsel %vm6702_vm2, %v11242_v24, -1.0  ;;  %s9155_s16 = smov [#allocation3]   ;;  %6715 = vst.msk [vmem:[#allocation3] sm:$0x1] %vm6714_vm8, %v8681_v41 }
0x2ae1   :  { %s6732_s18 = sshll.u32 %s9155_s16, 4  ;;  %v8682_v49 = vtrunc.f32 %v6711_v10  ;;  %s6733_s18 = int_to_ptr.vmem [resolvable:$true] %s6732_s18 }
0x2ae2   :  { %s9094_s22 = scalar_lea.vmem %s6733_s18, 32  ;;  %p9099_p6 = scmp.lt.s32.totalorder %s6733_s18, %s6733_s18 }
0x2ae3   :  { %v8683_v56 = vcvt.f32.s32 %v8682_v49  ;;  %p9095_p5 = scmp.ne.s32.totalorder %s6733_s18, %s9094_s22  ;;  %p9100_p7 = scmp.lt.s32.totalorder %s9094_s22, %s9094_s22 }
0x2ae5   :  { %6716 = vst.msk [vmem:[#allocation3 + $0x1] sm:$0x1] %vm6714_vm8, %v8683_v56  ;;  %p9101_p8 = por %p9100_p7, %p9099_p6 }
0x2ae7   :  { %p9102_p9 = pnand %p9101_p8, %p9095_p5 }
0x2ae9   :  { %9105 = shalt.err (!%p9102_p9)
}
0x2aea   :  { %6738 = dma.vmem_to_hbm [thread:$0]  %s6733_s18, 32, %s9304_s27, [#allocation4], %s9153_s4, %s9153_s4, %s9154_s15  }
0x2aeb   :  { %9114 = dma.done.wait [#allocation4], 32  }
0x2aec   :  { %9115 = vsyncadd [#allocation4], 4294967264 }
0x2aed   :  { %9116 = dma.done.wait [#allocation6], 32  }
0x2aee   :  { %9117 = vsyncadd [#allocation6], 4294967264 }
0x2aef   :  { %6767 = vsyncpa [#allocation4], 1 }
0x2af0   :  { %6768 = vsyncpa [#allocation6], 1 }

</bundles_post_ra>
